<compile_context>
chip_gen: v6e
topology: v6e:2x2x1
jax: 0.10.0
libtpu: 0.0.40
codegen_flags: <defaults>
</compile_context>

<pallas_src>
import jax
import jax.numpy as jnp
import numpy as np
from jax import lax
from jax.experimental import pallas as pl
from jax.experimental.pallas import tpu as pltpu

_LANE = 128


def _round_up(x, m):
    return (x + m - 1) // m * m


# ---------------------------------------------------------------------------
# Fused Pallas kernel: conv1+bn1+relu -> conv2+bn2+residual+relu (one image)
# ---------------------------------------------------------------------------
def _fused_block_kernel(xpad_ref, w1_ref, b1_ref, w2_ref, b2_ref, o_ref,
                        y1pad_ref):
    # xpad_ref : (1, H+2, W+2, Cp)  bf16, spatial zero halo + channel padding
    # w1_ref   : (9, Cp, Cm)        bf16, BN1 scale folded into columns
    # b1_ref   : (1, Cm)            f32
    # w2_ref   : (9, Cm, Co)        bf16, BN2 scale folded into columns
    # b2_ref   : (1, Co)            f32
    # o_ref    : (1, H, W, Co)      f32
    # y1pad_ref: VMEM (H+2, W+2, Cm) bf16 scratch for the intermediate
    _, Hp, Wp, Cp = xpad_ref.shape
    H, W = Hp - 2, Wp - 2
    Cm = w1_ref.shape[2]
    Co = w2_ref.shape[2]
    M = H * W

    # ---- conv1 as 9 accumulated GEMM taps + folded bn1 + relu --------------
    acc1 = jnp.zeros((M, Cm), jnp.float32)
    for kh in range(3):
        for kw in range(3):
            tap = xpad_ref[0, kh:kh + H, kw:kw + W, :].reshape(M, Cp)
            acc1 = acc1 + jnp.dot(tap, w1_ref[kh * 3 + kw],
                                  preferred_element_type=jnp.float32)
    y1 = jnp.maximum(acc1 + b1_ref[...], 0.0)

    # Stash y1 (with a zero halo) in VMEM for the second conv.
    y1pad_ref[...] = jnp.zeros_like(y1pad_ref)
    y1pad_ref[1:H + 1, 1:W + 1, :] = (
        y1.reshape(H, W, Cm).astype(y1pad_ref.dtype))

    # ---- conv2 as 9 accumulated GEMM taps + folded bn2 + identity + relu ---
    acc2 = jnp.zeros((M, Co), jnp.float32)
    for kh in range(3):
        for kw in range(3):
            tap = y1pad_ref[kh:kh + H, kw:kw + W, :].reshape(M, Cm)
            acc2 = acc2 + jnp.dot(tap, w2_ref[kh * 3 + kw],
                                  preferred_element_type=jnp.float32)
    identity = xpad_ref[0, 1:H + 1, 1:W + 1, :Co].reshape(M, Co)
    out = jnp.maximum(acc2 + b2_ref[...] + identity.astype(jnp.float32), 0.0)
    o_ref[...] = out.reshape(1, H, W, Co).astype(o_ref.dtype)


# ---------------------------------------------------------------------------
# JAX glue: BN folding, weight layout, padding, pallas_call wrapper
# ---------------------------------------------------------------------------
def _fold_bn(gamma, beta, mean, var, eps=1e-5):
    scale = gamma / jnp.sqrt(var + eps)
    bias = beta - mean * scale
    return scale, bias


def _prep_weight(w_oihw, scale, cin_p, cout_p):
    """(O, I, 3, 3) conv weight -> (9, I_pad, O_pad) bf16, BN scale folded."""
    O, I = w_oihw.shape[0], w_oihw.shape[1]
    w = jnp.transpose(w_oihw, (2, 3, 1, 0)).reshape(9, I, O)   # (kh*3+kw, I, O)
    w = w * scale[None, None, :]
    w = jnp.pad(w, ((0, 0), (0, cin_p - I), (0, cout_p - O)))
    return w.astype(jnp.bfloat16)


def basic_block_forward(x_nchw, params, eps=1e-5):
    """Forward pass of BasicBlock (stride=1, expansion=1, downsample=None)."""
    (w1, g1, be1, m1, v1, w2, g2, be2, m2, v2) = params
    N, C_in, H, W = x_nchw.shape
    C_mid = w1.shape[0]
    C_out = w2.shape[0]
    assert C_in == C_out, "residual add requires Cin == Cout (downsample=None)"

    cin_p = _round_up(C_in, _LANE)
    cmid_p = _round_up(C_mid, _LANE)
    cout_p = _round_up(C_out, _LANE)
    assert cin_p == cout_p  # needed for the in-kernel identity slice

    s1, b1 = _fold_bn(g1, be1, m1, v1, eps)
    s2, b2 = _fold_bn(g2, be2, m2, v2, eps)
    w1c = _prep_weight(w1, s1, cin_p, cmid_p)
    w2c = _prep_weight(w2, s2, cmid_p, cout_p)
    b1p = jnp.pad(b1, (0, cmid_p - C_mid)).reshape(1, cmid_p).astype(jnp.float32)
    b2p = jnp.pad(b2, (0, cout_p - C_out)).reshape(1, cout_p).astype(jnp.float32)

    # NCHW -> NHWC, spatial zero halo (pad=1) + channel padding, cast to bf16.
    x = jnp.transpose(x_nchw, (0, 2, 3, 1))
    xpad = jnp.pad(x, ((0, 0), (1, 1), (1, 1), (0, cin_p - C_in)))
    xpad = xpad.astype(jnp.bfloat16)

    flops = 2 * N * H * W * 9 * (cin_p * cmid_p + cmid_p * cout_p)
    bytes_accessed = (xpad.size * 2 + w1c.size * 2 + w2c.size * 2
                      + (b1p.size + b2p.size) * 4 + N * H * W * cout_p * 4)
    cost = pl.CostEstimate(flops=flops, transcendentals=0,
                           bytes_accessed=bytes_accessed)

    out = pl.pallas_call(
        _fused_block_kernel,
        out_shape=jax.ShapeDtypeStruct((N, H, W, cout_p), jnp.float32),
        grid=(N,),
        in_specs=[
            pl.BlockSpec((1, H + 2, W + 2, cin_p), lambda n: (n, 0, 0, 0)),
            pl.BlockSpec((9, cin_p, cmid_p), lambda n: (0, 0, 0)),
            pl.BlockSpec((1, cmid_p), lambda n: (0, 0)),
            pl.BlockSpec((9, cmid_p, cout_p), lambda n: (0, 0, 0)),
            pl.BlockSpec((1, cout_p), lambda n: (0, 0)),
        ],
        out_specs=pl.BlockSpec((1, H, W, cout_p), lambda n: (n, 0, 0, 0)),
        scratch_shapes=[pltpu.VMEM((H + 2, W + 2, cmid_p), jnp.bfloat16)],
        compiler_params=pltpu.CompilerParams(
            dimension_semantics=("parallel",)),
        cost_estimate=cost,
    )(xpad, w1c, b1p, w2c, b2p)

    out = out[..., :C_out]                        # drop channel padding
    return jnp.transpose(out, (0, 3, 1, 2))       # NHWC -> NCHW


# ---------------------------------------------------------------------------
# Pure-JAX f32 reference (PyTorch BasicBlock semantics, inference-mode BN)
# ---------------------------------------------------------------------------
def _ref_forward(x_nchw, params, eps=1e-5):
    (w1, g1, be1, m1, v1, w2, g2, be2, m2, v2) = params
    dn = ("NCHW", "OIHW", "NCHW")
    y = lax.conv_general_dilated(x_nchw, w1, (1, 1), ((1, 1), (1, 1)),
                                 dimension_numbers=dn)
    s1 = g1 / jnp.sqrt(v1 + eps)
    y = y * s1[None, :, None, None] + (be1 - m1 * s1)[None, :, None, None]
    y = jnp.maximum(y, 0.0)
    z = lax.conv_general_dilated(y, w2, (1, 1), ((1, 1), (1, 1)),
                                 dimension_numbers=dn)
    s2 = g2 / jnp.sqrt(v2 + eps)
    z = z * s2[None, :, None, None] + (be2 - m2 * s2)[None, :, None, None]
    z = z + x_nchw
    return jnp.maximum(z, 0.0)


# ---------------------------------------------------------------------------
if __name__ == "__main__":
    key = jax.random.PRNGKey(0)
    ks = jax.random.split(key, 11)

    N, C_in, H, W = 2, 4, 16, 16
    C_out, expansion = 4, 1          # stride=1, downsample=None

    x = jax.random.normal(ks[0], (N, C_in, H, W), jnp.float32)

    w1 = jax.random.normal(ks[1], (C_out, C_in, 3, 3), jnp.float32) * 0.1
    g1 = jax.random.uniform(ks[2], (C_out,), jnp.float32, 0.5, 1.5)
    be1 = jax.random.normal(ks[3], (C_out,), jnp.float32) * 0.1
    m1 = jax.random.normal(ks[4], (C_out,), jnp.float32) * 0.1
    v1 = jax.random.uniform(ks[5], (C_out,), jnp.float32, 0.5, 1.5)

    w2 = jax.random.normal(ks[6], (C_out * expansion, C_out, 3, 3),
                           jnp.float32) * 0.1
    g2 = jax.random.uniform(ks[7], (C_out * expansion,), jnp.float32, 0.5, 1.5)
    be2 = jax.random.normal(ks[8], (C_out * expansion,), jnp.float32) * 0.1
    m2 = jax.random.normal(ks[9], (C_out * expansion,), jnp.float32) * 0.1
    v2 = jax.random.uniform(ks[10], (C_out * expansion,), jnp.float32, 0.5, 1.5)

    params = (w1, g1, be1, m1, v1, w2, g2, be2, m2, v2)

    out = jax.jit(basic_block_forward)(x, params)
    jax.block_until_ready(out)

    # Loose tolerance: kernel uses bf16 operands with f32 accumulation, while
    # the reference is full f32; structural bugs would produce O(1) errors.
    ref = _ref_forward(x, params)
    np.testing.assert_allclose(np.asarray(out), np.asarray(ref),
                               rtol=1e-1, atol=1e-1)
    print("KERNEL_OK")
</pallas_src>

<mosaic_0001>
module attributes {stable_mosaic.version = 11 : i64} {
  func.func @_fused_block_kernel(%arg0: i32, %arg1: memref<1x18x18x128xbf16, #tpu.memory_space<vmem>>, %arg2: memref<9x128x128xbf16, #tpu.memory_space<vmem>>, %arg3: memref<1x128xf32, #tpu.memory_space<vmem>>, %arg4: memref<9x128x128xbf16, #tpu.memory_space<vmem>>, %arg5: memref<1x128xf32, #tpu.memory_space<vmem>>, %arg6: memref<1x16x16x128xf32, #tpu.memory_space<vmem>>, %arg7: memref<18x18x128xbf16, #tpu.memory_space<vmem>>) attributes {dimension_semantics = [#tpu.dimension_semantics<parallel>], iteration_bounds = array<i64: 2>, scalar_prefetch = 0 : i64, scratch_operands = 1 : i64, tpu.core_type = #tpu.core_type<tc>, window_params = [{transform_indices = @transform_0, window_bounds = array<i64: 1, 18, 18, 128>}, {pipeline_mode = #tpu.pipeline_mode<synchronous>, transform_indices = @transform_1, window_bounds = array<i64: 9, 128, 128>}, {pipeline_mode = #tpu.pipeline_mode<synchronous>, transform_indices = @transform_2, window_bounds = array<i64: 1, 128>}, {pipeline_mode = #tpu.pipeline_mode<synchronous>, transform_indices = @transform_3, window_bounds = array<i64: 9, 128, 128>}, {pipeline_mode = #tpu.pipeline_mode<synchronous>, transform_indices = @transform_4, window_bounds = array<i64: 1, 128>}, {transform_indices = @transform_5, window_bounds = array<i64: 1, 16, 16, 128>}]} {
    %cst = arith.constant 0.000000e+00 : f32
    %0 = vector.broadcast %cst : f32 to vector<256x128xf32>
    %c0 = arith.constant 0 : index
    %c0_0 = arith.constant 0 : index
    %c0_1 = arith.constant 0 : index
    %c0_2 = arith.constant 0 : index
    %1 = vector.load %arg1[%c0, %c0_0, %c0_1, %c0_2] : memref<1x18x18x128xbf16, #tpu.memory_space<vmem>>, vector<1x16x16x128xbf16>
    %2 = vector.shape_cast %1 : vector<1x16x16x128xbf16> to vector<16x16x128xbf16>
    %3 = vector.shape_cast %2 : vector<16x16x128xbf16> to vector<256x128xbf16>
    %c0_3 = arith.constant 0 : index
    %c0_4 = arith.constant 0 : index
    %c0_5 = arith.constant 0 : index
    %4 = vector.load %arg2[%c0_3, %c0_4, %c0_5] : memref<9x128x128xbf16, #tpu.memory_space<vmem>>, vector<1x128x128xbf16>
    %5 = vector.shape_cast %4 : vector<1x128x128xbf16> to vector<128x128xbf16>
    %cst_6 = arith.constant dense<0.000000e+00> : vector<256x128xf32>
    %6 = tpu.matmul %3, %5, %cst_6 {dimension_numbers = #tpu.dot_dimension_numbers<[1], [0], [0], [1], [0, 0, 1, 1], [], []>} : vector<256x128xbf16>, vector<128x128xbf16>, vector<256x128xf32> -> vector<256x128xf32>
    %7 = arith.addf %0, %6 : vector<256x128xf32>
    %c0_7 = arith.constant 0 : index
    %c0_8 = arith.constant 0 : index
    %c1 = arith.constant 1 : index
    %c0_9 = arith.constant 0 : index
    %8 = vector.load %arg1[%c0_7, %c0_8, %c1, %c0_9] : memref<1x18x18x128xbf16, #tpu.memory_space<vmem>>, vector<1x16x16x128xbf16>
    %9 = vector.shape_cast %8 : vector<1x16x16x128xbf16> to vector<16x16x128xbf16>
    %10 = vector.shape_cast %9 : vector<16x16x128xbf16> to vector<256x128xbf16>
    %c1_10 = arith.constant 1 : index
    %c0_11 = arith.constant 0 : index
    %c0_12 = arith.constant 0 : index
    %11 = vector.load %arg2[%c1_10, %c0_11, %c0_12] : memref<9x128x128xbf16, #tpu.memory_space<vmem>>, vector<1x128x128xbf16>
    %12 = vector.shape_cast %11 : vector<1x128x128xbf16> to vector<128x128xbf16>
    %cst_13 = arith.constant dense<0.000000e+00> : vector<256x128xf32>
    %13 = tpu.matmul %10, %12, %cst_13 {dimension_numbers = #tpu.dot_dimension_numbers<[1], [0], [0], [1], [0, 0, 1, 1], [], []>} : vector<256x128xbf16>, vector<128x128xbf16>, vector<256x128xf32> -> vector<256x128xf32>
    %14 = arith.addf %7, %13 : vector<256x128xf32>
    %c0_14 = arith.constant 0 : index
    %c0_15 = arith.constant 0 : index
    %c2 = arith.constant 2 : index
    %c0_16 = arith.constant 0 : index
    %15 = vector.load %arg1[%c0_14, %c0_15, %c2, %c0_16] : memref<1x18x18x128xbf16, #tpu.memory_space<vmem>>, vector<1x16x16x128xbf16>
    %16 = vector.shape_cast %15 : vector<1x16x16x128xbf16> to vector<16x16x128xbf16>
    %17 = vector.shape_cast %16 : vector<16x16x128xbf16> to vector<256x128xbf16>
    %c2_17 = arith.constant 2 : index
    %c0_18 = arith.constant 0 : index
    %c0_19 = arith.constant 0 : index
    %18 = vector.load %arg2[%c2_17, %c0_18, %c0_19] : memref<9x128x128xbf16, #tpu.memory_space<vmem>>, vector<1x128x128xbf16>
    %19 = vector.shape_cast %18 : vector<1x128x128xbf16> to vector<128x128xbf16>
    %cst_20 = arith.constant dense<0.000000e+00> : vector<256x128xf32>
    %20 = tpu.matmul %17, %19, %cst_20 {dimension_numbers = #tpu.dot_dimension_numbers<[1], [0], [0], [1], [0, 0, 1, 1], [], []>} : vector<256x128xbf16>, vector<128x128xbf16>, vector<256x128xf32> -> vector<256x128xf32>
    %21 = arith.addf %14, %20 : vector<256x128xf32>
    %c0_21 = arith.constant 0 : index
    %c1_22 = arith.constant 1 : index
    %c0_23 = arith.constant 0 : index
    %c0_24 = arith.constant 0 : index
    %22 = vector.load %arg1[%c0_21, %c1_22, %c0_23, %c0_24] : memref<1x18x18x128xbf16, #tpu.memory_space<vmem>>, vector<1x16x16x128xbf16>
    %23 = vector.shape_cast %22 : vector<1x16x16x128xbf16> to vector<16x16x128xbf16>
    %24 = vector.shape_cast %23 : vector<16x16x128xbf16> to vector<256x128xbf16>
    %c3 = arith.constant 3 : index
    %c0_25 = arith.constant 0 : index
    %c0_26 = arith.constant 0 : index
    %25 = vector.load %arg2[%c3, %c0_25, %c0_26] : memref<9x128x128xbf16, #tpu.memory_space<vmem>>, vector<1x128x128xbf16>
    %26 = vector.shape_cast %25 : vector<1x128x128xbf16> to vector<128x128xbf16>
    %cst_27 = arith.constant dense<0.000000e+00> : vector<256x128xf32>
    %27 = tpu.matmul %24, %26, %cst_27 {dimension_numbers = #tpu.dot_dimension_numbers<[1], [0], [0], [1], [0, 0, 1, 1], [], []>} : vector<256x128xbf16>, vector<128x128xbf16>, vector<256x128xf32> -> vector<256x128xf32>
    %28 = arith.addf %21, %27 : vector<256x128xf32>
    %c0_28 = arith.constant 0 : index
    %c1_29 = arith.constant 1 : index
    %c1_30 = arith.constant 1 : index
    %c0_31 = arith.constant 0 : index
    %29 = vector.load %arg1[%c0_28, %c1_29, %c1_30, %c0_31] : memref<1x18x18x128xbf16, #tpu.memory_space<vmem>>, vector<1x16x16x128xbf16>
    %30 = vector.shape_cast %29 : vector<1x16x16x128xbf16> to vector<16x16x128xbf16>
    %31 = vector.shape_cast %30 : vector<16x16x128xbf16> to vector<256x128xbf16>
    %c4 = arith.constant 4 : index
    %c0_32 = arith.constant 0 : index
    %c0_33 = arith.constant 0 : index
    %32 = vector.load %arg2[%c4, %c0_32, %c0_33] : memref<9x128x128xbf16, #tpu.memory_space<vmem>>, vector<1x128x128xbf16>
    %33 = vector.shape_cast %32 : vector<1x128x128xbf16> to vector<128x128xbf16>
    %cst_34 = arith.constant dense<0.000000e+00> : vector<256x128xf32>
    %34 = tpu.matmul %31, %33, %cst_34 {dimension_numbers = #tpu.dot_dimension_numbers<[1], [0], [0], [1], [0, 0, 1, 1], [], []>} : vector<256x128xbf16>, vector<128x128xbf16>, vector<256x128xf32> -> vector<256x128xf32>
    %35 = arith.addf %28, %34 : vector<256x128xf32>
    %c0_35 = arith.constant 0 : index
    %c1_36 = arith.constant 1 : index
    %c2_37 = arith.constant 2 : index
    %c0_38 = arith.constant 0 : index
    %36 = vector.load %arg1[%c0_35, %c1_36, %c2_37, %c0_38] : memref<1x18x18x128xbf16, #tpu.memory_space<vmem>>, vector<1x16x16x128xbf16>
    %37 = vector.shape_cast %36 : vector<1x16x16x128xbf16> to vector<16x16x128xbf16>
    %38 = vector.shape_cast %37 : vector<16x16x128xbf16> to vector<256x128xbf16>
    %c5 = arith.constant 5 : index
    %c0_39 = arith.constant 0 : index
    %c0_40 = arith.constant 0 : index
    %39 = vector.load %arg2[%c5, %c0_39, %c0_40] : memref<9x128x128xbf16, #tpu.memory_space<vmem>>, vector<1x128x128xbf16>
    %40 = vector.shape_cast %39 : vector<1x128x128xbf16> to vector<128x128xbf16>
    %cst_41 = arith.constant dense<0.000000e+00> : vector<256x128xf32>
    %41 = tpu.matmul %38, %40, %cst_41 {dimension_numbers = #tpu.dot_dimension_numbers<[1], [0], [0], [1], [0, 0, 1, 1], [], []>} : vector<256x128xbf16>, vector<128x128xbf16>, vector<256x128xf32> -> vector<256x128xf32>
    %42 = arith.addf %35, %41 : vector<256x128xf32>
    %c0_42 = arith.constant 0 : index
    %c2_43 = arith.constant 2 : index
    %c0_44 = arith.constant 0 : index
    %c0_45 = arith.constant 0 : index
    %43 = vector.load %arg1[%c0_42, %c2_43, %c0_44, %c0_45] : memref<1x18x18x128xbf16, #tpu.memory_space<vmem>>, vector<1x16x16x128xbf16>
    %44 = vector.shape_cast %43 : vector<1x16x16x128xbf16> to vector<16x16x128xbf16>
    %45 = vector.shape_cast %44 : vector<16x16x128xbf16> to vector<256x128xbf16>
    %c6 = arith.constant 6 : index
    %c0_46 = arith.constant 0 : index
    %c0_47 = arith.constant 0 : index
    %46 = vector.load %arg2[%c6, %c0_46, %c0_47] : memref<9x128x128xbf16, #tpu.memory_space<vmem>>, vector<1x128x128xbf16>
    %47 = vector.shape_cast %46 : vector<1x128x128xbf16> to vector<128x128xbf16>
    %cst_48 = arith.constant dense<0.000000e+00> : vector<256x128xf32>
    %48 = tpu.matmul %45, %47, %cst_48 {dimension_numbers = #tpu.dot_dimension_numbers<[1], [0], [0], [1], [0, 0, 1, 1], [], []>} : vector<256x128xbf16>, vector<128x128xbf16>, vector<256x128xf32> -> vector<256x128xf32>
    %49 = arith.addf %42, %48 : vector<256x128xf32>
    %c0_49 = arith.constant 0 : index
    %c2_50 = arith.constant 2 : index
    %c1_51 = arith.constant 1 : index
    %c0_52 = arith.constant 0 : index
    %50 = vector.load %arg1[%c0_49, %c2_50, %c1_51, %c0_52] : memref<1x18x18x128xbf16, #tpu.memory_space<vmem>>, vector<1x16x16x128xbf16>
    %51 = vector.shape_cast %50 : vector<1x16x16x128xbf16> to vector<16x16x128xbf16>
    %52 = vector.shape_cast %51 : vector<16x16x128xbf16> to vector<256x128xbf16>
    %c7 = arith.constant 7 : index
    %c0_53 = arith.constant 0 : index
    %c0_54 = arith.constant 0 : index
    %53 = vector.load %arg2[%c7, %c0_53, %c0_54] : memref<9x128x128xbf16, #tpu.memory_space<vmem>>, vector<1x128x128xbf16>
    %54 = vector.shape_cast %53 : vector<1x128x128xbf16> to vector<128x128xbf16>
    %cst_55 = arith.constant dense<0.000000e+00> : vector<256x128xf32>
    %55 = tpu.matmul %52, %54, %cst_55 {dimension_numbers = #tpu.dot_dimension_numbers<[1], [0], [0], [1], [0, 0, 1, 1], [], []>} : vector<256x128xbf16>, vector<128x128xbf16>, vector<256x128xf32> -> vector<256x128xf32>
    %56 = arith.addf %49, %55 : vector<256x128xf32>
    %c0_56 = arith.constant 0 : index
    %c2_57 = arith.constant 2 : index
    %c2_58 = arith.constant 2 : index
    %c0_59 = arith.constant 0 : index
    %57 = vector.load %arg1[%c0_56, %c2_57, %c2_58, %c0_59] : memref<1x18x18x128xbf16, #tpu.memory_space<vmem>>, vector<1x16x16x128xbf16>
    %58 = vector.shape_cast %57 : vector<1x16x16x128xbf16> to vector<16x16x128xbf16>
    %59 = vector.shape_cast %58 : vector<16x16x128xbf16> to vector<256x128xbf16>
    %c8 = arith.constant 8 : index
    %c0_60 = arith.constant 0 : index
    %c0_61 = arith.constant 0 : index
    %60 = vector.load %arg2[%c8, %c0_60, %c0_61] : memref<9x128x128xbf16, #tpu.memory_space<vmem>>, vector<1x128x128xbf16>
    %61 = vector.shape_cast %60 : vector<1x128x128xbf16> to vector<128x128xbf16>
    %cst_62 = arith.constant dense<0.000000e+00> : vector<256x128xf32>
    %62 = tpu.matmul %59, %61, %cst_62 {dimension_numbers = #tpu.dot_dimension_numbers<[1], [0], [0], [1], [0, 0, 1, 1], [], []>} : vector<256x128xbf16>, vector<128x128xbf16>, vector<256x128xf32> -> vector<256x128xf32>
    %63 = arith.addf %56, %62 : vector<256x128xf32>
    %c0_63 = arith.constant 0 : index
    %c0_64 = arith.constant 0 : index
    %64 = vector.load %arg3[%c0_63, %c0_64] : memref<1x128xf32, #tpu.memory_space<vmem>>, vector<1x128xf32>
    %65 = vector.broadcast %64 : vector<1x128xf32> to vector<256x128xf32>
    %66 = arith.addf %63, %65 : vector<256x128xf32>
    %cst_65 = arith.constant 0.000000e+00 : f32
    %67 = vector.broadcast %cst_65 : f32 to vector<256x128xf32>
    %68 = arith.maximumf %66, %67 : vector<256x128xf32>
    %cst_66 = arith.constant 0.000000e+00 : bf16
    %69 = vector.broadcast %cst_66 : bf16 to vector<18x18x128xbf16>
    %c0_67 = arith.constant 0 : index
    %c0_68 = arith.constant 0 : index
    %c0_69 = arith.constant 0 : index
    %70 = vector.load %arg7[%c0_67, %c0_68, %c0_69] : memref<18x18x128xbf16, #tpu.memory_space<vmem>>, vector<18x18x128xbf16>
    tpu.vector_store %arg7[%c0_67, %c0_68, %c0_69], %69 {strides = array<i32>} : memref<18x18x128xbf16, #tpu.memory_space<vmem>>, vector<18x18x128xbf16>,
    %71 = vector.shape_cast %68 : vector<256x128xf32> to vector<16x16x128xf32>
    %72 = arith.truncf %71 : vector<16x16x128xf32> to vector<16x16x128xbf16>
    %c1_70 = arith.constant 1 : index
    %c1_71 = arith.constant 1 : index
    %c0_72 = arith.constant 0 : index
    %73 = vector.load %arg7[%c1_70, %c1_71, %c0_72] : memref<18x18x128xbf16, #tpu.memory_space<vmem>>, vector<16x16x128xbf16>
    tpu.vector_store %arg7[%c1_70, %c1_71, %c0_72], %72 {strides = array<i32>} : memref<18x18x128xbf16, #tpu.memory_space<vmem>>, vector<16x16x128xbf16>,
    %cst_73 = arith.constant 0.000000e+00 : f32
    %74 = vector.broadcast %cst_73 : f32 to vector<256x128xf32>
    %c0_74 = arith.constant 0 : index
    %c0_75 = arith.constant 0 : index
    %c0_76 = arith.constant 0 : index
    %75 = vector.load %arg7[%c0_74, %c0_75, %c0_76] : memref<18x18x128xbf16, #tpu.memory_space<vmem>>, vector<16x16x128xbf16>
    %76 = vector.shape_cast %75 : vector<16x16x128xbf16> to vector<256x128xbf16>
    %c0_77 = arith.constant 0 : index
    %c0_78 = arith.constant 0 : index
    %c0_79 = arith.constant 0 : index
    %77 = vector.load %arg4[%c0_77, %c0_78, %c0_79] : memref<9x128x128xbf16, #tpu.memory_space<vmem>>, vector<1x128x128xbf16>
    %78 = vector.shape_cast %77 : vector<1x128x128xbf16> to vector<128x128xbf16>
    %cst_80 = arith.constant dense<0.000000e+00> : vector<256x128xf32>
    %79 = tpu.matmul %76, %78, %cst_80 {dimension_numbers = #tpu.dot_dimension_numbers<[1], [0], [0], [1], [0, 0, 1, 1], [], []>} : vector<256x128xbf16>, vector<128x128xbf16>, vector<256x128xf32> -> vector<256x128xf32>
    %80 = arith.addf %74, %79 : vector<256x128xf32>
    %c0_81 = arith.constant 0 : index
    %c1_82 = arith.constant 1 : index
    %c0_83 = arith.constant 0 : index
    %81 = vector.load %arg7[%c0_81, %c1_82, %c0_83] : memref<18x18x128xbf16, #tpu.memory_space<vmem>>, vector<16x16x128xbf16>
    %82 = vector.shape_cast %81 : vector<16x16x128xbf16> to vector<256x128xbf16>
    %c1_84 = arith.constant 1 : index
    %c0_85 = arith.constant 0 : index
    %c0_86 = arith.constant 0 : index
    %83 = vector.load %arg4[%c1_84, %c0_85, %c0_86] : memref<9x128x128xbf16, #tpu.memory_space<vmem>>, vector<1x128x128xbf16>
    %84 = vector.shape_cast %83 : vector<1x128x128xbf16> to vector<128x128xbf16>
    %cst_87 = arith.constant dense<0.000000e+00> : vector<256x128xf32>
    %85 = tpu.matmul %82, %84, %cst_87 {dimension_numbers = #tpu.dot_dimension_numbers<[1], [0], [0], [1], [0, 0, 1, 1], [], []>} : vector<256x128xbf16>, vector<128x128xbf16>, vector<256x128xf32> -> vector<256x128xf32>
    %86 = arith.addf %80, %85 : vector<256x128xf32>
    %c0_88 = arith.constant 0 : index
    %c2_89 = arith.constant 2 : index
    %c0_90 = arith.constant 0 : index
    %87 = vector.load %arg7[%c0_88, %c2_89, %c0_90] : memref<18x18x128xbf16, #tpu.memory_space<vmem>>, vector<16x16x128xbf16>
    %88 = vector.shape_cast %87 : vector<16x16x128xbf16> to vector<256x128xbf16>
    %c2_91 = arith.constant 2 : index
    %c0_92 = arith.constant 0 : index
    %c0_93 = arith.constant 0 : index
    %89 = vector.load %arg4[%c2_91, %c0_92, %c0_93] : memref<9x128x128xbf16, #tpu.memory_space<vmem>>, vector<1x128x128xbf16>
    %90 = vector.shape_cast %89 : vector<1x128x128xbf16> to vector<128x128xbf16>
    %cst_94 = arith.constant dense<0.000000e+00> : vector<256x128xf32>
    %91 = tpu.matmul %88, %90, %cst_94 {dimension_numbers = #tpu.dot_dimension_numbers<[1], [0], [0], [1], [0, 0, 1, 1], [], []>} : vector<256x128xbf16>, vector<128x128xbf16>, vector<256x128xf32> -> vector<256x128xf32>
    %92 = arith.addf %86, %91 : vector<256x128xf32>
    %c1_95 = arith.constant 1 : index
    %c0_96 = arith.constant 0 : index
    %c0_97 = arith.constant 0 : index
    %93 = vector.load %arg7[%c1_95, %c0_96, %c0_97] : memref<18x18x128xbf16, #tpu.memory_space<vmem>>, vector<16x16x128xbf16>
    %94 = vector.shape_cast %93 : vector<16x16x128xbf16> to vector<256x128xbf16>
    %c3_98 = arith.constant 3 : index
    %c0_99 = arith.constant 0 : index
    %c0_100 = arith.constant 0 : index
    %95 = vector.load %arg4[%c3_98, %c0_99, %c0_100] : memref<9x128x128xbf16, #tpu.memory_space<vmem>>, vector<1x128x128xbf16>
    %96 = vector.shape_cast %95 : vector<1x128x128xbf16> to vector<128x128xbf16>
    %cst_101 = arith.constant dense<0.000000e+00> : vector<256x128xf32>
    %97 = tpu.matmul %94, %96, %cst_101 {dimension_numbers = #tpu.dot_dimension_numbers<[1], [0], [0], [1], [0, 0, 1, 1], [], []>} : vector<256x128xbf16>, vector<128x128xbf16>, vector<256x128xf32> -> vector<256x128xf32>
    %98 = arith.addf %92, %97 : vector<256x128xf32>
    %c1_102 = arith.constant 1 : index
    %c1_103 = arith.constant 1 : index
    %c0_104 = arith.constant 0 : index
    %99 = vector.load %arg7[%c1_102, %c1_103, %c0_104] : memref<18x18x128xbf16, #tpu.memory_space<vmem>>, vector<16x16x128xbf16>
    %100 = vector.shape_cast %99 : vector<16x16x128xbf16> to vector<256x128xbf16>
    %c4_105 = arith.constant 4 : index
    %c0_106 = arith.constant 0 : index
    %c0_107 = arith.constant 0 : index
    %101 = vector.load %arg4[%c4_105, %c0_106, %c0_107] : memref<9x128x128xbf16, #tpu.memory_space<vmem>>, vector<1x128x128xbf16>
    %102 = vector.shape_cast %101 : vector<1x128x128xbf16> to vector<128x128xbf16>
    %cst_108 = arith.constant dense<0.000000e+00> : vector<256x128xf32>
    %103 = tpu.matmul %100, %102, %cst_108 {dimension_numbers = #tpu.dot_dimension_numbers<[1], [0], [0], [1], [0, 0, 1, 1], [], []>} : vector<256x128xbf16>, vector<128x128xbf16>, vector<256x128xf32> -> vector<256x128xf32>
    %104 = arith.addf %98, %103 : vector<256x128xf32>
    %c1_109 = arith.constant 1 : index
    %c2_110 = arith.constant 2 : index
    %c0_111 = arith.constant 0 : index
    %105 = vector.load %arg7[%c1_109, %c2_110, %c0_111] : memref<18x18x128xbf16, #tpu.memory_space<vmem>>, vector<16x16x128xbf16>
    %106 = vector.shape_cast %105 : vector<16x16x128xbf16> to vector<256x128xbf16>
    %c5_112 = arith.constant 5 : index
    %c0_113 = arith.constant 0 : index
    %c0_114 = arith.constant 0 : index
    %107 = vector.load %arg4[%c5_112, %c0_113, %c0_114] : memref<9x128x128xbf16, #tpu.memory_space<vmem>>, vector<1x128x128xbf16>
    %108 = vector.shape_cast %107 : vector<1x128x128xbf16> to vector<128x128xbf16>
    %cst_115 = arith.constant dense<0.000000e+00> : vector<256x128xf32>
    %109 = tpu.matmul %106, %108, %cst_115 {dimension_numbers = #tpu.dot_dimension_numbers<[1], [0], [0], [1], [0, 0, 1, 1], [], []>} : vector<256x128xbf16>, vector<128x128xbf16>, vector<256x128xf32> -> vector<256x128xf32>
    %110 = arith.addf %104, %109 : vector<256x128xf32>
    %c2_116 = arith.constant 2 : index
    %c0_117 = arith.constant 0 : index
    %c0_118 = arith.constant 0 : index
    %111 = vector.load %arg7[%c2_116, %c0_117, %c0_118] : memref<18x18x128xbf16, #tpu.memory_space<vmem>>, vector<16x16x128xbf16>
    %112 = vector.shape_cast %111 : vector<16x16x128xbf16> to vector<256x128xbf16>
    %c6_119 = arith.constant 6 : index
    %c0_120 = arith.constant 0 : index
    %c0_121 = arith.constant 0 : index
    %113 = vector.load %arg4[%c6_119, %c0_120, %c0_121] : memref<9x128x128xbf16, #tpu.memory_space<vmem>>, vector<1x128x128xbf16>
    %114 = vector.shape_cast %113 : vector<1x128x128xbf16> to vector<128x128xbf16>
    %cst_122 = arith.constant dense<0.000000e+00> : vector<256x128xf32>
    %115 = tpu.matmul %112, %114, %cst_122 {dimension_numbers = #tpu.dot_dimension_numbers<[1], [0], [0], [1], [0, 0, 1, 1], [], []>} : vector<256x128xbf16>, vector<128x128xbf16>, vector<256x128xf32> -> vector<256x128xf32>
    %116 = arith.addf %110, %115 : vector<256x128xf32>
    %c2_123 = arith.constant 2 : index
    %c1_124 = arith.constant 1 : index
    %c0_125 = arith.constant 0 : index
    %117 = vector.load %arg7[%c2_123, %c1_124, %c0_125] : memref<18x18x128xbf16, #tpu.memory_space<vmem>>, vector<16x16x128xbf16>
    %118 = vector.shape_cast %117 : vector<16x16x128xbf16> to vector<256x128xbf16>
    %c7_126 = arith.constant 7 : index
    %c0_127 = arith.constant 0 : index
    %c0_128 = arith.constant 0 : index
    %119 = vector.load %arg4[%c7_126, %c0_127, %c0_128] : memref<9x128x128xbf16, #tpu.memory_space<vmem>>, vector<1x128x128xbf16>
    %120 = vector.shape_cast %119 : vector<1x128x128xbf16> to vector<128x128xbf16>
    %cst_129 = arith.constant dense<0.000000e+00> : vector<256x128xf32>
    %121 = tpu.matmul %118, %120, %cst_129 {dimension_numbers = #tpu.dot_dimension_numbers<[1], [0], [0], [1], [0, 0, 1, 1], [], []>} : vector<256x128xbf16>, vector<128x128xbf16>, vector<256x128xf32> -> vector<256x128xf32>
    %122 = arith.addf %116, %121 : vector<256x128xf32>
    %c2_130 = arith.constant 2 : index
    %c2_131 = arith.constant 2 : index
    %c0_132 = arith.constant 0 : index
    %123 = vector.load %arg7[%c2_130, %c2_131, %c0_132] : memref<18x18x128xbf16, #tpu.memory_space<vmem>>, vector<16x16x128xbf16>
    %124 = vector.shape_cast %123 : vector<16x16x128xbf16> to vector<256x128xbf16>
    %c8_133 = arith.constant 8 : index
    %c0_134 = arith.constant 0 : index
    %c0_135 = arith.constant 0 : index
    %125 = vector.load %arg4[%c8_133, %c0_134, %c0_135] : memref<9x128x128xbf16, #tpu.memory_space<vmem>>, vector<1x128x128xbf16>
    %126 = vector.shape_cast %125 : vector<1x128x128xbf16> to vector<128x128xbf16>
    %cst_136 = arith.constant dense<0.000000e+00> : vector<256x128xf32>
    %127 = tpu.matmul %124, %126, %cst_136 {dimension_numbers = #tpu.dot_dimension_numbers<[1], [0], [0], [1], [0, 0, 1, 1], [], []>} : vector<256x128xbf16>, vector<128x128xbf16>, vector<256x128xf32> -> vector<256x128xf32>
    %128 = arith.addf %122, %127 : vector<256x128xf32>
    %c0_137 = arith.constant 0 : index
    %c1_138 = arith.constant 1 : index
    %c1_139 = arith.constant 1 : index
    %c0_140 = arith.constant 0 : index
    %129 = vector.load %arg1[%c0_137, %c1_138, %c1_139, %c0_140] : memref<1x18x18x128xbf16, #tpu.memory_space<vmem>>, vector<1x16x16x128xbf16>
    %130 = vector.shape_cast %129 : vector<1x16x16x128xbf16> to vector<16x16x128xbf16>
    %131 = vector.shape_cast %130 : vector<16x16x128xbf16> to vector<256x128xbf16>
    %c0_141 = arith.constant 0 : index
    %c0_142 = arith.constant 0 : index
    %132 = vector.load %arg5[%c0_141, %c0_142] : memref<1x128xf32, #tpu.memory_space<vmem>>, vector<1x128xf32>
    %133 = vector.broadcast %132 : vector<1x128xf32> to vector<256x128xf32>
    %134 = arith.addf %128, %133 : vector<256x128xf32>
    %135 = arith.extf %131 : vector<256x128xbf16> to vector<256x128xf32>
    %136 = arith.addf %134, %135 : vector<256x128xf32>
    %cst_143 = arith.constant 0.000000e+00 : f32
    %137 = vector.broadcast %cst_143 : f32 to vector<256x128xf32>
    %138 = arith.maximumf %136, %137 : vector<256x128xf32>
    %139 = vector.shape_cast %138 : vector<256x128xf32> to vector<1x16x16x128xf32>
    %c0_144 = arith.constant 0 : index
    %c0_145 = arith.constant 0 : index
    %c0_146 = arith.constant 0 : index
    %c0_147 = arith.constant 0 : index
    %140 = vector.load %arg6[%c0_144, %c0_145, %c0_146, %c0_147] : memref<1x16x16x128xf32, #tpu.memory_space<vmem>>, vector<1x16x16x128xf32>
    tpu.vector_store %arg6[%c0_144, %c0_145, %c0_146, %c0_147], %139 {strides = array<i32>} : memref<1x16x16x128xf32, #tpu.memory_space<vmem>>, vector<1x16x16x128xf32>,
    return
  }
  func.func @transform_0(%arg0: i32) -> (i32, i32, i32, i32) {
    %c0_i32 = arith.constant 0 : i32
    %c0_i32_0 = arith.constant 0 : i32
    %c0_i32_1 = arith.constant 0 : i32
    %c0_i32_2 = arith.constant 0 : i32
    return %arg0, %c0_i32, %c0_i32_0, %c0_i32_1 : i32, i32, i32, i32
  }
  func.func @transform_1(%arg0: i32) -> (i32, i32, i32) {
    %c0_i32 = arith.constant 0 : i32
    %c0_i32_0 = arith.constant 0 : i32
    %c0_i32_1 = arith.constant 0 : i32
    %c0_i32_2 = arith.constant 0 : i32
    return %c0_i32, %c0_i32_0, %c0_i32_1 : i32, i32, i32
  }
  func.func @transform_2(%arg0: i32) -> (i32, i32) {
    %c0_i32 = arith.constant 0 : i32
    %c0_i32_0 = arith.constant 0 : i32
    %c0_i32_1 = arith.constant 0 : i32
    return %c0_i32, %c0_i32_0 : i32, i32
  }
  func.func @transform_3(%arg0: i32) -> (i32, i32, i32) {
    %c0_i32 = arith.constant 0 : i32
    %c0_i32_0 = arith.constant 0 : i32
    %c0_i32_1 = arith.constant 0 : i32
    %c0_i32_2 = arith.constant 0 : i32
    return %c0_i32, %c0_i32_0, %c0_i32_1 : i32, i32, i32
  }
  func.func @transform_4(%arg0: i32) -> (i32, i32) {
    %c0_i32 = arith.constant 0 : i32
    %c0_i32_0 = arith.constant 0 : i32
    %c0_i32_1 = arith.constant 0 : i32
    return %c0_i32, %c0_i32_0 : i32, i32
  }
  func.func @transform_5(%arg0: i32) -> (i32, i32, i32, i32) {
    %c0_i32 = arith.constant 0 : i32
    %c0_i32_0 = arith.constant 0 : i32
    %c0_i32_1 = arith.constant 0 : i32
    %c0_i32_2 = arith.constant 0 : i32
    return %arg0, %c0_i32, %c0_i32_0, %c0_i32_1 : i32, i32, i32, i32
  }
}

</mosaic_0001>

<bundles_post_ra>
// kernel: basic_block_forward.1
= control target key start
LH: loop header
LB: loop body
LE: loop exit
PB: predicated region body
PF: predicated region fallthrough
CT: control target
= control target key end

     0   :  { %s13889_s18 = smov 0   ;;  %s19051_s0 = inlined_call_operand.vmem [shape: bf16[2,18,18,128], index: 0, kind: input, shape index: {}]   ;;  %s19052_s1 = inlined_call_operand.vmem [shape: bf16[9,128,128], index: 1, kind: input, shape index: {}]   ;;  %s19053_s2 = inlined_call_operand.vmem [shape: f32[1,128], index: 2, kind: input, shape index: {}]   ;;  %s19054_s3 = inlined_call_operand.vmem [shape: bf16[9,128,128], index: 3, kind: input, shape index: {}]   ;;  %s19055_s4 = inlined_call_operand.vmem [shape: f32[1,128], index: 4, kind: input, shape index: {}]   ;;  %s19056_s5 = inlined_call_operand.vmem [shape: f32[2,16,16,128], index: 5, kind: output, shape index: {}]  }
   0x1 LB: > { %s11185_s19 = sadd.s32 4294967295, %s13856_s18   ;;  %p11189_p0 = scmp.ge.s32.totalorder %s13856_s18, 1  ;;  %s13856_s18 = sphi %s13889_s18, %s15_s18  }
   0x2   : > { %p187_p1 = scmp.lt.s32.totalorder %s13856_s18, 3 }
   0x4   : > { %p188_p2 = pnand %p11189_p0, %p187_p1 }
   0x6   : > { %191 = sbr.rel (%p188_p2) target bundleno = 1136 (0x470), region = 40 }
   0xb   : > { %v13592_v0 = vld [vmem:[%s19052_s1 + $0x78] sm:$0xff]   ;;  %p215_p3 = scmp.lt.s32.totalorder %s11185_s19, 1  ;;  %v13594_v2 = vld [vmem:[%s19052_s1 + $0x70] sm:$0xff]   ;;  %v13596_v4 = vld [vmem:[%s19052_s1 + $0x68] sm:$0xff]   ;;  %vm290_vm0 = vsmask.f32 3328 }
   0xc   : > { %v13593_v1 = vld [vmem:[%s19052_s1 + $0x38] sm:$0xff]   ;;  %12718 = vmatprep.subr.bf16.mxu0 %v13592_v0  ;;  %v13595_v3 = vld [vmem:[%s19052_s1 + $0x30] sm:$0xff]   ;;  %v13597_v5 = vld [vmem:[%s19052_s1 + $0x28] sm:$0xff]   ;;  %vm291_vm1 = vsmask.f32 7440  ;;  %v19078_v37 = vmov 0 }
   0xd   : > { %12766 = vmatprep.subr.bf16.mxu1 %v13593_v1  ;;  %12719 = vmatpush3.bf16.msra.mxu0 %v13592_v0  ;;  %s19505_s19 = smov (!%p215_p3, %s11185_s19), 1  ;;  %v13598_v6 = vld [vmem:[%s19052_s1 + $0x60] sm:$0xff]   ;;  %v13600_v8 = vld [vmem:[%s19052_s1 + $0x58] sm:$0xff]   ;;  %v13602_v10 = vld [vmem:[%s19052_s1 + $0x50] sm:$0xff]   ;;  %vm1320_vm3 = vcmask 1042432   ;;  %vm1321_vm4 = vcmask 1046532  }
   0xe   : > { %12767 = vmatpush3.bf16.msra.mxu1 %v13593_v1  ;;  %12720 = vmatprep.subr.bf16.mxu0 %v13594_v2  ;;  %v13599_v7 = vld [vmem:[%s19052_s1 + $0x20] sm:$0xff]   ;;  %s13582_s11 = smul.u32 216, %s19505_s19  ;;  %v13601_v9 = vld [vmem:[%s19052_s1 + $0x18] sm:$0xff]   ;;  %v13603_v11 = vld [vmem:[%s19052_s1 + $0x10] sm:$0xff]   ;;  %vm5580_vm6 = vcmask 1043456   ;;  %vm5587_vm10 = vcmask 1040384  }
   0xf   : > { %12768 = vmatprep.subr.bf16.mxu1 %v13595_v3  ;;  %v13604_v17 = vld [vmem:[%s19052_s1 + $0x48] sm:$0xff]   ;;  %vm13974_vm2 = vmor %vm290_vm0, %vm291_vm1  ;;  %v13606_v48 = vld [vmem:[%s19052_s1 + $0x40] sm:$0xff]   ;;  %vm5581_vm7 = vsmask.f32 7938  ;;  %vm5256_vm8 = vsmask.f32 256 }
  0x10   : > { %s13933_s20 = scalar_lea.vmem %s19051_s0, %s13582_s11  ;;  %v13605_v32 = vld [vmem:[%s19052_s1 + $0x8] sm:$0xff]   ;;  %v19079_v37 = vsel %vm13974_vm2, 4294967295, %v19078_v37  ;;  %v13607_v53 = vld [vmem:[%s19052_s1] sm:$0xff]   ;;  %vm14326_vm5 = vmor %vm1320_vm3, %vm1321_vm4  ;;  %vm5257_vm9 = vsmask.f32 4368  ;;  %s12253_s8 = sshll.u32 %s19505_s19, 8 }
  0x11   : > { %12721 = vmatpush3.bf16.msra.mxu0 %v13594_v2  ;;  %v226_v12 = vld [vmem:[%s13933_s20] sm:$0xf]  ;;  %v13943_v13 = vld [vmem:[%s13933_s20 + $0x4] sm:$0xf]  ;;  %v13946_v14 = vld [vmem:[%s13933_s20 + $0x8] sm:$0x1]  ;;  %s18807_s10 = scalar_lea.vmem %s19056_s5, %s12253_s8 }
  0x12   : > { %12769 = vmatpush3.bf16.msra.mxu1 %v13595_v3  ;;  %12722 = vmatprep.subr.bf16.mxu0 %v13596_v4  ;;  %v294_v15 = vshrl.u32 %v226_v12, 16  ;;  %v297_v16 = vshll.u32 %v226_v12, 16  ;;  %v303_v18 = vshll.u32 %v13943_v13, 16  ;;  %v307_v19 = vshrl.u32 %v13943_v13, 16  ;;  %v13956_v22 = vld [vmem:[%s13933_s20 + $0xc] sm:$0xf]  ;;  %vm16178_vm11 = vmand %vm5580_vm6, %vm5581_vm7 }
  0x13   : > { %12770 = vmatprep.subr.bf16.mxu1 %v13597_v5  ;;  %v313_v20 = vshll.u32 %v13946_v14, 16  ;;  %v1328_v21 = vrot.slane %v13946_v14, 5  ;;  %v11233_v25 = vcombine.low %v226_v12, %v13943_v13  ;;  %v13960_v26 = vld [vmem:[%s13933_s20 + $0x10] sm:$0xf]  ;;  %v13963_v27 = vld [vmem:[%s13933_s20 + $0x14] sm:$0x1]  ;;  %vm16189_vm12 = vmor %vm5256_vm8, %vm5257_vm9 }
  0x14   : > { %v296_v23 = vrot.slane %v294_v15, 4  ;;  %v299_v24 = vrot.slane %v297_v16, 5  ;;  %v305_v28 = vrot.slane %v303_v18, 5  ;;  %v309_v29 = vrot.slane %v307_v19, 4  ;;  %19080 = vst [vmem:[#allocation3_spill] sm:$0xff] %v19079_v37  ;;  %vm16195_vm13 = vmand %vm5587_vm10, %vm5256_vm8 }
  0x15   : > { %12723 = vmatpush3.bf16.msra.mxu0 %v13596_v4  ;;  %v315_v30 = vrot.slane %v313_v20, 5  ;;  %v318_v31 = vshrl.u32 %v13956_v22, 16  ;;  %12782 = vmatprep.mubr.bf16.mxu1 %v11233_v25  ;;  %v321_v34 = vshll.u32 %v13956_v22, 16  ;;  %v327_v35 = vshll.u32 %v13960_v26, 16  ;;  %v13981_v42 = vld [vmem:[%s13933_s20 + $0x18] sm:$0xf] }
  0x16   : > { %12771 = vmatpush3.bf16.msra.mxu1 %v13597_v5  ;;  %12724 = vmatprep.subr.bf16.mxu0 %v13598_v6  ;;  %v300_v33 = vor.u32 %v299_v24, %v296_v23  ;;  %v331_v36 = vshrl.u32 %v13960_v26, 16  ;;  %v310_v38 = vor.u32 %v309_v29, %v305_v28  ;;  %v337_v40 = vshll.u32 %v13963_v27, 16  ;;  %v13984_v47 = vld [vmem:[%s13933_s20 + $0x1c] sm:$0xf]  ;;  %v13998_v57 = vld [vmem:[%s13933_s20 + $0x20] sm:$0x1] }
  0x17   : > { %12772 = vmatprep.subr.bf16.mxu1 %v13599_v7  ;;  %v320_v39 = vrot.slane %v318_v31, 4  ;;  %v1335_v41 = vrot.slane %v13963_v27, 5  ;;  %v323_v44 = vrot.slane %v321_v34, 5  ;;  %v329_v45 = vrot.slane %v327_v35, 5  ;;  %v14002_v59 = vld [vmem:[%s13933_s20 + $0x24] sm:$0xf] }
  0x18   : > { %v301_v43 = vrot.slane %v300_v33, 4  ;;  %v333_v46 = vrot.slane %v331_v36, 4  ;;  %v311_v49 = vrot.slane %v310_v38, 4  ;;  %v339_v50 = vrot.slane %v337_v40, 5  ;;  %v14009_v0 = vld [vmem:[%s13933_s20 + $0x28] sm:$0xf] }
  0x19   : > { %12725 = vmatpush3.bf16.msra.mxu0 %v13598_v6  ;;  %v11234_v51 = vcombine.low %v13956_v22, %v13960_v26  ;;  %v342_v52 = vshrl.u32 %v13981_v42, 16  ;;  %v324_v55 = vor.u32 %v323_v44, %v320_v39  ;;  %v345_v58 = vshll.u32 %v13981_v42, 16  ;;  %v13610_v5 = vld [vmem:[%s19052_s1 + $0xb8] sm:$0xff]   ;;  %v14022_v15 = vld [vmem:[%s13933_s20 + $0x2c] sm:$0x1]  ;;  %v13613_v36 = vld [vmem:[%s19052_s1 + $0xb0] sm:$0xff]  }
  0x1a   : > { %12773 = vmatpush3.bf16.msra.mxu1 %v13599_v7  ;;  %12726 = vmatprep.subr.bf16.mxu0 %v13600_v8  ;;  %v306_v54 = vsel %vm13974_vm2, %v301_v43, %v305_v28  ;;  %v334_v56 = vor.u32 %v333_v46, %v329_v45  ;;  %v316_v60 = vsel %vm13974_vm2, %v311_v49, %v315_v30  ;;  %v351_v62 = vshll.u32 %v13984_v47, 16  ;;  %v14030_v24 = vld [vmem:[%s13933_s20 + $0x30] sm:$0xf]  ;;  %v14035_v31 = vld [vmem:[%s13933_s20 + $0x34] sm:$0xf] }
  0x1b   : > { %12774 = vmatprep.subr.bf16.mxu1 %v13601_v9  ;;  %v344_v61 = vrot.slane %v342_v52, 4  ;;  %v355_v63 = vshrl.u32 %v13984_v47, 16  ;;  %v11209_v1 = vcombine.low %v306_v54, %v316_v60  ;;  %v325_v2 = vrot.slane %v324_v55, 4  ;;  %v14044_v38 = vld [vmem:[%s13933_s20 + $0x38] sm:$0x1]  ;;  %v13624_v44 = vld [vmem:[%s19052_s1 + $0xf0] sm:$0xff]  }
  0x1c   : > { %v335_v3 = vrot.slane %v334_v56, 4  ;;  %v347_v4 = vrot.slane %v345_v58, 5  ;;  %v353_v6 = vrot.slane %v351_v62, 5  ;;  %v366_v16 = vshrl.u32 %v14002_v59, 16  ;;  %v13616_v56 = vld [vmem:[%s19052_s1 + $0xa8] sm:$0xff]  }
  0x1d   : > { %12727 = vmatpush3.bf16.msra.mxu0 %v13600_v8  ;;  %v357_v7 = vrot.slane %v355_v63, 4  ;;  %v361_v8 = vshll.u32 %v13998_v57, 16  ;;  %12734 = vmatprep.mubr.bf16.mxu0 %v11209_v1  ;;  %v369_v23 = vshll.u32 %v14002_v59, 16  ;;  %v375_v29 = vshll.u32 %v14009_v0, 16 }
  0x1e   : > { %12775 = vmatpush3.bf16.msra.mxu1 %v13601_v9  ;;  %12728 = vmatprep.subr.bf16.mxu0 %v13602_v10  ;;  %v11235_v9 = vcombine.low %v13981_v42, %v13984_v47  ;;  %v348_v12 = vor.u32 %v347_v4, %v344_v61  ;;  %v368_v28 = vrot.slane %v366_v16, 4  ;;  %v379_v30 = vshrl.u32 %v14009_v0, 16  ;;  %v13628_v4 = vld [vmem:[%s19052_s1 + $0xe8] sm:$0xff]  }
  0x1f   : > { %12776 = vmatprep.subr.bf16.mxu1 %v13603_v11  ;;  %v358_v19 = vor.u32 %v357_v7, %v353_v6  ;;  %v363_v20 = vrot.slane %v361_v8, 5  ;;  %v371_v33 = vrot.slane %v369_v23, 5  ;;  %v385_v34 = vshll.u32 %v14022_v15, 16  ;;  %v14090_v23 = vld [vmem:[%s13933_s20 + $0x4c] sm:$0xf] }
  0x20   : > { %v349_v25 = vrot.slane %v348_v12, 4  ;;  %v11236_v35 = vcombine.low %v14002_v59, %v14009_v0  ;;  %v377_v40 = vrot.slane %v375_v29, 5  ;;  %v381_v42 = vrot.slane %v379_v30, 4 }
  0x21   : > { %12729 = vmatpush3.bf16.msra.mxu0 %v13602_v10  ;;  %v330_v10 = vsel %vm13974_vm2, %v325_v2, %v329_v45  ;;  %v390_v43 = vshrl.u32 %v14030_v24, 16  ;;  %v372_v46 = vor.u32 %v371_v33, %v368_v28  ;;  %v393_v49 = vshll.u32 %v14030_v24, 16  ;;  %v14073_v2 = vld [vmem:[%s13933_s20 + $0x44] sm:$0x1] }
  0x22   : > { %12777 = vmatpush3.bf16.msra.mxu1 %v13603_v11  ;;  %12730 = vmatprep.subr.bf16.mxu0 %v13604_v17  ;;  %v340_v11 = vsel %vm13974_vm2, %v335_v3, %v339_v50  ;;  %v354_v39 = vsel %vm13974_vm2, %v349_v25, %v353_v6  ;;  %v14056_v50 = vld [vmem:[%s13933_s20 + $0x3c] sm:$0xf]  ;;  %v399_v55 = vshll.u32 %v14035_v31, 16  ;;  %v403_v61 = vshrl.u32 %v14035_v31, 16 }
  0x23   : > { %12778 = vmatprep.subr.bf16.mxu1 %v13605_v32  ;;  %v11210_v18 = vcombine.low %v330_v10, %v340_v11  ;;  %v392_v54 = vrot.slane %v390_v43, 4  ;;  %v373_v58 = vrot.slane %v372_v46, 4  ;;  %v395_v60 = vrot.slane %v393_v49, 5  ;;  %v14113_v46 = vld [vmem:[%s13933_s20 + $0x54] sm:$0xf] }
  0x24   : > { %v409_v22 = vshll.u32 %v14044_v38, 16  ;;  %v401_v63 = vrot.slane %v399_v55, 5  ;;  %v11237_v1 = vcombine.low %v14030_v24, %v14035_v31  ;;  %v414_v3 = vshrl.u32 %v14056_v50, 16  ;;  %v13619_v24 = vld [vmem:[%s19052_s1 + $0xa0] sm:$0xff]  }
  0x25   : > { %12731 = vmatpush3.bf16.msra.mxu0 %v13604_v17  ;;  %v13623_v17 = vld [vmem:[%s19052_s1 + $0xf8] sm:$0xff]   ;;  %v396_v6 = vor.u32 %v395_v60, %v392_v54  ;;  %v405_v7 = vrot.slane %v403_v61, 4  ;;  %v417_v12 = vshll.u32 %v14056_v50, 16  ;;  %v433_v29 = vshll.u32 %v14073_v2, 16 }
  0x26   : > { %12779 = vmatpush3.bf16.msra.mxu1 %v13605_v32  ;;  %12732 = vmatprep.subr.bf16.mxu0 %v13606_v48  ;;  %v359_v32 = vrot.slane %v358_v19, 4  ;;  %v411_v8 = vrot.slane %v409_v22, 5  ;;  %v416_v11 = vrot.slane %v414_v3, 4  ;;  %v1346_v27 = vrot.slane %v14009_v0, 5  ;;  %v13644_v0 = vld [vmem:[%s13933_s20 + $0x24] sm:$0xff]  }
  0x27   : > { %12780 = vmatprep.subr.bf16.mxu1 %v13607_v53  ;;  %v406_v19 = vor.u32 %v405_v7, %v401_v63  ;;  %v419_v25 = vrot.slane %v417_v12, 5  ;;  %v435_v43 = vrot.slane %v433_v29, 5  ;;  %v13634_v29 = vld [vmem:[%s19052_s1 + $0xd0] sm:$0xff]  }
  0x28   : > { %v364_v45 = vsel %vm13974_vm2, %v359_v32, %v363_v20 }
  0x29   : > { %12733 = vmatpush3.bf16.msra.mxu0 %v13606_v48  ;;  %v387_v48 = vrot.slane %v385_v34, 5  ;;  %v11211_v52 = vcombine.low %v354_v39, %v364_v45  ;;  %v407_v33 = vrot.slane %v406_v19, 4  ;;  %v447_v45 = vshll.u32 %v14090_v23, 16  ;;  %v13627_v19 = vld [vmem:[%s19052_s1 + $0x90] sm:$0xff]  }
  0x2a   : > { %12781 = vmatpush3.bf16.msra.mxu1 %v13607_v53  ;;  %12814 = vmatprep.subr.bf16.mxu0 %v13610_v5  ;;  %v382_v53 = vor.u32 %v381_v42, %v377_v40  ;;  %v420_v42 = vor.u32 %v419_v25, %v416_v11 }
  0x2b   : > { %12862 = vmatprep.subr.bf16.mxu1 %v13623_v17  ;;  %v412_v49 = vsel %vm13974_vm2, %v407_v33, %v411_v8 }
  0x2c   : > { %12735 = vmatmul.mubr.bf16.vlgmr.msra.gmra.mxu0 %v11210_v18  ;;  %v383_v62 = vrot.slane %v382_v53, 4  ;;  %v397_v18 = vrot.slane %v396_v6, 4  ;;  %v421_v54 = vrot.slane %v420_v42, 4  ;;  %v14163_v42 = vld [vmem:[%s13933_s20 + $0x6c] sm:$0xf] }
  0x2d   : > { %12783 = vmatmul.mubr.bf16.vlgmr.msra.gmra.mxu1 %v11234_v51  ;;  %12815 = vmatpush3.bf16.msra.mxu0 %v13610_v5  ;;  %v14068_v51 = vld [vmem:[%s13933_s20 + $0x40] sm:$0xf]  ;;  %v378_v5 = vsel %vm13974_vm2, %v373_v58, %v377_v40  ;;  %v14125_v58 = vld [vmem:[%s13933_s20 + $0x5c] sm:$0x1] }
  0x2e   : > { %12786 = vmatprep.mubr.bf16.mxu1 %v11235_v9  ;;  %12816 = vmatprep.subr.bf16.mxu0 %v13613_v36  ;;  %v14082_v9 = vld [vmem:[%s13933_s20 + $0x48] sm:$0xf]  ;;  %v388_v10 = vsel %vm13974_vm2, %v383_v62, %v387_v48  ;;  %v423_v16 = vshll.u32 %v14068_v51, 16  ;;  %v427_v20 = vshrl.u32 %v14068_v51, 16  ;;  %v11238_v30 = vcombine.low %v14056_v50, %v14068_v51  ;;  %v13629_v40 = vld [vmem:[%s19052_s1 + $0xe0] sm:$0xff]   ;;  %v13622_v48 = vld [vmem:[%s19052_s1 + $0x98] sm:$0xff]  }
  0x2f   : > { %12738 = vmatprep.mubr.bf16.mxu0 %v11211_v52  ;;  %12863 = vmatpush3.bf16.msra.mxu1 %v13623_v17  ;;  %v11212_v17 = vcombine.low %v378_v5, %v388_v10  ;;  %v402_v32 = vsel %vm13974_vm2, %v397_v18, %v401_v63  ;;  %v438_v39 = vshrl.u32 %v14082_v9, 16  ;;  %v451_v50 = vshrl.u32 %v14090_v23, 16  ;;  %v14122_v52 = vld [vmem:[%s13933_s20 + $0x58] sm:$0xf]  ;;  %v14141_v10 = vld [vmem:[%s13933_s20 + $0x60] sm:$0xf] }
  0x30   : > { %12864 = vmatprep.subr.bf16.mxu1 %v13624_v44  ;;  %v425_v28 = vrot.slane %v423_v16, 5  ;;  %v429_v34 = vrot.slane %v427_v20, 4  ;;  %v11213_v53 = vcombine.low %v402_v32, %v412_v49  ;;  %v11239_v62 = vcombine.low %v14082_v9, %v14090_v23  ;;  %v13633_v63 = vld [vmem:[%s19052_s1 + $0xd8] sm:$0xff]   ;;  %v14144_v18 = vld [vmem:[%s13933_s20 + $0x64] sm:$0xf] }
  0x31   : > { %12817 = vmatpush3.bf16.msra.mxu0 %v13613_v36  ;;  %v14101_v36 = vld [vmem:[%s13933_s20 + $0x50] sm:$0x1]  ;;  %v453_v61 = vrot.slane %v451_v50, 4  ;;  %v465_v5 = vshll.u32 %v14113_v46, 16  ;;  %v475_v25 = vshrl.u32 %v14122_v52, 16  ;;  %v495_v50 = vshll.u32 %v14144_v18, 16 }
  0x32   : > { %12818 = vmatprep.subr.bf16.mxu0 %v13616_v56  ;;  %v430_v59 = vor.u32 %v429_v34, %v425_v28  ;;  %v457_v22 = vshll.u32 %v14101_v36, 16  ;;  %v11240_v34 = vcombine.low %v14113_v46, %v14122_v52  ;;  %v14169_v49 = vld [vmem:[%s13933_s20 + $0x70] sm:$0xf] }
  0x33   : > { %12865 = vmatpush3.bf16.msra.mxu1 %v13624_v44  ;;  %v441_v44 = vshll.u32 %v14082_v9, 16  ;;  %v471_v9 = vshll.u32 %v14122_v52, 16 }
  0x34   : > { %12739 = vmatmul.mubr.bf16.gmra.mxu0 %v11212_v17  ;;  %12866 = vmatprep.subr.bf16.mxu1 %v13628_v4  ;;  %v431_v60 = vrot.slane %v430_v59, 4  ;;  %v459_v8 = vrot.slane %v457_v22, 5  ;;  %v467_v17 = vrot.slane %v465_v5, 5 }
  0x35   : > { %12787 = vmatmul.mubr.bf16.gmra.mxu1 %v11236_v35  ;;  %12819 = vmatpush3.bf16.msra.mxu0 %v13616_v56  ;;  %v440_v35 = vrot.slane %v438_v39, 4  ;;  %v443_v55 = vrot.slane %v441_v44, 5  ;;  %v449_v56 = vrot.slane %v447_v45, 5  ;;  %v14159_v39 = vld [vmem:[%s13933_s20 + $0x68] sm:$0x1]  ;;  %v477_v44 = vrot.slane %v475_v25, 4 }
  0x36   : > { %12790 = vmatprep.mubr.bf16.mxu1 %v11237_v1  ;;  %12820 = vmatprep.subr.bf16.mxu0 %v13619_v24  ;;  %v426_v1 = vsel %vm13974_vm2, %v421_v54, %v425_v28  ;;  %v436_v6 = vsel %vm13974_vm2, %v431_v60, %v435_v43  ;;  %v481_v28 = vshll.u32 %v14125_v58, 16  ;;  %v489_v45 = vshll.u32 %v14141_v10, 16  ;;  %v13632_v54 = vld [vmem:[%s19052_s1 + $0x88] sm:$0xff]  }
  0x37   : > { %12867 = vmatpush3.bf16.msra.mxu1 %v13628_v4  ;;  %12742 = vmatprep.mubr.bf16.mxu0 %v11213_v53  ;;  %v444_v3 = vor.u32 %v443_v55, %v440_v35  ;;  %v462_v4 = vshrl.u32 %v14113_v46, 16  ;;  %v454_v7 = vor.u32 %v453_v61, %v449_v56  ;;  %v11214_v11 = vcombine.low %v426_v1, %v436_v6  ;;  %v14173_v53 = vld [vmem:[%s13933_s20 + $0x74] sm:$0x1] }
  0x38   : > { %12868 = vmatprep.subr.bf16.mxu1 %v13629_v40  ;;  %v499_v60 = vshrl.u32 %v14144_v18, 16  ;;  %v505_v61 = vshll.u32 %v14159_v39, 16  ;;  %v11241_v1 = vcombine.low %v14141_v10, %v14144_v18 }
  0x39   : > { %12821 = vmatpush3.bf16.msra.mxu0 %v13619_v24  ;;  %v445_v12 = vrot.slane %v444_v3, 4  ;;  %v464_v16 = vrot.slane %v462_v4, 4  ;;  %v455_v20 = vrot.slane %v454_v7, 4  ;;  %v473_v24 = vrot.slane %v471_v9, 5  ;;  %v13637_v7 = vld [vmem:[%s19052_s1 + $0x80] sm:$0xff]  }
  0x3a   : > { %12822 = vmatprep.subr.bf16.mxu0 %v13622_v48  ;;  %v501_v5 = vrot.slane %v499_v60, 4  ;;  %v507_v6 = vrot.slane %v505_v61, 5  ;;  %v513_v9 = vshll.u32 %v14163_v42, 16  ;;  %v14225_v61 = vld [vmem:[%s13933_s20 + $0x88] sm:$0xf] }
  0x3b   : > { %12869 = vmatpush3.bf16.msra.mxu1 %v13629_v40  ;;  %v450_v32 = vsel %vm13974_vm2, %v445_v12, %v449_v56  ;;  %v468_v33 = vor.u32 %v467_v17, %v464_v16  ;;  %v486_v40 = vshrl.u32 %v14141_v10, 16  ;;  %v460_v43 = vsel %vm13974_vm2, %v455_v20, %v459_v8  ;;  %v246_v20 = vld [vmem:[%s13933_s20 + $0x78] sm:$0xf] }
  0x3c   : > { %12870 = vmatprep.subr.bf16.mxu1 %v13633_v63  ;;  %12743 = vmatmul.mubr.bf16.gmra.mxu0 %v11214_v11  ;;  %v11215_v59 = vcombine.low %v450_v32, %v460_v43  ;;  %v478_v55 = vor.u32 %v477_v44, %v473_v24  ;;  %v491_v56 = vrot.slane %v489_v45, 5  ;;  %v519_v11 = vshll.u32 %v14169_v49, 16  ;;  %v14214_v45 = vld [vmem:[%s19052_s1 + $0x138] sm:$0xff]  }
  0x3d   : > { %12791 = vmatmul.mubr.bf16.gmra.mxu1 %v11238_v30  ;;  %v483_v30 = vrot.slane %v481_v28, 5  ;;  %12823 = vmatpush3.bf16.msra.mxu0 %v13622_v48  ;;  %v469_v35 = vrot.slane %v468_v33, 4  ;;  %v488_v46 = vrot.slane %v486_v40, 4  ;;  %v13638_v48 = vld [vmem:[%s19052_s1 + $0xc8] sm:$0xff]   ;;  %v523_v10 = vshrl.u32 %v14169_v49, 16 }
  0x3e   : > { %12794 = vmatprep.mubr.bf16.mxu1 %v11239_v62  ;;  %12824 = vmatprep.subr.bf16.mxu0 %v13627_v19  ;;  %v497_v62 = vrot.slane %v495_v50, 5  ;;  %v479_v3 = vrot.slane %v478_v55, 4  ;;  %v515_v28 = vrot.slane %v513_v9, 5  ;;  %v521_v32 = vrot.slane %v519_v11, 5  ;;  %v14202_v40 = vld [vmem:[%s13933_s20 + $0x80] sm:$0x1] }
  0x3f   : > { %12871 = vmatpush3.bf16.msra.mxu1 %v13633_v63  ;;  %12746 = vmatprep.mubr.bf16.mxu0 %v11215_v59  ;;  %v474_v22 = vsel %vm13974_vm2, %v469_v35, %v473_v24  ;;  %v510_v63 = vshrl.u32 %v14163_v42, 16  ;;  %v492_v4 = vor.u32 %v491_v56, %v488_v46  ;;  %v14199_v24 = vld [vmem:[%s13933_s20 + $0x7c] sm:$0xf]  ;;  %v525_v33 = vrot.slane %v523_v10, 4  ;;  %v14217_v55 = vld [vmem:[%s13933_s20 + $0x84] sm:$0xf] }
  0x40   : > { %12872 = vmatprep.subr.bf16.mxu1 %v13634_v29  ;;  %v484_v12 = vsel %vm13974_vm2, %v479_v3, %v483_v30  ;;  %v502_v17 = vor.u32 %v501_v5, %v497_v62  ;;  %v534_v46 = vshrl.u32 %v246_v20, 16  ;;  %v537_v50 = vshll.u32 %v246_v20, 16 }
  0x41   : > { %12825 = vmatpush3.bf16.msra.mxu0 %v13627_v19  ;;  %v512_v8 = vrot.slane %v510_v63, 4  ;;  %v493_v16 = vrot.slane %v492_v4, 4  ;;  %v529_v19 = vshll.u32 %v14173_v53, 16  ;;  %v11216_v25 = vcombine.low %v474_v22, %v484_v12  ;;  %v14228_v22 = vld [vmem:[%s13933_s20 + $0x8c] sm:$0x1] }
  0x42   : > { %12826 = vmatprep.subr.bf16.mxu0 %v13632_v54  ;;  %v503_v44 = vrot.slane %v502_v17, 4  ;;  %v526_v35 = vor.u32 %v525_v33, %v521_v32  ;;  %v543_v60 = vshll.u32 %v14199_v24, 16  ;;  %v536_v3 = vrot.slane %v534_v46, 4  ;;  %v14243_v33 = vld [vmem:[%s13933_s20 + $0x94] sm:$0xf] }
  0x43   : > { %12873 = vmatpush3.bf16.msra.mxu1 %v13634_v29  ;;  %v13639_v29 = vld [vmem:[%s19052_s1 + $0xc0] sm:$0xff]   ;;  %v498_v43 = vsel %vm13974_vm2, %v493_v16, %v497_v62  ;;  %v531_v30 = vrot.slane %v529_v19, 5  ;;  %v516_v59 = vor.u32 %v515_v28, %v512_v8  ;;  %v539_v4 = vrot.slane %v537_v50, 5  ;;  %v250_v19 = vld [vmem:[%s13933_s20 + $0x90] sm:$0xf] }
  0x44   : > { %12874 = vmatprep.subr.bf16.mxu1 %v13638_v48  ;;  %12747 = vmatmul.mubr.bf16.gmra.mxu0 %v11216_v25  ;;  %v508_v56 = vsel %vm13974_vm2, %v503_v44, %v507_v6  ;;  %v527_v63 = vrot.slane %v526_v35, 4  ;;  %v545_v5 = vrot.slane %v543_v60, 5  ;;  %v558_v10 = vshrl.u32 %v14217_v55, 16 }
  0x45   : > { %12795 = vmatmul.mubr.bf16.gmra.mxu1 %v11240_v34  ;;  %v11242_v34 = vcombine.low %v14163_v42, %v14169_v49  ;;  %12827 = vmatpush3.bf16.msra.mxu0 %v13632_v54  ;;  %v547_v42 = vshrl.u32 %v14199_v24, 16  ;;  %v553_v54 = vshll.u32 %v14202_v40, 16  ;;  %v11217_v62 = vcombine.low %v498_v43, %v508_v56  ;;  %v14251_v56 = vld [vmem:[%s13933_s20 + $0x9c] sm:$0xf] }
  0x46   : > { %12798 = vmatprep.mubr.bf16.mxu1 %v11241_v1  ;;  %12828 = vmatprep.subr.bf16.mxu0 %v13637_v7  ;;  %v517_v1 = vrot.slane %v516_v59, 4  ;;  %v532_v11 = vsel %vm13974_vm2, %v527_v63, %v531_v30  ;;  %v540_v16 = vor.u32 %v539_v4, %v536_v3  ;;  %v560_v25 = vrot.slane %v558_v10, 4 }
  0x47   : > { %12875 = vmatpush3.bf16.msra.mxu1 %v13638_v48  ;;  %v549_v6 = vrot.slane %v547_v42, 4  ;;  %v555_v8 = vrot.slane %v553_v54, 5  ;;  %12750 = vmatprep.mubr.bf16.mxu0 %v11217_v62  ;;  %v11243_v48 = vcombine.low %v246_v20, %v14199_v24  ;;  %v567_v28 = vshll.u32 %v14225_v61, 16 }
  0x48   : > { %12876 = vmatprep.subr.bf16.mxu1 %v13639_v29  ;;  %v522_v9 = vsel %vm13974_vm2, %v517_v1, %v521_v32  ;;  %v571_v32 = vshrl.u32 %v14225_v61, 16  ;;  %v577_v20 = vshll.u32 %v14228_v22, 16  ;;  %v541_v43 = vrot.slane %v540_v16, 4  ;;  %v14258_v1 = vld [vmem:[%s13933_s20 + $0xa0] sm:$0xf] }
  0x49   : > { %12829 = vmatpush3.bf16.msra.mxu0 %v13637_v7  ;;  %v11218_v12 = vcombine.low %v522_v9, %v532_v11  ;;  %v550_v17 = vor.u32 %v549_v6, %v545_v5  ;;  %v561_v7 = vshll.u32 %v14217_v55, 16  ;;  %v11244_v59 = vcombine.low %v14217_v55, %v14225_v61 }
  0x4a   : > { %12910 = vmatprep.subr.bf16.mxu0 %v14214_v45  ;;  %v573_v35 = vrot.slane %v571_v32, 4  ;;  %v579_v46 = vrot.slane %v577_v20, 5  ;;  %v582_v50 = vshrl.u32 %v250_v19, 16  ;;  %v546_v60 = vsel %vm13974_vm2, %v541_v43, %v545_v5  ;;  %v14264_v5 = vld [vmem:[%s13933_s20 + $0xa4] sm:$0x1] }
  0x4b   : > { %12877 = vmatpush3.bf16.msra.mxu1 %v13639_v29  ;;  %v551_v44 = vrot.slane %v550_v17, 4  ;;  %v563_v30 = vrot.slane %v561_v7, 5  ;;  %v14248_v29 = vld [vmem:[%s13933_s20 + $0x98] sm:$0x1]  ;;  %v585_v62 = vshll.u32 %v250_v19, 16  ;;  %v591_v4 = vshll.u32 %v14243_v33, 16 }
  0x4c   : > { %12751 = vmatmul.mubr.bf16.gmra.mxu0 %v11218_v12  ;;  %v584_v3 = vrot.slane %v582_v50, 4  ;;  %v595_v11 = vshrl.u32 %v14243_v33, 16  ;;  %v11245_v12 = vcombine.low %v250_v19, %v14243_v33  ;;  %v606_v16 = vshrl.u32 %v14251_v56, 16  ;;  %v254_v32 = vld [vmem:[%s13933_s20 + $0xa8] sm:$0xf] }
  0x4d   : > { %12799 = vmatmul.mubr.bf16.gmra.mxu1 %v11242_v34  ;;  %v569_v34 = vrot.slane %v567_v28, 5  ;;  %v556_v42 = vsel %vm13974_vm2, %v551_v44, %v555_v8  ;;  %v564_v54 = vor.u32 %v563_v30, %v560_v25  ;;  %v587_v9 = vrot.slane %v585_v62, 5  ;;  %v14276_v19 = vld [vmem:[%s13933_s20 + $0xac] sm:$0xf] }
  0x4e   : > { %12802 = vmatprep.mubr.bf16.mxu1 %v11243_v48  ;;  %v11219_v55 = vcombine.low %v546_v60, %v556_v42  ;;  %v601_v48 = vshll.u32 %v14248_v29, 16  ;;  %v593_v10 = vrot.slane %v591_v4, 5  ;;  %v597_v25 = vrot.slane %v595_v11, 4 }
  0x4f   : > { %v574_v63 = vor.u32 %v573_v35, %v569_v34  ;;  %v565_v6 = vrot.slane %v564_v54, 4  ;;  %v588_v7 = vor.u32 %v587_v9, %v584_v3  ;;  %v608_v43 = vrot.slane %v606_v16, 4  ;;  %v14294_v9 = vld [vmem:[%s13933_s20 + $0xb4] sm:$0xf] }
  0x50   : > { %12754 = vmatprep.mubr.bf16.mxu0 %v11219_v55  ;;  %v603_v28 = vrot.slane %v601_v48, 5  ;;  %v609_v44 = vshll.u32 %v14251_v56, 16  ;;  %v615_v30 = vshll.u32 %v14258_v1, 16  ;;  %v598_v60 = vor.u32 %v597_v25, %v593_v10  ;;  %v14288_v55 = vld [vmem:[%s13933_s20 + $0xb0] sm:$0x1] }
  0x51   : > { %v575_v8 = vrot.slane %v574_v63, 4  ;;  %v570_v17 = vsel %vm13974_vm2, %v565_v6, %v569_v34  ;;  %v14281_v34 = vld [vmem:[%s19052_s1 + $0x178] sm:$0xff]   ;;  %v589_v50 = vrot.slane %v588_v7, 4  ;;  %v625_v54 = vshll.u32 %v14264_v5, 16 }
  0x52   : > { %v617_v42 = vrot.slane %v615_v30, 5  ;;  %v11246_v62 = vcombine.low %v14251_v56, %v14258_v1  ;;  %12958 = vmatprep.subr.bf16.mxu1 %v14281_v34  ;;  %v599_v3 = vrot.slane %v598_v60, 4  ;;  %v630_v6 = vshrl.u32 %v254_v32, 16 }
  0x53   : > { %v580_v20 = vsel %vm13974_vm2, %v575_v8, %v579_v46  ;;  %v611_v46 = vrot.slane %v609_v44, 5  ;;  %v594_v63 = vsel %vm13974_vm2, %v589_v50, %v593_v10  ;;  %v627_v48 = vrot.slane %v625_v54, 5  ;;  %v14301_v10 = vld [vmem:[%s13933_s20 + $0xb8] sm:$0xf] }
  0x54   : > { %v11220_v35 = vcombine.low %v570_v17, %v580_v20  ;;  %v633_v8 = vshll.u32 %v254_v32, 16  ;;  %v639_v56 = vshll.u32 %v14276_v19, 16  ;;  %v632_v17 = vrot.slane %v630_v6, 4 }
  0x55   : > { %12803 = vmatmul.mubr.bf16.gmra.mxu1 %v11244_v59  ;;  %v619_v59 = vshrl.u32 %v14258_v1, 16  ;;  %v612_v11 = vor.u32 %v611_v46, %v608_v43  ;;  %v643_v7 = vshrl.u32 %v14276_v19, 16  ;;  %v649_v60 = vshll.u32 %v14288_v55, 16 }
  0x56   : > { %12806 = vmatprep.mubr.bf16.mxu1 %v11245_v12  ;;  %12755 = vmatmul.mubr.bf16.gmra.mxu0 %v11220_v35  ;;  %v604_v12 = vsel %vm13974_vm2, %v599_v3, %v603_v28  ;;  %v635_v44 = vrot.slane %v633_v8, 5  ;;  %v641_v30 = vrot.slane %v639_v56, 5  ;;  %v14304_v35 = vld [vmem:[%s13933_s20 + $0xbc] sm:$0x1]  ;;  %v1272_v28 = vld [vmem:[%s13933_s20] sm:$0xe] }
  0x57   : > { %v621_v4 = vrot.slane %v619_v59, 4  ;;  %v11221_v25 = vcombine.low %v594_v63, %v604_v12  ;;  %v613_v20 = vrot.slane %v612_v11, 4  ;;  %v645_v50 = vrot.slane %v643_v7, 4  ;;  %v1273_v8 = vld [vmem:[%s13933_s20 + $0xc] sm:$0xe] }
  0x58   : > { %v11247_v59 = vcombine.low %v254_v32, %v14276_v19  ;;  %v636_v54 = vor.u32 %v635_v44, %v632_v17  ;;  %v654_v63 = vshrl.u32 %v14294_v9, 16  ;;  %v657_v3 = vshll.u32 %v14294_v9, 16 }
  0x59   : > { %v622_v16 = vor.u32 %v621_v4, %v617_v42  ;;  %12758 = vmatprep.mubr.bf16.mxu0 %v11221_v25  ;;  %v618_v46 = vsel %vm13974_vm2, %v613_v20, %v617_v42  ;;  %v646_v6 = vor.u32 %v645_v50, %v641_v30  ;;  %v651_v11 = vrot.slane %v649_v60, 5  ;;  %v1274_v20 = vld [vmem:[%s13933_s20 + $0x18] sm:$0xe] }
  0x5a   : > { %v663_v32 = vshll.u32 %v14301_v10, 16  ;;  %v637_v12 = vrot.slane %v636_v54, 4  ;;  %v656_v42 = vrot.slane %v654_v63, 4  ;;  %v667_v7 = vshrl.u32 %v14301_v10, 16 }
  0x5b   : > { %v623_v43 = vrot.slane %v622_v16, 4  ;;  %v647_v16 = vrot.slane %v646_v6, 4  ;;  %v673_v25 = vshll.u32 %v14304_v35, 16  ;;  %v19081_v50 = vmov 0 }
  0x5c   : > { %v665_v17 = vrot.slane %v663_v32, 5  ;;  %v19082_v50 = vsel %vm14326_vm5, 4294967295, %v19081_v50  ;;  %v11257_v60 = vrot.slane %v1272_v28, 9  ;;  %v669_v54 = vrot.slane %v667_v7, 4 }
  0x5d   : > { %12807 = vmatmul.mubr.bf16.gmra.mxu1 %v11246_v62  ;;  %v628_v4 = vsel %vm13974_vm2, %v623_v43, %v627_v48  ;;  %v659_v62 = vrot.slane %v657_v3, 5  ;;  %v642_v48 = vsel %vm13974_vm2, %v637_v12, %v641_v30  ;;  %v11248_v43 = vcombine.low %v14294_v9, %v14301_v10  ;;  %19083 = vst [vmem:[#allocation4_spill] sm:$0xff] %v19082_v50  ;;  %v13641_v30 = vld [vmem:[%s13933_s20 + $0xc] sm:$0xff]  }
  0x5e   : > { %12810 = vmatprep.mubr.bf16.mxu1 %v11247_v59  ;;  %v11222_v56 = vcombine.low %v618_v46, %v628_v4  ;;  %v1275_v59 = vld [vmem:[%s13933_s20 + $0x24] sm:$0xe]  ;;  %v652_v46 = vsel %vm13974_vm2, %v647_v16, %v651_v11  ;;  %v675_v63 = vrot.slane %v673_v25, 5  ;;  %v1325_v3 = vrot.slane %v13943_v13, 5 }
  0x5f   : > { %v660_v44 = vor.u32 %v659_v62, %v656_v42  ;;  %v11223_v4 = vcombine.low %v642_v48, %v652_v46  ;;  %v11258_v9 = vrot.slane %v1273_v8, 9  ;;  %v1332_v32 = vrot.slane %v13960_v26, 5  ;;  %v1276_v62 = vld [vmem:[%s13933_s20 + $0x30] sm:$0xe] }
  0x60   : > { %12759 = vmatmul.mubr.bf16.gmra.mxu0 %v11222_v56  ;;  %v670_v56 = vor.u32 %v669_v54, %v665_v17  ;;  %v1326_v28 = vsel %vm14326_vm5, %v11257_v60, %v1325_v3  ;;  %v1327_v12 = vrot.slane %v1325_v3, 4  ;;  %v11259_v42 = vrot.slane %v1274_v20, 9  ;;  %v1277_v20 = vld [vmem:[%s13933_s20 + $0x3c] sm:$0xe] }
  0x61   : > { %v661_v6 = vrot.slane %v660_v44, 4  ;;  %12762 = vmatprep.mubr.bf16.mxu0 %v11223_v4  ;;  %v14342_v13 = vsel %vm14326_vm5, %v11258_v9, %v1332_v32  ;;  %v1334_v8 = vrot.slane %v1332_v32, 4  ;;  %v1339_v26 = vrot.slane %v13984_v47, 5  ;;  %v13642_v47 = vld [vmem:[%s13933_s20 + $0x18] sm:$0xff]  }
  0x62   : > { %v671_v16 = vrot.slane %v670_v56, 4  ;;  %v1329_v7 = vsel %vm14326_vm5, %v1327_v12, %v1328_v21  ;;  %v1342_v25 = vrot.slane %v13998_v57, 5  ;;  %v11261_v54 = vrot.slane %v1276_v62, 9  ;;  %v13656_v12 = vld [vmem:[%s19052_s1 + $0x170] sm:$0xff]  }
  0x63   : > { %v666_v11 = vsel %vm13974_vm2, %v661_v6, %v665_v17  ;;  %v11260_v17 = vrot.slane %v1275_v59, 9  ;;  %v11289_v48 = vcombine.low %v1326_v28, %v1329_v7  ;;  %v14356_v44 = vsel %vm14326_vm5, %v1334_v8, %v1335_v41  ;;  %v1279_v6 = vld [vmem:[%s13933_s20 + $0x54] sm:$0xe]  ;;  %v1280_v28 = vld [vmem:[%s13933_s20 + $0x60] sm:$0xe] }
  0x64   : > { %v14361_v14 = vsel %vm14326_vm5, %v11259_v42, %v1339_v26  ;;  %v1341_v21 = vrot.slane %v1339_v26, 4  ;;  %v676_v57 = vsel %vm13974_vm2, %v671_v16, %v675_v63  ;;  %v11290_v60 = vcombine.low %v14342_v13, %v14356_v44  ;;  %v1281_v16 = vld [vmem:[%s13933_s20 + $0x6c] sm:$0xe] }
  0x65   : > { %12811 = vmatmul.mubr.bf16.gmra.mxu1 %v11248_v43  ;;  %v1278_v43 = vld [vmem:[%s13933_s20 + $0x48] sm:$0xe]  ;;  %v1349_v41 = vrot.slane %v14022_v15, 5  ;;  %v11224_v59 = vcombine.low %v666_v11, %v676_v57  ;;  %v1353_v3 = vrot.slane %v14035_v31, 5  ;;  %v14379_v63 = vsel %vm14326_vm5, %v11260_v17, %v1346_v27  ;;  %v13643_v17 = vld [vmem:[%s19052_s1 + $0x130] sm:$0xff]  }
  0x66   : > { %12878 = vmatprep.mubr.bf16.mxu1 %v13641_v30  ;;  %v14372_v46 = vsel %vm14326_vm5, %v1341_v21, %v1342_v25  ;;  %v1348_v4 = vrot.slane %v1346_v27, 4  ;;  %v1356_v15 = vrot.slane %v14044_v38, 5  ;;  %v11262_v31 = vrot.slane %v1277_v20, 9  ;;  %v13645_v20 = vld [vmem:[%s13933_s20 + $0x30] sm:$0xff]  }
  0x67   : > { %v11291_v30 = vcombine.low %v14361_v14, %v14372_v46  ;;  %v14386_v9 = vsel %vm14326_vm5, %v11261_v54, %v1353_v3  ;;  %v1355_v32 = vrot.slane %v1353_v3, 4  ;;  %v1360_v56 = vrot.slane %v14068_v51, 5  ;;  %v13647_v46 = vld [vmem:[%s13933_s20 + $0x3c] sm:$0xff]  }
  0x68   : > { %12763 = vmatmul.mubr.bf16.gmra.mxu0 %v11224_v59  ;;  %v14395_v38 = vsel %vm14326_vm5, %v1348_v4, %v1349_v41  ;;  %v1363_v42 = vrot.slane %v14073_v2, 5  ;;  %v11263_v11 = vrot.slane %v1278_v43, 9  ;;  %v1367_v13 = vrot.slane %v14090_v23, 5  ;;  %v1282_v59 = vld [vmem:[%s13933_s20 + $0x78] sm:$0xe] }
  0x69   : > { %12830 = vmatprep.mubr.bf16.mxu0 %v11289_v48  ;;  %v11292_v51 = vcombine.low %v14379_v63, %v14395_v38  ;;  %v14403_v8 = vsel %vm14326_vm5, %v1355_v32, %v1356_v15  ;;  %v14407_v26 = vsel %vm14326_vm5, %v11262_v31, %v1360_v56  ;;  %v1362_v62 = vrot.slane %v1360_v56, 4  ;;  %v13661_v31 = vld [vmem:[%s19052_s1 + $0x160] sm:$0xff]  }
  0x6a   : > { %v11293_v2 = vcombine.low %v14386_v9, %v14403_v8  ;;  %v14414_v23 = vsel %vm14326_vm5, %v11263_v11, %v1367_v13  ;;  %v1369_v7 = vrot.slane %v1367_v13, 4  ;;  %v1370_v25 = vrot.slane %v14101_v36, 5  ;;  %v13660_v36 = vld [vmem:[%s19052_s1 + $0x168] sm:$0xff]  }
  0x6b   : > { %v14424_v48 = vsel %vm14326_vm5, %v1362_v62, %v1363_v42  ;;  %v11264_v44 = vrot.slane %v1279_v6, 9  ;;  %v1377_v14 = vrot.slane %v14125_v58, 5  ;;  %v11265_v43 = vrot.slane %v1280_v28, 9 }
  0x6c   : > { %v14435_v21 = vsel %vm14326_vm5, %v1369_v7, %v1370_v25  ;;  %v1381_v57 = vrot.slane %v14144_v18, 5  ;;  %v1384_v41 = vrot.slane %v14159_v39, 5  ;;  %v11266_v4 = vrot.slane %v1281_v16, 9  ;;  %v13665_v16 = vld [vmem:[%s19052_s1 + $0x158] sm:$0xff]   ;;  %v13648_v7 = vld [vmem:[%s13933_s20 + $0x48] sm:$0xff]  }
  0x6d   : > { %12879 = vmatmul.mubr.bf16.vlgmr.msra.gmra.mxu1 %v13642_v47  ;;  %v1374_v47 = vrot.slane %v14122_v52, 5  ;;  %v11295_v52 = vcombine.low %v14414_v23, %v14435_v21  ;;  %v1388_v18 = vrot.slane %v14169_v49, 5  ;;  %v1391_v6 = vrot.slane %v14173_v53, 5  ;;  %v13646_v49 = vld [vmem:[%s19052_s1 + $0x128] sm:$0xff]   ;;  %v11388_v21 = vld [vmem:[%s13933_s20 + $0x18] sm:$0xf] }
  0x6e   : > { %12882 = vmatprep.mubr.bf16.mxu1 %v13644_v0  ;;  %12959 = vmatpush3.bf16.msra.mxu1 %v14281_v34  ;;  %v11294_v34 = vcombine.low %v14407_v26, %v14424_v48  ;;  %v14449_v54 = vsel %vm14326_vm5, %v11265_v43, %v1381_v57  ;;  %v1383_v3 = vrot.slane %v1381_v57, 4  ;;  %v1283_v0 = vld [vmem:[%s13933_s20 + $0x84] sm:$0xe]  ;;  %v11267_v39 = vrot.slane %v1282_v59, 9  ;;  %v13666_v59 = vld [vmem:[%s19052_s1 + $0x150] sm:$0xff]  }
  0x6f   : > { %12960 = vmatprep.subr.bf16.mxu1 %v13656_v12  ;;  %v14442_v58 = vsel %vm14326_vm5, %v11264_v44, %v1374_v47  ;;  %v1376_v27 = vrot.slane %v1374_v47, 4  ;;  %v1395_v32 = vrot.slane %v14199_v24, 5  ;;  %v14474_v24 = vsel %vm14326_vm5, %v11266_v4, %v1388_v18  ;;  %v14602_v48 = vld [vmem:[%s13933_s20 + $0x14] sm:$0x1] }
  0x70   : > { %12831 = vmatmul.mubr.bf16.vlgmr.msra.gmra.mxu0 %v11290_v60  ;;  %v14470_v53 = vsel %vm14326_vm5, %v1383_v3, %v1384_v41  ;;  %v1390_v56 = vrot.slane %v1388_v18, 4  ;;  %v11268_v11 = vrot.slane %v1283_v0, 9  ;;  %v1402_v13 = vrot.slane %v14225_v61, 5  ;;  %v13650_v61 = vld [vmem:[%s13933_s20 + $0x54] sm:$0xff]  }
  0x71   : > { %v14455_v15 = vsel %vm14326_vm5, %v1376_v27, %v1377_v14  ;;  %12911 = vmatpush3.bf16.msra.mxu0 %v14214_v45  ;;  %12834 = vmatprep.mubr.bf16.mxu0 %v11291_v30  ;;  %v11297_v45 = vcombine.low %v14449_v54, %v14470_v53  ;;  %v14480_v30 = vsel %vm14326_vm5, %v11267_v39, %v1395_v32  ;;  %v1397_v28 = vrot.slane %v1395_v32, 4  ;;  %v1284_v14 = vld [vmem:[%s13933_s20 + $0x90] sm:$0xe]  ;;  %v1285_v27 = vld [vmem:[%s13933_s20 + $0x9c] sm:$0xe]  ;;  %v13651_v32 = vld [vmem:[%s13933_s20 + $0x60] sm:$0xff]  }
  0x72   : > { %12961 = vmatpush3.bf16.msra.mxu1 %v13656_v12  ;;  %v11296_v60 = vcombine.low %v14442_v58, %v14455_v15  ;;  %12912 = vmatprep.subr.bf16.mxu0 %v13643_v17  ;;  %v1398_v12 = vrot.slane %v14202_v40, 5  ;;  %v14485_v42 = vsel %vm14326_vm5, %v1390_v56, %v1391_v6  ;;  %v1405_v62 = vrot.slane %v14228_v22, 5  ;;  %v13649_v40 = vld [vmem:[%s19052_s1 + $0x120] sm:$0xff]   ;;  %v1287_v39 = vld [vmem:[%s13933_s20 + $0xb4] sm:$0xe]  ;;  %v14647_v53 = vld [vmem:[%s19052_s1 + $0x1b8] sm:$0xff]  }
  0x73   : > { %12962 = vmatprep.subr.bf16.mxu1 %v13660_v36  ;;  %v11298_v25 = vcombine.low %v14474_v24, %v14485_v42  ;;  %v14507_v44 = vsel %vm14326_vm5, %v11268_v11, %v1402_v13  ;;  %v1404_v47 = vrot.slane %v1402_v13, 4  ;;  %v11269_v43 = vrot.slane %v1284_v14, 9  ;;  %v13653_v11 = vld [vmem:[%s13933_s20 + $0x6c] sm:$0xff]  }
  0x74   : > { %v1412_v57 = vrot.slane %v14248_v29, 5  ;;  %v1416_v41 = vrot.slane %v14258_v1, 5  ;;  %v13652_v29 = vld [vmem:[%s19052_s1 + $0x118] sm:$0xff]   ;;  %v1423_v18 = vrot.slane %v14276_v19, 5  ;;  %v1426_v6 = vrot.slane %v14288_v55, 5 }
  0x75   : > { %12883 = vmatmul.mubr.bf16.gmra.mxu1 %v13645_v20  ;;  %v14500_v20 = vsel %vm14326_vm5, %v1397_v28, %v1398_v12  ;;  %12913 = vmatpush3.bf16.msra.mxu0 %v13643_v17  ;;  %v1419_v17 = vrot.slane %v14264_v5, 5  ;;  %v11272_v56 = vrot.slane %v1287_v39, 9  ;;  %v1430_v28 = vrot.slane %v14301_v10, 5 }
  0x76   : > { %12886 = vmatprep.mubr.bf16.mxu1 %v13647_v46  ;;  %12963 = vmatpush3.bf16.msra.mxu1 %v13660_v36  ;;  %v11299_v22 = vcombine.low %v14480_v30, %v14500_v20  ;;  %v1409_v36 = vrot.slane %v14243_v33, 5  ;;  %v14520_v46 = vsel %vm14326_vm5, %v1404_v47, %v1405_v62  ;;  %v11270_v33 = vrot.slane %v1285_v27, 9  ;;  %v13662_v47 = vld [vmem:[%s19052_s1 + $0x108] sm:$0xff]  }
  0x77   : > { %12964 = vmatprep.subr.bf16.mxu1 %v13661_v31  ;;  %12914 = vmatprep.subr.bf16.mxu0 %v13646_v49  ;;  %v11300_v1 = vcombine.low %v14507_v44, %v14520_v46  ;;  %v1418_v4 = vrot.slane %v1416_v41, 4  ;;  %v1425_v0 = vrot.slane %v1423_v18, 4  ;;  %v1433_v12 = vrot.slane %v14304_v35, 5  ;;  %v13671_v35 = vld [vmem:[%s19052_s1 + $0x140] sm:$0xff]  }
  0x78   : > { %v1411_v3 = vrot.slane %v1409_v36, 4  ;;  %12835 = vmatmul.mubr.bf16.gmra.mxu0 %v11292_v51  ;;  %v14532_v5 = vsel %vm14326_vm5, %v11269_v43, %v1409_v36  ;;  %v14544_v38 = vsel %vm14326_vm5, %v11270_v33, %v1416_v41  ;;  %v13670_v51 = vld [vmem:[%s19052_s1 + $0x148] sm:$0xff]   ;;  %v14577_v62 = vsel %vm14326_vm5, %v11272_v56, %v1430_v28 }
  0x79   : > { %12838 = vmatprep.mubr.bf16.mxu0 %v11293_v2  ;;  %12915 = vmatpush3.bf16.msra.mxu0 %v13646_v49  ;;  %v14550_v9 = vsel %vm14326_vm5, %v1418_v4, %v1419_v17  ;;  %v1286_v2 = vld [vmem:[%s13933_s20 + $0xa8] sm:$0xe]  ;;  %v14569_v55 = vsel %vm14326_vm5, %v1425_v0, %v1426_v6  ;;  %v1432_v10 = vrot.slane %v1430_v28, 4  ;;  %v2212_v23 = vshll.u32 %v14602_v48, 16  ;;  %v14610_v17 = vld [vmem:[%s13933_s20 + $0x20] sm:$0x1] }
  0x7a   : > { %12965 = vmatpush3.bf16.msra.mxu1 %v13661_v31  ;;  %v14540_v63 = vsel %vm14326_vm5, %v1411_v3, %v1412_v57  ;;  %12916 = vmatprep.subr.bf16.mxu0 %v13649_v40  ;;  %v11302_v8 = vcombine.low %v14544_v38, %v14550_v9  ;;  %v13657_v31 = vld [vmem:[%s19052_s1 + $0x110] sm:$0xff]   ;;  %v11271_v49 = vrot.slane %v1286_v2, 9  ;;  %v13654_v3 = vld [vmem:[%s13933_s20 + $0x78] sm:$0xff]   ;;  %v2220_v4 = vshll.u32 %v11388_v21, 16  ;;  %v13658_v2 = vld [vmem:[%s13933_s20 + $0x84] sm:$0xff]  }
  0x7b   : > { %12966 = vmatprep.subr.bf16.mxu1 %v13665_v16  ;;  %v11301_v19 = vcombine.low %v14532_v5, %v14540_v63  ;;  %v2236_v39 = vshll.u32 %v14610_v17, 16 }
  0x7c   : > { %v14573_v13 = vsel %vm14326_vm5, %v11271_v49, %v1423_v18  ;;  %v13667_v49 = vld [vmem:[%s19052_s1 + $0x100] sm:$0xff]   ;;  %v2222_v28 = vrot.slane %v2220_v4, 5 }
  0x7d   : > { %12887 = vmatmul.mubr.bf16.gmra.mxu1 %v13648_v7  ;;  %12917 = vmatpush3.bf16.msra.mxu0 %v13649_v40  ;;  %v14589_v7 = vsel %vm14326_vm5, %v1432_v10, %v1433_v12  ;;  %v11385_v40 = vld [vmem:[%s13933_s20 + $0xc] sm:$0xf] }
  0x7e   : > { %12890 = vmatprep.mubr.bf16.mxu1 %v13650_v61  ;;  %12967 = vmatpush3.bf16.msra.mxu1 %v13665_v16  ;;  %v11303_v16 = vcombine.low %v14573_v13, %v14569_v55  ;;  %v11386_v61 = vld [vmem:[%s13933_s20 + $0x10] sm:$0xf]  ;;  %v11304_v26 = vcombine.low %v14577_v62, %v14589_v7  ;;  %v2196_v14 = vshll.u32 %v11385_v40, 16  ;;  %v11473_v12 = vld [vmem:[%s13933_s20 + $0xc] sm:$0xe] }
  0x7f   : > { %12968 = vmatprep.subr.bf16.mxu1 %v13666_v59  ;;  %12918 = vmatprep.subr.bf16.mxu0 %v13652_v29  ;;  %v2202_v36 = vshll.u32 %v11386_v61, 16  ;;  %v2206_v43 = vshrl.u32 %v11386_v61, 16  ;;  %v11406_v13 = vld [vmem:[%s13933_s20 + $0x60] sm:$0xf] }
  0x80   : > { %12839 = vmatmul.mubr.bf16.gmra.mxu0 %v11294_v34  ;;  %v2193_v34 = vshrl.u32 %v11385_v40, 16  ;;  %v2198_v27 = vrot.slane %v2196_v14, 5  ;;  %v11489_v14 = vrot.slane %v11473_v12, 9 }
  0x81   : > { %12842 = vmatprep.mubr.bf16.mxu0 %v11295_v52  ;;  %12919 = vmatpush3.bf16.msra.mxu0 %v13652_v29  ;;  %v14607_v52 = vld [vmem:[%s13933_s20 + $0x1c] sm:$0xf]  ;;  %v2204_v41 = vrot.slane %v2202_v36, 5  ;;  %v2208_v33 = vrot.slane %v2206_v43, 4  ;;  %v2214_v29 = vrot.slane %v2212_v23, 5 }
  0x82   : > { %12969 = vmatpush3.bf16.msra.mxu1 %v13666_v59  ;;  %12920 = vmatprep.subr.bf16.mxu0 %v13657_v31  ;;  %v2195_v57 = vrot.slane %v2193_v34, 4  ;;  %v2217_v59 = vshrl.u32 %v11388_v21, 16  ;;  %v2226_v18 = vshll.u32 %v14607_v52, 16  ;;  %v2238_v34 = vrot.slane %v2236_v39, 5  ;;  %v11474_v36 = vld [vmem:[%s13933_s20 + $0x18] sm:$0xe] }
  0x83   : > { %12970 = vmatprep.subr.bf16.mxu1 %v13670_v51  ;;  %v2209_v56 = vor.u32 %v2208_v33, %v2204_v41  ;;  %v11490_v15 = vrot.slane %v11474_v36, 9  ;;  %v2974_v33 = vrot.slane %v14610_v17, 5 }
  0x84   : > { %v2199_v0 = vor.u32 %v2198_v27, %v2195_v57  ;;  %v2219_v6 = vrot.slane %v2217_v59, 4  ;;  %v2967_v57 = vrot.slane %v14602_v48, 5  ;;  %v14655_v27 = vld [vmem:[%s13933_s20 + $0x28] sm:$0xf] }
  0x85   : > { %12891 = vmatmul.mubr.bf16.gmra.mxu1 %v13651_v32  ;;  %12921 = vmatpush3.bf16.msra.mxu0 %v13657_v31  ;;  %v14620_v32 = vld [vmem:[%s19052_s1 + $0x1f8] sm:$0xff]   ;;  %v2228_v31 = vrot.slane %v2226_v18, 5  ;;  %v2210_v43 = vrot.slane %v2209_v56, 4  ;;  %v2250_v17 = vshll.u32 %v14655_v27, 16  ;;  %v2254_v39 = vshrl.u32 %v14655_v27, 16 }
  0x86   : > { %12894 = vmatprep.mubr.bf16.mxu1 %v13653_v11  ;;  %12971 = vmatpush3.bf16.msra.mxu1 %v13670_v51  ;;  %v2230_v51 = vshrl.u32 %v14607_v52, 16  ;;  %v2964_v11 = vrot.slane %v11386_v61, 5  ;;  %v2200_v10 = vrot.slane %v2199_v0, 4  ;;  %v2223_v23 = vor.u32 %v2222_v28, %v2219_v6  ;;  %v11394_v0 = vld [vmem:[%s13933_s20 + $0x30] sm:$0xf] }
  0x87   : > { %12972 = vmatprep.subr.bf16.mxu1 %v13671_v35  ;;  %12922 = vmatprep.subr.bf16.mxu0 %v13662_v47  ;;  %v2215_v48 = vsel %vm13974_vm2, %v2210_v43, %v2214_v29  ;;  %v14663_v29 = vld [vmem:[%s13933_s20 + $0x2c] sm:$0x1]  ;;  %v11395_v56 = vld [vmem:[%s13933_s20 + $0x34] sm:$0xf]  ;;  %v2252_v36 = vrot.slane %v2250_v17, 5  ;;  %v2256_v43 = vrot.slane %v2254_v39, 4 }
  0x88   : > { %v2232_v40 = vrot.slane %v2230_v51, 4  ;;  %12843 = vmatmul.mubr.bf16.gmra.mxu0 %v11296_v60  ;;  %v2966_v21 = vrot.slane %v2964_v11, 4  ;;  %v14639_v58 = vsel %vm14326_vm5, %v11489_v14, %v2964_v11  ;;  %v11391_v60 = vld [vmem:[%s13933_s20 + $0x24] sm:$0xf]  ;;  %v2224_v54 = vrot.slane %v2223_v23, 4  ;;  %v13659_v28 = vld [vmem:[%s13933_s20 + $0x90] sm:$0xff]  }
  0x89   : > { %12846 = vmatprep.mubr.bf16.mxu0 %v11297_v45  ;;  %12923 = vmatpush3.bf16.msra.mxu0 %v13662_v47  ;;  %v2971_v47 = vrot.slane %v14607_v52, 5  ;;  %v2244_v51 = vshll.u32 %v11391_v60, 16  ;;  %v2260_v11 = vshll.u32 %v14663_v29, 16  ;;  %v11475_v23 = vld [vmem:[%s13933_s20 + $0x24] sm:$0xe]  ;;  %v2978_v20 = vrot.slane %v14655_v27, 5 }
  0x8a   : > { %12973 = vmatpush3.bf16.msra.mxu1 %v13671_v35  ;;  %v2205_v35 = vsel %vm13974_vm2, %v2200_v10, %v2204_v41  ;;  %v2233_v61 = vor.u32 %v2232_v40, %v2228_v31  ;;  %12924 = vmatprep.subr.bf16.mxu0 %v13667_v49  ;;  %v14651_v45 = vsel %vm14326_vm5, %v2966_v21, %v2967_v57  ;;  %v11396_v10 = vld [vmem:[%s13933_s20 + $0x38] sm:$0x1]  ;;  %v13663_v40 = vld [vmem:[%s13933_s20 + $0x9c] sm:$0xff]   ;;  %v2265_v57 = vshrl.u32 %v11394_v0, 16 }
  0x8b   : > { %13054 = vmatprep.subr.bf16.mxu1 %v14620_v32  ;;  %v14657_v41 = vcombine.low %v2205_v35, %v2215_v48  ;;  %v2229_v4 = vsel %vm13974_vm2, %v2224_v54, %v2228_v31  ;;  %v14669_v52 = vsel %vm14326_vm5, %v11490_v15, %v2971_v47  ;;  %v2973_v18 = vrot.slane %v2971_v47, 4  ;;  %v11476_v47 = vld [vmem:[%s13933_s20 + $0x30] sm:$0xe] }
  0x8c   : > { %v2234_v59 = vrot.slane %v2233_v61, 4  ;;  %v2246_v14 = vrot.slane %v2244_v51, 5  ;;  %v2262_v21 = vrot.slane %v2260_v11, 5  ;;  %v2268_v35 = vshll.u32 %v11394_v0, 16 }
  0x8d   : > { %12895 = vmatmul.mubr.bf16.gmra.mxu1 %v13654_v3  ;;  %v11521_v3 = vcombine.low %v14639_v58, %v14651_v45  ;;  %12925 = vmatpush3.bf16.msra.mxu0 %v13667_v49  ;;  %v14683_v12 = vsel %vm14326_vm5, %v2973_v18, %v2974_v33  ;;  %v2274_v61 = vshll.u32 %v11395_v56, 16  ;;  %v2278_v48 = vshrl.u32 %v11395_v56, 16 }
  0x8e   : > { %12898 = vmatprep.mubr.bf16.mxu1 %v13658_v2  ;;  %v2241_v2 = vshrl.u32 %v11391_v60, 16  ;;  %v2239_v6 = vsel %vm13974_vm2, %v2234_v59, %v2238_v34  ;;  %13006 = vmatprep.subr.bf16.mxu0 %v14647_v53  ;;  %v11522_v34 = vcombine.low %v14669_v52, %v14683_v12  ;;  %v2257_v60 = vor.u32 %v2256_v43, %v2252_v36  ;;  %v11409_v52 = vld [vmem:[%s13933_s20 + $0x6c] sm:$0xf] }
  0x8f   : > { %v14678_v31 = vcombine.low %v2229_v4, %v2239_v6  ;;  %v2284_v54 = vshll.u32 %v11396_v10, 16  ;;  %v2267_v59 = vrot.slane %v2265_v57, 4  ;;  %v2270_v33 = vrot.slane %v2268_v35, 5  ;;  %v14719_v57 = vld [vmem:[%s13933_s20 + $0x44] sm:$0x1] }
  0x90   : > { %v2243_v49 = vrot.slane %v2241_v2, 4  ;;  %12847 = vmatmul.mubr.bf16.gmra.mxu0 %v11298_v25  ;;  %v2276_v4 = vrot.slane %v2274_v61, 5  ;;  %v11491_v24 = vrot.slane %v11475_v23, 9  ;;  %v2258_v25 = vrot.slane %v2257_v60, 4 }
  0x91   : > { %12850 = vmatprep.mubr.bf16.mxu0 %v11299_v22  ;;  %v2280_v18 = vrot.slane %v2278_v48, 4  ;;  %v2286_v2 = vrot.slane %v2284_v54, 5  ;;  %v2271_v30 = vor.u32 %v2270_v33, %v2267_v59  ;;  %v2981_v22 = vrot.slane %v14663_v29, 5  ;;  %v11400_v48 = vld [vmem:[%s13933_s20 + $0x48] sm:$0xf] }
  0x92   : > { %v2247_v15 = vor.u32 %v2246_v14, %v2243_v49  ;;  %v11492_v0 = vrot.slane %v11476_v47, 9  ;;  %v2263_v51 = vsel %vm13974_vm2, %v2258_v25, %v2262_v21  ;;  %v2985_v39 = vrot.slane %v11395_v56, 5  ;;  %v13664_v49 = vld [vmem:[%s13933_s20 + $0xa8] sm:$0xff]   ;;  %v11398_v14 = vld [vmem:[%s13933_s20 + $0x40] sm:$0xf] }
  0x93   : > { %v2281_v17 = vor.u32 %v2280_v18, %v2276_v4  ;;  %v14710_v27 = vsel %vm14326_vm5, %v11491_v24, %v2978_v20  ;;  %v2980_v29 = vrot.slane %v2978_v20, 4  ;;  %v2988_v21 = vrot.slane %v11396_v10, 5  ;;  %v14732_v54 = vld [vmem:[%s13933_s20 + $0x4c] sm:$0xf]  ;;  %v14750_v59 = vld [vmem:[%s13933_s20 + $0x50] sm:$0x1] }
  0x94   : > { %v2248_v42 = vrot.slane %v2247_v15, 4  ;;  %v14716_v23 = vsel %vm14326_vm5, %v11492_v0, %v2985_v39  ;;  %v2987_v56 = vrot.slane %v2985_v39, 4  ;;  %v2298_v10 = vshll.u32 %v11398_v14, 16  ;;  %v11477_v20 = vld [vmem:[%s13933_s20 + $0x3c] sm:$0xe] }
  0x95   : > { %12899 = vmatmul.mubr.bf16.gmra.mxu1 %v13659_v28  ;;  %v11397_v28 = vld [vmem:[%s13933_s20 + $0x3c] sm:$0xf]  ;;  %v2282_v43 = vrot.slane %v2281_v17, 4  ;;  %v14728_v61 = vsel %vm14326_vm5, %v2980_v29, %v2981_v22  ;;  %v2308_v24 = vshll.u32 %v14719_v57, 16  ;;  %v2316_v18 = vshll.u32 %v11400_v48, 16  ;;  %v13669_v22 = vld [vmem:[%s13933_s20 + $0xc0] sm:$0xff]  }
  0x96   : > { %12902 = vmatprep.mubr.bf16.mxu1 %v13663_v40  ;;  %v2253_v6 = vsel %vm13974_vm2, %v2248_v42, %v2252_v36  ;;  %v2272_v40 = vrot.slane %v2271_v30, 4  ;;  %v13668_v36 = vld [vmem:[%s13933_s20 + $0xb4] sm:$0xff]   ;;  %v2289_v15 = vshrl.u32 %v11397_v28, 16  ;;  %v2292_v60 = vshll.u32 %v11397_v28, 16  ;;  %v11478_v29 = vld [vmem:[%s13933_s20 + $0x48] sm:$0xe] }
  0x97   : > { %v14706_v11 = vcombine.low %v2253_v6, %v2263_v51  ;;  %v2287_v44 = vsel %vm13974_vm2, %v2282_v43, %v2286_v2  ;;  %v11523_v46 = vcombine.low %v14710_v27, %v14728_v61  ;;  %v2300_v33 = vrot.slane %v2298_v10, 5  ;;  %v13680_v27 = vld [vmem:[%s19052_s1 + $0x1e8] sm:$0xff]   ;;  %v13673_v61 = vld [vmem:[%s19052_s1 + $0x1b0] sm:$0xff]  }
  0x98   : > { %12851 = vmatmul.mubr.bf16.gmra.mxu0 %v11300_v1  ;;  %v2277_v35 = vsel %vm13974_vm2, %v2272_v40, %v2276_v4  ;;  %v14743_v1 = vsel %vm14326_vm5, %v2987_v56, %v2988_v21  ;;  %v2291_v63 = vrot.slane %v2289_v15, 4  ;;  %v2302_v4 = vshrl.u32 %v11398_v14, 16 }
  0x99   : > { %12854 = vmatprep.mubr.bf16.mxu0 %v11301_v19  ;;  %v14745_v47 = vcombine.low %v2277_v35, %v2287_v44  ;;  %v11524_v5 = vcombine.low %v14716_v23, %v14743_v1  ;;  %v2294_v19 = vrot.slane %v2292_v60, 5  ;;  %v2313_v42 = vshrl.u32 %v11400_v48, 16  ;;  %v11403_v44 = vld [vmem:[%s13933_s20 + $0x54] sm:$0xf] }
  0x9a   : > { %v2322_v2 = vshll.u32 %v14732_v54, 16  ;;  %v2326_v30 = vshrl.u32 %v14732_v54, 16  ;;  %v2304_v0 = vrot.slane %v2302_v4, 4  ;;  %v2310_v6 = vrot.slane %v2308_v24, 5 }
  0x9b   : > { %v2295_v25 = vor.u32 %v2294_v19, %v2291_v63  ;;  %v2315_v51 = vrot.slane %v2313_v42, 4  ;;  %v2332_v17 = vshll.u32 %v14750_v59, 16  ;;  %v2318_v28 = vrot.slane %v2316_v18, 5  ;;  %v14777_v63 = vld [vmem:[%s13933_s20 + $0x5c] sm:$0x1] }
  0x9c   : > { %v2328_v40 = vrot.slane %v2326_v30, 4  ;;  %v11493_v56 = vrot.slane %v11477_v20, 9  ;;  %v2992_v21 = vrot.slane %v11398_v14, 5  ;;  %v2995_v48 = vrot.slane %v14719_v57, 5 }
  0x9d   : > { %12903 = vmatmul.mubr.bf16.gmra.mxu1 %v13664_v49  ;;  %v2296_v39 = vrot.slane %v2295_v25, 4  ;;  %v2324_v49 = vrot.slane %v2322_v2, 5  ;;  %v2334_v43 = vrot.slane %v2332_v17, 5  ;;  %v2319_v15 = vor.u32 %v2318_v28, %v2315_v51  ;;  %v14792_v25 = vld [vmem:[%s13933_s20 + $0x64] sm:$0xf] }
  0x9e   : > { %12906 = vmatprep.mubr.bf16.mxu1 %v13668_v36  ;;  %v2305_v36 = vor.u32 %v2304_v0, %v2300_v33  ;;  %v14771_v14 = vsel %vm14326_vm5, %v11493_v56, %v2992_v21  ;;  %v2994_v38 = vrot.slane %v2992_v21, 4  ;;  %v11494_v9 = vrot.slane %v11478_v29, 9  ;;  %v14816_v17 = vld [vmem:[%s13933_s20 + $0x68] sm:$0x1]  ;;  %v11479_v21 = vld [vmem:[%s13933_s20 + $0x54] sm:$0xe] }
  0x9f   : > { %v2301_v35 = vsel %vm13974_vm2, %v2296_v39, %v2300_v33  ;;  %v2329_v60 = vor.u32 %v2328_v40, %v2324_v49  ;;  %v2320_v19 = vrot.slane %v2319_v15, 4  ;;  %v2999_v33 = vrot.slane %v14732_v54, 5  ;;  %v13678_v40 = vld [vmem:[%s19052_s1 + $0x1f0] sm:$0xff]  }
  0xa0   : > { %12855 = vmatmul.mubr.bf16.gmra.mxu0 %v11302_v8  ;;  %v2306_v10 = vrot.slane %v2305_v36, 4  ;;  %v14774_v8 = vld [vmem:[%s13933_s20 + $0x58] sm:$0xf]  ;;  %v3002_v55 = vrot.slane %v14750_v59, 5  ;;  %v14789_v4 = vsel %vm14326_vm5, %v2994_v38, %v2995_v48  ;;  %v2337_v24 = vshrl.u32 %v11403_v44, 16 }
  0xa1   : > { %12858 = vmatprep.mubr.bf16.mxu0 %v11303_v16  ;;  %v2330_v57 = vrot.slane %v2329_v60, 4  ;;  %v2340_v42 = vshll.u32 %v11403_v44, 16  ;;  %v2325_v59 = vsel %vm13974_vm2, %v2320_v19, %v2324_v49  ;;  %v11525_v45 = vcombine.low %v14771_v14, %v14789_v4  ;;  %v13683_v14 = vld [vmem:[%s19052_s1 + $0x1d8] sm:$0xff]   ;;  %v13675_v4 = vld [vmem:[%s19052_s1 + $0x1a0] sm:$0xff]  }
  0xa2   : > { %v2311_v16 = vsel %vm13974_vm2, %v2306_v10, %v2310_v6  ;;  %v14806_v18 = vsel %vm14326_vm5, %v11494_v9, %v2999_v33  ;;  %v3001_v2 = vrot.slane %v2999_v33, 4  ;;  %v2339_v30 = vrot.slane %v2337_v24, 4 }
  0xa3   : > { %v14794_v54 = vcombine.low %v2301_v35, %v2311_v16  ;;  %v2335_v58 = vsel %vm13974_vm2, %v2330_v57, %v2334_v43  ;;  %v2342_v20 = vrot.slane %v2340_v42, 5  ;;  %v2350_v0 = vshrl.u32 %v14774_v8, 16  ;;  %v11480_v35 = vld [vmem:[%s13933_s20 + $0x60] sm:$0xe] }
  0xa4   : > { %v2356_v6 = vshll.u32 %v14777_v63, 16  ;;  %v14813_v51 = vsel %vm14326_vm5, %v3001_v2, %v3002_v55  ;;  %v2361_v39 = vshrl.u32 %v11406_v13, 16  ;;  %v2364_v28 = vshll.u32 %v11406_v13, 16  ;;  %v14845_v55 = vld [vmem:[%s13933_s20 + $0x70] sm:$0xf] }
  0xa5   : > { %12907 = vmatmul.mubr.bf16.gmra.mxu1 %v13669_v22  ;;  %v2346_v22 = vshll.u32 %v14774_v8, 16  ;;  %v2370_v49 = vshll.u32 %v14792_v25, 16  ;;  %v11526_v29 = vcombine.low %v14806_v18, %v14813_v51  ;;  %v2343_v36 = vor.u32 %v2342_v20, %v2339_v30  ;;  %v14858_v13 = vld [vmem:[%s13933_s20 + $0x74] sm:$0x1] }
  0xa6   : > { %12974 = vmatprep.mubr.bf16.mxu1 %v11521_v3  ;;  %v14802_v3 = vcombine.low %v2325_v59, %v2335_v58  ;;  %v2352_v56 = vrot.slane %v2350_v0, 4  ;;  %v2358_v15 = vrot.slane %v2356_v6, 5  ;;  %v2363_v60 = vrot.slane %v2361_v39, 4 }
  0xa7   : > { %v2348_v43 = vrot.slane %v2346_v22, 5  ;;  %v2366_v48 = vrot.slane %v2364_v28, 5  ;;  %v2372_v44 = vrot.slane %v2370_v49, 5  ;;  %v2344_v62 = vrot.slane %v2343_v36, 4  ;;  %v11412_v22 = vld [vmem:[%s13933_s20 + $0x78] sm:$0xf] }
  0xa8   : > { %12859 = vmatmul.mubr.bf16.gmra.mxu0 %v11304_v26  ;;  %v2374_v26 = vshrl.u32 %v14792_v25, 16  ;;  %v2380_v10 = vshll.u32 %v14816_v17, 16  ;;  %v11495_v38 = vrot.slane %v11479_v21, 9  ;;  %v3006_v9 = vrot.slane %v14774_v8, 5  ;;  %v14904_v21 = vld [vmem:[%s13933_s20 + $0x80] sm:$0x1] }
  0xa9   : > { %12926 = vmatprep.mubr.bf16.mxu0 %v14657_v41  ;;  %v2353_v7 = vor.u32 %v2352_v56, %v2348_v43  ;;  %v2367_v41 = vor.u32 %v2366_v48, %v2363_v60  ;;  %v3009_v19 = vrot.slane %v14777_v63, 5  ;;  %v2349_v12 = vsel %vm13974_vm2, %v2344_v62, %v2348_v43  ;;  %v14891_v43 = vld [vmem:[%s13933_s20 + $0x7c] sm:$0xf] }
  0xaa   : > { %v2376_v57 = vrot.slane %v2374_v26, 4  ;;  %v2382_v33 = vrot.slane %v2380_v10, 5  ;;  %v3008_v8 = vrot.slane %v3006_v9, 4  ;;  %v11496_v63 = vrot.slane %v11480_v35, 9 }
  0xab   : > { %v3013_v42 = vrot.slane %v14792_v25, 5  ;;  %v3016_v59 = vrot.slane %v14816_v17, 5  ;;  %v2385_v20 = vshrl.u32 %v11409_v52, 16  ;;  %v13674_v25 = vld [vmem:[%s19052_s1 + $0x1a8] sm:$0xff]   ;;  %v2388_v49 = vshll.u32 %v11409_v52, 16 }
  0xac   : > { %v2377_v24 = vor.u32 %v2376_v57, %v2372_v44  ;;  %v14870_v30 = vsel %vm14326_vm5, %v3008_v8, %v3009_v19  ;;  %v2398_v36 = vshrl.u32 %v14845_v55, 16  ;;  %v2409_v35 = vshrl.u32 %v11412_v22, 16  ;;  %v13684_v57 = vld [vmem:[%s19052_s1 + $0x1d0] sm:$0xff]  }
  0xad   : > { %12975 = vmatmul.mubr.bf16.vlgmr.msra.gmra.mxu1 %v11522_v34  ;;  %v2354_v34 = vrot.slane %v2353_v7, 4  ;;  %v14881_v17 = vsel %vm14326_vm5, %v11496_v63, %v3013_v42  ;;  %v3015_v39 = vrot.slane %v3013_v42, 4  ;;  %v2387_v28 = vrot.slane %v2385_v20, 4 }
  0xae   : > { %12978 = vmatprep.mubr.bf16.mxu1 %v11523_v46  ;;  %13055 = vmatpush3.bf16.msra.mxu1 %v14620_v32  ;;  %v2368_v46 = vrot.slane %v2367_v41, 4  ;;  %v14855_v32 = vsel %vm14326_vm5, %v11495_v38, %v3006_v9  ;;  %v2378_v0 = vrot.slane %v2377_v24, 4  ;;  %v2390_v1 = vrot.slane %v2388_v49, 5  ;;  %v11482_v38 = vld [vmem:[%s13933_s20 + $0x78] sm:$0xe] }
  0xaf   : > { %13056 = vmatprep.subr.bf16.mxu1 %v13678_v40  ;;  %v2359_v16 = vsel %vm13974_vm2, %v2354_v34, %v2358_v15  ;;  %v11527_v6 = vcombine.low %v14855_v32, %v14870_v30  ;;  %v11481_v15 = vld [vmem:[%s13933_s20 + $0x6c] sm:$0xe]  ;;  %v2400_v48 = vrot.slane %v2398_v36, 4  ;;  %v2411_v62 = vrot.slane %v2409_v35, 4  ;;  %v11415_v34 = vld [vmem:[%s13933_s20 + $0x84] sm:$0xf] }
  0xb0   : > { %v14864_v58 = vcombine.low %v2349_v12, %v2359_v16  ;;  %v2373_v2 = vsel %vm13974_vm2, %v2368_v46, %v2372_v44  ;;  %12927 = vmatmul.mubr.bf16.vlgmr.msra.gmra.mxu0 %v14678_v31  ;;  %v13681_v31 = vld [vmem:[%s19052_s1 + $0x1e0] sm:$0xff]   ;;  %v2383_v56 = vsel %vm13974_vm2, %v2378_v0, %v2382_v33  ;;  %v2412_v7 = vshll.u32 %v11412_v22, 16  ;;  %v14959_v0 = vld [vmem:[%s13933_s20 + $0x8c] sm:$0x1] }
  0xb1   : > { %13007 = vmatpush3.bf16.msra.mxu0 %v14647_v53  ;;  %12930 = vmatprep.mubr.bf16.mxu0 %v14706_v11  ;;  %v14900_v53 = vsel %vm14326_vm5, %v3015_v39, %v3016_v59  ;;  %v2404_v11 = vshll.u32 %v14858_v13, 16  ;;  %v14910_v60 = vcombine.low %v2373_v2, %v2383_v56  ;;  %v2418_v26 = vshll.u32 %v14891_v43, 16 }
  0xb2   : > { %13057 = vmatpush3.bf16.msra.mxu1 %v13678_v40  ;;  %v2394_v40 = vshll.u32 %v14845_v55, 16  ;;  %13008 = vmatprep.subr.bf16.mxu0 %v13673_v61  ;;  %v11528_v23 = vcombine.low %v14881_v17, %v14900_v53  ;;  %v2422_v10 = vshrl.u32 %v14891_v43, 16  ;;  %v2428_v41 = vshll.u32 %v14904_v21, 16 }
  0xb3   : > { %13058 = vmatprep.subr.bf16.mxu1 %v13680_v27  ;;  %v2406_v44 = vrot.slane %v2404_v11, 5  ;;  %v2414_v19 = vrot.slane %v2412_v7, 5  ;;  %v11497_v52 = vrot.slane %v11481_v15, 9  ;;  %v3020_v12 = vrot.slane %v14845_v55, 5 }
  0xb4   : > { %v2430_v46 = vrot.slane %v2428_v41, 5  ;;  %v3023_v59 = vrot.slane %v14858_v13, 5  ;;  %v3027_v22 = vrot.slane %v14891_v43, 5  ;;  %v3030_v13 = vrot.slane %v14904_v21, 5  ;;  %v13679_v21 = vld [vmem:[%s19052_s1 + $0x190] sm:$0xff]  }
  0xb5   : > { %12979 = vmatmul.mubr.bf16.gmra.mxu1 %v11524_v5  ;;  %v2396_v5 = vrot.slane %v2394_v40, 5  ;;  %13009 = vmatpush3.bf16.msra.mxu0 %v13673_v61  ;;  %v2424_v61 = vrot.slane %v2422_v10, 4  ;;  %v2415_v63 = vor.u32 %v2414_v19, %v2411_v62  ;;  %v14932_v16 = vsel %vm14326_vm5, %v11497_v52, %v3020_v12  ;;  %v13686_v40 = vld [vmem:[%s19052_s1 + $0x1c8] sm:$0xff]  }
  0xb6   : > { %12982 = vmatprep.mubr.bf16.mxu1 %v11525_v45  ;;  %13059 = vmatpush3.bf16.msra.mxu1 %v13680_v27  ;;  %v2391_v45 = vor.u32 %v2390_v1, %v2387_v28  ;;  %v2420_v27 = vrot.slane %v2418_v26, 5  ;;  %v3022_v55 = vrot.slane %v3020_v12, 4  ;;  %v2433_v39 = vshrl.u32 %v11415_v34, 16  ;;  %v13687_v26 = vld [vmem:[%s19052_s1 + $0x1c0] sm:$0xff]  }
  0xb7   : > { %13060 = vmatprep.subr.bf16.mxu1 %v13681_v31  ;;  %13010 = vmatprep.subr.bf16.mxu0 %v13674_v25  ;;  %v2401_v9 = vor.u32 %v2400_v48, %v2396_v5  ;;  %v2416_v20 = vrot.slane %v2415_v63, 4  ;;  %v3029_v30 = vrot.slane %v3027_v22, 4  ;;  %v2436_v56 = vshll.u32 %v11415_v34, 16  ;;  %v14990_v48 = vld [vmem:[%s13933_s20 + $0x98] sm:$0x1] }
  0xb8   : > { %v2392_v33 = vrot.slane %v2391_v45, 4  ;;  %12931 = vmatmul.mubr.bf16.gmra.mxu0 %v14745_v47  ;;  %v2425_v42 = vor.u32 %v2424_v61, %v2420_v27  ;;  %v11498_v47 = vrot.slane %v11482_v38, 9  ;;  %v2435_v43 = vrot.slane %v2433_v39, 4  ;;  %v11484_v45 = vld [vmem:[%s13933_s20 + $0x90] sm:$0xe] }
  0xb9   : > { %v2402_v8 = vrot.slane %v2401_v9, 4  ;;  %12934 = vmatprep.mubr.bf16.mxu0 %v14794_v54  ;;  %13011 = vmatpush3.bf16.msra.mxu0 %v13674_v25  ;;  %v13676_v54 = vld [vmem:[%s19052_s1 + $0x198] sm:$0xff]   ;;  %v14949_v25 = vld [vmem:[%s13933_s20 + $0x88] sm:$0xf]  ;;  %v2421_v28 = vsel %vm13974_vm2, %v2416_v20, %v2420_v27  ;;  %v14985_v15 = vsel %vm14326_vm5, %v3029_v30, %v3030_v13  ;;  %v2438_v7 = vrot.slane %v2436_v56, 5 }
  0xba   : > { %13061 = vmatpush3.bf16.msra.mxu1 %v13681_v31  ;;  %v2397_v24 = vsel %vm13974_vm2, %v2392_v33, %v2396_v5  ;;  %13012 = vmatprep.subr.bf16.mxu0 %v13675_v4  ;;  %v2426_v51 = vrot.slane %v2425_v42, 4  ;;  %v11418_v31 = vld [vmem:[%s13933_s20 + $0x90] sm:$0xf]  ;;  %v14967_v32 = vsel %vm14326_vm5, %v11498_v47, %v3027_v22  ;;  %v2442_v11 = vshll.u32 %v14949_v25, 16  ;;  %v11421_v61 = vld [vmem:[%s13933_s20 + $0x9c] sm:$0xf] }
  0xbb   : > { %13062 = vmatprep.subr.bf16.mxu1 %v13683_v14  ;;  %v2407_v2 = vsel %vm13974_vm2, %v2402_v8, %v2406_v44  ;;  %v2446_v1 = vshrl.u32 %v14949_v25, 16  ;;  %v2452_v5 = vshll.u32 %v14959_v0, 16  ;;  %v11483_v44 = vld [vmem:[%s13933_s20 + $0x84] sm:$0xe]  ;;  %v11530_v62 = vcombine.low %v14967_v32, %v14985_v15  ;;  %v15030_v39 = vld [vmem:[%s13933_s20 + $0xa4] sm:$0x1] }
  0xbc   : > { %v14954_v18 = vcombine.low %v2397_v24, %v2407_v2  ;;  %v2431_v36 = vsel %vm13974_vm2, %v2426_v51, %v2430_v46  ;;  %v2460_v38 = vshll.u32 %v11418_v31, 16  ;;  %v2439_v19 = vor.u32 %v2438_v7, %v2435_v43  ;;  %v15014_v24 = vld [vmem:[%s13933_s20 + $0xa0] sm:$0xf]  ;;  %v11485_v7 = vld [vmem:[%s13933_s20 + $0x9c] sm:$0xe] }
  0xbd   : > { %12983 = vmatmul.mubr.bf16.gmra.mxu1 %v11526_v29  ;;  %v3024_v29 = vsel %vm14326_vm5, %v3022_v55, %v3023_v59  ;;  %13013 = vmatpush3.bf16.msra.mxu0 %v13675_v4  ;;  %v14981_v35 = vcombine.low %v2421_v28, %v2431_v36  ;;  %v2457_v4 = vshrl.u32 %v11418_v31, 16  ;;  %v2448_v10 = vrot.slane %v2446_v1, 4  ;;  %v11486_v15 = vld [vmem:[%s13933_s20 + $0xa8] sm:$0xe] }
  0xbe   : > { %12986 = vmatprep.mubr.bf16.mxu1 %v11527_v6  ;;  %13063 = vmatpush3.bf16.msra.mxu1 %v13683_v14  ;;  %v11529_v49 = vcombine.low %v14932_v16, %v3024_v29  ;;  %v14970_v6 = vld [vmem:[%s13933_s20 + $0x94] sm:$0xf]  ;;  %v2444_v14 = vrot.slane %v2442_v11, 5  ;;  %v2454_v41 = vrot.slane %v2452_v5, 5  ;;  %v2476_v34 = vshll.u32 %v14990_v48, 16 }
  0xbf   : > { %13064 = vmatprep.subr.bf16.mxu1 %v13684_v57  ;;  %13014 = vmatprep.subr.bf16.mxu0 %v13676_v54  ;;  %v2466_v9 = vshll.u32 %v14970_v6, 16  ;;  %v2459_v52 = vrot.slane %v2457_v4, 4  ;;  %v2470_v12 = vshrl.u32 %v14970_v6, 16  ;;  %v11499_v27 = vrot.slane %v11483_v44, 9  ;;  %v15043_v11 = vld [vmem:[%s13933_s20 + $0xac] sm:$0xf] }
  0xc0   : > { %12935 = vmatmul.mubr.bf16.gmra.mxu0 %v14802_v3  ;;  %v2449_v3 = vor.u32 %v2448_v10, %v2444_v14  ;;  %v2440_v46 = vrot.slane %v2439_v19, 4  ;;  %v2478_v63 = vrot.slane %v2476_v34, 5  ;;  %v3034_v16 = vrot.slane %v14949_v25, 5  ;;  %v13685_v25 = vld [vmem:[%s19052_s1 + $0x180] sm:$0xff]   ;;  %v15060_v44 = vld [vmem:[%s13933_s20 + $0xb0] sm:$0x1] }
  0xc1   : > { %12938 = vmatprep.mubr.bf16.mxu0 %v14864_v58  ;;  %13015 = vmatpush3.bf16.msra.mxu0 %v13676_v54  ;;  %v2468_v33 = vrot.slane %v2466_v9, 5  ;;  %v13682_v58 = vld [vmem:[%s19052_s1 + $0x188] sm:$0xff]   ;;  %v2472_v8 = vrot.slane %v2470_v12, 4  ;;  %v11500_v55 = vrot.slane %v11484_v45, 9  ;;  %v3041_v22 = vrot.slane %v14970_v6, 5 }
  0xc2   : > { %13065 = vmatpush3.bf16.msra.mxu1 %v13684_v57  ;;  %v2462_v57 = vrot.slane %v2460_v38, 5  ;;  %13016 = vmatprep.subr.bf16.mxu0 %v13679_v21  ;;  %v2450_v17 = vrot.slane %v2449_v3, 4  ;;  %v2445_v42 = vsel %vm13974_vm2, %v2440_v46, %v2444_v14  ;;  %v3035_v47 = vsel %vm14326_vm5, %v11499_v27, %v3034_v16 }
  0xc3   : > { %13066 = vmatprep.subr.bf16.mxu1 %v13686_v40  ;;  %v2473_v59 = vor.u32 %v2472_v8, %v2468_v33  ;;  %v3036_v2 = vrot.slane %v3034_v16, 4  ;;  %v3044_v13 = vrot.slane %v14990_v48, 5  ;;  %v2481_v31 = vshrl.u32 %v11421_v61, 16 }
  0xc4   : > { %v2463_v53 = vor.u32 %v2462_v57, %v2459_v52  ;;  %v2455_v20 = vsel %vm13974_vm2, %v2450_v17, %v2454_v41  ;;  %v3042_v30 = vsel %vm14326_vm5, %v11500_v55, %v3041_v22  ;;  %v3043_v6 = vrot.slane %v3041_v22, 4 }
  0xc5   : > { %12987 = vmatmul.mubr.bf16.gmra.mxu1 %v11528_v23  ;;  %v3037_v23 = vrot.slane %v14959_v0, 5  ;;  %13017 = vmatpush3.bf16.msra.mxu0 %v13679_v21  ;;  %v11459_v51 = vcombine.low %v2445_v42, %v2455_v20  ;;  %v2474_v29 = vrot.slane %v2473_v59, 4  ;;  %v2483_v43 = vrot.slane %v2481_v31, 4  ;;  %v15048_v21 = vld [vmem:[%s19052_s1 + $0x238] sm:$0xff]  }
  0xc6   : > { %12990 = vmatprep.mubr.bf16.mxu1 %v11529_v49  ;;  %13067 = vmatpush3.bf16.msra.mxu1 %v13686_v40  ;;  %v2464_v54 = vrot.slane %v2463_v53, 4  ;;  %v11424_v40 = vld [vmem:[%s13933_s20 + $0xa8] sm:$0xf]  ;;  %v2484_v56 = vshll.u32 %v11421_v61, 16  ;;  %v3045_v1 = vsel %vm14326_vm5, %v3043_v6, %v3044_v13  ;;  %v2494_v5 = vshrl.u32 %v15014_v24, 16 }
  0xc7   : > { %13068 = vmatprep.subr.bf16.mxu1 %v13687_v26  ;;  %13018 = vmatprep.subr.bf16.mxu0 %v13682_v58  ;;  %v3038_v0 = vsel %vm14326_vm5, %v3036_v2, %v3037_v23  ;;  %v2479_v36 = vsel %vm13974_vm2, %v2474_v29, %v2478_v63  ;;  %v2500_v48 = vshll.u32 %v15030_v39, 16  ;;  %v11532_v14 = vcombine.low %v3042_v30, %v3045_v1  ;;  %v15082_v20 = vld [vmem:[%s13933_s20 + $0xbc] sm:$0x1]  ;;  %v15088_v29 = vld [vmem:[%s13933_s20 + $0xc4] sm:$0xf] }
  0xc8   : > { %12939 = vmatmul.mubr.bf16.gmra.mxu0 %v14910_v60  ;;  %v2469_v28 = vsel %vm13974_vm2, %v2464_v54, %v2468_v33  ;;  %v11531_v49 = vcombine.low %v3035_v47, %v3038_v0  ;;  %v2490_v60 = vshll.u32 %v15014_v24, 16  ;;  %v2486_v4 = vrot.slane %v2484_v56, 5  ;;  %v11427_v33 = vld [vmem:[%s13933_s20 + $0xb4] sm:$0xf] }
  0xc9   : > { %12942 = vmatprep.mubr.bf16.mxu0 %v14954_v18  ;;  %13019 = vmatpush3.bf16.msra.mxu0 %v13682_v58  ;;  %v15053_v18 = vcombine.low %v2469_v28, %v2479_v36  ;;  %v2505_v32 = vshrl.u32 %v11424_v40, 16  ;;  %v2508_v10 = vshll.u32 %v11424_v40, 16  ;;  %v2514_v41 = vshll.u32 %v15043_v11, 16 }
  0xca   : > { %13069 = vmatpush3.bf16.msra.mxu1 %v13687_v26  ;;  %13020 = vmatprep.subr.bf16.mxu0 %v13685_v25  ;;  %v2492_v45 = vrot.slane %v2490_v60, 5  ;;  %v2502_v26 = vrot.slane %v2500_v48, 5  ;;  %v2487_v38 = vor.u32 %v2486_v4, %v2483_v43  ;;  %v2518_v19 = vshrl.u32 %v15043_v11, 16  ;;  %v11487_v43 = vld [vmem:[%s13933_s20 + $0xb4] sm:$0xe] }
  0xcb   : > { %v2507_v9 = vrot.slane %v2505_v32, 4  ;;  %v2524_v52 = vshll.u32 %v15060_v44, 16  ;;  %v2510_v34 = vrot.slane %v2508_v10, 5  ;;  %v2516_v3 = vrot.slane %v2514_v41, 5  ;;  %v11488_v41 = vld [vmem:[%s13933_s20 + $0xc0] sm:$0xe] }
  0xcc   : > { %v11501_v57 = vrot.slane %v11485_v7, 9  ;;  %v2488_v27 = vrot.slane %v2487_v38, 4  ;;  %v2520_v61 = vrot.slane %v2518_v19, 4  ;;  %v3048_v46 = vrot.slane %v15014_v24, 5  ;;  %v11428_v24 = vld [vmem:[%s13933_s20 + $0xb8] sm:$0xf] }
  0xcd   : > { %12991 = vmatmul.mubr.bf16.gmra.mxu1 %v11530_v62  ;;  %v2496_v62 = vrot.slane %v2494_v5, 4  ;;  %13021 = vmatpush3.bf16.msra.mxu0 %v13685_v25  ;;  %v2526_v58 = vrot.slane %v2524_v52, 5  ;;  %v2511_v63 = vor.u32 %v2510_v34, %v2507_v9  ;;  %v3051_v16 = vrot.slane %v15030_v39, 5 }
  0xce   : > { %12994 = vmatprep.mubr.bf16.mxu1 %v11531_v49  ;;  %13102 = vmatprep.subr.bf16.mxu0 %v15048_v21  ;;  %v11502_v17 = vrot.slane %v11486_v15, 9  ;;  %v2493_v53 = vsel %vm13974_vm2, %v2488_v27, %v2492_v45  ;;  %v2521_v23 = vor.u32 %v2520_v61, %v2516_v3  ;;  %v3049_v55 = vsel %vm14326_vm5, %v11501_v57, %v3048_v46  ;;  %v15095_v49 = vld [vmem:[%s13933_s20 + $0xc8] sm:$0x1] }
  0xcf   : > { %v2497_v12 = vor.u32 %v2496_v62, %v2492_v45  ;;  %v3050_v42 = vrot.slane %v3048_v46, 4  ;;  %v2512_v59 = vrot.slane %v2511_v63, 4  ;;  %v3055_v47 = vrot.slane %v15043_v11, 5 }
  0xd0   : > { %12943 = vmatmul.mubr.bf16.gmra.mxu0 %v14981_v35  ;;  %v3058_v2 = vrot.slane %v15060_v44, 5  ;;  %v2522_v22 = vrot.slane %v2521_v23, 4  ;;  %v2529_v25 = vshrl.u32 %v11427_v33, 16  ;;  %v2532_v40 = vshll.u32 %v11427_v33, 16 }
  0xd1   : > { %v2498_v8 = vrot.slane %v2497_v12, 4  ;;  %12946 = vmatprep.mubr.bf16.mxu0 %v11459_v51  ;;  %v3052_v13 = vsel %vm14326_vm5, %v3050_v42, %v3051_v16  ;;  %v11430_v51 = vld [vmem:[%s13933_s20 + $0xc0] sm:$0xf]  ;;  %v2517_v0 = vsel %vm13974_vm2, %v2512_v59, %v2516_v3  ;;  %v3056_v31 = vsel %vm14326_vm5, %v11502_v17, %v3055_v47  ;;  %v11618_v17 = vld [vmem:[%s13933_s20 + $0x1c] sm:$0xf] }
  0xd2   : > { %v11533_v39 = vcombine.low %v3049_v55, %v3052_v13  ;;  %v3057_v28 = vrot.slane %v3055_v47, 4  ;;  %v2527_v30 = vsel %vm13974_vm2, %v2522_v22, %v2526_v58  ;;  %v2531_v6 = vrot.slane %v2529_v25, 4  ;;  %v11617_v58 = vld [vmem:[%s13933_s20 + $0x18] sm:$0xf] }
  0xd3   : > { %v2503_v35 = vsel %vm13974_vm2, %v2498_v8, %v2502_v26  ;;  %v2538_v36 = vshll.u32 %v11428_v24, 16  ;;  %v11462_v56 = vcombine.low %v2517_v0, %v2527_v30  ;;  %v2542_v11 = vshrl.u32 %v11428_v24, 16 }
  0xd4   : > { %v11461_v54 = vcombine.low %v2493_v53, %v2503_v35  ;;  %v3059_v60 = vsel %vm14326_vm5, %v3057_v28, %v3058_v2  ;;  %v2548_v1 = vshll.u32 %v15082_v20, 16  ;;  %v2534_v48 = vrot.slane %v2532_v40, 5  ;;  %v11619_v53 = vld [vmem:[%s13933_s20 + $0x20] sm:$0x1]  ;;  %v11620_v35 = vld [vmem:[%s13933_s20 + $0x24] sm:$0xf] }
  0xd5   : > { %12995 = vmatmul.mubr.bf16.gmra.mxu1 %v11532_v14  ;;  %v11534_v5 = vcombine.low %v3056_v31, %v3059_v60  ;;  %v2540_v44 = vrot.slane %v2538_v36, 5  ;;  %v2553_v7 = vshrl.u32 %v11430_v51, 16  ;;  %v2544_v14 = vrot.slane %v2542_v11, 4 }
  0xd6   : > { %12998 = vmatprep.mubr.bf16.mxu1 %v11533_v39  ;;  %v2550_v4 = vrot.slane %v2548_v1, 5  ;;  %v2556_v45 = vshll.u32 %v11430_v51, 16  ;;  %v2562_v32 = vshll.u32 %v15088_v29, 16  ;;  %v2535_v15 = vor.u32 %v2534_v48, %v2531_v6  ;;  %v15135_v6 = vld [vmem:[%s13933_s20 + $0x2c] sm:$0x1]  ;;  %v13688_v48 = vld [vmem:[%s13933_s20 + $0x18] sm:$0xff]  }
  0xd7   : > { %v2555_v62 = vrot.slane %v2553_v7, 4  ;;  %v2566_v26 = vshrl.u32 %v15088_v29, 16  ;;  %v2572_v10 = vshll.u32 %v15095_v49, 16  ;;  %v2545_v38 = vor.u32 %v2544_v14, %v2540_v44 }
  0xd8   : > { %12947 = vmatmul.mubr.bf16.gmra.mxu0 %v15053_v18  ;;  %v2558_v9 = vrot.slane %v2556_v45, 5  ;;  %v2564_v19 = vrot.slane %v2562_v32, 5  ;;  %v11503_v18 = vrot.slane %v11487_v43, 9  ;;  %v2536_v52 = vrot.slane %v2535_v15, 4  ;;  %v11623_v45 = vld [vmem:[%s13933_s20 + $0x30] sm:$0xf] }
  0xd9   : > { %12950 = vmatprep.mubr.bf16.mxu0 %v11461_v54  ;;  %v2568_v12 = vrot.slane %v2566_v26, 4  ;;  %v2574_v34 = vrot.slane %v2572_v10, 5  ;;  %v3062_v3 = vrot.slane %v11428_v24, 5  ;;  %v2546_v57 = vrot.slane %v2545_v38, 4  ;;  %v15124_v54 = vld [vmem:[%s13933_s20 + $0x28] sm:$0xf] }
  0xda   : > { %v2559_v33 = vor.u32 %v2558_v9, %v2555_v62  ;;  %v3065_v27 = vrot.slane %v15082_v20, 5  ;;  %v11504_v61 = vrot.slane %v11488_v41, 9  ;;  %v2541_v46 = vsel %vm13974_vm2, %v2536_v52, %v2540_v44  ;;  %v11624_v10 = vld [vmem:[%s13933_s20 + $0x34] sm:$0xf] }
  0xdb   : > { %v2569_v8 = vor.u32 %v2568_v12, %v2564_v19  ;;  %v3063_v63 = vsel %vm14326_vm5, %v11503_v18, %v3062_v3  ;;  %v3064_v16 = vrot.slane %v3062_v3, 4  ;;  %v2551_v23 = vsel %vm13974_vm2, %v2546_v57, %v2550_v4  ;;  %v11626_v3 = vld [vmem:[%s13933_s20 + $0x3c] sm:$0xf] }
  0xdc   : > { %v2560_v55 = vrot.slane %v2559_v33, 4  ;;  %v3069_v42 = vrot.slane %v15088_v29, 5  ;;  %v3072_v24 = vrot.slane %v15095_v49, 5  ;;  %v11463_v59 = vcombine.low %v2541_v46, %v2551_v23 }
  0xdd   : > { %12999 = vmatmul.mubr.bf16.gmra.mxu1 %v11534_v5  ;;  %v2570_v47 = vrot.slane %v2569_v8, 4  ;;  %v3066_v2 = vsel %vm14326_vm5, %v3064_v16, %v3065_v27  ;;  %v3832_v20 = vshrl.u32 %v11617_v58, 16  ;;  %v3835_v39 = vshll.u32 %v11617_v58, 16 }
  0xde   : > { %v2565_v22 = vsel %vm13974_vm2, %v2560_v55, %v2564_v19  ;;  %v11535_v13 = vcombine.low %v3063_v63, %v3066_v2  ;;  %v3070_v25 = vsel %vm14326_vm5, %v11504_v61, %v3069_v42  ;;  %v3071_v51 = vrot.slane %v3069_v42, 4  ;;  %v11625_v19 = vld [vmem:[%s13933_s20 + $0x38] sm:$0x1] }
  0xdf   : > { %v2575_v29 = vsel %vm13974_vm2, %v2570_v47, %v2574_v34  ;;  %v3834_v0 = vrot.slane %v3832_v20, 4  ;;  %v3841_v31 = vshll.u32 %v11618_v17, 16  ;;  %v3845_v49 = vshrl.u32 %v11618_v17, 16 }
  0xe0   : > { %12951 = vmatmul.mubr.bf16.gmra.mxu0 %v11462_v56  ;;  %13002 = vmatprep.mubr.bf16.mxu1 %v11535_v13  ;;  %v3073_v28 = vsel %vm14326_vm5, %v3071_v51, %v3072_v24  ;;  %v3851_v30 = vshll.u32 %v11619_v53, 16  ;;  %v3837_v36 = vrot.slane %v3835_v39, 5  ;;  %v3856_v56 = vshrl.u32 %v11620_v35, 16  ;;  %v11627_v13 = vld [vmem:[%s13933_s20 + $0x40] sm:$0xf]  ;;  %v13693_v39 = vld [vmem:[%s19052_s1 + $0x230] sm:$0xff]  }
  0xe1   : > { %12954 = vmatprep.mubr.bf16.mxu0 %v11463_v59  ;;  %v11536_v40 = vcombine.low %v3070_v25, %v3073_v28  ;;  %v3843_v43 = vrot.slane %v3841_v31, 5  ;;  %v11464_v60 = vcombine.low %v2565_v22, %v2575_v29  ;;  %v3847_v11 = vrot.slane %v3845_v49, 4  ;;  %v15164_v31 = vld [vmem:[%s13933_s20 + $0x44] sm:$0x1] }
  0xe2   : > { %v3859_v1 = vshll.u32 %v11620_v35, 16  ;;  %v3865_v5 = vshll.u32 %v15124_v54, 16  ;;  %v3838_v44 = vor.u32 %v3837_v36, %v3834_v0  ;;  %v3858_v7 = vrot.slane %v3856_v56, 4  ;;  %v13689_v35 = vld [vmem:[%s13933_s20 + $0x24] sm:$0xff]   ;;  %v13691_v0 = vld [vmem:[%s13933_s20 + $0x30] sm:$0xff]  }
  0xe3   : > { %v3869_v14 = vshrl.u32 %v15124_v54, 16  ;;  %v3875_v4 = vshll.u32 %v15135_v6, 16  ;;  %v3848_v32 = vor.u32 %v3847_v11, %v3843_v43  ;;  %v3853_v15 = vrot.slane %v3851_v30, 5 }
  0xe4   : > { %v3861_v62 = vrot.slane %v3859_v1, 5  ;;  %v3867_v26 = vrot.slane %v3865_v5, 5  ;;  %v3839_v41 = vrot.slane %v3838_v44, 4  ;;  %v3880_v12 = vshrl.u32 %v11623_v45, 16 }
  0xe5   : > { %13003 = vmatmul.mubr.bf16.gmra.mxu1 %v11536_v40  ;;  %v3871_v38 = vrot.slane %v3869_v14, 4  ;;  %v3877_v9 = vrot.slane %v3875_v4, 5  ;;  %v3849_v18 = vrot.slane %v3848_v32, 4  ;;  %v3883_v34 = vshll.u32 %v11623_v45, 16 }
  0xe6   : > { %v3862_v52 = vor.u32 %v3861_v62, %v3858_v7  ;;  %v3844_v33 = vsel %vm13974_vm2, %v3839_v41, %v3843_v43  ;;  %v3889_v61 = vshll.u32 %v11624_v10, 16  ;;  %v3893_v58 = vshrl.u32 %v11624_v10, 16  ;;  %v11630_v7 = vld [vmem:[%s13933_s20 + $0x4c] sm:$0xf]  ;;  %v11631_v62 = vld [vmem:[%s13933_s20 + $0x50] sm:$0x1] }
  0xe7   : > { %v3872_v27 = vor.u32 %v3871_v38, %v3867_v26  ;;  %v3854_v8 = vsel %vm13974_vm2, %v3849_v18, %v3853_v15  ;;  %v3882_v16 = vrot.slane %v3880_v12, 4  ;;  %v3885_v17 = vrot.slane %v3883_v34, 5 }
  0xe8   : > { %12955 = vmatmul.mubr.bf16.gmra.mxu0 %v11464_v60  ;;  %v3863_v63 = vrot.slane %v3862_v52, 4  ;;  %v11681_v23 = vcombine.low %v3844_v33, %v3854_v8  ;;  %v3891_v24 = vrot.slane %v3889_v61, 5  ;;  %v3895_v20 = vrot.slane %v3893_v58, 4  ;;  %v11629_v60 = vld [vmem:[%s13933_s20 + $0x48] sm:$0xf] }
  0xe9   : > { %13022 = vmatprep.mubr.bf16.mxu0 %v13688_v48  ;;  %v3873_v42 = vrot.slane %v3872_v27, 4  ;;  %v3886_v2 = vor.u32 %v3885_v17, %v3882_v16  ;;  %v3899_v22 = vshll.u32 %v11625_v19, 16  ;;  %v3904_v28 = vshrl.u32 %v11626_v3, 16  ;;  %v11632_v58 = vld [vmem:[%s13933_s20 + $0x54] sm:$0xf] }
  0xea   : > { %v3868_v47 = vsel %vm13974_vm2, %v3863_v63, %v3867_v26  ;;  %13070 = vmatprep.mubr.bf16.mxu1 %v11681_v23  ;;  %v3907_v49 = vshll.u32 %v11626_v3, 16  ;;  %v3896_v43 = vor.u32 %v3895_v20, %v3891_v24  ;;  %v3913_v44 = vshll.u32 %v11627_v13, 16  ;;  %v13699_v20 = vld [vmem:[%s19052_s1 + $0x220] sm:$0xff]  }
  0xeb   : > { %v3878_v51 = vsel %vm13974_vm2, %v3873_v42, %v3877_v9  ;;  %v3887_v36 = vrot.slane %v3886_v2, 4  ;;  %v3901_v56 = vrot.slane %v3899_v22, 5  ;;  %v3906_v5 = vrot.slane %v3904_v28, 4  ;;  %v15193_v2 = vld [vmem:[%s13933_s20 + $0x58] sm:$0xf] }
  0xec   : > { %v12736_v57 = vpop.f32.mrf.mxu0  ;;  %v11682_v30 = vcombine.low %v3868_v47, %v3878_v51  ;;  %v3909_v48 = vrot.slane %v3907_v49, 5  ;;  %v3897_v45 = vrot.slane %v3896_v43, 4  ;;  %v3917_v32 = vshrl.u32 %v11627_v13, 16  ;;  %v11635_v43 = vld [vmem:[%s13933_s20 + $0x60] sm:$0xf] }
  0xed   : > { %v12784_v46 = vpop.f32.mrf.mxu1  ;;  %v3892_v4 = vsel %vm13974_vm2, %v3887_v36, %v3891_v24  ;;  %v3923_v15 = vshll.u32 %v15164_v31, 16  ;;  %v3915_v9 = vrot.slane %v3913_v44, 5  ;;  %v3928_v34 = vshrl.u32 %v11629_v60, 16 }
  0xee   : > { %v15149_v53 = vadd.f32 %v12784_v46, %v12736_v57  ;;  %v840_v55 = vpop.f32.mrf.mxu0  ;;  %13071 = vmatmul.mubr.bf16.vlgmr.msra.gmra.mxu1 %v11682_v30  ;;  %v3910_v38 = vor.u32 %v3909_v48, %v3906_v5  ;;  %v3902_v18 = vsel %vm13974_vm2, %v3897_v45, %v3901_v56  ;;  %v3919_v52 = vrot.slane %v3917_v32, 4  ;;  %v13692_v46 = vld [vmem:[%s13933_s20 + $0x3c] sm:$0xff]  }
  0xef   : > { %v1145_v59 = vpop.f32.mrf.mxu1  ;;  %v3925_v12 = vrot.slane %v3923_v15, 5  ;;  %v11683_v57 = vcombine.low %v3892_v4, %v3902_v18  ;;  %v3931_v61 = vshll.u32 %v11629_v60, 16  ;;  %v3930_v16 = vrot.slane %v3928_v34, 4  ;;  %v15221_v34 = vld [vmem:[%s13933_s20 + $0x64] sm:$0xf] }
  0xf0   : > { %v15155_v25 = vadd.f32 %v1145_v59, %v840_v55  ;;  %v12737_v29 = vpop.f32.mrf.mxu0  ;;  %13023 = vmatmul.mubr.bf16.vlgmr.msra.gmra.mxu0 %v13689_v35  ;;  %v3911_v27 = vrot.slane %v3910_v38, 4  ;;  %v3920_v63 = vor.u32 %v3919_v52, %v3915_v9  ;;  %v3937_v17 = vshll.u32 %v11630_v7, 16  ;;  %v13694_v35 = vld [vmem:[%s13933_s20 + $0x48] sm:$0xff]   ;;  %v13695_v52 = vld [vmem:[%s13933_s20 + $0x54] sm:$0xff]  }
  0xf1   : > { %v12785_v40 = vpop.f32.mrf.mxu1  ;;  %13103 = vmatpush3.bf16.msra.mxu0 %v15048_v21  ;;  %13026 = vmatprep.mubr.bf16.mxu0 %v13691_v0  ;;  %v13696_v21 = vld [vmem:[%s19052_s1 + $0x228] sm:$0xff]   ;;  %v3941_v23 = vshrl.u32 %v11630_v7, 16  ;;  %v3933_v59 = vrot.slane %v3931_v61, 5  ;;  %v3947_v47 = vshll.u32 %v11631_v62, 16  ;;  %v15199_v0 = vld [vmem:[%s13933_s20 + $0x5c] sm:$0x1] }
  0xf2   : > { %v15167_v11 = vadd.f32 %v12785_v40, %v12737_v29  ;;  %v843_v1 = vpop.f32.mrf.mxu0  ;;  %13104 = vmatprep.subr.bf16.mxu0 %v13693_v39  ;;  %13074 = vmatprep.mubr.bf16.mxu1 %v11683_v57  ;;  %v3916_v42 = vsel %vm13974_vm2, %v3911_v27, %v3915_v9  ;;  %v3921_v22 = vrot.slane %v3920_v63, 4  ;;  %v3939_v51 = vrot.slane %v3937_v17, 5  ;;  %v13702_v9 = vld [vmem:[%s19052_s1 + $0x218] sm:$0xff]  }
  0xf3   : > { %v1148_v14 = vpop.f32.mrf.mxu1  ;;  %v3943_v29 = vrot.slane %v3941_v23, 4  ;;  %v3934_v30 = vor.u32 %v3933_v59, %v3930_v16  ;;  %v3949_v40 = vrot.slane %v3947_v47, 5  ;;  %v3955_v36 = vshll.u32 %v11632_v58, 16 }
  0xf4   : > { %v15176_v10 = vadd.f32 %v1148_v14, %v843_v1  ;;  %v12740_v41 = vpop.f32.mrf.mxu0  ;;  %v3926_v56 = vsel %vm13974_vm2, %v3921_v22, %v3925_v12  ;;  %v3961_v48 = vshll.u32 %v15193_v2, 16  ;;  %v3971_v38 = vshll.u32 %v15199_v0, 16 }
  0xf5   : > { %v12788_v19 = vpop.f32.mrf.mxu1  ;;  %13105 = vmatpush3.bf16.msra.mxu0 %v13693_v39  ;;  %v3952_v39 = vshrl.u32 %v11632_v58, 16  ;;  %v3944_v1 = vor.u32 %v3943_v29, %v3939_v51  ;;  %v11684_v44 = vcombine.low %v3916_v42, %v3926_v56  ;;  %v3935_v14 = vrot.slane %v3934_v30, 4 }
  0xf6   : > { %v15183_v3 = vadd.f32 %v12788_v19, %v12740_v41  ;;  %v856_v33 = vpop.f32.mrf.mxu0  ;;  %13106 = vmatprep.subr.bf16.mxu0 %v13696_v21  ;;  %v3957_v4 = vrot.slane %v3955_v36, 5  ;;  %v3963_v62 = vrot.slane %v3961_v48, 5  ;;  %v3965_v41 = vshrl.u32 %v15193_v2, 16  ;;  %v15246_v36 = vld [vmem:[%s13933_s20 + $0x74] sm:$0x1] }
  0xf7   : > { %v1161_v8 = vpop.f32.mrf.mxu1  ;;  %v3954_v5 = vrot.slane %v3952_v39, 4  ;;  %v3945_v15 = vrot.slane %v3944_v1, 4  ;;  %13075 = vmatmul.mubr.bf16.gmra.mxu1 %v11684_v44  ;;  %v3940_v12 = vsel %vm13974_vm2, %v3935_v14, %v3939_v51  ;;  %v3973_v58 = vrot.slane %v3971_v38, 5  ;;  %v13705_v39 = vld [vmem:[%s19052_s1 + $0x210] sm:$0xff]  }
  0xf8   : > { %v15187_v55 = vadd.f32 %v1161_v8, %v856_v33  ;;  %v12741_v24 = vpop.f32.mrf.mxu0  ;;  %13027 = vmatmul.mubr.bf16.gmra.mxu0 %v13692_v46  ;;  %v3967_v61 = vrot.slane %v3965_v41, 4  ;;  %v13697_v46 = vld [vmem:[%s13933_s20 + $0x60] sm:$0xff]   ;;  %v15227_v8 = vld [vmem:[%s13933_s20 + $0x68] sm:$0x1]  ;;  %v3976_v63 = vshrl.u32 %v11635_v43, 16  ;;  %v3979_v42 = vshll.u32 %v11635_v43, 16 }
  0xf9   : > { %v12789_v13 = vpop.f32.mrf.mxu1  ;;  %13030 = vmatprep.mubr.bf16.mxu0 %v13694_v35  ;;  %13107 = vmatpush3.bf16.msra.mxu0 %v13696_v21  ;;  %v3958_v21 = vor.u32 %v3957_v4, %v3954_v5  ;;  %v3950_v57 = vsel %vm13974_vm2, %v3945_v15, %v3949_v40  ;;  %v15233_v35 = vld [vmem:[%s13933_s20 + $0x70] sm:$0xf]  ;;  %v3985_v51 = vshll.u32 %v15221_v34, 16  ;;  %v3989_v29 = vshrl.u32 %v15221_v34, 16 }
  0xfa   : > { %v15201_v28 = vadd.f32 %v12789_v13, %v12741_v24  ;;  %v859_v49 = vpop.f32.mrf.mxu0  ;;  %13108 = vmatprep.subr.bf16.mxu0 %v13699_v20  ;;  %v11685_v16 = vcombine.low %v3940_v12, %v3950_v57  ;;  %v11638_v24 = vld [vmem:[%s13933_s20 + $0x6c] sm:$0xf]  ;;  %v3968_v59 = vor.u32 %v3967_v61, %v3963_v62  ;;  %v3978_v13 = vrot.slane %v3976_v63, 4 }
  0xfb   : > { %v1164_v60 = vpop.f32.mrf.mxu1  ;;  %v3959_v23 = vrot.slane %v3958_v21, 4  ;;  %v3981_v30 = vrot.slane %v3979_v42, 5  ;;  %v3995_v40 = vshll.u32 %v15227_v8, 16  ;;  %v3987_v1 = vrot.slane %v3985_v51, 5 }
  0xfc   : > { %v15207_v7 = vadd.f32 %v1164_v60, %v859_v49  ;;  %v12744_v45 = vpop.f32.mrf.mxu0  ;;  %13078 = vmatprep.mubr.bf16.mxu1 %v11685_v16  ;;  %v3969_v43 = vrot.slane %v3968_v59, 4  ;;  %v3991_v5 = vrot.slane %v3989_v29, 4  ;;  %v4000_v48 = vshrl.u32 %v11638_v24, 16 }
  0xfd   : > { %v12792_v32 = vpop.f32.mrf.mxu1  ;;  %13109 = vmatpush3.bf16.msra.mxu0 %v13699_v20  ;;  %v3964_v20 = vsel %vm13974_vm2, %v3959_v23, %v3963_v62  ;;  %v3982_v14 = vor.u32 %v3981_v30, %v3978_v13  ;;  %v3997_v4 = vrot.slane %v3995_v40, 5  ;;  %v4009_v38 = vshll.u32 %v15233_v35, 16  ;;  %v15267_v13 = vld [vmem:[%s13933_s20 + $0x7c] sm:$0xf]  ;;  %v15272_v40 = vld [vmem:[%s13933_s20 + $0x80] sm:$0x1] }
  0xfe   : > { %v15215_v18 = vadd.f32 %v12792_v32, %v12744_v45  ;;  %v872_v33 = vpop.f32.mrf.mxu0  ;;  %13110 = vmatprep.subr.bf16.mxu0 %v13702_v9  ;;  %v4003_v45 = vshll.u32 %v11638_v24, 16  ;;  %v3974_v32 = vsel %vm13974_vm2, %v3969_v43, %v3973_v58  ;;  %v3992_v62 = vor.u32 %v3991_v5, %v3987_v1  ;;  %v13698_v58 = vld [vmem:[%s13933_s20 + $0x6c] sm:$0xff]  }
  0xff   : > { %v1177_v27 = vpop.f32.mrf.mxu1  ;;  %v4002_v41 = vrot.slane %v4000_v48, 4  ;;  %v11686_v12 = vcombine.low %v3964_v20, %v3974_v32  ;;  %v3983_v21 = vrot.slane %v3982_v14, 4  ;;  %v4011_v16 = vrot.slane %v4009_v38, 5  ;;  %v11644_v14 = vld [vmem:[%s13933_s20 + $0x84] sm:$0xf] }
 0x100   : > { %v15229_v17 = vadd.f32 %v1177_v27, %v872_v33  ;;  %v12745_v47 = vpop.f32.mrf.mxu0  ;;  %13031 = vmatmul.mubr.bf16.gmra.mxu0 %v13695_v52  ;;  %v13708_v52 = vld [vmem:[%s19052_s1 + $0x208] sm:$0xff]   ;;  %v4005_v57 = vrot.slane %v4003_v45, 5  ;;  %v11641_v33 = vld [vmem:[%s13933_s20 + $0x78] sm:$0xf]  ;;  %v4019_v23 = vshll.u32 %v15246_v36, 16 }
 0x101   : > { %v12793_v22 = vpop.f32.mrf.mxu1  ;;  %13034 = vmatprep.mubr.bf16.mxu0 %v13697_v46  ;;  %13111 = vmatpush3.bf16.msra.mxu0 %v13702_v9  ;;  %v4013_v9 = vshrl.u32 %v15233_v35, 16  ;;  %v3993_v46 = vrot.slane %v3992_v62, 4  ;;  %v3988_v24 = vsel %vm13974_vm2, %v3983_v21, %v3987_v1  ;;  %v4024_v43 = vshrl.u32 %v11641_v33, 16 }
 0x102   : > { %v15242_v49 = vadd.f32 %v12793_v22, %v12745_v47  ;;  %v875_v56 = vpop.f32.mrf.mxu0  ;;  %13112 = vmatprep.subr.bf16.mxu0 %v13705_v39  ;;  %13079 = vmatmul.mubr.bf16.gmra.mxu1 %v11686_v12  ;;  %v4006_v59 = vor.u32 %v4005_v57, %v4002_v41  ;;  %v13700_v22 = vld [vmem:[%s13933_s20 + $0x78] sm:$0xff]   ;;  %v4021_v20 = vrot.slane %v4019_v23, 5  ;;  %v4033_v62 = vshll.u32 %v15267_v13, 16 }
 0x103   : > { %v1180_v60 = vpop.f32.mrf.mxu1  ;;  %v4015_v47 = vrot.slane %v4013_v9, 4  ;;  %v3998_v51 = vsel %vm13974_vm2, %v3993_v46, %v3997_v4  ;;  %v4026_v32 = vrot.slane %v4024_v43, 4  ;;  %v4037_v41 = vshrl.u32 %v15267_v13, 16  ;;  %v13701_v43 = vld [vmem:[%s13933_s20 + $0x84] sm:$0xff]  }
 0x104   : > { %v15248_v44 = vadd.f32 %v1180_v60, %v875_v56  ;;  %v12748_v61 = vpop.f32.mrf.mxu0  ;;  %v4027_v56 = vshll.u32 %v11641_v33, 16  ;;  %v11687_v60 = vcombine.low %v3988_v24, %v3998_v51  ;;  %v4007_v5 = vrot.slane %v4006_v59, 4  ;;  %v11647_v51 = vld [vmem:[%s13933_s20 + $0x90] sm:$0xf] }
 0x105   : > { %v12796_v15 = vpop.f32.mrf.mxu1  ;;  %13113 = vmatpush3.bf16.msra.mxu0 %v13705_v39  ;;  %v4016_v48 = vor.u32 %v4015_v47, %v4011_v16  ;;  %v13711_v39 = vld [vmem:[%s19052_s1 + $0x200] sm:$0xff]   ;;  %v4043_v57 = vshll.u32 %v15272_v40, 16  ;;  %v4039_v46 = vrot.slane %v4037_v41, 4  ;;  %v4048_v23 = vshrl.u32 %v11644_v14, 16  ;;  %v15295_v47 = vld [vmem:[%s13933_s20 + $0x8c] sm:$0x1] }
 0x106   : > { %v15261_v42 = vadd.f32 %v12796_v15, %v12748_v61  ;;  %v888_v29 = vpop.f32.mrf.mxu0  ;;  %13114 = vmatprep.subr.bf16.mxu0 %v13708_v52  ;;  %v4029_v15 = vrot.slane %v4027_v56, 5  ;;  %13082 = vmatprep.mubr.bf16.mxu1 %v11687_v60  ;;  %v4012_v38 = vsel %vm13974_vm2, %v4007_v5, %v4011_v16  ;;  %v4067_v41 = vshll.u32 %v15295_v47, 16 }
 0x107   : > { %v1193_v63 = vpop.f32.mrf.mxu1  ;;  %v4017_v12 = vrot.slane %v4016_v48, 4  ;;  %v4045_v59 = vrot.slane %v4043_v57, 5  ;;  %v4072_v57 = vshrl.u32 %v11647_v51, 16 }
 0x108   : > { %v15274_v1 = vadd.f32 %v1193_v63, %v888_v29  ;;  %13035 = vmatmul.mubr.bf16.gmra.mxu0 %v13698_v58  ;;  %v12749_v4 = vpop.f32.mrf.mxu0  ;;  %v4030_v61 = vor.u32 %v4029_v15, %v4026_v32  ;;  %v4035_v58 = vrot.slane %v4033_v62, 5  ;;  %v15288_v63 = vld [vmem:[%s13933_s20 + $0x88] sm:$0xf] }
 0x109   : > { %v12797_v30 = vpop.f32.mrf.mxu1  ;;  %13038 = vmatprep.mubr.bf16.mxu0 %v13700_v22  ;;  %13115 = vmatpush3.bf16.msra.mxu0 %v13708_v52  ;;  %v4022_v16 = vsel %vm13974_vm2, %v4017_v12, %v4021_v20  ;;  %v4051_v22 = vshll.u32 %v11644_v14, 16  ;;  %v4050_v52 = vrot.slane %v4048_v23, 4  ;;  %v13703_v14 = vld [vmem:[%s13933_s20 + $0x90] sm:$0xff]   ;;  %v15313_v23 = vld [vmem:[%s13933_s20 + $0x98] sm:$0x1] }
 0x10a   : > { %19084 = vst [vmem:[#allocation5_spill] sm:$0xff] %v15274_v1  ;;  %v15284_v21 = vadd.f32 %v12797_v30, %v12749_v4  ;;  %v891_v9 = vpop.f32.mrf.mxu0  ;;  %13116 = vmatprep.subr.bf16.mxu0 %v13711_v39  ;;  %v11688_v29 = vcombine.low %v4012_v38, %v4022_v16  ;;  %v4031_v56 = vrot.slane %v4030_v61, 4  ;;  %v4040_v60 = vor.u32 %v4039_v46, %v4035_v58  ;;  %v15308_v12 = vld [vmem:[%s13933_s20 + $0x94] sm:$0xf]  ;;  %v11650_v16 = vld [vmem:[%s13933_s20 + $0x9c] sm:$0xf] }
 0x10b   : > { %v1196_v45 = vpop.f32.mrf.mxu1  ;;  %v4053_v20 = vrot.slane %v4051_v22, 5  ;;  %v4057_v4 = vshll.u32 %v15288_v63, 16  ;;  %v4069_v22 = vrot.slane %v4067_v41, 5  ;;  %v15331_v41 = vld [vmem:[%s13933_s20 + $0xa4] sm:$0x1] }
 0x10c   : > { %19085 = vst [vmem:[#allocation6_spill] sm:$0xff] %v15284_v21  ;;  %v15292_v24 = vadd.f32 %v1196_v45, %v891_v9  ;;  %v12752_v30 = vpop.f32.mrf.mxu0  ;;  %v4061_v45 = vshrl.u32 %v15288_v63, 16  ;;  %13083 = vmatmul.mubr.bf16.gmra.mxu1 %v11688_v29  ;;  %v4036_v32 = vsel %vm13974_vm2, %v4031_v56, %v4035_v58  ;;  %v4041_v15 = vrot.slane %v4040_v60, 4  ;;  %19092 = vst [vmem:[#allocation13_spill] sm:$0xff] %v15331_v41  ;;  %v15381_v21 = vld [vmem:[%s13933_s20 + $0xc4] sm:$0xf] }
 0x10d   : > { %v12800_v33 = vpop.f32.mrf.mxu1  ;;  %13117 = vmatpush3.bf16.msra.mxu0 %v13711_v39  ;;  %v4059_v61 = vrot.slane %v4057_v4, 5  ;;  %v4074_v56 = vrot.slane %v4072_v57, 4  ;;  %v4075_v60 = vshll.u32 %v11647_v51, 16  ;;  %v15321_v39 = vld [vmem:[%s13933_s20 + $0xa0] sm:$0xf]  ;;  %v4091_v51 = vshll.u32 %v15313_v23, 16 }
 0x10e   : > { %19086 = vst [vmem:[#allocation7_spill] sm:$0xff] %v15292_v24  ;;  %v15299_v48 = vadd.f32 %v12800_v33, %v12752_v30  ;;  %v904_v62 = vpop.f32.mrf.mxu0  ;;  %v4054_v33 = vor.u32 %v4053_v20, %v4050_v52  ;;  %v4063_v46 = vrot.slane %v4061_v45, 4  ;;  %v4046_v58 = vsel %vm13974_vm2, %v4041_v15, %v4045_v59  ;;  %v11653_v57 = vld [vmem:[%s13933_s20 + $0xa8] sm:$0xf]  ;;  %19100 = vst [vmem:[#allocation21_spill] sm:$0xff] %v15381_v21 }
 0x10f   : > { %v1209_v5 = vpop.f32.mrf.mxu1  ;;  %v4077_v45 = vrot.slane %v4075_v60, 5  ;;  %v4081_v15 = vshll.u32 %v15308_v12, 16  ;;  %v4093_v60 = vrot.slane %v4091_v51, 5 }
 0x110   : > { %19087 = vst [vmem:[#allocation8_spill] sm:$0xff] %v15299_v48  ;;  %v15310_v9 = vadd.f32 %v1209_v5, %v904_v62  ;;  %13039 = vmatmul.mubr.bf16.gmra.mxu0 %v13701_v43  ;;  %v12753_v29 = vpop.f32.mrf.mxu0  ;;  %v11689_v5 = vcombine.low %v4036_v32, %v4046_v58  ;;  %v4055_v52 = vrot.slane %v4054_v33, 4  ;;  %v4064_v20 = vor.u32 %v4063_v46, %v4059_v61  ;;  %v13704_v33 = vld [vmem:[%s13933_s20 + $0x9c] sm:$0xff]  }
 0x111   : > { %v12801_v38 = vpop.f32.mrf.mxu1  ;;  %13042 = vmatprep.mubr.bf16.mxu0 %v13703_v14  ;;  %v4085_v62 = vshrl.u32 %v15308_v12, 16  ;;  %v4096_v14 = vshrl.u32 %v11650_v16, 16  ;;  %v4078_v46 = vor.u32 %v4077_v45, %v4074_v56  ;;  %v4083_v58 = vrot.slane %v4081_v15, 5 }
 0x112   : > { %19088 = vst [vmem:[#allocation9_spill] sm:$0xff] %v15310_v9  ;;  %v15323_v4 = vadd.f32 %v12801_v38, %v12753_v29  ;;  %v15325_v43 = vpop.f32.mrf.mxu0  ;;  %13086 = vmatprep.mubr.bf16.mxu1 %v11689_v5  ;;  %v4060_v32 = vsel %vm13974_vm2, %v4055_v52, %v4059_v61  ;;  %v4065_v38 = vrot.slane %v4064_v20, 4  ;;  %v13706_v61 = vld [vmem:[%s13933_s20 + $0xa8] sm:$0xff]   ;;  %v4123_v48 = vshll.u32 %v11653_v57, 16 }
 0x113   : > { %v15318_v30 = vpop.f32.mrf.mxu1  ;;  %19091 = vst [vmem:[#allocation12_spill] sm:$0xff] %v15325_v43  ;;  %v4087_v29 = vrot.slane %v4085_v62, 4  ;;  %v4098_v5 = vrot.slane %v4096_v14, 4  ;;  %v4105_v43 = vshll.u32 %v15321_v39, 16  ;;  %v15342_v52 = vld [vmem:[%s13933_s20 + $0xac] sm:$0xf] }
 0x114   : > { %19089 = vst [vmem:[#allocation10_spill] sm:$0xff] %v15318_v30  ;;  %19090 = vst [vmem:[#allocation11_spill] sm:$0xff] %v15323_v4  ;;  %v4070_v19 = vsel %vm13974_vm2, %v4065_v38, %v4069_v22  ;;  %v4099_v30 = vshll.u32 %v11650_v16, 16  ;;  %v4079_v56 = vrot.slane %v4078_v46, 4  ;;  %v4109_v22 = vshrl.u32 %v15321_v39, 16 }
 0x115   : > { %v12804_v59 = vpop.f32.mrf.mxu1  ;;  %v11690_v20 = vcombine.low %v4060_v32, %v4070_v19  ;;  %v4088_v45 = vor.u32 %v4087_v29, %v4083_v58  ;;  %v4107_v9 = vrot.slane %v4105_v43, 5  ;;  %v4115_v38 = vshll.u32 %v15331_v41, 16  ;;  %v15349_v16 = vld [vmem:[%s13933_s20 + $0xb0] sm:$0x1]  ;;  %v11656_v43 = vld [vmem:[%s13933_s20 + $0xb4] sm:$0xf] }
 0x116   : > { %v12756_v26 = vpop.f32.mrf.mxu0  ;;  %v4101_v51 = vrot.slane %v4099_v30, 5  ;;  %19094 = vst [vmem:[#allocation15_spill] sm:$0xff] %v15349_v16  ;;  %v4120_v30 = vshrl.u32 %v11653_v57, 16  ;;  %v4111_v46 = vrot.slane %v4109_v22, 4  ;;  %v4125_v57 = vrot.slane %v4123_v48, 5 }
 0x117   : > { %v1225_v27 = vpop.f32.mrf.mxu1  ;;  %v15344_v4 = vadd.f32 %v12804_v59, %v12756_v26  ;;  %13087 = vmatmul.mubr.bf16.gmra.mxu1 %v11690_v20  ;;  %v4084_v26 = vsel %vm13974_vm2, %v4079_v56, %v4083_v58  ;;  %v4089_v19 = vrot.slane %v4088_v45, 4  ;;  %v4117_v29 = vrot.slane %v4115_v38, 5  ;;  %v15359_v20 = vld [vmem:[%s13933_s20 + $0xb8] sm:$0xf]  ;;  %v11659_v48 = vld [vmem:[%s13933_s20 + $0xc0] sm:$0xf] }
 0x118   : > { %v920_v62 = vpop.f32.mrf.mxu0  ;;  %13043 = vmatmul.mubr.bf16.gmra.mxu0 %v13704_v33  ;;  %v4102_v14 = vor.u32 %v4101_v51, %v4098_v5  ;;  %v13707_v56 = vld [vmem:[%s13933_s20 + $0xb4] sm:$0xff]   ;;  %v4122_v45 = vrot.slane %v4120_v30, 4  ;;  %v4112_v22 = vor.u32 %v4111_v46, %v4107_v9  ;;  %v4144_v46 = vshrl.u32 %v11656_v43, 16 }
 0x119   : > { %19093 = vst [vmem:[#allocation14_spill] sm:$0xff] %v15344_v4  ;;  %v12805_v15 = vpop.f32.mrf.mxu1  ;;  %v15353_v59 = vadd.f32 %v1225_v27, %v920_v62  ;;  %13046 = vmatprep.mubr.bf16.mxu0 %v13706_v61  ;;  %v4094_v33 = vsel %vm13974_vm2, %v4089_v19, %v4093_v60  ;;  %v4129_v62 = vshll.u32 %v15342_v52, 16  ;;  %v13709_v61 = vld [vmem:[%s13933_s20 + $0xc0] sm:$0xff]   ;;  %v4139_v60 = vshll.u32 %v15349_v16, 16  ;;  %v15374_v19 = vld [vmem:[%s13933_s20 + $0xbc] sm:$0x1] }
 0x11a   : > { %v12757_v4 = vpop.f32.mrf.mxu0  ;;  %v11691_v5 = vcombine.low %v4084_v26, %v4094_v33  ;;  %v4103_v51 = vrot.slane %v4102_v14, 4  ;;  %19099 = vst [vmem:[#allocation20_spill] sm:$0xff] %v15374_v19  ;;  %v4113_v30 = vrot.slane %v4112_v22, 4  ;;  %v4126_v14 = vor.u32 %v4125_v57, %v4122_v45 }
 0x11b   : > { %19095 = vst [vmem:[#allocation16_spill] sm:$0xff] %v15353_v59  ;;  %v15355_v32 = vpop.f32.mrf.mxu1  ;;  %v15363_v58 = vadd.f32 %v12805_v15, %v12757_v4  ;;  %v4131_v59 = vrot.slane %v4129_v62, 5  ;;  %v4133_v4 = vshrl.u32 %v15342_v52, 16  ;;  %v4147_v62 = vshll.u32 %v11656_v43, 16 }
 0x11c   : > { %19096 = vst [vmem:[#allocation17_spill] sm:$0xff] %v15355_v32  ;;  %v15367_v38 = vpop.f32.mrf.mxu0  ;;  %13090 = vmatprep.mubr.bf16.mxu1 %v11691_v5  ;;  %v4108_v26 = vsel %vm13974_vm2, %v4103_v51, %v4107_v9  ;;  %v4141_v32 = vrot.slane %v4139_v60, 5  ;;  %v4118_v16 = vsel %vm13974_vm2, %v4113_v30, %v4117_v29  ;;  %v4127_v9 = vrot.slane %v4126_v14, 4 }
 0x11d   : > { %19097 = vst [vmem:[#allocation18_spill] sm:$0xff] %v15363_v58  ;;  %v12808_v27 = vpop.f32.mrf.mxu1  ;;  %19098 = vst [vmem:[#allocation19_spill] sm:$0xff] %v15367_v38  ;;  %v4135_v38 = vrot.slane %v4133_v4, 4  ;;  %v4153_v58 = vshll.u32 %v15359_v20, 16  ;;  %v4146_v51 = vrot.slane %v4144_v46, 4  ;;  %v11692_v45 = vcombine.low %v4108_v26, %v4118_v16 }
 0x11e   : > { %v4149_v4 = vrot.slane %v4147_v62, 5  ;;  %v4132_v41 = vsel %vm13974_vm2, %v4127_v9, %v4131_v59  ;;  %v4157_v29 = vshrl.u32 %v15359_v20, 16  ;;  %v15396_v16 = vld [vmem:[%s13933_s20 + $0xc8] sm:$0x1]  ;;  %v4168_v30 = vshrl.u32 %v11659_v48, 16 }
 0x11f   : > { %v1241_v15 = vpop.f32.mrf.mxu1  ;;  %v4136_v22 = vor.u32 %v4135_v38, %v4131_v59  ;;  %v4155_v43 = vrot.slane %v4153_v58, 5  ;;  %19104 = vst [vmem:[#allocation25_spill] sm:$0xff] %v15396_v16  ;;  %13091 = vmatmul.mubr.bf16.gmra.mxu1 %v11692_v45  ;;  %v4171_v14 = vshll.u32 %v11659_v48, 16  ;;  %v11662_v46 = vld [vmem:[%s13933_s20 + $0xcc] sm:$0xf] }
 0x120   : > { %v12760_v33 = vpop.f32.mrf.mxu0  ;;  %13047 = vmatmul.mubr.bf16.gmra.mxu0 %v13707_v56  ;;  %v4150_v38 = vor.u32 %v4149_v4, %v4146_v51  ;;  %v4159_v59 = vrot.slane %v4157_v29, 4  ;;  %v15403_v62 = vld [vmem:[%s13933_s20 + $0xd0] sm:$0xf] }
 0x121   : > { %v12809_v24 = vpop.f32.mrf.mxu1  ;;  %v15385_v5 = vadd.f32 %v12808_v27, %v12760_v33  ;;  %v4163_v27 = vshll.u32 %v15374_v19, 16  ;;  %13050 = vmatprep.mubr.bf16.mxu0 %v13709_v61  ;;  %v4137_v56 = vrot.slane %v4136_v22, 4  ;;  %v4177_v33 = vshll.u32 %v15381_v21, 16  ;;  %19106 = vst [vmem:[#allocation27_spill] sm:$0xff] %v15403_v62  ;;  %v13710_v51 = vld [vmem:[%s13933_s20 + $0xcc] sm:$0xff]  }
 0x122   : > { %v936_v57 = vpop.f32.mrf.mxu0  ;;  %v4151_v9 = vrot.slane %v4150_v38, 4  ;;  %v4170_v22 = vrot.slane %v4168_v30, 4  ;;  %v4160_v29 = vor.u32 %v4159_v59, %v4155_v43 }
 0x123   : > { %19101 = vst [vmem:[#allocation22_spill] sm:$0xff] %v15385_v5  ;;  %v15387_v60 = vpop.f32.mrf.mxu1  ;;  %v15391_v1 = vadd.f32 %v1241_v15, %v936_v57  ;;  %v4142_v61 = vsel %vm13974_vm2, %v4137_v56, %v4141_v32  ;;  %v4173_v57 = vrot.slane %v4171_v14, 5  ;;  %v4187_v32 = vshll.u32 %v15396_v16, 16  ;;  %v15415_v56 = vld [vmem:[%s13933_s20 + $0xd4] sm:$0x1] }
 0x124   : > { %19102 = vst [vmem:[#allocation23_spill] sm:$0xff] %v15387_v60  ;;  %v12761_v58 = vpop.f32.mrf.mxu0  ;;  %v11693_v48 = vcombine.low %v4132_v41, %v4142_v61  ;;  %v4156_v60 = vsel %vm13974_vm2, %v4151_v9, %v4155_v43  ;;  %v4161_v30 = vrot.slane %v4160_v29, 4  ;;  %v4192_v14 = vshrl.u32 %v11662_v46, 16  ;;  %v11706_v5 = vld [vmem:[%s13933_s20 + $0x24] sm:$0xe] }
 0x125   : > { %19103 = vst [vmem:[#allocation24_spill] sm:$0xff] %v15391_v1  ;;  %v12812_v26 = vpop.f32.mrf.mxu1  ;;  %v15399_v15 = vadd.f32 %v12809_v24, %v12761_v58  ;;  %v4165_v24 = vrot.slane %v4163_v27, 5  ;;  %v4179_v58 = vrot.slane %v4177_v33, 5  ;;  %v4181_v1 = vshrl.u32 %v15381_v21, 16  ;;  %v11705_v27 = vld [vmem:[%s13933_s20 + $0x18] sm:$0xe] }
 0x126   : > { %v15407_v45 = vpop.f32.mrf.mxu0  ;;  %13094 = vmatprep.mubr.bf16.mxu1 %v11693_v48  ;;  %v4201_v41 = vshll.u32 %v15403_v62, 16  ;;  %v4189_v61 = vrot.slane %v4187_v32, 5  ;;  %v4205_v9 = vshrl.u32 %v15403_v62, 16  ;;  %v4194_v29 = vrot.slane %v4192_v14, 4  ;;  %v13832_v14 = vld [vmem:[%s13933_s20 + $0x1c] sm:$0xf] }
 0x127   : > { %19105 = vst [vmem:[#allocation26_spill] sm:$0xff] %v15399_v15  ;;  %19107 = vst [vmem:[#allocation28_spill] sm:$0xff] %v15407_v45  ;;  %v1257_v4 = vpop.f32.mrf.mxu1  ;;  %v4174_v15 = vor.u32 %v4173_v57, %v4170_v22  ;;  %v4195_v45 = vshll.u32 %v11662_v46, 16  ;;  %v4183_v43 = vrot.slane %v4181_v1, 4  ;;  %v4166_v57 = vsel %vm13974_vm2, %v4161_v30, %v4165_v24  ;;  %v11707_v24 = vld [vmem:[%s13933_s20 + $0x30] sm:$0xe] }
 0x128   : > { %v12764_v59 = vpop.f32.mrf.mxu0  ;;  %13051 = vmatmul.mubr.bf16.gmra.mxu0 %v13710_v51  ;;  %v11694_v16 = vcombine.low %v4156_v60, %v4166_v57  ;;  %v4203_v32 = vrot.slane %v4201_v41, 5  ;;  %v4207_v19 = vrot.slane %v4205_v9, 4  ;;  %v11721_v60 = vrot.slane %v11705_v27, 9  ;;  %v11708_v9 = vld [vmem:[%s13933_s20 + $0x3c] sm:$0xe] }
 0x129   : > { %v12813_v38 = vpop.f32.mrf.mxu1  ;;  %v4175_v33 = vrot.slane %v4174_v15, 4  ;;  %v15424_v48 = vadd.f32 %v12812_v26, %v12764_v59  ;;  %v4197_v46 = vrot.slane %v4195_v45, 5  ;;  %v4184_v1 = vor.u32 %v4183_v43, %v4179_v58 }
 0x12a   : > { %v952_v51 = vpop.f32.mrf.mxu0  ;;  %v4211_v26 = vshll.u32 %v15415_v56, 16  ;;  %13095 = vmatmul.mubr.bf16.gmra.mxu1 %v11694_v16  ;;  %v4603_v59 = vrot.slane %v13832_v14, 5  ;;  %v4208_v43 = vor.u32 %v4207_v19, %v4203_v32 }
 0x12b   : > { %v15420_v22 = vpop.f32.mrf.mxu1  ;;  %v4180_v15 = vsel %vm13974_vm2, %v4175_v33, %v4179_v58  ;;  %v4198_v21 = vor.u32 %v4197_v46, %v4194_v29  ;;  %v4185_v45 = vrot.slane %v4184_v1, 4  ;;  %v13833_v33 = vld [vmem:[%s13933_s20 + $0x20] sm:$0x1]  ;;  %v11722_v1 = vrot.slane %v11706_v5, 9 }
 0x12c   : > { %19108 = vst [vmem:[#allocation29_spill] sm:$0xff] %v15420_v22  ;;  %v15429_v22 = vadd.f32 %v1257_v4, %v952_v51  ;;  %v12765_v30 = vpop.f32.mrf.mxu0  ;;  %v4606_v57 = vrot.slane %v13833_v33, 5  ;;  %v4213_v4 = vrot.slane %v4211_v26, 5  ;;  %v4604_v16 = vsel %vm14326_vm5, %v11721_v60, %v4603_v59  ;;  %v11709_v26 = vld [vmem:[%s13933_s20 + $0x48] sm:$0xe] }
 0x12d   : > { %v12880_v62 = vpop.f32.mrf.mxu1  ;;  %v4199_v41 = vrot.slane %v4198_v21, 4  ;;  %v15435_v51 = vadd.f32 %v12813_v38, %v12765_v30  ;;  %v4190_v29 = vsel %vm13974_vm2, %v4185_v45, %v4189_v61  ;;  %v4605_v27 = vrot.slane %v4603_v59, 4 }
 0x12e   : > { %v15440_v46 = vpop.f32.mrf.mxu0  ;;  %v11695_v21 = vcombine.low %v4180_v15, %v4190_v29  ;;  %v4209_v38 = vrot.slane %v4208_v43, 4  ;;  %v19110_v30 = vrot.slane %v15124_v54, 5  ;;  %v11723_v33 = vrot.slane %v11707_v24, 9  ;;  %v11710_v29 = vld [vmem:[%s13933_s20 + $0x54] sm:$0xe] }
 0x12f   : > { %v1985_v58 = vpop.f32.mrf.mxu1  ;;  %19109 = vst [vmem:[#allocation30_spill] sm:$0xff] %v15440_v46  ;;  %v4204_v19 = vsel %vm13974_vm2, %v4199_v41, %v4203_v32  ;;  %v4607_v61 = vsel %vm14326_vm5, %v4605_v27, %v4606_v57  ;;  %v13834_v43 = vld [vmem:[%s13933_s20 + $0x34] sm:$0xf] }
 0x130   : > { %v12832_v45 = vpop.f32.mrf.mxu0  ;;  %v4611_v5 = vsel %vm14326_vm5, %v11722_v1, %v19110_v30  ;;  %v19111_v60 = vmov %v19110_v30  ;;  %13098 = vmatprep.mubr.bf16.mxu1 %v11695_v21  ;;  %v4214_v32 = vsel %vm13974_vm2, %v4209_v38, %v4213_v4  ;;  %v11753_v41 = vcombine.low %v4604_v16, %v4607_v61  ;;  %v13835_v30 = vld [vmem:[%s13933_s20 + $0x38] sm:$0x1]  ;;  %v13836_v61 = vld [vmem:[%s13933_s20 + $0x40] sm:$0xf] }
 0x131   : > { %v12881_v14 = vpop.f32.mrf.mxu1  ;;  %v4612_v59 = vrot.slane %v19111_v60, 4  ;;  %v1727_v57 = vadd.f32 %v12832_v45, %v15149_v53  ;;  %v4617_v27 = vrot.slane %v13834_v43, 5  ;;  %v11696_v46 = vcombine.low %v4204_v19, %v4214_v32 }
 0x132   : > { %v19113_v1 = vrot.slane %v15135_v6, 5  ;;  %v1598_v24 = vpop.f32.mrf.mxu0  ;;  %v4620_v60 = vrot.slane %v13835_v30, 5  ;;  %v11724_v21 = vrot.slane %v11708_v9, 9  ;;  %13118 = vmatprep.mubr.bf16.mxu0 %v11753_v41  ;;  %v4624_v45 = vrot.slane %v13836_v61, 5  ;;  %v13837_v9 = vld [vmem:[%s13933_s20 + $0x4c] sm:$0xf] }
 0x133   : > { %v15456_v15 = vpop.f32.mrf.mxu1  ;;  %v1725_v53 = vadd.f32 %v1598_v24, %v15155_v25  ;;  %v15469_v16 = vadd.f32 %v12880_v62, %v1727_v57  ;;  %v4618_v19 = vsel %vm14326_vm5, %v11723_v33, %v4617_v27  ;;  %13099 = vmatmul.mubr.bf16.gmra.mxu1 %v11696_v46  ;;  %v4619_v38 = vrot.slane %v4617_v27, 4  ;;  %v13838_v25 = vld [vmem:[%s13933_s20 + $0x50] sm:$0x1]  ;;  %v11712_v61 = vld [vmem:[%s13933_s20 + $0x6c] sm:$0xe] }
 0x134   : > { %19112 = vst [vmem:[#allocation31_spill] sm:$0xff] %v15456_v15  ;;  %v4614_v54 = vsel %vm14326_vm5, %v4612_v59, %v19113_v1  ;;  %v12833_v6 = vpop.f32.mrf.mxu0  ;;  %v11725_v32 = vrot.slane %v11709_v26, 9  ;;  %v4631_v43 = vrot.slane %v13837_v9, 5  ;;  %v4634_v62 = vrot.slane %v13838_v25, 5  ;;  %v11711_v1 = vld [vmem:[%s13933_s20 + $0x60] sm:$0xe] }
 0x135   : > { %v12884_v15 = vpop.f32.mrf.mxu1  ;;  %v11754_v4 = vcombine.low %v4611_v5, %v4614_v54  ;;  %v1728_v5 = vadd.f32 %v12833_v6, %v15167_v11  ;;  %v15476_v41 = vadd.f32 %v1985_v58, %v1725_v53  ;;  %v11726_v57 = vrot.slane %v11710_v29, 9 }
 0x136   : > { %v1601_v33 = vpop.f32.mrf.mxu0  ;;  %v4621_v46 = vsel %vm14326_vm5, %v4619_v38, %v4620_v60  ;;  %v4625_v27 = vsel %vm14326_vm5, %v11724_v21, %v4624_v45  ;;  %v4626_v26 = vrot.slane %v4624_v45, 4  ;;  %v4632_v24 = vsel %vm14326_vm5, %v11725_v32, %v4631_v43 }
 0x137   : > { %v2001_v59 = vpop.f32.mrf.mxu1  ;;  %13119 = vmatmul.mubr.bf16.vlgmr.msra.gmra.mxu0 %v11754_v4  ;;  %v15487_v11 = vadd.f32 %v1601_v33, %v15176_v10  ;;  %v15489_v58 = vadd.f32 %v12881_v14, %v1728_v5  ;;  %v11755_v29 = vcombine.low %v4618_v19, %v4621_v46  ;;  %v4633_v30 = vrot.slane %v4631_v43, 4 }
 0x138   : > { %v12836_v4 = vpop.f32.mrf.mxu0  ;;  %v19114_v53 = vrot.slane %v15164_v31, 5  ;;  %v4638_v21 = vrot.slane %v15193_v2, 5  ;;  %v4645_v38 = vrot.slane %v15221_v34, 5  ;;  %v11727_v5 = vrot.slane %v11711_v1, 9 }
 0x139   : > { %v12885_v54 = vpop.f32.mrf.mxu1  ;;  %13122 = vmatprep.mubr.bf16.mxu0 %v11755_v29  ;;  %v1731_v10 = vadd.f32 %v12836_v4, %v15183_v3  ;;  %v4635_v19 = vsel %vm14326_vm5, %v4633_v30, %v4634_v62  ;;  %v4648_v3 = vrot.slane %v15227_v8, 5  ;;  %v19115_v46 = vrot.slane %v15199_v0, 5 }
 0x13a   : > { %v4628_v60 = vsel %vm14326_vm5, %v4626_v26, %v19114_v53  ;;  %v1614_v45 = vpop.f32.mrf.mxu0  ;;  %v11757_v31 = vcombine.low %v4632_v24, %v4635_v19  ;;  %v4639_v32 = vsel %vm14326_vm5, %v11726_v57, %v4638_v21  ;;  %v4640_v9 = vrot.slane %v4638_v21, 4  ;;  %v11713_v24 = vld [vmem:[%s13933_s20 + $0x78] sm:$0xe] }
 0x13b   : > { %v15495_v6 = vpop.f32.mrf.mxu1  ;;  %v11756_v14 = vcombine.low %v4625_v27, %v4628_v60  ;;  %v1729_v2 = vadd.f32 %v1614_v45, %v15187_v55  ;;  %v15506_v34 = vadd.f32 %v12884_v15, %v1731_v10  ;;  %v4647_v25 = vrot.slane %v4645_v38, 4 }
 0x13c   : > { %v12837_v33 = vpop.f32.mrf.mxu0  ;;  %v4642_v62 = vsel %vm14326_vm5, %v4640_v9, %v19115_v46  ;;  %v11728_v26 = vrot.slane %v11712_v61, 9  ;;  %v4652_v57 = vrot.slane %v15233_v35, 5  ;;  %v4659_v4 = vrot.slane %v15267_v13, 5 }
 0x13d   : > { %v12888_v43 = vpop.f32.mrf.mxu1  ;;  %v1732_v1 = vadd.f32 %v12837_v33, %v15201_v28  ;;  %v15516_v55 = vadd.f32 %v2001_v59, %v1729_v2  ;;  %v11758_v15 = vcombine.low %v4639_v32, %v4642_v62  ;;  %v4646_v28 = vsel %vm14326_vm5, %v11727_v5, %v4645_v38 }
 0x13e   : > { %v1617_v29 = vpop.f32.mrf.mxu0  ;;  %v15520_v0 = vsel %vm14326_vm5, %v11728_v26, %v4652_v57  ;;  %v4654_v30 = vrot.slane %v4652_v57, 4  ;;  %v4649_v59 = vsel %vm14326_vm5, %v4647_v25, %v4648_v3  ;;  %v19116_v61 = vrot.slane %v15246_v36, 5  ;;  %v11714_v36 = vld [vmem:[%s13933_s20 + $0x84] sm:$0xe]  ;;  %v15556_v26 = vld [vmem:[%s13933_s20 + $0x9c] sm:$0xe] }
 0x13f   : > { %v2017_v27 = vpop.f32.mrf.mxu1  ;;  %13123 = vmatmul.mubr.bf16.gmra.mxu0 %v11756_v14  ;;  %v15524_v53 = vadd.f32 %v1617_v29, %v15207_v7  ;;  %v15526_v35 = vadd.f32 %v12885_v54, %v1732_v1  ;;  %v11729_v10 = vrot.slane %v11713_v24, 9  ;;  %v11759_v19 = vcombine.low %v4646_v28, %v4649_v59  ;;  %v15566_v1 = vld [vmem:[%s13933_s20 + $0xa8] sm:$0xe]  ;;  %v15572_v28 = vld [vmem:[%s13933_s20 + $0xb4] sm:$0xe] }
 0x140   : > { %13126 = vmatprep.mubr.bf16.mxu0 %v11757_v31  ;;  %v12840_v60 = vpop.f32.mrf.mxu0  ;;  %v4656_v13 = vsel %vm14326_vm5, %v4654_v30, %v19116_v61  ;;  %v4661_v45 = vrot.slane %v4659_v4, 4  ;;  %v4662_v31 = vrot.slane %v15272_v40, 5  ;;  %v4666_v25 = vrot.slane %v15288_v63, 5  ;;  %v15578_v61 = vld [vmem:[%s13933_s20 + $0xc0] sm:$0xe] }
 0x141   : > { %v12889_v8 = vpop.f32.mrf.mxu1  ;;  %v1735_v7 = vadd.f32 %v12840_v60, %v15215_v18  ;;  %v11760_v54 = vcombine.low %v15520_v0, %v4656_v13  ;;  %v11715_v18 = vld [vmem:[%s13933_s20 + $0x90] sm:$0xe]  ;;  %v11730_v62 = vrot.slane %v11714_v36, 9  ;;  %v4673_v63 = vrot.slane %v15308_v12, 5  ;;  %v19117_v13 = vld [vmem:[#allocation5_spill] sm:$0xff] }
 0x142   : > { %v1630_v14 = vpop.f32.mrf.mxu0  ;;  %v4680_v24 = vrot.slane %v15321_v39, 5  ;;  %v4668_v0 = vrot.slane %v4666_v25, 4  ;;  %v11731_v30 = vrot.slane %v11715_v18, 9  ;;  %v11732_v60 = vrot.slane %v15556_v26, 9  ;;  %v19121_v26 = vld [vmem:[#allocation7_spill] sm:$0xff] }
 0x143   : > { %v15532_v21 = vpop.f32.mrf.mxu1  ;;  %v1733_v32 = vadd.f32 %v1630_v14, %v15229_v17  ;;  %v15542_v9 = vadd.f32 %v12888_v43, %v1735_v7  ;;  %v4660_v17 = vsel %vm14326_vm5, %v11729_v10, %v4659_v4  ;;  %v4663_v43 = vsel %vm14326_vm5, %v4661_v45, %v4662_v31 }
 0x144   : > { %v12841_v5 = vpop.f32.mrf.mxu0  ;;  %v11761_v4 = vcombine.low %v4660_v17, %v4663_v43  ;;  %v4675_v59 = vrot.slane %v4673_v63, 4  ;;  %v4687_v39 = vrot.slane %v15342_v52, 5  ;;  %v4682_v14 = vrot.slane %v4680_v24, 4  ;;  %v19119_v52 = vld [vmem:[#allocation6_spill] sm:$0xff] }
 0x145   : > { %v12892_v38 = vpop.f32.mrf.mxu1  ;;  %v1736_v3 = vadd.f32 %v12841_v5, %v15242_v49  ;;  %v15548_v33 = vadd.f32 %v2017_v27, %v1733_v32  ;;  %v4669_v27 = vrot.slane %v15295_v47, 5  ;;  %v4676_v47 = vrot.slane %v15313_v23, 5 }
 0x146   : > { %v1633_v46 = vpop.f32.mrf.mxu0  ;;  %v4667_v31 = vsel %vm14326_vm5, %v11730_v62, %v4666_v25  ;;  %v11733_v23 = vrot.slane %v15566_v1, 9  ;;  %v4694_v36 = vrot.slane %v15359_v20, 5  ;;  %v4689_v43 = vrot.slane %v4687_v39, 4  ;;  %v19120_v62 = vld [vmem:[#allocation15_spill] sm:$0xff] }
 0x147   : > { %v2033_v2 = vpop.f32.mrf.mxu1  ;;  %13127 = vmatmul.mubr.bf16.gmra.mxu0 %v11758_v15  ;;  %v15559_v57 = vadd.f32 %v1633_v46, %v15248_v44  ;;  %v15561_v49 = vadd.f32 %v12889_v8, %v1736_v3  ;;  %v4674_v3 = vsel %vm14326_vm5, %v11731_v30, %v4673_v63  ;;  %v4677_v25 = vsel %vm14326_vm5, %v4675_v59, %v4676_v47  ;;  %v19124_v59 = vld [vmem:[#allocation8_spill] sm:$0xff] }
 0x148   : > { %13130 = vmatprep.mubr.bf16.mxu0 %v11759_v19  ;;  %v12844_v15 = vpop.f32.mrf.mxu0  ;;  %v4690_v20 = vrot.slane %v19120_v62, 5  ;;  %v11735_v63 = vrot.slane %v15578_v61, 9  ;;  %v19126_v61 = vld [vmem:[#allocation11_spill] sm:$0xff] }
 0x149   : > { %v12893_v40 = vpop.f32.mrf.mxu1  ;;  %v1739_v12 = vadd.f32 %v12844_v15, %v15261_v42  ;;  %v19118_v42 = vld [vmem:[#allocation13_spill] sm:$0xff] }
 0x14a   : > { %v1646_v44 = vpop.f32.mrf.mxu0  ;;  %v4683_v19 = vrot.slane %v19118_v42, 5 }
 0x14b   : > { %v15568_v29 = vpop.f32.mrf.mxu1  ;;  %v1737_v7 = vadd.f32 %v1646_v44, %v19117_v13  ;;  %v15581_v10 = vadd.f32 %v12892_v38, %v1739_v12  ;;  %v4670_v38 = vsel %vm14326_vm5, %v4668_v0, %v4669_v27  ;;  %v19122_v27 = vld [vmem:[#allocation20_spill] sm:$0xff]  ;;  %v4696_v12 = vrot.slane %v4694_v36, 4 }
 0x14c   : > { %v12845_v45 = vpop.f32.mrf.mxu0  ;;  %v4697_v15 = vrot.slane %v19122_v27, 5  ;;  %v11762_v13 = vcombine.low %v4667_v31, %v4670_v38  ;;  %v4681_v31 = vsel %vm14326_vm5, %v11732_v60, %v4680_v24  ;;  %v4684_v38 = vsel %vm14326_vm5, %v4682_v14, %v4683_v19 }
 0x14d   : > { %v12896_v8 = vpop.f32.mrf.mxu1  ;;  %v1740_v5 = vadd.f32 %v12845_v45, %v19119_v52  ;;  %v15589_v18 = vadd.f32 %v2033_v2, %v1737_v7  ;;  %v19125_v45 = vld [vmem:[#allocation9_spill] sm:$0xff] }
 0x14e   : > { %v1649_v46 = vpop.f32.mrf.mxu0 }
 0x14f   : > { %v2049_v32 = vpop.f32.mrf.mxu1  ;;  %13131 = vmatmul.mubr.bf16.gmra.mxu0 %v11760_v54  ;;  %v11734_v54 = vrot.slane %v15572_v28, 9  ;;  %v15600_v2 = vadd.f32 %v1649_v46, %v19121_v26  ;;  %v15602_v1 = vadd.f32 %v12893_v40, %v1740_v5  ;;  %v11763_v28 = vcombine.low %v4674_v3, %v4677_v25 }
 0x150   : > { %13134 = vmatprep.mubr.bf16.mxu0 %v11761_v4  ;;  %v12848_v0 = vpop.f32.mrf.mxu0  ;;  %v19123_v4 = vld [vmem:[#allocation21_spill] sm:$0xff] }
 0x151   : > { %v12897_v17 = vpop.f32.mrf.mxu1  ;;  %v4701_v44 = vrot.slane %v19123_v4, 5  ;;  %v1743_v47 = vadd.f32 %v12848_v0, %v19124_v59  ;;  %v4691_v0 = vsel %vm14326_vm5, %v4689_v43, %v4690_v20  ;;  %v19127_v59 = vld [vmem:[#allocation14_spill] sm:$0xff] }
 0x152   : > { %v1662_v7 = vpop.f32.mrf.mxu0  ;;  %v19130_v43 = vld [vmem:[#allocation18_spill] sm:$0xff] }
 0x153   : > { %v15606_v30 = vpop.f32.mrf.mxu1  ;;  %v1741_v52 = vadd.f32 %v1662_v7, %v19125_v45  ;;  %v15611_v40 = vadd.f32 %v12896_v8, %v1743_v47  ;;  %v4688_v8 = vsel %vm14326_vm5, %v11733_v23, %v4687_v39  ;;  %v19129_v45 = vld [vmem:[#allocation25_spill] sm:$0xff] }
 0x154   : > { %v12849_v5 = vpop.f32.mrf.mxu0  ;;  %v11765_v24 = vcombine.low %v4688_v8, %v4691_v0  ;;  %v4704_v39 = vrot.slane %v19129_v45, 5 }
 0x155   : > { %v12900_v42 = vpop.f32.mrf.mxu1  ;;  %v1744_v62 = vadd.f32 %v12849_v5, %v19126_v61  ;;  %v15614_v26 = vadd.f32 %v2049_v32, %v1741_v52 }
 0x156   : > { %v15616_v27 = vpop.f32.mrf.mxu0 }
 0x157   : > { %v2065_v46 = vpop.f32.mrf.mxu1  ;;  %13135 = vmatmul.mubr.bf16.gmra.mxu0 %v11762_v13  ;;  %v15622_v25 = vadd.f32 %v12897_v17, %v1744_v62  ;;  %v11764_v13 = vcombine.low %v4681_v31, %v4684_v38  ;;  %v4703_v17 = vrot.slane %v4701_v44, 4  ;;  %v4695_v62 = vsel %vm14326_vm5, %v11734_v54, %v4694_v36  ;;  %v19131_v38 = vld [vmem:[#allocation27_spill] sm:$0xff] }
 0x158   : > { %13138 = vmatprep.mubr.bf16.mxu0 %v11763_v28  ;;  %v12852_v32 = vpop.f32.mrf.mxu0  ;;  %v19128_v28 = vld [vmem:[#allocation16_spill] sm:$0xff]  ;;  %v4708_v8 = vrot.slane %v19131_v38, 5 }
 0x159   : > { %v12901_v3 = vpop.f32.mrf.mxu1  ;;  %v1747_v47 = vadd.f32 %v12852_v32, %v19127_v59  ;;  %v4702_v32 = vsel %vm14326_vm5, %v11735_v63, %v4701_v44  ;;  %v11720_v59 = vld [vmem:[%s13933_s20 + $0xcc] sm:$0xe]  ;;  %v4711_v63 = vrot.slane %v15415_v56, 5 }
 0x15a   : > { %v1678_v7 = vpop.f32.mrf.mxu0 }
 0x15b   : > { %v15628_v4 = vpop.f32.mrf.mxu1  ;;  %v1745_v14 = vadd.f32 %v1678_v7, %v19128_v28  ;;  %v15632_v19 = vadd.f32 %v12900_v42, %v1747_v47  ;;  %v4698_v42 = vsel %vm14326_vm5, %v4696_v12, %v4697_v15  ;;  %v13712_v47 = vld [vmem:[%s19054_s3 + $0x78] sm:$0xff]   ;;  %v19132_v15 = vld [vmem:[#allocation22_spill] sm:$0xff]  ;;  %v4710_v28 = vrot.slane %v4708_v8, 4 }
 0x15c   : > { %v12853_v23 = vpop.f32.mrf.mxu0  ;;  %13150 = vmatprep.subr.bf16.mxu1 %v13712_v47 }
 0x15d   : > { %v12904_v60 = vpop.f32.mrf.mxu1  ;;  %v1748_v20 = vadd.f32 %v12853_v23, %v19130_v43  ;;  %v15636_v5 = vadd.f32 %v2065_v46, %v1745_v14  ;;  %v4705_v46 = vsel %vm14326_vm5, %v4703_v17, %v4704_v39  ;;  %13151 = vmatpush3.bf16.msra.mxu1 %v13712_v47  ;;  %v19133_v14 = vld [vmem:[#allocation24_spill] sm:$0xff]  ;;  %v19134_v43 = vld [vmem:[#allocation26_spill] sm:$0xff]  ;;  %v4712_v56 = vsel %vm14326_vm5, %v4710_v28, %v4711_v63 }
 0x15e   : > { %v15638_v61 = vpop.f32.mrf.mxu0  ;;  %v11767_v7 = vcombine.low %v4702_v32, %v4705_v46 }
 0x15f   : > { %v2081_v52 = vpop.f32.mrf.mxu1  ;;  %13139 = vmatmul.mubr.bf16.gmra.mxu0 %v11764_v13  ;;  %v15645_v0 = vadd.f32 %v12901_v3, %v1748_v20  ;;  %v11766_v13 = vcombine.low %v4695_v62, %v4698_v42 }
 0x160   : > { %13142 = vmatprep.mubr.bf16.mxu0 %v11765_v24  ;;  %v12856_v36 = vpop.f32.mrf.mxu0  ;;  %v11736_v24 = vrot.slane %v11720_v59, 9 }
 0x161   : > { %v12905_v31 = vpop.f32.mrf.mxu1  ;;  %v1751_v12 = vadd.f32 %v12856_v36, %v19132_v15 }
 0x162   : > { %v1694_v3 = vpop.f32.mrf.mxu0  ;;  %v4709_v42 = vsel %vm14326_vm5, %v11736_v24, %v4708_v8 }
 0x163   : > { %v15655_v54 = vpop.f32.mrf.mxu1  ;;  %v1749_v17 = vadd.f32 %v1694_v3, %v19133_v14  ;;  %v15660_v45 = vadd.f32 %v12904_v60, %v1751_v12  ;;  %v11768_v36 = vcombine.low %v4709_v42, %v4712_v56 }
 0x164   : > { %v12857_v39 = vpop.f32.mrf.mxu0 }
 0x165   : > { %v12908_v44 = vpop.f32.mrf.mxu1  ;;  %v1752_v20 = vadd.f32 %v12857_v39, %v19134_v43  ;;  %v15663_v38 = vadd.f32 %v2081_v52, %v1749_v17  ;;  %v13713_v52 = vld [vmem:[%s19054_s3 + $0x70] sm:$0xff]  }
 0x166   : > { %v15665_v62 = vpop.f32.mrf.mxu0  ;;  %13152 = vmatprep.subr.bf16.mxu1 %v13713_v52 }
 0x167   : > { %v2097_v23 = vpop.f32.mrf.mxu1  ;;  %13143 = vmatmul.mubr.bf16.gmra.mxu0 %v11766_v13  ;;  %v15671_v46 = vadd.f32 %v12905_v31, %v1752_v20  ;;  %13153 = vmatpush3.bf16.msra.mxu1 %v13713_v52 }
 0x168   : > { %13146 = vmatprep.mubr.bf16.mxu0 %v11767_v7  ;;  %v12860_v60 = vpop.f32.mrf.mxu0 }
 0x169   : > { %v12909_v32 = vpop.f32.mrf.mxu1  ;;  %v1755_v47 = vadd.f32 %v12860_v60, %v15424_v48 }
 0x16a   : > { %v1710_v15 = vpop.f32.mrf.mxu0 }
 0x16b   : > { %v15673_v59 = vpop.f32.mrf.mxu1  ;;  %v1753_v8 = vadd.f32 %v1710_v15, %v15429_v22  ;;  %v15682_v13 = vadd.f32 %v12908_v44, %v1755_v47 }
 0x16c   : > { %v12861_v31 = vpop.f32.mrf.mxu0 }
 0x16d   : > { %v15679_v12 = vpop.f32.mrf.mxu1  ;;  %v1756_v48 = vadd.f32 %v12861_v31, %v15435_v51  ;;  %v15687_v7 = vadd.f32 %v2097_v23, %v1753_v8  ;;  %v13714_v51 = vld [vmem:[%s19054_s3 + $0x68] sm:$0xff]   ;;  %v13858_v31 = vmov 0  }
 0x16e   : > { %v15689_v24 = vpop.f32.mrf.mxu0  ;;  %13154 = vmatprep.subr.bf16.mxu1 %v13714_v51  ;;  %5112 = vst [vmem:[#allocation2 + $0x18] sm:$0xf] %v13858_v31  ;;  %5106 = vst [vmem:[#allocation2] sm:$0xf] %v13858_v31 }
 0x16f   : > { %v15684_v3 = vpop.f32.mrf.mxu1  ;;  %13147 = vmatmul.mubr.bf16.gmra.mxu0 %v11768_v36  ;;  %v15693_v63 = vadd.f32 %v12909_v32, %v1756_v48  ;;  %13155 = vmatpush3.bf16.msra.mxu1 %v13714_v51  ;;  %5107 = vst [vmem:[#allocation2 + $0x4] sm:$0xf] %v13858_v31  ;;  %5108 = vst [vmem:[#allocation2 + $0x8] sm:$0x1] %v13858_v31 }
 0x170   : > { %v12928_v14 = vpop.f32.mrf.mxu0  ;;  %5109 = vst [vmem:[#allocation2 + $0xc] sm:$0xf] %v13858_v31  ;;  %5110 = vst [vmem:[#allocation2 + $0x10] sm:$0xf] %v13858_v31 }
 0x171   : > { %v15691_v28 = vpop.f32.mrf.mxu1  ;;  %v15698_v44 = vadd.f32 %v12928_v14, %v15469_v16  ;;  %5111 = vst [vmem:[#allocation2 + $0x14] sm:$0x1] %v13858_v31  ;;  %5113 = vst [vmem:[#allocation2 + $0x1c] sm:$0xf] %v13858_v31 }
 0x172   : > { %v2739_v17 = vpop.f32.mrf.mxu0  ;;  %5114 = vst [vmem:[#allocation2 + $0x20] sm:$0x1] %v13858_v31  ;;  %5115 = vst [vmem:[#allocation2 + $0x24] sm:$0xf] %v13858_v31 }
 0x173   : > { %v15695_v22 = vpop.f32.mrf.mxu1  ;;  %v15703_v43 = vadd.f32 %v2739_v17, %v15476_v41  ;;  %v13715_v41 = vld [vmem:[%s19054_s3 + $0x38] sm:$0xff]   ;;  %5116 = vst [vmem:[#allocation2 + $0x28] sm:$0xf] %v13858_v31  ;;  %5117 = vst [vmem:[#allocation2 + $0x2c] sm:$0x1] %v13858_v31 }
 0x174   : > { %19135 = vst [vmem:[#allocation5_spill] sm:$0xff] %v15695_v22  ;;  %v12929_v23 = vpop.f32.mrf.mxu0  ;;  %13198 = vmatprep.subr.bf16.mxu0 %v13715_v41  ;;  %5118 = vst [vmem:[#allocation2 + $0x30] sm:$0xf] %v13858_v31 }
 0x175   : > { %v15700_v39 = vpop.f32.mrf.mxu1  ;;  %v15711_v42 = vadd.f32 %v12929_v23, %v15489_v58  ;;  %13199 = vmatpush3.bf16.msra.mxu0 %v13715_v41  ;;  %5119 = vst [vmem:[#allocation2 + $0x34] sm:$0xf] %v13858_v31  ;;  %5120 = vst [vmem:[#allocation2 + $0x38] sm:$0x1] %v13858_v31 }
 0x176   : > { %19136 = vst [vmem:[#allocation13_spill] sm:$0xff] %v15700_v39  ;;  %v15713_v56 = vpop.f32.mrf.mxu0  ;;  %5121 = vst [vmem:[#allocation2 + $0x3c] sm:$0xf] %v13858_v31  ;;  %v5745_v22 = vld [vmem:[#allocation2 + $0x8] sm:$0x1] }
 0x177   : > { %v15708_v20 = vpop.f32.mrf.mxu1  ;;  %5122 = vst [vmem:[#allocation2 + $0x40] sm:$0xf] %v13858_v31  ;;  %5123 = vst [vmem:[#allocation2 + $0x44] sm:$0x1] %v13858_v31 }
 0x178   : > { %19137 = vst [vmem:[#allocation6_spill] sm:$0xff] %v15708_v20  ;;  %v12932_v32 = vpop.f32.mrf.mxu0  ;;  %5124 = vst [vmem:[#allocation2 + $0x48] sm:$0xf] %v13858_v31 }
 0x179   : > { %v15715_v16 = vpop.f32.mrf.mxu1  ;;  %v15723_v47 = vadd.f32 %v12932_v32, %v15506_v34  ;;  %5125 = vst [vmem:[#allocation2 + $0x4c] sm:$0xf] %v13858_v31  ;;  %5126 = vst [vmem:[#allocation2 + $0x50] sm:$0x1] %v13858_v31  ;;  %v13717_v34 = vld [vmem:[%s19054_s3 + $0x30] sm:$0xff]   ;;  %v13718_v32 = vld [vmem:[%s19054_s3 + $0x28] sm:$0xff]  }
 0x17a   : > { %v2755_v36 = vpop.f32.mrf.mxu0  ;;  %5127 = vst [vmem:[#allocation2 + $0x54] sm:$0xf] %v13858_v31  ;;  %5128 = vst [vmem:[#allocation2 + $0x58] sm:$0xf] %v13858_v31  ;;  %13200 = vmatprep.subr.bf16.mxu0 %v13717_v34 }
 0x17b   : > { %v15717_v60 = vpop.f32.mrf.mxu1  ;;  %19139 = vst [vmem:[#allocation7_spill] sm:$0xff] %v15723_v47  ;;  %v15728_v58 = vadd.f32 %v2755_v36, %v15516_v55  ;;  %5129 = vst [vmem:[#allocation2 + $0x5c] sm:$0x1] %v13858_v31  ;;  %13201 = vmatpush3.bf16.msra.mxu0 %v13717_v34 }
 0x17c   : > { %19138 = vst [vmem:[#allocation15_spill] sm:$0xff] %v15717_v60  ;;  %v12933_v15 = vpop.f32.mrf.mxu0  ;;  %5130 = vst [vmem:[#allocation2 + $0x60] sm:$0xf] %v13858_v31  ;;  %13202 = vmatprep.subr.bf16.mxu0 %v13718_v32 }
 0x17d   : > { %v15725_v52 = vpop.f32.mrf.mxu1  ;;  %19140 = vst [vmem:[#allocation20_spill] sm:$0xff] %v15728_v58  ;;  %5131 = vst [vmem:[#allocation2 + $0x64] sm:$0xf] %v13858_v31  ;;  %v2873_v55 = vadd.f32 %v12933_v15, %v15526_v35 }
 0x17e   : > { %5132 = vst [vmem:[#allocation2 + $0x68] sm:$0x1] %v13858_v31  ;;  %5133 = vst [vmem:[#allocation2 + $0x6c] sm:$0xf] %v13858_v31  ;;  %v15736_v48 = vpop.f32.mrf.mxu0 }
 0x17f   : > { %v15730_v8 = vpop.f32.mrf.mxu1  ;;  %5134 = vst [vmem:[#allocation2 + $0x70] sm:$0xf] %v13858_v31  ;;  %5135 = vst [vmem:[#allocation2 + $0x74] sm:$0x1] %v13858_v31  ;;  %v15739_v17 = vadd.f32 %v15715_v16, %v2873_v55  ;;  %13203 = vmatpush3.bf16.msra.mxu0 %v13718_v32  ;;  %v13720_v55 = vld [vmem:[%s19054_s3 + $0x20] sm:$0xff]  }
 0x180   : > { %5136 = vst [vmem:[#allocation2 + $0x78] sm:$0xf] %v13858_v31  ;;  %5137 = vst [vmem:[#allocation2 + $0x7c] sm:$0xf] %v13858_v31  ;;  %v12936_v51 = vpop.f32.mrf.mxu0  ;;  %13204 = vmatprep.subr.bf16.mxu0 %v13720_v55 }
 0x181   : > { %5138 = vst [vmem:[#allocation2 + $0x80] sm:$0x1] %v13858_v31  ;;  %5139 = vst [vmem:[#allocation2 + $0x84] sm:$0xf] %v13858_v31  ;;  %v12985_v14 = vpop.f32.mrf.mxu1  ;;  %v2876_v41 = vadd.f32 %v12936_v51, %v15542_v9  ;;  %v13716_v9 = vld [vmem:[%s19054_s3 + $0x60] sm:$0xff]  }
 0x182   : > { %5140 = vst [vmem:[#allocation2 + $0x88] sm:$0xf] %v13858_v31  ;;  %5141 = vst [vmem:[#allocation2 + $0x8c] sm:$0x1] %v13858_v31  ;;  %v2771_v36 = vpop.f32.mrf.mxu0  ;;  %13156 = vmatprep.subr.bf16.mxu1 %v13716_v9 }
 0x183   : > { %5142 = vst [vmem:[#allocation2 + $0x90] sm:$0xf] %v13858_v31  ;;  %5143 = vst [vmem:[#allocation2 + $0x94] sm:$0xf] %v13858_v31  ;;  %v15741_v23 = vpop.f32.mrf.mxu1  ;;  %v2874_v35 = vadd.f32 %v2771_v36, %v15548_v33  ;;  %v15749_v15 = vadd.f32 %v15725_v52, %v2876_v41  ;;  %13205 = vmatpush3.bf16.msra.mxu0 %v13720_v55  ;;  %13157 = vmatpush3.bf16.msra.mxu1 %v13716_v9  ;;  %v13723_v9 = vld [vmem:[%s19054_s3 + $0x10] sm:$0xff]  }
 0x184   : > { %5144 = vst [vmem:[#allocation2 + $0x98] sm:$0x1] %v13858_v31  ;;  %5145 = vst [vmem:[#allocation2 + $0x9c] sm:$0xf] %v13858_v31  ;;  %v12937_v16 = vpop.f32.mrf.mxu0 }
 0x185   : > { %5146 = vst [vmem:[#allocation2 + $0xa0] sm:$0xf] %v13858_v31  ;;  %5147 = vst [vmem:[#allocation2 + $0xa4] sm:$0x1] %v13858_v31  ;;  %v2877_v50 = vadd.f32 %v12937_v16, %v15561_v49  ;;  %v13721_v49 = vld [vmem:[%s19054_s3 + $0x18] sm:$0xff]  }
 0x186   : > { %5148 = vst [vmem:[#allocation2 + $0xa8] sm:$0xf] %v13858_v31  ;;  %5149 = vst [vmem:[#allocation2 + $0xac] sm:$0xf] %v13858_v31  ;;  %v15761_v33 = vpop.f32.mrf.mxu0  ;;  %13206 = vmatprep.subr.bf16.mxu0 %v13721_v49 }
 0x187   : > { %5150 = vst [vmem:[#allocation2 + $0xb0] sm:$0x1] %v13858_v31  ;;  %5151 = vst [vmem:[#allocation2 + $0xb4] sm:$0xf] %v13858_v31  ;;  %v15763_v51 = vadd.f32 %v12985_v14, %v2877_v50  ;;  %13207 = vmatpush3.bf16.msra.mxu0 %v13721_v49 }
 0x188   : > { %5152 = vst [vmem:[#allocation2 + $0xb8] sm:$0xf] %v13858_v31  ;;  %5153 = vst [vmem:[#allocation2 + $0xbc] sm:$0x1] %v13858_v31  ;;  %v12940_v32 = vpop.f32.mrf.mxu0  ;;  %13208 = vmatprep.subr.bf16.mxu0 %v13723_v9 }
 0x189   : > { %5154 = vst [vmem:[#allocation2 + $0xc0] sm:$0xf] %v13858_v31  ;;  %5155 = vst [vmem:[#allocation2 + $0xc4] sm:$0xf] %v13858_v31 }
 0x18a   : > { %5156 = vst [vmem:[#allocation2 + $0xc8] sm:$0x1] %v13858_v31  ;;  %5157 = vst [vmem:[#allocation2 + $0xcc] sm:$0xf] %v13858_v31  ;;  %v2787_v36 = vpop.f32.mrf.mxu0 }
 0x18b   : > { %5158 = vst [vmem:[#allocation2 + $0xd0] sm:$0xf] %v13858_v31  ;;  %5159 = vst [vmem:[#allocation2 + $0xd4] sm:$0x1] %v13858_v31  ;;  %v12988_v31 = vpop.f32.mrf.mxu1  ;;  %v2878_v16 = vadd.f32 %v2787_v36, %v15589_v18  ;;  %v13719_v18 = vld [vmem:[%s19054_s3 + $0x58] sm:$0xff]   ;;  %13209 = vmatpush3.bf16.msra.mxu0 %v13723_v9 }
 0x18c   : > { %19141 = vst [vmem:[#allocation21_spill] sm:$0xff] %v15741_v23  ;;  %v15756_v23 = vadd.f32 %v15730_v8, %v2874_v35  ;;  %19142 = vst [vmem:[#allocation8_spill] sm:$0xff] %v15761_v33  ;;  %v2880_v8 = vadd.f32 %v12940_v32, %v15581_v10  ;;  %v12941_v50 = vpop.f32.mrf.mxu0  ;;  %13158 = vmatprep.subr.bf16.mxu1 %v13719_v18 }
 0x18d   : > { %v3285_v34 = vpop.f32.mrf.mxu1  ;;  %v2881_v55 = vadd.f32 %v12941_v50, %v15602_v1  ;;  %13159 = vmatpush3.bf16.msra.mxu1 %v13719_v18 }
 0x18e   : > { %v15772_v60 = vadd.f32 %v12988_v31, %v2880_v8  ;;  %v15780_v20 = vpop.f32.mrf.mxu0 }
 0x18f   : > { %v12989_v52 = vpop.f32.mrf.mxu1  ;;  %19144 = vst [vmem:[#allocation11_spill] sm:$0xff] %v15780_v20 }
 0x190   : > { %v15785_v31 = vadd.f32 %v12989_v52, %v2881_v55  ;;  %v12944_v32 = vpop.f32.mrf.mxu0  ;;  %v13724_v52 = vld [vmem:[%s19054_s3 + $0x8] sm:$0xff]  }
 0x191   : > { %v15765_v41 = vpop.f32.mrf.mxu1  ;;  %v2884_v1 = vadd.f32 %v12944_v32, %v15611_v40  ;;  %v13722_v40 = vld [vmem:[%s19054_s3 + $0x50] sm:$0xff]   ;;  %13210 = vmatprep.subr.bf16.mxu0 %v13724_v52 }
 0x192   : > { %19143 = vst [vmem:[#allocation9_spill] sm:$0xff] %v15765_v41  ;;  %v15775_v41 = vadd.f32 %v3285_v34, %v2878_v16  ;;  %v2803_v34 = vpop.f32.mrf.mxu0  ;;  %13160 = vmatprep.subr.bf16.mxu1 %v13722_v40  ;;  %13211 = vmatpush3.bf16.msra.mxu0 %v13724_v52  ;;  %v5698_v52 = vld [vmem:[#allocation2 + $0x4] sm:$0xf] }
 0x193   : > { %v12992_v35 = vpop.f32.mrf.mxu1  ;;  %v2882_v36 = vadd.f32 %v2803_v34, %v15614_v26  ;;  %13161 = vmatpush3.bf16.msra.mxu1 %v13722_v40 }
 0x194   : > { %v15791_v16 = vadd.f32 %v12992_v35, %v2884_v1  ;;  %v12945_v50 = vpop.f32.mrf.mxu0 }
 0x195   : > { %v3301_v14 = vpop.f32.mrf.mxu1  ;;  %v2885_v55 = vadd.f32 %v12945_v50, %v15622_v25  ;;  %v13726_v25 = vld [vmem:[%s19054_s3] sm:$0xff]  }
 0x196   : > { %v15802_v9 = vpop.f32.mrf.mxu0  ;;  %13212 = vmatprep.subr.bf16.mxu0 %v13726_v25 }
 0x197   : > { %v12993_v10 = vpop.f32.mrf.mxu1  ;;  %19146 = vst [vmem:[#allocation16_spill] sm:$0xff] %v15802_v9  ;;  %13213 = vmatpush3.bf16.msra.mxu0 %v13726_v25 }
 0x198   : > { %v15804_v26 = vadd.f32 %v12993_v10, %v2885_v55  ;;  %v12948_v35 = vpop.f32.mrf.mxu0  ;;  %v5697_v10 = vld [vmem:[#allocation2] sm:$0xf] }
 0x199   : > { %v15787_v49 = vpop.f32.mrf.mxu1  ;;  %v5765_v33 = vshll.u32 %v5697_v10, 16 }
 0x19a   : > { %19145 = vst [vmem:[#allocation14_spill] sm:$0xff] %v15787_v49  ;;  %v15797_v49 = vadd.f32 %v3301_v14, %v2882_v36  ;;  %v2888_v14 = vadd.f32 %v12948_v35, %v15632_v19  ;;  %v2819_v1 = vpop.f32.mrf.mxu0  ;;  %v13725_v19 = vld [vmem:[%s19054_s3 + $0x48] sm:$0xff]  }
 0x19b   : > { %v12996_v8 = vpop.f32.mrf.mxu1  ;;  %v2886_v36 = vadd.f32 %v2819_v1, %v15636_v5  ;;  %13162 = vmatprep.subr.bf16.mxu1 %v13725_v19 }
 0x19c   : > { %v15813_v50 = vadd.f32 %v12996_v8, %v2888_v14  ;;  %v12949_v55 = vpop.f32.mrf.mxu0  ;;  %13163 = vmatpush3.bf16.msra.mxu1 %v13725_v19 }
 0x19d   : > { %v3317_v58 = vpop.f32.mrf.mxu1  ;;  %v2889_v40 = vadd.f32 %v12949_v55, %v15645_v0 }
 0x19e   : > { %v15816_v20 = vadd.f32 %v3317_v58, %v2886_v36  ;;  %v15821_v35 = vpop.f32.mrf.mxu0 }
 0x19f   : > { %v12997_v18 = vpop.f32.mrf.mxu1  ;;  %19148 = vst [vmem:[#allocation18_spill] sm:$0xff] %v15821_v35 }
 0x1a0   : > { %v15823_v5 = vadd.f32 %v12997_v18, %v2889_v40  ;;  %v12952_v8 = vpop.f32.mrf.mxu0 }
 0x1a1   : > { %v15806_v32 = vpop.f32.mrf.mxu1  ;;  %v2892_v25 = vadd.f32 %v12952_v8, %v15660_v45  ;;  %v5762_v45 = vshrl.u32 %v5697_v10, 16 }
 0x1a2   : > { %19147 = vst [vmem:[#allocation25_spill] sm:$0xff] %v15806_v32  ;;  %v11850_v32 = vcombine.low %v5697_v10, %v5698_v52  ;;  %v2835_v0 = vpop.f32.mrf.mxu0  ;;  %v5767_v10 = vrot.slane %v5765_v33, 5 }
 0x1a3   : > { %v13000_v34 = vpop.f32.mrf.mxu1  ;;  %v2890_v58 = vadd.f32 %v2835_v0, %v15663_v38  ;;  %v13729_v38 = vld [vmem:[%s19054_s3 + $0x40] sm:$0xff]  }
 0x1a4   : > { %13214 = vmatprep.mubr.bf16.mxu0 %v11850_v32  ;;  %v15829_v1 = vadd.f32 %v13000_v34, %v2892_v25  ;;  %v12953_v36 = vpop.f32.mrf.mxu0  ;;  %v5775_v25 = vshrl.u32 %v5698_v52, 16  ;;  %13164 = vmatprep.subr.bf16.mxu1 %v13729_v38 }
 0x1a5   : > { %v3333_v9 = vpop.f32.mrf.mxu1  ;;  %v2893_v55 = vadd.f32 %v12953_v36, %v15671_v46  ;;  %13165 = vmatpush3.bf16.msra.mxu1 %v13729_v38  ;;  %v5771_v36 = vshll.u32 %v5698_v52, 16 }
 0x1a6   : > { %v15832_v35 = vadd.f32 %v3333_v9, %v2890_v58  ;;  %v15834_v18 = vpop.f32.mrf.mxu0  ;;  %v5764_v58 = vrot.slane %v5762_v45, 4 }
 0x1a7   : > { %v13001_v39 = vpop.f32.mrf.mxu1  ;;  %19150 = vst [vmem:[#allocation22_spill] sm:$0xff] %v15834_v18 }
 0x1a8   : > { %v15836_v40 = vadd.f32 %v13001_v39, %v2893_v55  ;;  %v12956_v47 = vpop.f32.mrf.mxu0 }
 0x1a9   : > { %v15826_v14 = vpop.f32.mrf.mxu1  ;;  %v2896_v8 = vadd.f32 %v12956_v47, %v15682_v13 }
 0x1aa   : > { %19149 = vst [vmem:[#allocation27_spill] sm:$0xff] %v15826_v14  ;;  %v2851_v34 = vpop.f32.mrf.mxu0 }
 0x1ab   : > { %v13004_v32 = vpop.f32.mrf.mxu1  ;;  %v2894_v46 = vadd.f32 %v2851_v34, %v15687_v7  ;;  %v5773_v7 = vrot.slane %v5771_v36, 5 }
 0x1ac   : > { %v15843_v9 = vadd.f32 %v13004_v32, %v2896_v8  ;;  %v12957_v39 = vpop.f32.mrf.mxu0  ;;  %v5777_v32 = vrot.slane %v5775_v25, 4 }
 0x1ad   : > { %v3349_v19 = vpop.f32.mrf.mxu1  ;;  %v2897_v13 = vadd.f32 %v12957_v39, %v15693_v63 }
 0x1ae   : > { %v15848_v47 = vadd.f32 %v3349_v19, %v2894_v46  ;;  %v15850_v55 = vpop.f32.mrf.mxu0  ;;  %v5778_v45 = vor.u32 %v5777_v32, %v5773_v7  ;;  %v5781_v19 = vshll.u32 %v5745_v22, 16 }
 0x1af   : > { %v13005_v14 = vpop.f32.mrf.mxu1 }
 0x1b0   : > { %v15852_v18 = vadd.f32 %v13005_v14, %v2897_v13  ;;  %v15854_v8 = vpop.f32.mrf.mxu0  ;;  %v5779_v52 = vrot.slane %v5778_v45, 4  ;;  %v5783_v39 = vrot.slane %v5781_v19, 5 }
 0x1b1   : > { %v15845_v0 = vpop.f32.mrf.mxu1 }
 0x1b2   : > { %19151 = vst [vmem:[#allocation24_spill] sm:$0xff] %v15845_v0  ;;  %v5768_v0 = vor.u32 %v5767_v10, %v5764_v58  ;;  %v15858_v38 = vpop.f32.mrf.mxu0  ;;  %v5784_v58 = vsel %vm13974_vm2, %v5779_v52, %v5783_v39  ;;  %v13733_v52 = vld [vmem:[%s19054_s3 + $0xb8] sm:$0xff]  }
 0x1b3   : > { %v15856_v34 = vpop.f32.mrf.mxu1  ;;  %13246 = vmatprep.subr.bf16.mxu1 %v13733_v52 }
 0x1b4   : > { %v5769_v33 = vrot.slane %v5768_v0, 4  ;;  %v15862_v46 = vpop.f32.mrf.mxu0 }
 0x1b5   : > { %v15860_v63 = vpop.f32.mrf.mxu1 }
 0x1b6   : > { %v5774_v25 = vsel %vm13974_vm2, %v5769_v33, %v5773_v7  ;;  %v15868_v13 = vpop.f32.mrf.mxu0 }
 0x1b7   : > { %v15864_v14 = vpop.f32.mrf.mxu1  ;;  %v11826_v36 = vcombine.low %v5774_v25, %v5784_v58 }
 0x1b8   : > { %v15874_v32 = vpop.f32.mrf.mxu0 }
 0x1b9   : > { %v15872_v10 = vpop.f32.mrf.mxu1  ;;  %13166 = vmatprep.mubr.bf16.mxu1 %v11826_v36 }
 0x1ba   : > { %19152 = vst [vmem:[#allocation26_spill] sm:$0xff] %v15872_v10  ;;  %v15876_v22 = vpop.f32.mrf.mxu0 }
 0x1bb   : > { %v15878_v0 = vpop.f32.mrf.mxu1 }
 0x1bc   : > { %19153 = vst [vmem:[#allocation32_spill] sm:$0xff] %v15878_v0  ;;  %v13029_v45 = vpop.f32.mrf.mxu0 }
 0x1bd   : > { %v15881_v19 = vadd.f32 %v13029_v45, %v15739_v17  ;;  %v15883_v7 = vpop.f32.mrf.mxu1 }
 0x1be   : > { %19155 = vst [vmem:[#allocation34_spill] sm:$0xff] %v15883_v7  ;;  %v15885_v33 = vpop.f32.mrf.mxu0 }
 0x1bf   : > { %19154 = vst [vmem:[#allocation33_spill] sm:$0xff] %v15881_v19  ;;  %v15890_v39 = vpop.f32.mrf.mxu1 }
 0x1c0   : > { %19156 = vst [vmem:[#allocation35_spill] sm:$0xff] %v15890_v39  ;;  %v13032_v25 = vpop.f32.mrf.mxu0 }
 0x1c1   : > { %v15893_v58 = vadd.f32 %v13032_v25, %v15749_v15  ;;  %v15895_v36 = vpop.f32.mrf.mxu1 }
 0x1c2   : > { %v3656_v37 = vpop.f32.mrf.mxu0 }
 0x1c3   : > { %19157 = vst [vmem:[#allocation36_spill] sm:$0xff] %v15893_v58  ;;  %v15898_v17 = vadd.f32 %v3656_v37, %v15756_v23  ;;  %v15900_v19 = vpop.f32.mrf.mxu1 }
 0x1c4   : > { %v13033_v45 = vpop.f32.mrf.mxu0 }
 0x1c5   : > { %v15903_v7 = vadd.f32 %v13033_v45, %v15763_v51  ;;  %v15907_v39 = vpop.f32.mrf.mxu1 }
 0x1c6   : > { %v15905_v0 = vpop.f32.mrf.mxu0  ;;  %19159 = vst [vmem:[#allocation38_spill] sm:$0xff] %v15907_v39 }
 0x1c7   : > { %19158 = vst [vmem:[#allocation37_spill] sm:$0xff] %v15903_v7  ;;  %v15909_v10 = vpop.f32.mrf.mxu1 }
 0x1c8   : > { %v13036_v52 = vpop.f32.mrf.mxu0  ;;  %19160 = vst [vmem:[#allocation39_spill] sm:$0xff] %v15909_v10 }
 0x1c9   : > { %v15912_v15 = vadd.f32 %v13036_v52, %v15772_v60  ;;  %v15914_v58 = vpop.f32.mrf.mxu1 }
 0x1ca   : > { %v3672_v25 = vpop.f32.mrf.mxu0 }
 0x1cb   : > { %19161 = vst [vmem:[#allocation40_spill] sm:$0xff] %v15912_v15  ;;  %v15917_v37 = vadd.f32 %v3672_v25, %v15775_v41 }
 0x1cc   : > { %v13037_v23 = vpop.f32.mrf.mxu0  ;;  %v15922_v45 = vpop.f32.mrf.mxu1 }
 0x1cd   : > { %19162 = vst [vmem:[#allocation41_spill] sm:$0xff] %v15917_v37  ;;  %v15920_v51 = vadd.f32 %v13037_v23, %v15785_v31 }
 0x1ce   : > { %v15924_v7 = vpop.f32.mrf.mxu0  ;;  %v15926_v39 = vpop.f32.mrf.mxu1 }
 0x1cf   : > { %19163 = vst [vmem:[#allocation42_spill] sm:$0xff] %v15920_v51  ;;  %19164 = vst [vmem:[#allocation43_spill] sm:$0xff] %v15926_v39 }
 0x1d0   : > { %v13040_v10 = vpop.f32.mrf.mxu0  ;;  %v15931_v52 = vpop.f32.mrf.mxu1 }
 0x1d1   : > { %v15929_v60 = vadd.f32 %v13040_v10, %v15791_v16  ;;  %19166 = vst [vmem:[#allocation45_spill] sm:$0xff] %v15931_v52 }
 0x1d2   : > { %v3688_v15 = vpop.f32.mrf.mxu0  ;;  %v15936_v25 = vpop.f32.mrf.mxu1 }
 0x1d3   : > { %19165 = vst [vmem:[#allocation44_spill] sm:$0xff] %v15929_v60  ;;  %v15934_v41 = vadd.f32 %v3688_v15, %v15797_v49  ;;  %19168 = vst [vmem:[#allocation47_spill] sm:$0xff] %v15936_v25 }
 0x1d4   : > { %v13041_v31 = vpop.f32.mrf.mxu0 }
 0x1d5   : > { %19167 = vst [vmem:[#allocation46_spill] sm:$0xff] %v15934_v41  ;;  %v15939_v23 = vadd.f32 %v13041_v31, %v15804_v26 }
 0x1d6   : > { %v15941_v51 = vpop.f32.mrf.mxu0 }
 0x1d7   : > { %19169 = vst [vmem:[#allocation48_spill] sm:$0xff] %v15939_v23  ;;  %v15943_v37 = vpop.f32.mrf.mxu1 }
 0x1d8   : > { %19170 = vst [vmem:[#allocation49_spill] sm:$0xff] %v15943_v37  ;;  %v13044_v39 = vpop.f32.mrf.mxu0 }
 0x1d9   : > { %v15946_v16 = vadd.f32 %v13044_v39, %v15813_v50  ;;  %v15948_v10 = vpop.f32.mrf.mxu1 }
 0x1da   : > { %19172 = vst [vmem:[#allocation51_spill] sm:$0xff] %v15948_v10  ;;  %v3704_v60 = vpop.f32.mrf.mxu0  ;;  %v19182_v10 = vld [vmem:[#allocation19_spill] sm:$0xff] }
 0x1db   : > { %19171 = vst [vmem:[#allocation50_spill] sm:$0xff] %v15946_v16  ;;  %v15951_v49 = vadd.f32 %v3704_v60, %v15816_v20  ;;  %v15953_v15 = vpop.f32.mrf.mxu1  ;;  %v19180_v60 = vld [vmem:[#allocation12_spill] sm:$0xff] }
 0x1dc   : > { %19174 = vst [vmem:[#allocation53_spill] sm:$0xff] %v15953_v15  ;;  %v13045_v41 = vpop.f32.mrf.mxu0 }
 0x1dd   : > { %19173 = vst [vmem:[#allocation52_spill] sm:$0xff] %v15951_v49  ;;  %v15956_v26 = vadd.f32 %v13045_v41, %v15823_v5  ;;  %v15958_v31 = vpop.f32.mrf.mxu1  ;;  %v19181_v49 = vld [vmem:[#allocation10_spill] sm:$0xff]  ;;  %v19183_v5 = vld [vmem:[#allocation17_spill] sm:$0xff] }
 0x1de   : > { %19176 = vst [vmem:[#allocation55_spill] sm:$0xff] %v15958_v31  ;;  %v15960_v23 = vpop.f32.mrf.mxu0  ;;  %v1213_v15 = vadd.f32 %v19181_v49, %v19180_v60  ;;  %v1229_v41 = vadd.f32 %v19183_v5, %v19182_v10  ;;  %v19185_v31 = vld [vmem:[#allocation23_spill] sm:$0xff] }
 0x1df   : > { %19175 = vst [vmem:[#allocation54_spill] sm:$0xff] %v15956_v26  ;;  %19177 = vst [vmem:[#allocation56_spill] sm:$0xff] %v15960_v23  ;;  %v15965_v39 = vpop.f32.mrf.mxu1  ;;  %v19184_v26 = vld [vmem:[#allocation28_spill] sm:$0xff] }
 0x1e0   : > { %v13048_v37 = vpop.f32.mrf.mxu0  ;;  %19179 = vst [vmem:[#allocation58_spill] sm:$0xff] %v15965_v39  ;;  %v1245_v25 = vadd.f32 %v19185_v31, %v19184_v26  ;;  %v1742_v49 = vadd.f32 %v15616_v27, %v1213_v15  ;;  %v1746_v60 = vadd.f32 %v15638_v61, %v1229_v41  ;;  %v2121_v27 = vadd.f32 %v15532_v21, %v15559_v57 }
 0x1e1   : > { %v15963_v50 = vadd.f32 %v13048_v37, %v15829_v1  ;;  %v15976_v23 = vpop.f32.mrf.mxu1  ;;  %v19186_v1 = vld [vmem:[#allocation30_spill] sm:$0xff]  ;;  %v19187_v37 = vld [vmem:[#allocation29_spill] sm:$0xff]  ;;  %v3364_v57 = vadd.f32 %v15684_v3, %v15703_v43  ;;  %v19195_v3 = vld [vmem:[#allocation20_spill] sm:$0xff] }
 0x1e2   : > { %v3720_v16 = vpop.f32.mrf.mxu0  ;;  %v1750_v10 = vadd.f32 %v15665_v62, %v1245_v25  ;;  %v2125_v62 = vadd.f32 %v15568_v29, %v15600_v2  ;;  %v3367_v29 = vadd.f32 %v15691_v28, %v15711_v42  ;;  %v19189_v2 = vld [vmem:[#allocation5_spill] sm:$0xff]  ;;  %v19196_v43 = vld [vmem:[#allocation6_spill] sm:$0xff] }
 0x1e3   : > { %19178 = vst [vmem:[#allocation57_spill] sm:$0xff] %v15963_v50  ;;  %v15968_v20 = vadd.f32 %v3720_v16, %v15832_v35  ;;  %v1261_v50 = vadd.f32 %v19187_v37, %v19186_v1  ;;  %v19188_v35 = vld [vmem:[#allocation31_spill] sm:$0xff]  ;;  %v15988_v5 = vpop.f32.mrf.mxu1  ;;  %v3368_v28 = vadd.f32 %v19196_v43, %v19195_v3  ;;  %v19197_v42 = vld [vmem:[#allocation18_spill] sm:$0xff]  ;;  %v19209_v43 = vld [vmem:[#allocation33_spill] sm:$0xff] }
 0x1e4   : > { %v13049_v52 = vpop.f32.mrf.mxu0  ;;  %v2113_v16 = vadd.f32 %v19188_v35, %v15487_v11  ;;  %v2117_v11 = vadd.f32 %v15495_v6, %v15524_v53  ;;  %v3366_v6 = vadd.f32 %v15679_v12, %v15698_v44  ;;  %v19192_v12 = vld [vmem:[#allocation13_spill] sm:$0xff] }
 0x1e5   : > { %v15981_v39 = vadd.f32 %v13049_v52, %v15836_v40  ;;  %v1754_v31 = vadd.f32 %v15689_v24, %v1261_v50  ;;  %v15994_v37 = vpop.f32.mrf.mxu1  ;;  %v2129_v52 = vadd.f32 %v15606_v30, %v1742_v49  ;;  %v2133_v24 = vadd.f32 %v15628_v4, %v1746_v60  ;;  %v19190_v4 = vld [vmem:[#allocation8_spill] sm:$0xff]  ;;  %v19191_v50 = vld [vmem:[#allocation7_spill] sm:$0xff]  ;;  %v19198_v60 = vld [vmem:[#allocation22_spill] sm:$0xff] }
 0x1e6   : > { %v15990_v26 = vpop.f32.mrf.mxu0  ;;  %v2867_v1 = vadd.f32 %v15713_v56, %v2113_v16  ;;  %v2137_v56 = vadd.f32 %v15655_v54, %v1750_v10  ;;  %v2871_v53 = vadd.f32 %v15736_v48, %v2117_v11  ;;  %v2875_v54 = vadd.f32 %v19190_v4, %v2121_v27  ;;  %v19193_v48 = vld [vmem:[#allocation11_spill] sm:$0xff] }
 0x1e7   : > { %v2141_v15 = vadd.f32 %v15673_v59, %v1754_v31  ;;  %v3370_v44 = vadd.f32 %v19192_v12, %v19191_v50  ;;  %v2879_v41 = vadd.f32 %v19193_v48, %v2125_v62  ;;  %v2887_v49 = vadd.f32 %v19197_v42, %v2133_v24  ;;  %v19206_v48 = vld [vmem:[#allocation26_spill] sm:$0xff] }
 0x1e8   : > { %v13052_v40 = vpop.f32.mrf.mxu0  ;;  %v3365_v30 = vadd.f32 %v19189_v2, %v2867_v1  ;;  %v2891_v10 = vadd.f32 %v19198_v60, %v2137_v56  ;;  %v3753_v27 = vadd.f32 %v15854_v8, %v3366_v6  ;;  %v3751_v62 = vadd.f32 %v15858_v38, %v3364_v57  ;;  %v19203_v38 = vld [vmem:[#allocation25_spill] sm:$0xff] }
 0x1e9   : > { %v16001_v61 = vadd.f32 %v13052_v40, %v15843_v9  ;;  %v2895_v31 = vadd.f32 %v15850_v55, %v2141_v15  ;;  %v19199_v40 = vld [vmem:[#allocation15_spill] sm:$0xff]  ;;  %v3757_v24 = vadd.f32 %v15874_v32, %v3370_v44  ;;  %v3755_v56 = vadd.f32 %v15876_v22, %v3368_v28  ;;  %v19201_v55 = vld [vmem:[#allocation9_spill] sm:$0xff] }
 0x1ea   : > { %v3736_v25 = vpop.f32.mrf.mxu0  ;;  %v16021_v9 = vpop.f32.mrf.mxu1  ;;  %v3369_v11 = vadd.f32 %v19199_v40, %v2871_v53  ;;  %v3752_v2 = vadd.f32 %v15868_v13, %v3365_v30  ;;  %v3377_v15 = vadd.f32 %v19201_v55, %v2879_v41  ;;  %v3385_v57 = vadd.f32 %v19203_v38, %v2887_v49  ;;  %v19207_v41 = vld [vmem:[#allocation32_spill] sm:$0xff]  ;;  %v19210_v28 = vld [vmem:[#allocation35_spill] sm:$0xff]  ;;  %v19212_v49 = vld [vmem:[#allocation38_spill] sm:$0xff] }
 0x1eb   : > { %v16013_v21 = vadd.f32 %v3736_v25, %v15848_v47  ;;  %v19194_v47 = vld [vmem:[#allocation16_spill] sm:$0xff]  ;;  %v4507_v22 = vadd.f32 %v15856_v34, %v3753_v27  ;;  %v4505_v30 = vadd.f32 %v15860_v63, %v3751_v62  ;;  %v16072_v34 = vld [vmem:[%s19054_s3 + $0xf8] sm:$0xff]   ;;  %v16083_v60 = vadd.f32 %v19212_v49, %v15898_v17  ;;  %v19223_v38 = vld [vmem:[#allocation49_spill] sm:$0xff] }
 0x1ec   : > { %v13053_v59 = vpop.f32.mrf.mxu0  ;;  %v2883_v35 = vadd.f32 %v19194_v47, %v2129_v52  ;;  %v16035_v1 = vpop.f32.mrf.mxu1  ;;  %v19200_v52 = vld [vmem:[#allocation21_spill] sm:$0xff]  ;;  %v3756_v8 = vadd.f32 %v15885_v33, %v3369_v11  ;;  %v3764_v44 = vadd.f32 %v15924_v7, %v3377_v15  ;;  %v4506_v33 = vadd.f32 %v19206_v48, %v3752_v2  ;;  %v16089_v40 = vld [vmem:[%s19053_s2] ss:$0 sm:$0xff]  ;;  %v19214_v27 = vld [vmem:[#allocation39_spill] sm:$0xff]  ;;  %13294 = vmatprep.subr.bf16.mxu0 %v16072_v34 }
 0x1ed   : > { %v16028_v16 = vadd.f32 %v13053_v59, %v15852_v18  ;;  %v3754_v18 = vadd.f32 %v15862_v46, %v3367_v29  ;;  %v3373_v25 = vadd.f32 %v19200_v52, %v2875_v54  ;;  %v19202_v59 = vld [vmem:[#allocation14_spill] sm:$0xff]  ;;  %v19204_v46 = vld [vmem:[#allocation27_spill] sm:$0xff]  ;;  %v19205_v54 = vld [vmem:[#allocation24_spill] sm:$0xff]  ;;  %v16060_v47 = vadd.f32 %v19207_v41, %v3757_v24 }
 0x1ee   : > { %v16045_v4 = vpop.f32.mrf.mxu1  ;;  %v3381_v53 = vadd.f32 %v19202_v59, %v2883_v35  ;;  %v3739_v6 = vpop.f32.mrf.mxu0  ;;  %v3389_v29 = vadd.f32 %v19204_v46, %v2891_v10  ;;  %v3393_v50 = vadd.f32 %v19205_v54, %v2895_v31  ;;  %v19208_v35 = vld [vmem:[#allocation34_spill] sm:$0xff]  ;;  %v16075_v63 = vadd.f32 %v15895_v36, %v3756_v8  ;;  %v19213_v11 = vld [vmem:[#allocation37_spill] sm:$0xff]  ;;  %v19221_v59 = vld [vmem:[#allocation56_spill] sm:$0xff] }
 0x1ef   : > { %v3760_v13 = vadd.f32 %v15905_v0, %v3373_v25  ;;  %v4508_v12 = vadd.f32 %v15864_v14, %v3754_v18  ;;  %v16063_v3 = vadd.f32 %v19208_v35, %v3755_v56  ;;  %v16067_v0 = vadd.f32 %v19210_v28, %v19209_v43  ;;  %v19211_v14 = vld [vmem:[#allocation36_spill] sm:$0xff]  ;;  %v19217_v25 = vld [vmem:[#allocation43_spill] sm:$0xff]  ;;  %v19218_v24 = vld [vmem:[#allocation42_spill] sm:$0xff] }
 0x1f0   : > { %v4477_v32 = vpop.f32.mrf.mxu1  ;;  %v16079_v7 = vadd.f32 %v15900_v19, %v19211_v14  ;;  %v3768_v10 = vadd.f32 %v15941_v51, %v3381_v53  ;;  %v16093_v36 = vadd.f32 %v19214_v27, %v19213_v11  ;;  %v19215_v19 = vld [vmem:[#allocation40_spill] sm:$0xff]  ;;  %v19216_v51 = vld [vmem:[#allocation41_spill] sm:$0xff]  ;;  %v19224_v54 = vld [vmem:[#allocation46_spill] sm:$0xff]  ;;  %v3776_v27 = vadd.f32 %v15990_v26, %v3389_v29 }
 0x1f1   : > { %v16096_v62 = vadd.f32 %v15914_v58, %v3760_v13  ;;  %v16100_v18 = vadd.f32 %v15922_v45, %v19215_v19  ;;  %v16105_v2 = vadd.f32 %v19217_v25, %v19216_v51  ;;  %v19219_v56 = vld [vmem:[#allocation45_spill] sm:$0xff]  ;;  %v19220_v58 = vld [vmem:[#allocation47_spill] sm:$0xff]  ;;  %v3772_v45 = vadd.f32 %v19221_v59, %v3385_v57  ;;  %v19222_v8 = vld [vmem:[#allocation44_spill] sm:$0xff] }
 0x1f2   : > { %v16109_v55 = vadd.f32 %v19219_v56, %v19218_v24  ;;  %v16112_v15 = vadd.f32 %v19220_v58, %v3764_v44  ;;  %v16117_v46 = vadd.f32 %v19223_v38, %v19222_v8  ;;  %v19225_v13 = vld [vmem:[#allocation51_spill] sm:$0xff]  ;;  %v19226_v43 = vld [vmem:[#allocation48_spill] sm:$0xff]  ;;  %v19227_v28 = vld [vmem:[#allocation53_spill] sm:$0xff]  ;;  %v3780_v59 = vadd.f32 %v3739_v6, %v3393_v50 }
 0x1f3   : > { %v13100_v42 = vpop.f32.mrf.mxu1  ;;  %v16126_v14 = vadd.f32 %v19227_v28, %v19226_v43  ;;  %v19228_v44 = vld [vmem:[#allocation55_spill] sm:$0xff]  ;;  %v19229_v57 = vld [vmem:[#allocation50_spill] sm:$0xff]  ;;  %v19231_v51 = vld [vmem:[#allocation52_spill] sm:$0xff]  ;;  %v16146_v58 = vadd.f32 %v15994_v37, %v3772_v45  ;;  %v16161_v37 = vadd.f32 %v4477_v32, %v3776_v27 }
 0x1f4   : > { %v16129_v49 = vadd.f32 %v19228_v44, %v3768_v10  ;;  %v19232_v10 = vld [vmem:[#allocation54_spill] sm:$0xff]  ;;  %v19233_v26 = vld [vmem:[#allocation57_spill] sm:$0xff] }
 0x1f5   : > { %v4490_v17 = vpop.f32.mrf.mxu1  ;;  %v16143_v56 = vadd.f32 %v15988_v5, %v19232_v10  ;;  %v16150_v29 = vadd.f32 %v16021_v9, %v19233_v26  ;;  %v16159_v5 = vadd.f32 %v16045_v4, %v15981_v39  ;;  %v16164_v9 = vadd.f32 %v13100_v42, %v16001_v61 }
 0x1f6   : > { %v16167_v50 = vadd.f32 %v4490_v17, %v16013_v21  ;;  %v5592_v17 = vld [vmem:[#allocation2 + $0x18] sm:$0xf] }
 0x1f7   : > { %v13120_v31 = vpop.f32.mrf.mxu0  ;;  %v13101_v48 = vpop.f32.mrf.mxu1 }
 0x1f8   : > { %v5005_v52 = vadd.f32 %v13120_v31, %v4507_v22  ;;  %v16121_v22 = vadd.f32 %v19225_v13, %v19224_v54  ;;  %v19230_v31 = vld [vmem:[#allocation58_spill] sm:$0xff]  ;;  %v16155_v13 = vadd.f32 %v16035_v1, %v15968_v20 }
 0x1f9   : > { %v4876_v53 = vpop.f32.mrf.mxu0  ;;  %v16133_v11 = vadd.f32 %v19230_v31, %v19229_v57 }
 0x1fa   : > { %v5044_v41 = vadd.f32 %v16089_v40, %v5005_v52  ;;  %v5003_v35 = vadd.f32 %v4876_v53, %v4505_v30  ;;  %v16138_v52 = vadd.f32 %v15976_v23, %v19231_v51  ;;  %v4493_v23 = vpop.f32.mrf.mxu1  ;;  %v5583_v51 = vld [vmem:[#allocation2 + $0xc] sm:$0xf] }
 0x1fb   : > { %v13121_v19 = vpop.f32.mrf.mxu0  ;;  %v16172_v20 = vadd.f32 %v4493_v23, %v3780_v59 }
 0x1fc   : > { %v5076_v30 = vmax.f32 %v5044_v41, 0.0  ;;  %v5042_v25 = vadd.f32 %v16089_v40, %v5003_v35  ;;  %v5006_v24 = vadd.f32 %v13121_v19, %v4508_v12  ;;  %v16170_v35 = vadd.f32 %v13101_v48, %v16028_v16 }
 0x1fd   : > { %v4879_v53 = vpop.f32.mrf.mxu0 }
 0x1fe   : > { %v12256_v8 = vpack.c.bf16 %v5076_v30, %v5076_v30  ;;  %v5074_v38 = vmax.f32 %v5042_v25, 0.0  ;;  %v5045_v54 = vadd.f32 %v16089_v40, %v5006_v24  ;;  %v5004_v12 = vadd.f32 %v4879_v53, %v4506_v33 }
 0x1ff   : > { %v13124_v6 = vpop.f32.mrf.mxu0 }
 0x200   : > { %v5277_v45 = vshrl.u32 %v12256_v8, 16  ;;  %v12254_v41 = vpack.c.bf16 %v5074_v38, %v5074_v38  ;;  %v5077_v33 = vmax.f32 %v5045_v54, 0.0  ;;  %v5043_v39 = vadd.f32 %v16089_v40, %v5004_v12  ;;  %v5596_v54 = vld [vmem:[#allocation2 + $0x20] sm:$0x1] }
 0x201   : > { %v5009_v1 = vadd.f32 %v13124_v6, %v16060_v47  ;;  %v4892_v4 = vpop.f32.mrf.mxu0  ;;  %v5280_v61 = vshll.u32 %v12256_v8, 16 }
 0x202   : > { %v5279_v32 = vrot.slane %v5277_v45, 7  ;;  %v5260_v42 = vshrl.u32 %v12254_v41, 16  ;;  %v12257_v43 = vpack.c.bf16 %v5077_v33, %v5077_v33  ;;  %v5263_v16 = vshll.u32 %v12254_v41, 16 }
 0x203   : > { %v5075_v48 = vmax.f32 %v5043_v39, 0.0  ;;  %v5048_v28 = vadd.f32 %v16089_v40, %v5009_v1  ;;  %v5007_v44 = vadd.f32 %v4892_v4, %v16063_v3  ;;  %v13125_v57 = vpop.f32.mrf.mxu0 }
 0x204   : > { %v5282_v47 = vor.u32 %v5280_v61, %v5279_v32  ;;  %v5283_v31 = vrot.slane %v5279_v32, 4  ;;  %v5262_v27 = vrot.slane %v5260_v42, 7  ;;  %v5285_v19 = vshrl.u32 %v12257_v43, 16 }
 0x205   : > { %v5288_v30 = vshll.u32 %v12257_v43, 16  ;;  %v12255_v25 = vpack.c.bf16 %v5075_v48, %v5075_v48  ;;  %v5080_v24 = vmax.f32 %v5048_v28, 0.0  ;;  %v5046_v10 = vadd.f32 %v16089_v40, %v5007_v44  ;;  %v4895_v26 = vpop.f32.mrf.mxu0  ;;  %v5589_v44 = vld [vmem:[#allocation2 + $0x14] sm:$0x1] }
 0x206   : > { %v5593_v59 = vsel %vm16178_vm11, %v5282_v47, %v5592_v17  ;;  %v5265_v53 = vor.u32 %v5263_v16, %v5262_v27  ;;  %v5266_v23 = vrot.slane %v5262_v27, 4  ;;  %v5287_v8 = vrot.slane %v5285_v19, 7 }
 0x207   : > { %5594 = vst [vmem:[#allocation2 + $0x18] sm:$0xf] %v5593_v59  ;;  %v5268_v12 = vshrl.u32 %v12255_v25, 16  ;;  %v5271_v6 = vshll.u32 %v12255_v25, 16  ;;  %v12260_v45 = vpack.c.bf16 %v5080_v24, %v5080_v24  ;;  %v5078_v41 = vmax.f32 %v5046_v10, 0.0  ;;  %v13128_v33 = vpop.f32.mrf.mxu0 }
 0x208   : > { %v5584_v39 = vsel %vm16178_vm11, %v5265_v53, %v5583_v51  ;;  %v5290_v1 = vor.u32 %v5288_v30, %v5287_v8  ;;  %v5292_v4 = vrot.slane %v5287_v8, 4  ;;  %v5010_v32 = vadd.f32 %v13125_v57, %v16067_v0  ;;  %v5606_v25 = vld [vmem:[#allocation2 + $0x30] sm:$0xf] }
 0x209   : > { %5585 = vst [vmem:[#allocation2 + $0xc] sm:$0xf] %v5584_v39  ;;  %v5270_v61 = vrot.slane %v5268_v12, 7  ;;  %v5311_v42 = vshrl.u32 %v12260_v45, 16  ;;  %v5314_v43 = vshll.u32 %v12260_v45, 16  ;;  %v12258_v17 = vpack.c.bf16 %v5078_v41, %v5078_v41  ;;  %v4908_v16 = vpop.f32.mrf.mxu0 }
 0x20a   : > { %v5291_v48 = vsel %vm16189_vm12, %v5283_v31, %v5290_v1  ;;  %v5597_v28 = vsel %vm16195_vm13, %v5292_v4, %v5596_v54  ;;  %v5049_v47 = vadd.f32 %v16089_v40, %v5010_v32  ;;  %v5008_v27 = vadd.f32 %v4895_v26, %v16075_v63 }
 0x20b   : > { %5595 = vst [vmem:[#allocation2 + $0x1c] sm:$0xf] %v5291_v48  ;;  %5598 = vst [vmem:[#allocation2 + $0x20] sm:$0x1] %v5597_v28  ;;  %v5273_v0 = vor.u32 %v5271_v6, %v5270_v61  ;;  %v5275_v57 = vrot.slane %v5270_v61, 4  ;;  %v5313_v19 = vrot.slane %v5311_v42, 7  ;;  %v13129_v30 = vpop.f32.mrf.mxu0  ;;  %v5013_v59 = vadd.f32 %v13128_v33, %v16079_v7 }
 0x20c   : > { %v5294_v51 = vshrl.u32 %v12258_v17, 16  ;;  %v5297_v24 = vshll.u32 %v12258_v17, 16  ;;  %v5081_v10 = vmax.f32 %v5049_v47, 0.0  ;;  %v5047_v31 = vadd.f32 %v16089_v40, %v5008_v27  ;;  %v5599_v7 = vld [vmem:[#allocation2 + $0x24] sm:$0xf] }
 0x20d   : > { %v5274_v53 = vsel %vm16189_vm12, %v5266_v23, %v5273_v0  ;;  %v5590_v63 = vsel %vm16195_vm13, %v5275_v57, %v5589_v44  ;;  %v5316_v26 = vor.u32 %v5314_v43, %v5313_v19  ;;  %v5317_v8 = vrot.slane %v5313_v19, 4  ;;  %v4911_v54 = vpop.f32.mrf.mxu0  ;;  %v5610_v27 = vld [vmem:[#allocation2 + $0x38] sm:$0x1] }
 0x20e   : > { %5586 = vst [vmem:[#allocation2 + $0x10] sm:$0xf] %v5274_v53  ;;  %5591 = vst [vmem:[#allocation2 + $0x14] sm:$0x1] %v5590_v63  ;;  %v5296_v12 = vrot.slane %v5294_v51, 7  ;;  %v12261_v6 = vpack.c.bf16 %v5081_v10, %v5081_v10  ;;  %v5079_v45 = vmax.f32 %v5047_v31, 0.0  ;;  %v5052_v41 = vadd.f32 %v16089_v40, %v5013_v59 }
 0x20f   : > { %v5607_v39 = vsel %vm16178_vm11, %v5316_v26, %v5606_v25  ;;  %v5011_v33 = vadd.f32 %v4908_v16, %v16083_v60  ;;  %v5014_v23 = vadd.f32 %v13129_v30, %v16093_v36  ;;  %v5012_v1 = vadd.f32 %v4911_v54, %v16096_v62  ;;  %v13132_v4 = vpop.f32.mrf.mxu0 }
 0x210   : > { %5608 = vst [vmem:[#allocation2 + $0x30] sm:$0xf] %v5607_v39  ;;  %v5299_v32 = vor.u32 %v5297_v24, %v5296_v12  ;;  %v5300_v61 = vrot.slane %v5296_v12, 4  ;;  %v5319_v42 = vshrl.u32 %v12261_v6, 16  ;;  %v5322_v43 = vshll.u32 %v12261_v6, 16 }
 0x211   : > { %v12259_v17 = vpack.c.bf16 %v5079_v45, %v5079_v45  ;;  %v5084_v48 = vmax.f32 %v5052_v41, 0.0  ;;  %v5050_v28 = vadd.f32 %v16089_v40, %v5011_v33  ;;  %v5053_v44 = vadd.f32 %v16089_v40, %v5014_v23  ;;  %v4924_v47 = vpop.f32.mrf.mxu0  ;;  %v5603_v12 = vld [vmem:[#allocation2 + $0x2c] sm:$0x1]  ;;  %v5620_v33 = vld [vmem:[#allocation2 + $0x48] sm:$0xf] }
 0x212   : > { %v5600_v60 = vsel %vm16178_vm11, %v5299_v32, %v5599_v7  ;;  %v5321_v16 = vrot.slane %v5319_v42, 7  ;;  %v5051_v36 = vadd.f32 %v16089_v40, %v5012_v1  ;;  %v5017_v62 = vadd.f32 %v13132_v4, %v16100_v18 }
 0x213   : > { %5601 = vst [vmem:[#allocation2 + $0x24] sm:$0xf] %v5600_v60  ;;  %v5302_v0 = vshrl.u32 %v12259_v17, 16  ;;  %v5305_v57 = vshll.u32 %v12259_v17, 16  ;;  %v12264_v19 = vpack.c.bf16 %v5084_v48, %v5084_v48  ;;  %v5082_v51 = vmax.f32 %v5050_v28, 0.0  ;;  %v13133_v30 = vpop.f32.mrf.mxu0 }
 0x214   : > { %v5324_v25 = vor.u32 %v5322_v43, %v5321_v16  ;;  %v5326_v24 = vrot.slane %v5321_v16, 4  ;;  %v5085_v10 = vmax.f32 %v5053_v44, 0.0  ;;  %v5083_v31 = vmax.f32 %v5051_v36, 0.0  ;;  %v5613_v60 = vld [vmem:[#allocation2 + $0x3c] sm:$0xf] }
 0x215   : > { %v5304_v59 = vrot.slane %v5302_v0, 7  ;;  %v5345_v53 = vshrl.u32 %v12264_v19, 16  ;;  %v5348_v63 = vshll.u32 %v12264_v19, 16  ;;  %v12262_v26 = vpack.c.bf16 %v5082_v51, %v5082_v51  ;;  %v4927_v1 = vpop.f32.mrf.mxu0  ;;  %v5617_v19 = vld [vmem:[#allocation2 + $0x44] sm:$0x1] }
 0x216   : > { %v5325_v54 = vsel %vm16189_vm12, %v5317_v8, %v5324_v25  ;;  %v5611_v18 = vsel %vm16195_vm13, %v5326_v24, %v5610_v27  ;;  %v12265_v6 = vpack.c.bf16 %v5085_v10, %v5085_v10  ;;  %v12263_v45 = vpack.c.bf16 %v5083_v31, %v5083_v31 }
 0x217   : > { %5609 = vst [vmem:[#allocation2 + $0x34] sm:$0xf] %v5325_v54  ;;  %5612 = vst [vmem:[#allocation2 + $0x38] sm:$0x1] %v5611_v18  ;;  %v5307_v41 = vor.u32 %v5305_v57, %v5304_v59  ;;  %v5309_v39 = vrot.slane %v5304_v59, 4  ;;  %v5347_v7 = vrot.slane %v5345_v53, 7  ;;  %v5056_v51 = vadd.f32 %v16089_v40, %v5017_v62  ;;  %v13136_v24 = vpop.f32.mrf.mxu0 }
 0x218   : > { %v5328_v23 = vshrl.u32 %v12262_v26, 16  ;;  %v5331_v4 = vshll.u32 %v12262_v26, 16  ;;  %v5353_v32 = vshrl.u32 %v12265_v6, 16  ;;  %v5356_v42 = vshll.u32 %v12265_v6, 16  ;;  %v5624_v57 = vld [vmem:[#allocation2 + $0x50] sm:$0x1] }
 0x219   : > { %v5336_v43 = vshrl.u32 %v12263_v45, 16  ;;  %v5308_v8 = vsel %vm16189_vm12, %v5300_v61, %v5307_v41  ;;  %v5604_v17 = vsel %vm16195_vm13, %v5309_v39, %v5603_v12  ;;  %v5350_v48 = vor.u32 %v5348_v63, %v5347_v7  ;;  %v5699_v12 = vld [vmem:[#allocation2 + $0xc] sm:$0xf]  ;;  %v16251_v39 = vpop.f32.mrf.mxu0 }
 0x21a   : > { %v5351_v28 = vrot.slane %v5347_v7, 4  ;;  %5602 = vst [vmem:[#allocation2 + $0x28] sm:$0xf] %v5308_v8  ;;  %5605 = vst [vmem:[#allocation2 + $0x2c] sm:$0x1] %v5604_v17  ;;  %v5330_v44 = vrot.slane %v5328_v23, 7  ;;  %v5015_v61 = vadd.f32 %v4924_v47, %v16105_v2  ;;  %v5018_v25 = vadd.f32 %v13133_v30, %v16109_v55 }
 0x21b   : > { %v5355_v16 = vrot.slane %v5353_v32, 7  ;;  %v5338_v36 = vrot.slane %v5336_v43, 7  ;;  %v5339_v27 = vshll.u32 %v12263_v45, 16  ;;  %v5621_v0 = vsel %vm16178_vm11, %v5350_v48, %v5620_v33  ;;  %v5634_v17 = vld [vmem:[#allocation2 + $0x60] sm:$0xf] }
 0x21c   : > { %5622 = vst [vmem:[#allocation2 + $0x48] sm:$0xf] %v5621_v0  ;;  %v5333_v10 = vor.u32 %v5331_v4, %v5330_v44  ;;  %v5334_v31 = vrot.slane %v5330_v44, 4  ;;  %v5088_v54 = vmax.f32 %v5056_v51, 0.0  ;;  %v5054_v18 = vadd.f32 %v16089_v40, %v5015_v61  ;;  %v13137_v0 = vpop.f32.mrf.mxu0 }
 0x21d   : > { %v5358_v59 = vor.u32 %v5356_v42, %v5355_v16  ;;  %v5360_v53 = vrot.slane %v5355_v16, 4  ;;  %v5341_v63 = vor.u32 %v5339_v27, %v5338_v36  ;;  %v5343_v26 = vrot.slane %v5338_v36, 4 }
 0x21e   : > { %v5614_v6 = vsel %vm16178_vm11, %v5333_v10, %v5613_v60  ;;  %v5057_v47 = vadd.f32 %v16089_v40, %v5018_v25  ;;  %v12268_v45 = vpack.c.bf16 %v5088_v54, %v5088_v54  ;;  %v5086_v41 = vmax.f32 %v5054_v18, 0.0  ;;  %v16257_v60 = vld [vmem:[#allocation2 + $0x10] sm:$0xf] }
 0x21f   : > { %v5359_v2 = vsel %vm16189_vm12, %v5351_v28, %v5358_v59  ;;  %v5625_v55 = vsel %vm16195_vm13, %v5360_v53, %v5624_v57  ;;  %5615 = vst [vmem:[#allocation2 + $0x3c] sm:$0xf] %v5614_v6  ;;  %v5342_v62 = vsel %vm16189_vm12, %v5334_v31, %v5341_v63  ;;  %v5618_v30 = vsel %vm16195_vm13, %v5343_v26, %v5617_v19  ;;  %v5627_v59 = vld [vmem:[#allocation2 + $0x54] sm:$0xf] }
 0x220   : > { %5623 = vst [vmem:[#allocation2 + $0x4c] sm:$0xf] %v5359_v2  ;;  %5626 = vst [vmem:[#allocation2 + $0x50] sm:$0x1] %v5625_v55  ;;  %v5089_v7 = vmax.f32 %v5057_v47, 0.0  ;;  %v5016_v33 = vadd.f32 %v4927_v1, %v16112_v15  ;;  %v5021_v23 = vadd.f32 %v13136_v24, %v16117_v46  ;;  %v5786_v4 = vshrl.u32 %v5699_v12, 16 }
 0x221   : > { %5616 = vst [vmem:[#allocation2 + $0x40] sm:$0xf] %v5342_v62  ;;  %5619 = vst [vmem:[#allocation2 + $0x44] sm:$0x1] %v5618_v30  ;;  %v5379_v32 = vshrl.u32 %v12268_v45, 16  ;;  %v5382_v42 = vshll.u32 %v12268_v45, 16  ;;  %v12266_v43 = vpack.c.bf16 %v5086_v41, %v5086_v41  ;;  %v11851_v54 = vcombine.low %v5699_v12, %v16257_v60  ;;  %v4943_v30 = vpop.f32.mrf.mxu0 }
 0x222   : > { %v5789_v8 = vshll.u32 %v5699_v12, 16  ;;  %v12269_v48 = vpack.c.bf16 %v5089_v7, %v5089_v7  ;;  %v5055_v28 = vadd.f32 %v16089_v40, %v5016_v33  ;;  %v5060_v44 = vadd.f32 %v16089_v40, %v5021_v23  ;;  %v5701_v46 = vld [vmem:[#allocation2 + $0x18] sm:$0xf]  ;;  %v13744_v18 = vld [vmem:[%s19054_s3 + $0xf0] sm:$0xff]   ;;  %v5638_v47 = vld [vmem:[#allocation2 + $0x68] sm:$0x1] }
 0x223   : > { %v16259_v16 = vrot.slane %v5786_v4, 4  ;;  %v5381_v36 = vrot.slane %v5379_v32, 7  ;;  %v5362_v27 = vshrl.u32 %v12266_v43, 16  ;;  %v5365_v15 = vshll.u32 %v12266_v43, 16  ;;  %13215 = vmatmul.mubr.bf16.vlgmr.msra.gmra.mxu0 %v11851_v54  ;;  %v16270_v23 = vld [vmem:[#allocation2 + $0x1c] sm:$0xf] }
 0x224   : > { %v16261_v1 = vrot.slane %v5789_v8, 5  ;;  %v5387_v57 = vshrl.u32 %v12269_v48, 16  ;;  %v5390_v19 = vshll.u32 %v12269_v48, 16  ;;  %v5087_v51 = vmax.f32 %v5055_v28, 0.0  ;;  %v5631_v4 = vld [vmem:[#allocation2 + $0x5c] sm:$0x1]  ;;  %13295 = vmatpush3.bf16.msra.mxu0 %v16072_v34 }
 0x225   : > { %v5092_v61 = vmax.f32 %v5060_v44, 0.0  ;;  %v5384_v25 = vor.u32 %v5382_v42, %v5381_v36  ;;  %v5385_v24 = vrot.slane %v5381_v36, 4  ;;  %v5364_v10 = vrot.slane %v5362_v27, 7  ;;  %v13746_v8 = vld [vmem:[%s19054_s3 + $0xe8] sm:$0xff]   ;;  %13296 = vmatprep.subr.bf16.mxu0 %v13744_v18  ;;  %v5648_v27 = vld [vmem:[#allocation2 + $0x78] sm:$0xf] }
 0x226   : > { %v5799_v31 = vshrl.u32 %v16257_v60, 16  ;;  %v5389_v53 = vrot.slane %v5387_v57, 7  ;;  %v12267_v63 = vpack.c.bf16 %v5087_v51, %v5087_v51  ;;  %v5810_v62 = vshrl.u32 %v5701_v46, 16  ;;  %v5703_v51 = vld [vmem:[#allocation2 + $0x24] sm:$0xf] }
 0x227   : > { %v12272_v26 = vpack.c.bf16 %v5092_v61, %v5092_v61  ;;  %v5635_v6 = vsel %vm16178_vm11, %v5384_v25, %v5634_v17  ;;  %v5367_v2 = vor.u32 %v5365_v15, %v5364_v10  ;;  %v5368_v55 = vrot.slane %v5364_v10, 4  ;;  %v13749_v54 = vld [vmem:[%s19054_s3 + $0xe0] sm:$0xff]  }
 0x228   : > { %5636 = vst [vmem:[#allocation2 + $0x60] sm:$0xf] %v5635_v6  ;;  %v5392_v45 = vor.u32 %v5390_v19, %v5389_v53  ;;  %v5394_v41 = vrot.slane %v5389_v53, 4  ;;  %v5370_v7 = vshrl.u32 %v12267_v63, 16  ;;  %v5373_v33 = vshll.u32 %v12267_v63, 16  ;;  %v13140_v19 = vpop.f32.mrf.mxu0  ;;  %13297 = vmatpush3.bf16.msra.mxu0 %v13744_v18 }
 0x229   : > { %v5628_v12 = vsel %vm16178_vm11, %v5367_v2, %v5627_v59  ;;  %v5413_v32 = vshrl.u32 %v12272_v26, 16  ;;  %v5416_v42 = vshll.u32 %v12272_v26, 16  ;;  %v16274_v43 = vrot.slane %v5810_v62, 4  ;;  %v16297_v26 = vld [vmem:[#allocation2 + $0x28] sm:$0xf]  ;;  %13298 = vmatprep.subr.bf16.mxu0 %v13746_v8 }
 0x22a   : > { %5629 = vst [vmem:[#allocation2 + $0x54] sm:$0xf] %v5628_v12  ;;  %v5393_v17 = vsel %vm16189_vm12, %v5385_v24, %v5392_v45  ;;  %v5639_v48 = vsel %vm16195_vm13, %v5394_v41, %v5638_v47  ;;  %v5372_v28 = vrot.slane %v5370_v7, 7  ;;  %v5813_v44 = vshll.u32 %v5701_v46, 16 }
 0x22b   : > { %5637 = vst [vmem:[#allocation2 + $0x64] sm:$0xf] %v5393_v17  ;;  %5640 = vst [vmem:[#allocation2 + $0x68] sm:$0x1] %v5639_v48  ;;  %v16284_v36 = vrot.slane %v5413_v32, 7  ;;  %v5823_v34 = vshrl.u32 %v16270_v23, 16  ;;  %v11852_v15 = vcombine.low %v5701_v46, %v16270_v23  ;;  %v5019_v57 = vadd.f32 %v16251_v39, %v16121_v22 }
 0x22c   : > { %v5375_v61 = vor.u32 %v5373_v33, %v5372_v28  ;;  %v5377_v25 = vrot.slane %v5372_v28, 4  ;;  %v16290_v24 = vrot.slane %v5813_v44, 5  ;;  %v5022_v10 = vadd.f32 %v13137_v0, %v16126_v14  ;;  %v16316_v33 = vpop.f32.mrf.mxu0  ;;  %13299 = vmatpush3.bf16.msra.mxu0 %v13746_v8  ;;  %v13751_v17 = vld [vmem:[%s19054_s3 + $0xd8] sm:$0xff]  }
 0x22d   : > { %v5418_v59 = vor.u32 %v5416_v42, %v16284_v36  ;;  %v5419_v53 = vrot.slane %v16284_v36, 4  ;;  %13218 = vmatprep.mubr.bf16.mxu0 %v11852_v15  ;;  %v5058_v63 = vadd.f32 %v16089_v40, %v5019_v57  ;;  %v5020_v46 = vadd.f32 %v4943_v30, %v16129_v49  ;;  %13300 = vmatprep.subr.bf16.mxu0 %v13749_v54  ;;  %v5641_v15 = vld [vmem:[#allocation2 + $0x6c] sm:$0xf] }
 0x22e   : > { %v5376_v22 = vsel %vm16189_vm12, %v5368_v55, %v5375_v61  ;;  %v5632_v39 = vsel %vm16195_vm13, %v5377_v25, %v5631_v4  ;;  %v5061_v14 = vadd.f32 %v16089_v40, %v5022_v10  ;;  %v5025_v0 = vadd.f32 %v13140_v19, %v16133_v11  ;;  %v5652_v25 = vld [vmem:[#allocation2 + $0x80] sm:$0x1] }
 0x22f   : > { %5630 = vst [vmem:[#allocation2 + $0x58] sm:$0xf] %v5376_v22  ;;  %5633 = vst [vmem:[#allocation2 + $0x5c] sm:$0x1] %v5632_v39  ;;  %v5649_v49 = vsel %vm16178_vm11, %v5418_v59, %v5648_v27  ;;  %v5090_v18 = vmax.f32 %v5058_v63, 0.0  ;;  %v5059_v6 = vadd.f32 %v16089_v40, %v5020_v46  ;;  %v5834_v2 = vshrl.u32 %v5703_v51, 16  ;;  %v16326_v59 = vpop.f32.mrf.mxu0 }
 0x230   : > { %5650 = vst [vmem:[#allocation2 + $0x78] sm:$0xf] %v5649_v49  ;;  %v5093_v55 = vmax.f32 %v5061_v14, 0.0  ;;  %v5064_v47 = vadd.f32 %v16089_v40, %v5025_v0  ;;  %v5837_v62 = vshll.u32 %v5703_v51, 16  ;;  %v5847_v11 = vshrl.u32 %v16297_v26, 16  ;;  %13301 = vmatpush3.bf16.msra.mxu0 %v13749_v54  ;;  %v13754_v63 = vld [vmem:[%s19054_s3 + $0xd0] sm:$0xff]  }
 0x231   : > { %v12270_v30 = vpack.c.bf16 %v5090_v18, %v5090_v18  ;;  %v5091_v45 = vmax.f32 %v5059_v6, 0.0  ;;  %v16313_v41 = vrot.slane %v5834_v2, 4  ;;  %v11853_v7 = vcombine.low %v5703_v51, %v16297_v26  ;;  %v5746_v14 = vld [vmem:[#allocation2 + $0x14] sm:$0x1]  ;;  %13302 = vmatprep.subr.bf16.mxu0 %v13751_v17 }
 0x232   : > { %v12273_v12 = vpack.c.bf16 %v5093_v55, %v5093_v55  ;;  %v5096_v4 = vmax.f32 %v5064_v47, 0.0  ;;  %v16318_v32 = vrot.slane %v5837_v62, 5  ;;  %v5792_v42 = vor.u32 %v16261_v1, %v16259_v16  ;;  %v5645_v2 = vld [vmem:[#allocation2 + $0x74] sm:$0x1]  ;;  %v5662_v55 = vld [vmem:[#allocation2 + $0x90] sm:$0xf] }
 0x233   : > { %v5396_v48 = vshrl.u32 %v12270_v30, 16  ;;  %v5399_v28 = vshll.u32 %v12270_v30, 16  ;;  %v12271_v44 = vpack.c.bf16 %v5091_v45, %v5091_v45  ;;  %13219 = vmatmul.mubr.bf16.gmra.mxu0 %v11853_v7  ;;  %v5795_v27 = vshll.u32 %v16257_v60, 16 }
 0x234   : > { %v5421_v8 = vshrl.u32 %v12273_v12, 16  ;;  %v5424_v57 = vshll.u32 %v12273_v12, 16  ;;  %v12276_v19 = vpack.c.bf16 %v5096_v4, %v5096_v4  ;;  %v5793_v51 = vrot.slane %v5792_v42, 4  ;;  %v5705_v12 = vld [vmem:[#allocation2 + $0x30] sm:$0xf]  ;;  %13303 = vmatpush3.bf16.msra.mxu0 %v13751_v17 }
 0x235   : > { %v5398_v61 = vrot.slane %v5396_v48, 7  ;;  %v5404_v10 = vshrl.u32 %v12271_v44, 16  ;;  %v5407_v16 = vshll.u32 %v12271_v44, 16  ;;  %v5797_v1 = vrot.slane %v5795_v27, 5  ;;  %v16339_v48 = vld [vmem:[#allocation2 + $0x34] sm:$0xf]  ;;  %13304 = vmatprep.subr.bf16.mxu0 %v13754_v63 }
 0x236   : > { %v5423_v46 = vrot.slane %v5421_v8, 7  ;;  %v5447_v22 = vshrl.u32 %v12276_v19, 16  ;;  %v5450_v39 = vshll.u32 %v12276_v19, 16  ;;  %v5801_v0 = vrot.slane %v5799_v31, 4 }
 0x237   : > { %v5401_v49 = vor.u32 %v5399_v28, %v5398_v61  ;;  %v5402_v18 = vrot.slane %v5398_v61, 4  ;;  %v5406_v6 = vrot.slane %v5404_v10, 7  ;;  %v5798_v54 = vsel %vm13974_vm2, %v5793_v51, %v5797_v1  ;;  %v4959_v28 = vpop.f32.mrf.mxu0  ;;  %v5747_v51 = vld [vmem:[#allocation2 + $0x20] sm:$0x1] }
 0x238   : > { %v5426_v62 = vor.u32 %v5424_v57, %v5423_v46  ;;  %v5428_v30 = vrot.slane %v5423_v46, 4  ;;  %v16335_v45 = vrot.slane %v5447_v22, 7  ;;  %v5802_v7 = vor.u32 %v5801_v0, %v5797_v1  ;;  %v13756_v57 = vld [vmem:[%s19054_s3 + $0xc8] sm:$0xff]   ;;  %v5707_v0 = vld [vmem:[#allocation2 + $0x3c] sm:$0xf]  ;;  %13305 = vmatpush3.bf16.msra.mxu0 %v13754_v63  ;;  %v13759_v63 = vld [vmem:[%s19054_s3 + $0xc0] sm:$0xff]  }
 0x239   : > { %v5642_v4 = vsel %vm16178_vm11, %v5401_v49, %v5641_v15  ;;  %v5409_v60 = vor.u32 %v5407_v16, %v5406_v6  ;;  %v5411_v31 = vrot.slane %v5406_v6, 4  ;;  %v5805_v42 = vshll.u32 %v5746_v14, 16  ;;  %v13144_v14 = vpop.f32.mrf.mxu0  ;;  %13306 = vmatprep.subr.bf16.mxu0 %v13756_v57 }
 0x23a   : > { %5643 = vst [vmem:[#allocation2 + $0x6c] sm:$0xf] %v5642_v4  ;;  %v5427_v44 = vsel %vm16189_vm12, %v5419_v53, %v5426_v62  ;;  %v5653_v27 = vsel %vm16195_vm13, %v5428_v30, %v5652_v25  ;;  %v5452_v8 = vor.u32 %v5450_v39, %v16335_v45  ;;  %v5453_v15 = vrot.slane %v16335_v45, 4 }
 0x23b   : > { %5651 = vst [vmem:[#allocation2 + $0x7c] sm:$0xf] %v5427_v44  ;;  %5654 = vst [vmem:[#allocation2 + $0x80] sm:$0x1] %v5653_v27  ;;  %v5410_v36 = vsel %vm16189_vm12, %v5402_v18, %v5409_v60  ;;  %v5646_v53 = vsel %vm16195_vm13, %v5411_v31, %v5645_v2  ;;  %v5803_v17 = vrot.slane %v5802_v7, 4  ;;  %v5807_v19 = vrot.slane %v5805_v42, 5 }
 0x23c   : > { %5644 = vst [vmem:[#allocation2 + $0x70] sm:$0xf] %v5410_v36  ;;  %5647 = vst [vmem:[#allocation2 + $0x74] sm:$0x1] %v5646_v53  ;;  %v5663_v61 = vsel %vm16178_vm11, %v5452_v8, %v5662_v55  ;;  %v5858_v25 = vshrl.u32 %v5705_v12, 16  ;;  %v5861_v10 = vshll.u32 %v5705_v12, 16  ;;  %v11854_v46 = vcombine.low %v5705_v12, %v16339_v48  ;;  %13307 = vmatpush3.bf16.msra.mxu0 %v13756_v57 }
 0x23d   : > { %v5871_v16 = vshrl.u32 %v16339_v48, 16  ;;  %5664 = vst [vmem:[#allocation2 + $0x90] sm:$0xf] %v5663_v61  ;;  %v5808_v1 = vsel %vm13974_vm2, %v5803_v17, %v5807_v19  ;;  %v5023_v22 = vadd.f32 %v16316_v33, %v16138_v52  ;;  %v5816_v39 = vor.u32 %v16290_v24, %v16274_v43  ;;  %v13736_v55 = vld [vmem:[%s19054_s3 + $0xb0] sm:$0xff]   ;;  %13308 = vmatprep.subr.bf16.mxu0 %v13759_v63  ;;  %v16404_v57 = vld [vmem:[%s19054_s3 + $0x178] sm:$0xff]  }
 0x23e   : > { %v11827_v49 = vcombine.low %v5798_v54, %v5808_v1  ;;  %v16366_v18 = vrot.slane %v5858_v25, 4  ;;  %v16368_v6 = vrot.slane %v5861_v10, 5  ;;  %v5819_v2 = vshll.u32 %v16270_v23, 16  ;;  %13222 = vmatprep.mubr.bf16.mxu0 %v11854_v46  ;;  %v13839_v23 = vld [vmem:[%s19054_s3 + $0xb8] sm:$0xff]   ;;  %v16408_v10 = vpop.f32.mrf.mxu0 }
 0x23f   : > { %v5062_v52 = vadd.f32 %v16089_v40, %v5023_v22  ;;  %v5817_v33 = vrot.slane %v5816_v39, 4  ;;  %v5825_v43 = vrot.slane %v5823_v34, 4  ;;  %v5829_v24 = vshll.u32 %v5747_v51, 16  ;;  %v16387_v34 = vld [vmem:[#allocation2 + $0x40] sm:$0xf] }
 0x240   : > { %13167 = vmatmul.mubr.bf16.vlgmr.msra.gmra.mxu1 %v11827_v49  ;;  %v5821_v54 = vrot.slane %v5819_v2, 5  ;;  %v5026_v62 = vadd.f32 %v16326_v59, %v16143_v56  ;;  %v5024_v30 = vadd.f32 %v4959_v28, %v16146_v58  ;;  %v5029_v7 = vadd.f32 %v13144_v14, %v16150_v29  ;;  %v13739_v59 = vld [vmem:[%s19054_s3 + $0xa8] sm:$0xff]   ;;  %13309 = vmatpush3.bf16.msra.mxu0 %v13759_v63  ;;  %v13743_v14 = vld [vmem:[%s19054_s3 + $0xa0] sm:$0xff]  }
 0x241   : > { %v5094_v12 = vmax.f32 %v5062_v52, 0.0  ;;  %v5831_v4 = vrot.slane %v5829_v24, 5  ;;  %13247 = vmatpush3.bf16.msra.mxu1 %v13839_v23  ;;  %v5882_v60 = vshrl.u32 %v5707_v0, 16  ;;  %v5885_v31 = vshll.u32 %v5707_v0, 16  ;;  %v5655_v2 = vld [vmem:[#allocation2 + $0x84] sm:$0xf]  ;;  %13390 = vmatprep.subr.bf16.mxu0 %v16404_v57 }
 0x242   : > { %v5822_v42 = vsel %vm13974_vm2, %v5817_v33, %v5821_v54  ;;  %v5826_v56 = vor.u32 %v5825_v43, %v5821_v54  ;;  %v5065_v58 = vadd.f32 %v16089_v40, %v5026_v62  ;;  %v5063_v29 = vadd.f32 %v16089_v40, %v5024_v30  ;;  %13248 = vmatprep.subr.bf16.mxu1 %v13736_v55  ;;  %v16419_v54 = vld [vmem:[#allocation2 + $0x2c] sm:$0x1]  ;;  %v5666_v62 = vld [vmem:[#allocation2 + $0x98] sm:$0x1] }
 0x243   : > { %v12274_v28 = vpack.c.bf16 %v5094_v12, %v5094_v12  ;;  %v5068_v44 = vadd.f32 %v16089_v40, %v5029_v7  ;;  %v16397_v27 = vrot.slane %v5882_v60, 4  ;;  %v16399_v8 = vrot.slane %v5885_v31, 5  ;;  %v16421_v12 = vpop.f32.mrf.mxu0 }
 0x244   : > { %v5827_v36 = vrot.slane %v5826_v56, 4  ;;  %v5097_v53 = vmax.f32 %v5065_v58, 0.0  ;;  %v5095_v17 = vmax.f32 %v5063_v29, 0.0  ;;  %v5895_v19 = vshrl.u32 %v16387_v34, 16  ;;  %v5659_v58 = vld [vmem:[#allocation2 + $0x8c] sm:$0x1] }
 0x245   : > { %v5430_v51 = vshrl.u32 %v12274_v28, 16  ;;  %v5433_v61 = vshll.u32 %v12274_v28, 16  ;;  %v5100_v25 = vmax.f32 %v5068_v44, 0.0  ;;  %v11855_v40 = vcombine.low %v5707_v0, %v16387_v34  ;;  %13249 = vmatpush3.bf16.msra.mxu1 %v13736_v55  ;;  %v5721_v3 = vld [vmem:[#allocation2 + $0x90] sm:$0xf] }
 0x246   : > { %v5832_v1 = vsel %vm13974_vm2, %v5827_v36, %v5831_v4  ;;  %v12277_v46 = vpack.c.bf16 %v5097_v53, %v5097_v53  ;;  %v12275_v22 = vpack.c.bf16 %v5095_v17, %v5095_v17  ;;  %v5840_v39 = vor.u32 %v16318_v32, %v16313_v41  ;;  %13250 = vmatprep.subr.bf16.mxu1 %v13739_v59 }
 0x247   : > { %v5432_v49 = vrot.slane %v5430_v51, 7  ;;  %v11828_v0 = vcombine.low %v5822_v42, %v5832_v1  ;;  %v12280_v52 = vpack.c.bf16 %v5100_v25, %v5100_v25  ;;  %13223 = vmatmul.mubr.bf16.gmra.mxu0 %v11855_v40  ;;  %v5843_v55 = vshll.u32 %v16297_v26, 16  ;;  %v13748_v42 = vld [vmem:[%s19054_s3 + $0x98] sm:$0xff]   ;;  %v5676_v51 = vld [vmem:[#allocation2 + $0xa8] sm:$0xf]  ;;  %v4975_v26 = vpop.f32.mrf.mxu0 }
 0x248   : > { %v5455_v33 = vshrl.u32 %v12277_v46, 16  ;;  %v5458_v43 = vshll.u32 %v12277_v46, 16  ;;  %v5438_v24 = vshrl.u32 %v12275_v22, 16  ;;  %v5441_v63 = vshll.u32 %v12275_v22, 16  ;;  %v16437_v22 = vld [vmem:[#allocation2 + $0x4c] sm:$0xf] }
 0x249   : > { %v5435_v41 = vor.u32 %v5433_v61, %v5432_v49  ;;  %v5436_v32 = vrot.slane %v5432_v49, 4  ;;  %13170 = vmatprep.mubr.bf16.mxu1 %v11828_v0  ;;  %v5481_v30 = vshrl.u32 %v12280_v52, 16  ;;  %v5484_v7 = vshll.u32 %v12280_v52, 16  ;;  %13251 = vmatpush3.bf16.msra.mxu1 %v13739_v59  ;;  %v5709_v61 = vld [vmem:[#allocation2 + $0x48] sm:$0xf]  ;;  %v13753_v0 = vld [vmem:[%s19054_s3 + $0x90] sm:$0xff]  }
 0x24a   : > { %v5457_v4 = vrot.slane %v5455_v33, 7  ;;  %v5440_v23 = vrot.slane %v5438_v24, 7  ;;  %v5841_v60 = vrot.slane %v5840_v39, 4  ;;  %v5845_v31 = vrot.slane %v5843_v55, 5  ;;  %13252 = vmatprep.subr.bf16.mxu1 %v13743_v14 }
 0x24b   : > { %v5656_v56 = vsel %vm16178_vm11, %v5435_v41, %v5655_v2  ;;  %v16428_v29 = vrot.slane %v5481_v30, 7  ;;  %v5849_v28 = vrot.slane %v5847_v11, 4  ;;  %v5853_v59 = vshll.u32 %v16419_v54, 16 }
 0x24c   : > { %5657 = vst [vmem:[#allocation2 + $0x84] sm:$0xf] %v5656_v56  ;;  %v5460_v44 = vor.u32 %v5458_v43, %v5457_v4  ;;  %v5462_v36 = vrot.slane %v5457_v4, 4  ;;  %v5443_v53 = vor.u32 %v5441_v63, %v5440_v23  ;;  %v5445_v17 = vrot.slane %v5440_v23, 4  ;;  %v16458_v63 = vld [vmem:[#allocation2 + $0x38] sm:$0x1] }
 0x24d   : > { %v5486_v25 = vor.u32 %v5484_v7, %v16428_v29  ;;  %v5487_v40 = vrot.slane %v16428_v29, 4  ;;  %v5846_v1 = vsel %vm13974_vm2, %v5841_v60, %v5845_v31  ;;  %v5850_v46 = vor.u32 %v5849_v28, %v5845_v31  ;;  %13253 = vmatpush3.bf16.msra.mxu1 %v13743_v14  ;;  %v13148_v7 = vpop.f32.mrf.mxu0  ;;  %v5711_v4 = vld [vmem:[#allocation2 + $0x54] sm:$0xf] }
 0x24e   : > { %v5461_v11 = vsel %vm16189_vm12, %v5453_v15, %v5460_v44  ;;  %v5667_v39 = vsel %vm16195_vm13, %v5462_v36, %v5666_v62  ;;  %v5444_v49 = vsel %vm16189_vm12, %v5436_v32, %v5443_v53  ;;  %v5660_v2 = vsel %vm16195_vm13, %v5445_v17, %v5659_v58  ;;  %13254 = vmatprep.subr.bf16.mxu1 %v13748_v42 }
 0x24f   : > { %5665 = vst [vmem:[#allocation2 + $0x94] sm:$0xf] %v5461_v11  ;;  %5668 = vst [vmem:[#allocation2 + $0x98] sm:$0x1] %v5667_v39  ;;  %v5677_v45 = vsel %vm16178_vm11, %v5486_v25, %v5676_v51  ;;  %v5851_v15 = vrot.slane %v5850_v46, 4  ;;  %v5855_v14 = vrot.slane %v5853_v59, 5  ;;  %v11856_v43 = vcombine.low %v5709_v61, %v16437_v22 }
 0x250   : > { %5658 = vst [vmem:[#allocation2 + $0x88] sm:$0xf] %v5444_v49  ;;  %5661 = vst [vmem:[#allocation2 + $0x8c] sm:$0x1] %v5660_v2  ;;  %v5906_v52 = vshrl.u32 %v5709_v61, 16  ;;  %v5909_v55 = vshll.u32 %v5709_v61, 16  ;;  %v5027_v24 = vadd.f32 %v16408_v10, %v16155_v13  ;;  %v5864_v62 = vor.u32 %v16368_v6, %v16366_v18 }
 0x251   : > { %5678 = vst [vmem:[#allocation2 + $0xa8] sm:$0xf] %v5677_v45  ;;  %v5919_v33 = vshrl.u32 %v16437_v22, 16  ;;  %v5856_v41 = vsel %vm13974_vm2, %v5851_v15, %v5855_v14  ;;  %v5867_v30 = vshll.u32 %v16339_v48, 16  ;;  %13255 = vmatpush3.bf16.msra.mxu1 %v13748_v42  ;;  %13226 = vmatprep.mubr.bf16.mxu0 %v11856_v43  ;;  %v16472_v13 = vld [vmem:[%s19053_s2] ss:$0 sm:$0xff]  ;;  %v5030_v58 = vadd.f32 %v16421_v12, %v16159_v5 }
 0x252   : > { %v16462_v32 = vrot.slane %v5906_v52, 4  ;;  %v11829_v23 = vcombine.low %v5846_v1, %v5856_v41  ;;  %v16467_v60 = vrot.slane %v5909_v55, 5  ;;  %v5066_v10 = vadd.f32 %v16472_v13, %v5027_v24  ;;  %13256 = vmatprep.subr.bf16.mxu1 %v13753_v0  ;;  %v13757_v18 = vld [vmem:[%s19054_s3 + $0x88] sm:$0xff]   ;;  %v16485_v48 = vld [vmem:[#allocation2 + $0x58] sm:$0xf] }
 0x253   : > { %v5873_v31 = vrot.slane %v5871_v16, 4  ;;  %v5865_v6 = vrot.slane %v5864_v62, 4  ;;  %v5869_v42 = vrot.slane %v5867_v30, 5  ;;  %v5877_v56 = vshll.u32 %v16458_v63, 16  ;;  %v16506_v41 = vld [vmem:[%s19054_s3 + $0x138] sm:$0xff]  }
 0x254   : > { %13171 = vmatmul.mubr.bf16.gmra.mxu1 %v11829_v23  ;;  %v5098_v28 = vmax.f32 %v5066_v10, 0.0  ;;  %v5028_v59 = vadd.f32 %v4975_v26, %v16161_v37  ;;  %v5033_v44 = vadd.f32 %v13148_v7, %v16164_v9  ;;  %v5930_v16 = vshrl.u32 %v5711_v4, 16  ;;  %v13761_v37 = vld [vmem:[%s19054_s3 + $0x80] sm:$0xff]   ;;  %v5669_v62 = vld [vmem:[#allocation2 + $0x9c] sm:$0xf] }
 0x255   : > { %v5870_v36 = vsel %vm13974_vm2, %v5865_v6, %v5869_v42  ;;  %v5874_v53 = vor.u32 %v5873_v31, %v5869_v42  ;;  %v5879_v17 = vrot.slane %v5877_v56, 5  ;;  %v5069_v51 = vadd.f32 %v16472_v13, %v5030_v58  ;;  %13257 = vmatpush3.bf16.msra.mxu1 %v13753_v0  ;;  %v16511_v42 = vld [vmem:[#allocation2 + $0x44] sm:$0x1]  ;;  %v4988_v56 = vpop.f32.mrf.mxu0 }
 0x256   : > { %v12278_v61 = vpack.c.bf16 %v5098_v28, %v5098_v28  ;;  %v5067_v5 = vadd.f32 %v16472_v13, %v5028_v59  ;;  %v5072_v12 = vadd.f32 %v16472_v13, %v5033_v44  ;;  %v16492_v25 = vrot.slane %v5930_v16, 4  ;;  %13258 = vmatprep.subr.bf16.mxu1 %v13757_v18  ;;  %v5680_v28 = vld [vmem:[#allocation2 + $0xb0] sm:$0x1] }
 0x257   : > { %v5875_v9 = vrot.slane %v5874_v53, 4  ;;  %v5101_v1 = vmax.f32 %v5069_v51, 0.0  ;;  %v5933_v46 = vshll.u32 %v5711_v4, 16  ;;  %v5943_v26 = vshrl.u32 %v16485_v48, 16 }
 0x258   : > { %v5464_v11 = vshrl.u32 %v12278_v61, 16  ;;  %v5467_v39 = vshll.u32 %v12278_v61, 16  ;;  %v5099_v49 = vmax.f32 %v5067_v5, 0.0  ;;  %v5104_v2 = vmax.f32 %v5072_v12, 0.0  ;;  %v5690_v12 = vld [vmem:[#allocation2 + $0xc0] sm:$0xf] }
 0x259   : > { %v5880_v0 = vsel %vm13974_vm2, %v5875_v9, %v5879_v17  ;;  %v12281_v45 = vpack.c.bf16 %v5101_v1, %v5101_v1  ;;  %v16500_v15 = vrot.slane %v5933_v46, 5  ;;  %v11857_v14 = vcombine.low %v5711_v4, %v16485_v48  ;;  %13259 = vmatpush3.bf16.msra.mxu1 %v13757_v18 }
 0x25a   : > { %v5466_v52 = vrot.slane %v5464_v11, 7  ;;  %v11830_v55 = vcombine.low %v5870_v36, %v5880_v0  ;;  %v12279_v43 = vpack.c.bf16 %v5099_v49, %v5099_v49  ;;  %v12284_v24 = vpack.c.bf16 %v5104_v2, %v5104_v2  ;;  %13260 = vmatprep.subr.bf16.mxu1 %v13761_v37  ;;  %v16523_v49 = vld [vmem:[#allocation2 + $0x64] sm:$0xf] }
 0x25b   : > { %v5489_v30 = vshrl.u32 %v12281_v45, 16  ;;  %v5492_v7 = vshll.u32 %v12281_v45, 16  ;;  %13227 = vmatmul.mubr.bf16.gmra.mxu0 %v11857_v14  ;;  %v5888_v23 = vor.u32 %v16399_v8, %v16397_v27  ;;  %v5891_v4 = vshll.u32 %v16387_v34, 16  ;;  %v5673_v8 = vld [vmem:[#allocation2 + $0xa4] sm:$0x1]  ;;  %v13149_v34 = vpop.f32.mrf.mxu0 }
 0x25c   : > { %v5469_v10 = vor.u32 %v5467_v39, %v5466_v52  ;;  %v5470_v31 = vrot.slane %v5466_v52, 4  ;;  %13174 = vmatprep.mubr.bf16.mxu1 %v11830_v55  ;;  %v5472_v18 = vshrl.u32 %v12279_v43, 16  ;;  %v5475_v6 = vshll.u32 %v12279_v43, 16  ;;  %v5713_v39 = vld [vmem:[#allocation2 + $0x60] sm:$0xf] }
 0x25d   : > { %v5491_v58 = vrot.slane %v5489_v30, 7  ;;  %v5515_v59 = vshrl.u32 %v12284_v24, 16  ;;  %v5518_v44 = vshll.u32 %v12284_v24, 16  ;;  %v5889_v16 = vrot.slane %v5888_v23, 4  ;;  %13261 = vmatpush3.bf16.msra.mxu1 %v13761_v37  ;;  %v16537_v43 = vld [vmem:[#allocation2 + $0x50] sm:$0x1] }
 0x25e   : > { %v5670_v36 = vsel %vm16178_vm11, %v5469_v10, %v5669_v62  ;;  %v5474_v27 = vrot.slane %v5472_v18, 7  ;;  %v5893_v53 = vrot.slane %v5891_v4, 5  ;;  %v5897_v17 = vrot.slane %v5895_v19, 4  ;;  %13342 = vmatprep.subr.bf16.mxu1 %v16506_v41  ;;  %v4991_v18 = vpop.f32.mrf.mxu0 }
 0x25f   : > { %5671 = vst [vmem:[#allocation2 + $0x9c] sm:$0xf] %v5670_v36  ;;  %v5494_v51 = vor.u32 %v5492_v7, %v5491_v58  ;;  %v5496_v61 = vrot.slane %v5491_v58, 4  ;;  %v16518_v5 = vrot.slane %v5515_v59, 7  ;;  %v5901_v9 = vshll.u32 %v16511_v42, 16 }
 0x260   : > { %v5477_v37 = vor.u32 %v5475_v6, %v5474_v27  ;;  %v5479_v1 = vrot.slane %v5474_v27, 4  ;;  %v5894_v46 = vsel %vm13974_vm2, %v5889_v16, %v5893_v53  ;;  %v5898_v11 = vor.u32 %v5897_v17, %v5893_v53  ;;  %v5715_v7 = vld [vmem:[#allocation2 + $0x6c] sm:$0xf]  ;;  %v16548_v6 = vld [vmem:[#allocation2 + $0x70] sm:$0xf] }
 0x261   : > { %v5495_v19 = vsel %vm16189_vm12, %v5487_v40, %v5494_v51  ;;  %v5681_v2 = vsel %vm16195_vm13, %v5496_v61, %v5680_v28  ;;  %v5520_v0 = vor.u32 %v5518_v44, %v16518_v5  ;;  %v5521_v45 = vrot.slane %v16518_v5, 4 }
 0x262   : > { %5679 = vst [vmem:[#allocation2 + $0xac] sm:$0xf] %v5495_v19  ;;  %5682 = vst [vmem:[#allocation2 + $0xb0] sm:$0x1] %v5681_v2  ;;  %v5478_v14 = vsel %vm16189_vm12, %v5470_v31, %v5477_v37  ;;  %v5674_v52 = vsel %vm16195_vm13, %v5479_v1, %v5673_v8  ;;  %v5899_v55 = vrot.slane %v5898_v11, 4  ;;  %v5903_v29 = vrot.slane %v5901_v9, 5 }
 0x263   : > { %5672 = vst [vmem:[#allocation2 + $0xa0] sm:$0xf] %v5478_v14  ;;  %5675 = vst [vmem:[#allocation2 + $0xa4] sm:$0x1] %v5674_v52  ;;  %v5691_v40 = vsel %vm16178_vm11, %v5520_v0, %v5690_v12  ;;  %v5954_v24 = vshrl.u32 %v5713_v39, 16  ;;  %v5957_v62 = vshll.u32 %v5713_v39, 16  ;;  %v11858_v4 = vcombine.low %v5713_v39, %v16523_v49 }
 0x264   : > { %v5967_v30 = vshrl.u32 %v16523_v49, 16  ;;  %5692 = vst [vmem:[#allocation2 + $0xc0] sm:$0xf] %v5691_v40  ;;  %v5904_v23 = vsel %vm13974_vm2, %v5899_v55, %v5903_v29  ;;  %v5031_v10 = vadd.f32 %v4988_v56, %v16167_v50  ;;  %v5912_v31 = vor.u32 %v16467_v60, %v16462_v32  ;;  %v16571_v11 = vld [vmem:[#allocation2 + $0x5c] sm:$0x1] }
 0x265   : > { %v11831_v58 = vcombine.low %v5894_v46, %v5904_v23  ;;  %v16550_v28 = vrot.slane %v5954_v24, 4  ;;  %v16552_v59 = vrot.slane %v5957_v62, 5  ;;  %v5915_v44 = vshll.u32 %v16437_v22, 16  ;;  %13230 = vmatprep.mubr.bf16.mxu0 %v11858_v4  ;;  %v5683_v55 = vld [vmem:[#allocation2 + $0xb4] sm:$0xf] }
 0x266   : > { %v5070_v16 = vadd.f32 %v16472_v13, %v5031_v10  ;;  %v5913_v36 = vrot.slane %v5912_v31, 4  ;;  %v5921_v50 = vrot.slane %v5919_v33, 4  ;;  %v5925_v56 = vshll.u32 %v16537_v43, 16 }
 0x267   : > { %13175 = vmatmul.mubr.bf16.gmra.mxu1 %v11831_v58  ;;  %v5917_v32 = vrot.slane %v5915_v44, 5  ;;  %v5034_v60 = vadd.f32 %v13149_v34, %v16170_v35  ;;  %v5032_v27 = vadd.f32 %v4991_v18, %v16172_v20  ;;  %v5978_v8 = vshrl.u32 %v5715_v7, 16  ;;  %v16581_v44 = vld [vmem:[#allocation2 + $0x7c] sm:$0xf] }
 0x268   : > { %v5102_v53 = vmax.f32 %v5070_v16, 0.0  ;;  %v5927_v17 = vrot.slane %v5925_v56, 5  ;;  %v5981_v51 = vshll.u32 %v5715_v7, 16  ;;  %v5991_v61 = vshrl.u32 %v16548_v6, 16 }
 0x269   : > { %v5918_v12 = vsel %vm13974_vm2, %v5913_v36, %v5917_v32  ;;  %v5922_v9 = vor.u32 %v5921_v50, %v5917_v32  ;;  %v5073_v33 = vadd.f32 %v16472_v13, %v5034_v60  ;;  %v5071_v37 = vadd.f32 %v16472_v13, %v5032_v27  ;;  %v5694_v32 = vld [vmem:[#allocation2 + $0xc8] sm:$0x1] }
 0x26a   : > { %v12282_v1 = vpack.c.bf16 %v5102_v53, %v5102_v53  ;;  %v16566_v46 = vrot.slane %v5978_v8, 4  ;;  %v16568_v35 = vrot.slane %v5981_v51, 5  ;;  %v11859_v20 = vcombine.low %v5715_v7, %v16548_v6 }
 0x26b   : > { %v5923_v39 = vrot.slane %v5922_v9, 4  ;;  %v5105_v34 = vmax.f32 %v5073_v33, 0.0  ;;  %v5103_v19 = vmax.f32 %v5071_v37, 0.0  ;;  %v5936_v2 = vor.u32 %v16500_v15, %v16492_v25  ;;  %v5717_v15 = vld [vmem:[#allocation2 + $0x78] sm:$0xf] }
 0x26c   : > { %v5498_v0 = vshrl.u32 %v12282_v1, 16  ;;  %v5501_v14 = vshll.u32 %v12282_v1, 16  ;;  %13231 = vmatmul.mubr.bf16.gmra.mxu0 %v11859_v20  ;;  %v5939_v13 = vshll.u32 %v16485_v48, 16  ;;  %v5945_v52 = vrot.slane %v5943_v26, 4 }
 0x26d   : > { %v5928_v29 = vsel %vm13974_vm2, %v5923_v39, %v5927_v17  ;;  %v12285_v40 = vpack.c.bf16 %v5105_v34, %v5105_v34  ;;  %v12283_v24 = vpack.c.bf16 %v5103_v19, %v5103_v19  ;;  %v5937_v62 = vrot.slane %v5936_v2, 4  ;;  %v5687_v17 = vld [vmem:[#allocation2 + $0xbc] sm:$0x1]  ;;  %v16588_v39 = vld [vmem:[#allocation2 + $0x68] sm:$0x1] }
 0x26e   : > { %v5500_v7 = vrot.slane %v5498_v0, 7  ;;  %v11832_v23 = vcombine.low %v5918_v12, %v5928_v29  ;;  %v5941_v4 = vrot.slane %v5939_v13, 5  ;;  %v5949_v25 = vshll.u32 %v16571_v11, 16  ;;  %v5719_v0 = vld [vmem:[#allocation2 + $0x84] sm:$0xf] }
 0x26f   : > { %v5523_v10 = vshrl.u32 %v12285_v40, 16  ;;  %v5526_v31 = vshll.u32 %v12285_v40, 16  ;;  %v5506_v18 = vshrl.u32 %v12283_v24, 16  ;;  %v5509_v58 = vshll.u32 %v12283_v24, 16 }
 0x270   : > { %v5503_v26 = vor.u32 %v5501_v14, %v5500_v7  ;;  %v5504_v16 = vrot.slane %v5500_v7, 4  ;;  %13178 = vmatprep.mubr.bf16.mxu1 %v11832_v23  ;;  %v5942_v36 = vsel %vm13974_vm2, %v5937_v62, %v5941_v4  ;;  %v5946_v50 = vor.u32 %v5945_v52, %v5941_v4  ;;  %v16593_v14 = vld [vmem:[#allocation2 + $0x88] sm:$0xf]  ;;  %v16610_v62 = vld [vmem:[#allocation2 + $0x74] sm:$0x1] }
 0x271   : > { %v5525_v56 = vrot.slane %v5523_v10, 7  ;;  %v5508_v60 = vrot.slane %v5506_v18, 7  ;;  %v5951_v27 = vrot.slane %v5949_v25, 5  ;;  %v6002_v8 = vshrl.u32 %v5717_v15, 16  ;;  %v16614_v25 = vld [vmem:[#allocation2 + $0x94] sm:$0xf] }
 0x272   : > { %v5684_v53 = vsel %vm16178_vm11, %v5503_v26, %v5683_v55  ;;  %v5947_v51 = vrot.slane %v5946_v50, 4  ;;  %v6005_v12 = vshll.u32 %v5717_v15, 16  ;;  %v6015_v9 = vshrl.u32 %v16581_v44, 16 }
 0x273   : > { %5685 = vst [vmem:[#allocation2 + $0xb4] sm:$0xf] %v5684_v53  ;;  %v5528_v33 = vor.u32 %v5526_v31, %v5525_v56  ;;  %v5530_v37 = vrot.slane %v5525_v56, 4  ;;  %v5511_v1 = vor.u32 %v5509_v58, %v5508_v60  ;;  %v5513_v20 = vrot.slane %v5508_v60, 4  ;;  %v16627_v53 = vld [vmem:[#allocation2 + $0x80] sm:$0x1] }
 0x274   : > { %v5952_v34 = vsel %vm13974_vm2, %v5947_v51, %v5951_v27  ;;  %v6004_v19 = vrot.slane %v6002_v8, 4  ;;  %v6007_v2 = vrot.slane %v6005_v12, 5  ;;  %v11860_v21 = vcombine.low %v5717_v15, %v16581_v44 }
 0x275   : > { %v5529_v13 = vsel %vm16189_vm12, %v5521_v45, %v5528_v33  ;;  %v5695_v52 = vsel %vm16195_vm13, %v5530_v37, %v5694_v32  ;;  %v5512_v55 = vsel %vm16189_vm12, %v5504_v16, %v5511_v1  ;;  %v5688_v29 = vsel %vm16195_vm13, %v5513_v20, %v5687_v17  ;;  %v16631_v1 = vld [vmem:[#allocation2 + $0xa0] sm:$0xf] }
 0x276   : > { %5693 = vst [vmem:[#allocation2 + $0xc4] sm:$0xf] %v5529_v13  ;;  %5696 = vst [vmem:[#allocation2 + $0xc8] sm:$0x1] %v5695_v52  ;;  %v11833_v40 = vcombine.low %v5942_v36, %v5952_v34  ;;  %13234 = vmatprep.mubr.bf16.mxu0 %v11860_v21  ;;  %v5960_v5 = vor.u32 %v16552_v59, %v16550_v28  ;;  %v5963_v45 = vshll.u32 %v16523_v49, 16  ;;  %v5969_v24 = vrot.slane %v5967_v30, 4 }
 0x277   : > { %5686 = vst [vmem:[#allocation2 + $0xb8] sm:$0xf] %v5512_v55  ;;  %5689 = vst [vmem:[#allocation2 + $0xbc] sm:$0x1] %v5688_v29  ;;  %v5973_v38 = vshll.u32 %v16588_v39, 16  ;;  %v6026_v7 = vshrl.u32 %v5719_v0, 16  ;;  %v11861_v28 = vcombine.low %v5719_v0, %v16593_v14  ;;  %v5984_v59 = vor.u32 %v16568_v35, %v16566_v46 }
 0x278   : > { %v6029_v23 = vshll.u32 %v5719_v0, 16  ;;  %v6039_v4 = vshrl.u32 %v16593_v14, 16  ;;  %13179 = vmatmul.mubr.bf16.gmra.mxu1 %v11833_v40  ;;  %v5961_v15 = vrot.slane %v5960_v5, 4  ;;  %v5965_v10 = vrot.slane %v5963_v45, 5 }
 0x279   : > { %v5975_v30 = vrot.slane %v5973_v38, 5  ;;  %v6028_v31 = vrot.slane %v6026_v7, 4  ;;  %v5987_v58 = vshll.u32 %v16548_v6, 16  ;;  %13235 = vmatmul.mubr.bf16.gmra.mxu0 %v11861_v28  ;;  %v5985_v36 = vrot.slane %v5984_v59, 4  ;;  %v16643_v38 = vld [vmem:[#allocation2 + $0x8c] sm:$0x1] }
 0x27a   : > { %v6031_v18 = vrot.slane %v6029_v23, 5  ;;  %v5966_v26 = vsel %vm13974_vm2, %v5961_v15, %v5965_v10  ;;  %v5970_v16 = vor.u32 %v5969_v24, %v5965_v10  ;;  %v5993_v50 = vrot.slane %v5991_v61, 4  ;;  %v5723_v61 = vld [vmem:[#allocation2 + $0x9c] sm:$0xf]  ;;  %v5725_v23 = vld [vmem:[#allocation2 + $0xa8] sm:$0xf] }
 0x27b   : > { %v5989_v56 = vrot.slane %v5987_v58, 5  ;;  %v5997_v32 = vshll.u32 %v16610_v62, 16  ;;  %v6050_v60 = vshrl.u32 %v5721_v3, 16  ;;  %v6053_v27 = vshll.u32 %v5721_v3, 16  ;;  %v16647_v59 = vld [vmem:[#allocation2 + $0xac] sm:$0xf] }
 0x27c   : > { %v5971_v46 = vrot.slane %v5970_v16, 4  ;;  %v6063_v35 = vshrl.u32 %v16614_v25, 16  ;;  %v11862_v8 = vcombine.low %v5721_v3, %v16614_v25  ;;  %v6008_v17 = vor.u32 %v6007_v2, %v6004_v19 }
 0x27d   : > { %v5990_v51 = vsel %vm13974_vm2, %v5985_v36, %v5989_v56  ;;  %v5994_v12 = vor.u32 %v5993_v50, %v5989_v56  ;;  %v5999_v33 = vrot.slane %v5997_v32, 5  ;;  %v6052_v37 = vrot.slane %v6050_v60, 4  ;;  %v16650_v36 = vld [vmem:[#allocation2 + $0x98] sm:$0x1]  ;;  %v5727_v32 = vld [vmem:[#allocation2 + $0xb4] sm:$0xf] }
 0x27e   : > { %v5976_v20 = vsel %vm13974_vm2, %v5971_v46, %v5975_v30  ;;  %v6055_v34 = vrot.slane %v6053_v27, 5  ;;  %13238 = vmatprep.mubr.bf16.mxu0 %v11862_v8  ;;  %v6009_v21 = vrot.slane %v6008_v17, 4  ;;  %v6011_v0 = vshll.u32 %v16581_v44, 16 }
 0x27f   : > { %v11834_v13 = vcombine.low %v5966_v26, %v5976_v20  ;;  %v5995_v52 = vrot.slane %v5994_v12, 4  ;;  %v6017_v19 = vrot.slane %v6015_v9, 4  ;;  %v6021_v2 = vshll.u32 %v16627_v53, 16 }
 0x280   : > { %v6013_v55 = vrot.slane %v6011_v0, 5  ;;  %v6074_v29 = vshrl.u32 %v5723_v61, 16  ;;  %v6077_v40 = vshll.u32 %v5723_v61, 16  ;;  %v6087_v5 = vshrl.u32 %v16631_v1, 16 }
 0x281   : > { %13182 = vmatprep.mubr.bf16.mxu1 %v11834_v13  ;;  %v6000_v45 = vsel %vm13974_vm2, %v5995_v52, %v5999_v33  ;;  %v6023_v24 = vrot.slane %v6021_v2, 5  ;;  %v11863_v3 = vcombine.low %v5723_v61, %v16631_v1  ;;  %v6032_v7 = vor.u32 %v6031_v18, %v6028_v31  ;;  %v16657_v33 = vld [vmem:[#allocation2 + $0xb8] sm:$0xf] }
 0x282   : > { %v11835_v15 = vcombine.low %v5990_v51, %v6000_v45  ;;  %v6014_v9 = vsel %vm13974_vm2, %v6009_v21, %v6013_v55  ;;  %v6018_v10 = vor.u32 %v6017_v19, %v6013_v55  ;;  %v6076_v28 = vrot.slane %v6074_v29, 4 }
 0x283   : > { %v6079_v30 = vrot.slane %v6077_v40, 5  ;;  %13239 = vmatmul.mubr.bf16.gmra.mxu0 %v11863_v3  ;;  %v6033_v58 = vrot.slane %v6032_v7, 4  ;;  %v6035_v26 = vshll.u32 %v16593_v14, 16  ;;  %v6041_v16 = vrot.slane %v6039_v4, 4  ;;  %v16665_v3 = vld [vmem:[#allocation2 + $0xa4] sm:$0x1] }
 0x284   : > { %13183 = vmatmul.mubr.bf16.gmra.mxu1 %v11835_v15  ;;  %v6019_v50 = vrot.slane %v6018_v10, 4  ;;  %v6045_v31 = vshll.u32 %v16643_v38, 16  ;;  %v6098_v18 = vshrl.u32 %v5725_v23, 16  ;;  %v6101_v56 = vshll.u32 %v5725_v23, 16 }
 0x285   : > { %v6037_v60 = vrot.slane %v6035_v26, 5  ;;  %v6111_v27 = vshrl.u32 %v16647_v59, 16  ;;  %v11864_v46 = vcombine.low %v5725_v23, %v16647_v59  ;;  %v6056_v8 = vor.u32 %v6055_v34, %v6052_v37  ;;  %v13758_v23 = vld [vmem:[#allocation2 + $0xc] sm:$0xff]  }
 0x286   : > { %v6024_v17 = vsel %vm13974_vm2, %v6019_v50, %v6023_v24  ;;  %v6047_v51 = vrot.slane %v6045_v31, 5  ;;  %v6100_v4 = vrot.slane %v6098_v18, 4  ;;  %v6103_v12 = vrot.slane %v6101_v56, 5 }
 0x287   : > { %v11836_v61 = vcombine.low %v6014_v9, %v6024_v17  ;;  %v6038_v20 = vsel %vm13974_vm2, %v6033_v58, %v6037_v60  ;;  %v6042_v21 = vor.u32 %v6041_v16, %v6037_v60  ;;  %13242 = vmatprep.mubr.bf16.mxu0 %v11864_v46  ;;  %v6057_v0 = vrot.slane %v6056_v8, 4  ;;  %v16670_v58 = vld [vmem:[#allocation2 + $0xb0] sm:$0x1] }
 0x288   : > { %v6059_v13 = vshll.u32 %v16614_v25, 16  ;;  %v6065_v52 = vrot.slane %v6063_v35, 4  ;;  %v6069_v37 = vshll.u32 %v16650_v36, 16  ;;  %v6122_v34 = vshrl.u32 %v5727_v32, 16 }
 0x289   : > { %13186 = vmatprep.mubr.bf16.mxu1 %v11836_v61  ;;  %v6043_v19 = vrot.slane %v6042_v21, 4  ;;  %v6125_v2 = vshll.u32 %v5727_v32, 16  ;;  %v6135_v55 = vshrl.u32 %v16657_v33, 16  ;;  %v11865_v29 = vcombine.low %v5727_v32, %v16657_v33  ;;  %v6740_v21 = vld [vmem:[#allocation2] sm:$0xe] }
 0x28a   : > { %v6061_v40 = vrot.slane %v6059_v13, 5  ;;  %v6071_v45 = vrot.slane %v6069_v37, 5  ;;  %v6124_v24 = vrot.slane %v6122_v34, 4  ;;  %v6080_v7 = vor.u32 %v6079_v30, %v6076_v28  ;;  %v13760_v34 = vld [vmem:[#allocation2 + $0x18] sm:$0xff]  }
 0x28b   : > { %v6048_v35 = vsel %vm13974_vm2, %v6043_v19, %v6047_v51  ;;  %v6127_v15 = vrot.slane %v6125_v2, 5  ;;  %13243 = vmatmul.mubr.bf16.gmra.mxu0 %v11865_v29  ;;  %v6083_v9 = vshll.u32 %v16631_v1, 16  ;;  %v6089_v10 = vrot.slane %v6087_v5, 4  ;;  %v13776_v29 = vld [vmem:[%s19054_s3 + $0x170] sm:$0xff]  }
 0x28c   : > { %v11837_v26 = vcombine.low %v6038_v20, %v6048_v35  ;;  %v6062_v16 = vsel %vm13974_vm2, %v6057_v0, %v6061_v40  ;;  %v6066_v50 = vor.u32 %v6065_v52, %v6061_v40  ;;  %v6081_v31 = vrot.slane %v6080_v7, 4  ;;  %13310 = vmatprep.mubr.bf16.mxu0 %v13758_v23  ;;  %v16679_v20 = vld [vmem:[#allocation2 + $0xbc] sm:$0x1]  ;;  %v13762_v7 = vld [vmem:[#allocation2 + $0x24] sm:$0xff]  }
 0x28d   : > { %v6085_v18 = vrot.slane %v6083_v9, 5  ;;  %v6093_v28 = vshll.u32 %v16665_v3, 16  ;;  %v6104_v30 = vor.u32 %v6103_v12, %v6100_v4  ;;  %v6107_v56 = vshll.u32 %v16647_v59, 16  ;;  %v13841_v9 = vld [vmem:[#allocation2 + $0x4] sm:$0xf] }
 0x28e   : > { %13187 = vmatmul.mubr.bf16.gmra.mxu1 %v11837_v26  ;;  %v6067_v32 = vrot.slane %v6066_v50, 4  ;;  %v6113_v60 = vrot.slane %v6111_v27, 4  ;;  %v6117_v5 = vshll.u32 %v16670_v58, 16  ;;  %v6128_v46 = vor.u32 %v6127_v15, %v6124_v24  ;;  %v6741_v27 = vld [vmem:[#allocation2 + $0xc] sm:$0xe] }
 0x28f   : > { %v6086_v8 = vsel %vm13974_vm2, %v6081_v31, %v6085_v18  ;;  %v6090_v17 = vor.u32 %v6089_v10, %v6085_v18  ;;  %v6095_v51 = vrot.slane %v6093_v28, 5  ;;  %v6105_v61 = vrot.slane %v6104_v30, 4  ;;  %v13842_v10 = vld [vmem:[#allocation2 + $0x8] sm:$0x1] }
 0x290   : > { %v6072_v4 = vsel %vm13974_vm2, %v6067_v32, %v6071_v45  ;;  %v6109_v12 = vrot.slane %v6107_v56, 5  ;;  %v6119_v0 = vrot.slane %v6117_v5, 5  ;;  %v16683_v13 = vrot.slane %v6128_v46, 4  ;;  %v13778_v46 = vld [vmem:[%s19054_s3 + $0x168] sm:$0xff]  }
 0x291   : > { %v11838_v52 = vcombine.low %v6062_v16, %v6072_v4  ;;  %v6091_v37 = vrot.slane %v6090_v17, 4  ;;  %v6131_v19 = vshll.u32 %v16657_v33, 16  ;;  %v6137_v2 = vrot.slane %v6135_v55, 4  ;;  %v6742_v16 = vld [vmem:[#allocation2 + $0x18] sm:$0xe] }
 0x292   : > { %v6110_v40 = vsel %vm13974_vm2, %v6105_v61, %v6109_v12  ;;  %v6114_v24 = vor.u32 %v6113_v60, %v6109_v12  ;;  %v6141_v45 = vshll.u32 %v16679_v20, 16  ;;  %v11874_v23 = vrot.slane %v6740_v21, 9  ;;  %v6743_v4 = vld [vmem:[#allocation2 + $0x24] sm:$0xe] }
 0x293   : > { %13190 = vmatprep.mubr.bf16.mxu1 %v11838_v52  ;;  %v6096_v35 = vsel %vm13974_vm2, %v6091_v37, %v6095_v51  ;;  %13311 = vmatmul.mubr.bf16.vlgmr.msra.gmra.mxu0 %v13760_v34  ;;  %v6133_v15 = vrot.slane %v6131_v19, 5  ;;  %v6790_v55 = vrot.slane %v13841_v9, 5  ;;  %v6793_v26 = vrot.slane %v13842_v10, 5  ;;  %v13844_v51 = vld [vmem:[#allocation2 + $0x14] sm:$0x1]  ;;  %v13781_v9 = vld [vmem:[%s19054_s3 + $0x160] sm:$0xff]  }
 0x294   : > { %v11839_v50 = vcombine.low %v6086_v8, %v6096_v35  ;;  %v6115_v31 = vrot.slane %v6114_v24, 4  ;;  %v6143_v18 = vrot.slane %v6141_v45, 5  ;;  %13314 = vmatprep.mubr.bf16.mxu0 %v13762_v7  ;;  %v11875_v28 = vrot.slane %v6741_v27, 9  ;;  %13391 = vmatpush3.bf16.msra.mxu0 %v16404_v57  ;;  %v13843_v57 = vld [vmem:[#allocation2 + $0x10] sm:$0xf]  ;;  %v13764_v10 = vld [vmem:[#allocation2 + $0x3c] sm:$0xff]  }
 0x295   : > { %v6134_v30 = vsel %vm13974_vm2, %v16683_v13, %v6133_v15  ;;  %v6138_v56 = vor.u32 %v6137_v2, %v6133_v15  ;;  %v16700_v60 = vsel %vm14326_vm5, %v11874_v23, %v6790_v55  ;;  %v6792_v5 = vrot.slane %v6790_v55, 4  ;;  %13392 = vmatprep.subr.bf16.mxu0 %v13776_v29  ;;  %v13845_v52 = vld [vmem:[#allocation2 + $0x1c] sm:$0xf]  ;;  %v13846_v2 = vld [vmem:[#allocation2 + $0x20] sm:$0x1]  ;;  %v13763_v7 = vld [vmem:[#allocation2 + $0x30] sm:$0xff]  }
 0x296   : > { %13191 = vmatmul.mubr.bf16.gmra.mxu1 %v11839_v50  ;;  %v6120_v8 = vsel %vm13974_vm2, %v6115_v31, %v6119_v0  ;;  %v6797_v17 = vrot.slane %v13843_v57, 5  ;;  %v6800_v61 = vrot.slane %v13844_v51, 5  ;;  %v11876_v21 = vrot.slane %v6742_v16, 9  ;;  %v6744_v45 = vld [vmem:[#allocation2 + $0x30] sm:$0xe] }
 0x297   : > { %v11840_v12 = vcombine.low %v6110_v40, %v6120_v8  ;;  %v6139_v13 = vrot.slane %v6138_v56, 4  ;;  %v6794_v27 = vsel %vm14326_vm5, %v6792_v5, %v6793_v26  ;;  %v6804_v37 = vrot.slane %v13845_v52, 5  ;;  %v13847_v26 = vld [vmem:[#allocation2 + $0x28] sm:$0xf]  ;;  %v6745_v31 = vld [vmem:[#allocation2 + $0x3c] sm:$0xe] }
 0x298   : > { %v11906_v34 = vcombine.low %v16700_v60, %v6794_v27  ;;  %v16712_v19 = vsel %vm14326_vm5, %v11875_v28, %v6797_v17  ;;  %v6799_v0 = vrot.slane %v6797_v17, 4  ;;  %v6807_v24 = vrot.slane %v13846_v2, 5  ;;  %13393 = vmatpush3.bf16.msra.mxu0 %v13776_v29  ;;  %v6746_v5 = vld [vmem:[#allocation2 + $0x48] sm:$0xe] }
 0x299   : > { %13194 = vmatprep.mubr.bf16.mxu1 %v11840_v12  ;;  %v6144_v40 = vsel %vm13974_vm2, %v6139_v13, %v6143_v18  ;;  %v16718_v23 = vsel %vm14326_vm5, %v11876_v21, %v6804_v37  ;;  %v6806_v35 = vrot.slane %v6804_v37, 4  ;;  %v11877_v15 = vrot.slane %v6743_v4, 9  ;;  %13394 = vmatprep.subr.bf16.mxu0 %v13778_v46  ;;  %v13849_v4 = vld [vmem:[#allocation2 + $0x40] sm:$0xf]  ;;  %v13783_v13 = vld [vmem:[%s19054_s3 + $0x158] sm:$0xff]  }
 0x29a   : > { %v11841_v55 = vcombine.low %v6134_v30, %v6144_v40  ;;  %v16725_v29 = vsel %vm14326_vm5, %v6799_v0, %v6800_v61  ;;  %v6811_v16 = vrot.slane %v13847_v26, 5  ;;  %v6814_v50 = vrot.slane %v16419_v54, 5  ;;  %v13848_v30 = vld [vmem:[#allocation2 + $0x34] sm:$0xf]  ;;  %v6748_v40 = vld [vmem:[#allocation2 + $0x60] sm:$0xe] }
 0x29b   : > { %13315 = vmatmul.mubr.bf16.gmra.mxu0 %v13763_v7  ;;  %v11907_v18 = vcombine.low %v16712_v19, %v16725_v29  ;;  %v16732_v28 = vsel %vm14326_vm5, %v6806_v35, %v6807_v24  ;;  %v11878_v56 = vrot.slane %v6744_v45, 9  ;;  %v6818_v60 = vrot.slane %v13848_v30, 5  ;;  %v6747_v37 = vld [vmem:[#allocation2 + $0x54] sm:$0xe]  ;;  %v13766_v7 = vld [vmem:[#allocation2 + $0x48] sm:$0xff]  }
 0x29c   : > { %13318 = vmatprep.mubr.bf16.mxu0 %v13764_v10  ;;  %v11908_v8 = vcombine.low %v16718_v23, %v16732_v28  ;;  %v16738_v54 = vsel %vm14326_vm5, %v11877_v15, %v6811_v16  ;;  %v6813_v57 = vrot.slane %v6811_v16, 4  ;;  %v6821_v17 = vrot.slane %v16458_v63, 5  ;;  %13395 = vmatpush3.bf16.msra.mxu0 %v13778_v46  ;;  %v6749_v16 = vld [vmem:[#allocation2 + $0x6c] sm:$0xe] }
 0x29d   : > { %v16743_v51 = vsel %vm14326_vm5, %v11878_v56, %v6818_v60  ;;  %v6820_v61 = vrot.slane %v6818_v60, 4  ;;  %v11879_v21 = vrot.slane %v6745_v31, 9  ;;  %v6825_v12 = vrot.slane %v13849_v4, 5  ;;  %13396 = vmatprep.subr.bf16.mxu0 %v13781_v9  ;;  %v13767_v31 = vld [vmem:[#allocation2 + $0x54] sm:$0xff]  }
 0x29e   : > { %13195 = vmatmul.mubr.bf16.gmra.mxu1 %v11841_v55  ;;  %v16750_v27 = vsel %vm14326_vm5, %v6813_v57, %v6814_v50  ;;  %v6828_v63 = vrot.slane %v16511_v42, 5  ;;  %v11880_v46 = vrot.slane %v6746_v5, 9  ;;  %v6832_v52 = vrot.slane %v16437_v22, 5  ;;  %v13786_v50 = vld [vmem:[%s19054_s3 + $0x150] sm:$0xff]  }
 0x29f   : > { %13262 = vmatprep.mubr.bf16.mxu1 %v11906_v34  ;;  %v11909_v0 = vcombine.low %v16738_v54, %v16750_v27  ;;  %v16758_v2 = vsel %vm14326_vm5, %v6820_v61, %v6821_v17  ;;  %v16762_v24 = vsel %vm14326_vm5, %v11879_v21, %v6825_v12  ;;  %v6827_v45 = vrot.slane %v6825_v12, 4  ;;  %v13768_v17 = vld [vmem:[%s19054_s3 + $0x130] sm:$0xff]  }
 0x2a0   : > { %v11910_v42 = vcombine.low %v16743_v51, %v16758_v2  ;;  %v16768_v22 = vsel %vm14326_vm5, %v11880_v46, %v6832_v52  ;;  %v6834_v34 = vrot.slane %v6832_v52, 4  ;;  %v6835_v35 = vrot.slane %v16537_v43, 5  ;;  %13397 = vmatpush3.bf16.msra.mxu0 %v13781_v9  ;;  %v6751_v52 = vld [vmem:[#allocation2 + $0x84] sm:$0xe] }
 0x2a1   : > { %v16773_v15 = vsel %vm14326_vm5, %v6827_v45, %v6828_v63  ;;  %v11881_v55 = vrot.slane %v6747_v37, 9  ;;  %v6839_v10 = vrot.slane %v16485_v48, 5  ;;  %v6842_v26 = vrot.slane %v16571_v11, 5  ;;  %13398 = vmatprep.subr.bf16.mxu0 %v13783_v13  ;;  %v6750_v48 = vld [vmem:[#allocation2 + $0x78] sm:$0xe]  ;;  %v13788_v37 = vld [vmem:[%s19054_s3 + $0x148] sm:$0xff]  }
 0x2a2   : > { %v11911_v43 = vcombine.low %v16762_v24, %v16773_v15  ;;  %v16784_v9 = vsel %vm14326_vm5, %v6834_v34, %v6835_v35  ;;  %v11882_v56 = vrot.slane %v6748_v40, 9  ;;  %v6846_v30 = vrot.slane %v16523_v49, 5  ;;  %v6752_v45 = vld [vmem:[#allocation2 + $0x90] sm:$0xe]  ;;  %v13771_v34 = vld [vmem:[%s19054_s3 + $0x128] sm:$0xff]  }
 0x2a3   : > { %13319 = vmatmul.mubr.bf16.gmra.mxu0 %v13766_v7  ;;  %v11912_v11 = vcombine.low %v16768_v22, %v16784_v9  ;;  %v16791_v60 = vsel %vm14326_vm5, %v11881_v55, %v6839_v10  ;;  %v6841_v5 = vrot.slane %v6839_v10, 4  ;;  %v6849_v57 = vrot.slane %v16588_v39, 5  ;;  %v8362_v7 = vld [vmem:[#allocation2 + $0xc] sm:$0xe]  ;;  %v6753_v35 = vld [vmem:[#allocation2 + $0x9c] sm:$0xe] }
 0x2a4   : > { %13322 = vmatprep.mubr.bf16.mxu0 %v13767_v31  ;;  %v16799_v49 = vsel %vm14326_vm5, %v11882_v56, %v6846_v30  ;;  %v6848_v61 = vrot.slane %v6846_v30, 4  ;;  %v11883_v21 = vrot.slane %v6749_v16, 9  ;;  %v6853_v4 = vrot.slane %v16548_v6, 5  ;;  %13399 = vmatpush3.bf16.msra.mxu0 %v13783_v13  ;;  %v13769_v55 = vld [vmem:[#allocation2 + $0x60] sm:$0xff]   ;;  %v16851_v31 = vld [vmem:[#allocation2 + $0x10] sm:$0xf] }
 0x2a5   : > { %v16804_v12 = vsel %vm14326_vm5, %v6841_v5, %v6842_v26  ;;  %v6856_v39 = vrot.slane %v16610_v62, 5  ;;  %v11884_v63 = vrot.slane %v6750_v48, 9  ;;  %v6860_v46 = vrot.slane %v16581_v44, 5  ;;  %13400 = vmatprep.subr.bf16.mxu0 %v13786_v50  ;;  %v13770_v56 = vld [vmem:[#allocation2 + $0x6c] sm:$0xff]   ;;  %v16860_v48 = vld [vmem:[#allocation2 + $0x14] sm:$0x1] }
 0x2a6   : > { %13263 = vmatmul.mubr.bf16.vlgmr.msra.gmra.mxu1 %v11907_v18  ;;  %v11913_v6 = vcombine.low %v16791_v60, %v16804_v12  ;;  %v16818_v13 = vsel %vm14326_vm5, %v6848_v61, %v6849_v57  ;;  %v16822_v44 = vsel %vm14326_vm5, %v11883_v21, %v6853_v4  ;;  %v6855_v62 = vrot.slane %v6853_v4, 4  ;;  %v8363_v4 = vld [vmem:[#allocation2 + $0x18] sm:$0xe]  ;;  %v13789_v22 = vld [vmem:[%s19054_s3 + $0x108] sm:$0xff]   ;;  %v17016_v9 = vld [vmem:[#allocation2 + $0x44] sm:$0x1] }
 0x2a7   : > { %13266 = vmatprep.mubr.bf16.mxu1 %v11908_v8  ;;  %13343 = vmatpush3.bf16.msra.mxu1 %v16506_v41  ;;  %v11914_v19 = vcombine.low %v16799_v49, %v16818_v13  ;;  %v16832_v29 = vsel %vm14326_vm5, %v11884_v63, %v6860_v46  ;;  %v6862_v18 = vrot.slane %v6860_v46, 4  ;;  %v6863_v40 = vrot.slane %v16627_v53, 5  ;;  %v17037_v49 = vld [vmem:[%s19054_s3 + $0x1b8] sm:$0xff]   ;;  %v8367_v13 = vld [vmem:[#allocation2 + $0x48] sm:$0xe] }
 0x2a8   : > { %13344 = vmatprep.subr.bf16.mxu1 %v13768_v17  ;;  %v16840_v23 = vsel %vm14326_vm5, %v6855_v62, %v6856_v39  ;;  %v11885_v41 = vrot.slane %v6751_v52, 9  ;;  %v6867_v28 = vrot.slane %v16593_v14, 5  ;;  %v6870_v8 = vrot.slane %v16643_v38, 5  ;;  %13401 = vmatpush3.bf16.msra.mxu0 %v13786_v50  ;;  %v6754_v52 = vld [vmem:[#allocation2 + $0xa8] sm:$0xe] }
 0x2a9   : > { %v11915_v53 = vcombine.low %v16822_v44, %v16840_v23  ;;  %v16848_v10 = vsel %vm14326_vm5, %v6862_v18, %v6863_v40  ;;  %v11886_v26 = vrot.slane %v6752_v45, 9  ;;  %v6874_v16 = vrot.slane %v16614_v25, 5  ;;  %13402 = vmatprep.subr.bf16.mxu0 %v13788_v37  ;;  %v13790_v25 = vld [vmem:[%s19054_s3 + $0x140] sm:$0xff]   ;;  %v16889_v40 = vld [vmem:[#allocation2 + $0x1c] sm:$0xf] }
 0x2aa   : > { %v11916_v14 = vcombine.low %v16832_v29, %v16848_v10  ;;  %v16857_v38 = vsel %vm14326_vm5, %v11885_v41, %v6867_v28  ;;  %v6869_v50 = vrot.slane %v6867_v28, 4  ;;  %v6877_v30 = vrot.slane %v16650_v36, 5  ;;  %v13775_v36 = vld [vmem:[%s19054_s3 + $0x120] sm:$0xff]  }
 0x2ab   : > { %13345 = vmatpush3.bf16.msra.mxu1 %v13768_v17  ;;  %13323 = vmatmul.mubr.bf16.gmra.mxu0 %v13769_v55  ;;  %v16867_v5 = vsel %vm14326_vm5, %v11886_v26, %v6874_v16  ;;  %v6876_v57 = vrot.slane %v6874_v16, 4  ;;  %v11887_v61 = vrot.slane %v6753_v35, 9  ;;  %v6881_v21 = vrot.slane %v16631_v1, 5  ;;  %v16906_v35 = vld [vmem:[%s19054_s3 + $0x1f8] sm:$0xff]   ;;  %v6755_v26 = vld [vmem:[#allocation2 + $0xb4] sm:$0xe] }
 0x2ac   : > { %13326 = vmatprep.mubr.bf16.mxu0 %v13770_v56  ;;  %13346 = vmatprep.subr.bf16.mxu1 %v13771_v34  ;;  %v16875_v39 = vsel %vm14326_vm5, %v6869_v50, %v6870_v8  ;;  %v6884_v17 = vrot.slane %v16665_v3, 5  ;;  %v12010_v63 = vrot.slane %v8362_v7, 9  ;;  %v8428_v46 = vrot.slane %v16851_v31, 5  ;;  %v16891_v3 = vld [vmem:[#allocation2 + $0x20] sm:$0x1]  ;;  %v13780_v16 = vld [vmem:[%s19054_s3 + $0x118] sm:$0xff]  }
 0x2ad   : > { %v11917_v1 = vcombine.low %v16857_v38, %v16875_v39  ;;  %v16883_v62 = vsel %vm14326_vm5, %v6876_v57, %v6877_v30  ;;  %v16887_v45 = vsel %vm14326_vm5, %v11887_v61, %v6881_v21  ;;  %v6883_v18 = vrot.slane %v6881_v21, 4  ;;  %13403 = vmatpush3.bf16.msra.mxu0 %v13788_v37  ;;  %v8364_v37 = vld [vmem:[#allocation2 + $0x24] sm:$0xe]  ;;  %v16927_v56 = vld [vmem:[#allocation2 + $0x28] sm:$0xf] }
 0x2ae   : > { %13267 = vmatmul.mubr.bf16.gmra.mxu1 %v11909_v0  ;;  %v11918_v7 = vcombine.low %v16867_v5, %v16883_v62  ;;  %v16900_v41 = vsel %vm14326_vm5, %v12010_v63, %v8428_v46  ;;  %v8430_v28 = vrot.slane %v8428_v46, 4  ;;  %v8431_v8 = vrot.slane %v16860_v48, 5  ;;  %13404 = vmatprep.subr.bf16.mxu0 %v13790_v25  ;;  %v13774_v61 = vld [vmem:[#allocation2 + $0x84] sm:$0xff]   ;;  %v16941_v46 = vld [vmem:[#allocation2 + $0x2c] sm:$0x1] }
 0x2af   : > { %13270 = vmatprep.mubr.bf16.mxu1 %v11910_v42  ;;  %13347 = vmatpush3.bf16.msra.mxu1 %v13771_v34  ;;  %v16913_v54 = vsel %vm14326_vm5, %v6883_v18, %v6884_v17  ;;  %v11888_v27 = vrot.slane %v6754_v52, 9  ;;  %v6888_v0 = vrot.slane %v16647_v59, 5  ;;  %v6891_v55 = vrot.slane %v16670_v58, 5  ;;  %v13772_v59 = vld [vmem:[#allocation2 + $0x78] sm:$0xff]  }
 0x2b0   : > { %13348 = vmatprep.subr.bf16.mxu1 %v13775_v36  ;;  %v16924_v2 = vsel %vm14326_vm5, %v8430_v28, %v8431_v8  ;;  %v12011_v42 = vrot.slane %v8363_v4, 9  ;;  %v8435_v34 = vrot.slane %v16889_v40, 5  ;;  %v8438_v57 = vrot.slane %v16891_v3, 5  ;;  %v7608_v8 = vld [vmem:[#allocation2 + $0xc] sm:$0xf] }
 0x2b1   : > { %v12042_v58 = vcombine.low %v16900_v41, %v16924_v2  ;;  %v16933_v50 = vsel %vm14326_vm5, %v11888_v27, %v6888_v0  ;;  %v6890_v30 = vrot.slane %v6888_v0, 4  ;;  %13405 = vmatpush3.bf16.msra.mxu0 %v13790_v25  ;;  %v11889_v17 = vrot.slane %v6755_v26, 9 }
 0x2b2   : > { %v16938_v21 = vsel %vm14326_vm5, %v12011_v42, %v8435_v34  ;;  %v8437_v4 = vrot.slane %v8435_v34, 4  ;;  %v6895_v63 = vrot.slane %v16657_v33, 5  ;;  %13486 = vmatprep.subr.bf16.mxu0 %v16906_v35  ;;  %v6898_v52 = vrot.slane %v16679_v20, 5  ;;  %v13785_v33 = vld [vmem:[%s19054_s3 + $0x110] sm:$0xff]  }
 0x2b3   : > { %13327 = vmatmul.mubr.bf16.gmra.mxu0 %v13772_v59  ;;  %13349 = vmatpush3.bf16.msra.mxu1 %v13775_v36  ;;  %v16946_v25 = vsel %vm14326_vm5, %v6890_v30, %v6891_v55  ;;  %v12012_v18 = vrot.slane %v8364_v37, 9  ;;  %v8442_v28 = vrot.slane %v16927_v56, 5  ;;  %v8445_v42 = vrot.slane %v16941_v46, 5  ;;  %v8365_v34 = vld [vmem:[#allocation2 + $0x30] sm:$0xe] }
 0x2b4   : > { %13330 = vmatprep.mubr.bf16.mxu0 %v13774_v61  ;;  %13350 = vmatprep.subr.bf16.mxu1 %v13780_v16  ;;  %v16957_v36 = vsel %vm14326_vm5, %v8437_v4, %v8438_v57  ;;  %v16961_v20 = vsel %vm14326_vm5, %v11889_v17, %v6895_v63  ;;  %v6897_v37 = vrot.slane %v6895_v63, 4  ;;  %v7657_v30 = vshrl.u32 %v7608_v8, 16  ;;  %v16978_v4 = vld [vmem:[#allocation2 + $0x34] sm:$0xf]  ;;  %v16991_v63 = vld [vmem:[#allocation2 + $0x38] sm:$0x1] }
 0x2b5   : > { %v16967_v55 = vsel %vm14326_vm5, %v12012_v18, %v8442_v28  ;;  %v8444_v26 = vrot.slane %v8442_v28, 4  ;;  %v7660_v57 = vshll.u32 %v7608_v8, 16  ;;  %v7666_v61 = vshll.u32 %v16851_v31, 16  ;;  %v13777_v28 = vld [vmem:[#allocation2 + $0x90] sm:$0xff]  }
 0x2b6   : > { %13271 = vmatmul.mubr.bf16.gmra.mxu1 %v11911_v43  ;;  %v16975_v59 = vsel %vm14326_vm5, %v6897_v37, %v6898_v52  ;;  %v7670_v15 = vshrl.u32 %v16851_v31, 16  ;;  %v7676_v43 = vshll.u32 %v16860_v48, 16  ;;  %v7611_v52 = vld [vmem:[#allocation2 + $0x18] sm:$0xf]  ;;  %v12013_v31 = vrot.slane %v8365_v34, 9 }
 0x2b7   : > { %13274 = vmatprep.mubr.bf16.mxu1 %v11912_v11  ;;  %13351 = vmatpush3.bf16.msra.mxu1 %v13780_v16  ;;  %v16987_v24 = vsel %vm14326_vm5, %v8444_v26, %v8445_v42  ;;  %v7659_v11 = vrot.slane %v7657_v30, 4  ;;  %v7662_v16 = vrot.slane %v7660_v57, 5  ;;  %v7668_v18 = vrot.slane %v7666_v61, 5  ;;  %v13779_v26 = vld [vmem:[#allocation2 + $0x9c] sm:$0xff]  }
 0x2b8   : > { %13352 = vmatprep.subr.bf16.mxu1 %v13785_v33  ;;  %v7672_v8 = vrot.slane %v7670_v15, 4  ;;  %v7678_v37 = vrot.slane %v7676_v43, 5  ;;  %v8449_v48 = vrot.slane %v16978_v4, 5  ;;  %v8452_v17 = vrot.slane %v16991_v63, 5  ;;  %v17005_v15 = vld [vmem:[#allocation2 + $0x40] sm:$0xf] }
 0x2b9   : > { %v7663_v42 = vor.u32 %v7662_v16, %v7659_v11  ;;  %v7681_v27 = vshrl.u32 %v7611_v52, 16  ;;  %v7684_v51 = vshll.u32 %v7611_v52, 16  ;;  %v7690_v61 = vshll.u32 %v16889_v40, 16  ;;  %v8366_v34 = vld [vmem:[#allocation2 + $0x3c] sm:$0xe]  ;;  %v13791_v43 = vld [vmem:[%s19054_s3 + $0x100] sm:$0xff]  }
 0x2ba   : > { %v7673_v0 = vor.u32 %v7672_v8, %v7668_v18  ;;  %v17002_v30 = vsel %vm14326_vm5, %v12013_v31, %v8449_v48  ;;  %v8451_v57 = vrot.slane %v8449_v48, 4  ;;  %v7694_v16 = vshrl.u32 %v16889_v40, 16 }
 0x2bb   : > { %13331 = vmatmul.mubr.bf16.gmra.mxu0 %v13777_v28  ;;  %13353 = vmatpush3.bf16.msra.mxu1 %v13785_v33  ;;  %v7664_v52 = vrot.slane %v7663_v42, 4  ;;  %v7683_v11 = vrot.slane %v7681_v27, 4  ;;  %v7686_v33 = vrot.slane %v7684_v51, 5  ;;  %v7692_v31 = vrot.slane %v7690_v61, 5 }
 0x2bc   : > { %13334 = vmatprep.mubr.bf16.mxu0 %v13779_v26  ;;  %13354 = vmatprep.subr.bf16.mxu1 %v13789_v22  ;;  %v7674_v28 = vrot.slane %v7673_v0, 4  ;;  %v17013_v8 = vsel %vm14326_vm5, %v8451_v57, %v8452_v17  ;;  %v7700_v48 = vshll.u32 %v16891_v3, 16  ;;  %v7696_v0 = vrot.slane %v7694_v16, 4  ;;  %v7614_v26 = vld [vmem:[#allocation2 + $0x24] sm:$0xf] }
 0x2bd   : > { %v7669_v27 = vsel %vm13974_vm2, %v7664_v52, %v7668_v18  ;;  %v12045_v40 = vcombine.low %v17002_v30, %v17013_v8  ;;  %v7687_v51 = vor.u32 %v7686_v33, %v7683_v11  ;;  %v12014_v60 = vrot.slane %v8366_v34, 9  ;;  %v7617_v52 = vld [vmem:[#allocation2 + $0x30] sm:$0xf]  ;;  %v13784_v11 = vld [vmem:[#allocation2 + $0xb4] sm:$0xff]  }
 0x2be   : > { %13275 = vmatmul.mubr.bf16.gmra.mxu1 %v11913_v6  ;;  %v7679_v3 = vsel %vm13974_vm2, %v7674_v28, %v7678_v37  ;;  %v7702_v17 = vrot.slane %v7700_v48, 5  ;;  %v8456_v12 = vrot.slane %v17005_v15, 5  ;;  %v7697_v42 = vor.u32 %v7696_v0, %v7692_v31 }
 0x2bf   : > { %13278 = vmatprep.mubr.bf16.mxu1 %v11914_v19  ;;  %13355 = vmatpush3.bf16.msra.mxu1 %v13789_v22  ;;  %v17031_v6 = vcombine.low %v7669_v27, %v7679_v3  ;;  %v7688_v18 = vrot.slane %v7687_v51, 4  ;;  %v8459_v57 = vrot.slane %v17016_v9, 5  ;;  %v13782_v19 = vld [vmem:[#allocation2 + $0xa8] sm:$0xff]   ;;  %v7705_v61 = vshrl.u32 %v7614_v26, 16 }
 0x2c0   : > { %13356 = vmatprep.subr.bf16.mxu1 %v13791_v43  ;;  %v17041_v22 = vsel %vm14326_vm5, %v12014_v60, %v8456_v12  ;;  %v8458_v37 = vrot.slane %v8456_v12, 4  ;;  %v7708_v34 = vshll.u32 %v7614_v26, 16  ;;  %v7698_v16 = vrot.slane %v7697_v42, 4  ;;  %v17047_v27 = vld [vmem:[#allocation2 + $0x4c] sm:$0xf] }
 0x2c1   : > { %v7693_v33 = vsel %vm13974_vm2, %v7688_v18, %v7692_v31  ;;  %v7714_v28 = vshll.u32 %v16927_v56, 16  ;;  %v7718_v48 = vshrl.u32 %v16927_v56, 16  ;;  %v7707_v0 = vrot.slane %v7705_v61, 4  ;;  %v17054_v60 = vld [vmem:[#allocation2 + $0x50] sm:$0x1] }
 0x2c2   : > { %v17051_v51 = vsel %vm14326_vm5, %v8458_v37, %v8459_v57  ;;  %v7710_v26 = vrot.slane %v7708_v34, 5  ;;  %v7724_v3 = vshll.u32 %v16941_v46, 16  ;;  %v7703_v31 = vsel %vm13974_vm2, %v7698_v16, %v7702_v17  ;;  %v8368_v16 = vld [vmem:[#allocation2 + $0x54] sm:$0xe] }
 0x2c3   : > { %13335 = vmatmul.mubr.bf16.gmra.mxu0 %v13782_v19  ;;  %13357 = vmatpush3.bf16.msra.mxu1 %v13791_v43  ;;  %v12046_v56 = vcombine.low %v17041_v22, %v17051_v51  ;;  %v7716_v43 = vrot.slane %v7714_v28, 5  ;;  %v7720_v12 = vrot.slane %v7718_v48, 4  ;;  %v17061_v18 = vcombine.low %v7693_v33, %v7703_v31  ;;  %v7620_v28 = vld [vmem:[#allocation2 + $0x3c] sm:$0xf] }
 0x2c4   : > { %13338 = vmatprep.mubr.bf16.mxu0 %v13784_v11  ;;  %13438 = vmatprep.subr.bf16.mxu1 %v17037_v49  ;;  %v7711_v42 = vor.u32 %v7710_v26, %v7707_v0  ;;  %v7726_v57 = vrot.slane %v7724_v3, 5  ;;  %v12015_v19 = vrot.slane %v8367_v13, 9  ;;  %v8463_v37 = vrot.slane %v17047_v27, 5  ;;  %v17077_v0 = vld [vmem:[#allocation2 + $0x58] sm:$0xf]  ;;  %v13787_v26 = vld [vmem:[#allocation2 + $0xc0] sm:$0xff]  }
 0x2c5   : > { %v7721_v46 = vor.u32 %v7720_v12, %v7716_v43  ;;  %v8466_v17 = vrot.slane %v17054_v60, 5  ;;  %v7729_v61 = vshrl.u32 %v7617_v52, 16  ;;  %v7732_v11 = vshll.u32 %v7617_v52, 16  ;;  %v17081_v3 = vld [vmem:[#allocation2 + $0x5c] sm:$0x1] }
 0x2c6   : > { %13279 = vmatmul.mubr.bf16.gmra.mxu1 %v11915_v53  ;;  %v7712_v34 = vrot.slane %v7711_v42, 4  ;;  %v7738_v33 = vshll.u32 %v16978_v4, 16  ;;  %v7742_v13 = vshrl.u32 %v16978_v4, 16  ;;  %v17075_v23 = vsel %vm14326_vm5, %v12015_v19, %v8463_v37  ;;  %v13801_v22 = vld [vmem:[%s19054_s3 + $0x1d8] sm:$0xff]  }
 0x2c7   : > { %13282 = vmatprep.mubr.bf16.mxu1 %v11916_v14  ;;  %v7722_v44 = vrot.slane %v7721_v46, 4  ;;  %v8465_v53 = vrot.slane %v8463_v37, 4  ;;  %v7731_v48 = vrot.slane %v7729_v61, 4  ;;  %v7734_v10 = vrot.slane %v7732_v11, 5 }
 0x2c8   : > { %v7717_v29 = vsel %vm13974_vm2, %v7712_v34, %v7716_v43  ;;  %v7740_v14 = vrot.slane %v7738_v33, 5  ;;  %v7744_v52 = vrot.slane %v7742_v13, 4  ;;  %v7748_v12 = vshll.u32 %v16991_v63, 16 }
 0x2c9   : > { %v7727_v4 = vsel %vm13974_vm2, %v7722_v44, %v7726_v57  ;;  %v17087_v31 = vsel %vm14326_vm5, %v8465_v53, %v8466_v17  ;;  %v12016_v42 = vrot.slane %v8368_v16, 9  ;;  %v7735_v46 = vor.u32 %v7734_v10, %v7731_v48  ;;  %v17100_v16 = vld [vmem:[#allocation2 + $0x64] sm:$0xf]  ;;  %v8369_v53 = vld [vmem:[#allocation2 + $0x60] sm:$0xe] }
 0x2ca   : > { %v17090_v19 = vcombine.low %v7717_v29, %v7727_v4  ;;  %v12047_v43 = vcombine.low %v17075_v23, %v17087_v31  ;;  %v7745_v37 = vor.u32 %v7744_v52, %v7740_v14  ;;  %v7750_v57 = vrot.slane %v7748_v12, 5  ;;  %v17117_v48 = vld [vmem:[#allocation2 + $0x68] sm:$0x1]  ;;  %v13797_v4 = vld [vmem:[%s19054_s3 + $0x1f0] sm:$0xff]  }
 0x2cb   : > { %13339 = vmatmul.mubr.bf16.gmra.mxu0 %v13787_v26  ;;  %v8470_v61 = vrot.slane %v17077_v0, 5  ;;  %v8473_v17 = vrot.slane %v17081_v3, 5  ;;  %v7753_v34 = vshrl.u32 %v7620_v28, 16  ;;  %v7736_v63 = vrot.slane %v7735_v46, 4  ;;  %v7623_v26 = vld [vmem:[#allocation2 + $0x48] sm:$0xf] }
 0x2cc   : > { %13406 = vmatprep.mubr.bf16.mxu0 %v12042_v58  ;;  %v7746_v11 = vrot.slane %v7745_v37, 4  ;;  %v7756_v33 = vshll.u32 %v7620_v28, 16  ;;  %v7762_v13 = vshll.u32 %v17005_v15, 16  ;;  %v7766_v44 = vshrl.u32 %v17005_v15, 16 }
 0x2cd   : > { %v17107_v41 = vsel %vm14326_vm5, %v12016_v42, %v8470_v61  ;;  %v8472_v2 = vrot.slane %v8470_v61, 4  ;;  %v7755_v58 = vrot.slane %v7753_v34, 4  ;;  %v7741_v28 = vsel %vm13974_vm2, %v7736_v63, %v7740_v14  ;;  %v8370_v63 = vld [vmem:[#allocation2 + $0x6c] sm:$0xe] }
 0x2ce   : > { %13283 = vmatmul.mubr.bf16.gmra.mxu1 %v11917_v1  ;;  %v7751_v38 = vsel %vm13974_vm2, %v7746_v11, %v7750_v57  ;;  %v7758_v39 = vrot.slane %v7756_v33, 5  ;;  %v7764_v1 = vrot.slane %v7762_v13, 5  ;;  %v7768_v10 = vrot.slane %v7766_v44, 4  ;;  %v7626_v11 = vld [vmem:[#allocation2 + $0x54] sm:$0xf] }
 0x2cf   : > { %13286 = vmatprep.mubr.bf16.mxu1 %v11918_v7  ;;  %v17119_v29 = vcombine.low %v7741_v28, %v7751_v38  ;;  %v17123_v15 = vsel %vm14326_vm5, %v8472_v2, %v8473_v17  ;;  %v7772_v5 = vshll.u32 %v17016_v9, 16  ;;  %v12017_v14 = vrot.slane %v8369_v53, 9 }
 0x2d0   : > { %v12048_v62 = vcombine.low %v17107_v41, %v17123_v15  ;;  %v7759_v7 = vor.u32 %v7758_v39, %v7755_v58  ;;  %v8477_v52 = vrot.slane %v17100_v16, 5  ;;  %v7769_v12 = vor.u32 %v7768_v10, %v7764_v1  ;;  %v13804_v41 = vld [vmem:[%s19054_s3 + $0x1c8] sm:$0xff]  }
 0x2d1   : > { %v7774_v42 = vrot.slane %v7772_v5, 5  ;;  %v8480_v46 = vrot.slane %v17117_v48, 5  ;;  %v7777_v37 = vshrl.u32 %v7623_v26, 16  ;;  %v19242_v57 = vcombine.low %v16938_v21, %v16957_v36  ;;  %v17145_v36 = vld [vmem:[#allocation2 + $0x70] sm:$0xf] }
 0x2d2   : > { %v7760_v9 = vrot.slane %v7759_v7, 4  ;;  %v17138_v61 = vsel %vm14326_vm5, %v12017_v14, %v8477_v52  ;;  %v8479_v17 = vrot.slane %v8477_v52, 4  ;;  %v7780_v34 = vshll.u32 %v7623_v26, 16 }
 0x2d3   : > { %13407 = vmatmul.mubr.bf16.vlgmr.msra.gmra.mxu0 %v19242_v57  ;;  %v19243_v33 = vcombine.low %v16967_v55, %v16987_v24  ;;  %v7770_v13 = vrot.slane %v7769_v12, 4  ;;  %v7779_v2 = vrot.slane %v7777_v37, 4  ;;  %v7786_v58 = vshll.u32 %v17047_v27, 16  ;;  %v17155_v24 = vld [vmem:[#allocation2 + $0x74] sm:$0x1] }
 0x2d4   : > { %v7790_v21 = vshrl.u32 %v17047_v27, 16  ;;  %13487 = vmatpush3.bf16.msra.mxu0 %v16906_v35  ;;  %v7765_v44 = vsel %vm13974_vm2, %v7760_v9, %v7764_v1  ;;  %v17152_v53 = vsel %vm14326_vm5, %v8479_v17, %v8480_v46  ;;  %v7782_v28 = vrot.slane %v7780_v34, 5  ;;  %v13798_v27 = vld [vmem:[%s19054_s3 + $0x1e8] sm:$0xff]   ;;  %v13800_v9 = vld [vmem:[%s19054_s3 + $0x1e0] sm:$0xff]  }
 0x2d5   : > { %13410 = vmatprep.mubr.bf16.mxu0 %v19243_v33  ;;  %v7796_v55 = vshll.u32 %v17054_v60, 16  ;;  %13488 = vmatprep.subr.bf16.mxu0 %v13797_v4  ;;  %v19244_v35 = vcombine.low %v16887_v45, %v16913_v54  ;;  %v7775_v38 = vsel %vm13974_vm2, %v7770_v13, %v7774_v42  ;;  %v12049_v39 = vcombine.low %v17138_v61, %v17152_v53  ;;  %v8371_v42 = vld [vmem:[#allocation2 + $0x78] sm:$0xe] }
 0x2d6   : > { %v7788_v1 = vrot.slane %v7786_v58, 5  ;;  %v7792_v26 = vrot.slane %v7790_v21, 4  ;;  %v19245_v60 = vcombine.low %v16933_v50, %v16946_v25  ;;  %v17170_v10 = vcombine.low %v7765_v44, %v7775_v38  ;;  %v7629_v25 = vld [vmem:[#allocation2 + $0x60] sm:$0xf] }
 0x2d7   : > { %13287 = vmatmul.mubr.bf16.gmra.mxu1 %v19244_v35  ;;  %v7783_v5 = vor.u32 %v7782_v28, %v7779_v2  ;;  %v7798_v7 = vrot.slane %v7796_v55, 5  ;;  %v12018_v14 = vrot.slane %v8370_v63, 9  ;;  %v8484_v45 = vrot.slane %v17145_v36, 5  ;;  %v17190_v58 = vld [vmem:[#allocation2 + $0x80] sm:$0x1] }
 0x2d8   : > { %13290 = vmatprep.mubr.bf16.mxu1 %v19245_v60  ;;  %v7793_v52 = vor.u32 %v7792_v26, %v7788_v1  ;;  %v8487_v54 = vrot.slane %v17155_v24, 5  ;;  %v7801_v12 = vshrl.u32 %v7626_v11, 16  ;;  %13489 = vmatpush3.bf16.msra.mxu0 %v13797_v4  ;;  %v7804_v37 = vshll.u32 %v7626_v11, 16  ;;  %v17183_v4 = vld [vmem:[#allocation2 + $0x7c] sm:$0xf] }
 0x2d9   : > { %v7784_v46 = vrot.slane %v7783_v5, 4  ;;  %v7810_v57 = vshll.u32 %v17077_v0, 16  ;;  %v7814_v50 = vshrl.u32 %v17077_v0, 16  ;;  %13490 = vmatprep.subr.bf16.mxu0 %v13798_v27  ;;  %v17181_v34 = vsel %vm14326_vm5, %v12018_v14, %v8484_v45  ;;  %v7632_v14 = vld [vmem:[#allocation2 + $0x6c] sm:$0xf] }
 0x2da   : > { %v7794_v17 = vrot.slane %v7793_v52, 4  ;;  %v8486_v63 = vrot.slane %v8484_v45, 4  ;;  %v7803_v33 = vrot.slane %v7801_v12, 4  ;;  %v7806_v11 = vrot.slane %v7804_v37, 5  ;;  %v17227_v37 = vld [vmem:[#allocation2 + $0x8c] sm:$0x1] }
 0x2db   : > { %13411 = vmatmul.mubr.bf16.gmra.mxu0 %v12045_v40  ;;  %v7789_v0 = vsel %vm13974_vm2, %v7784_v46, %v7788_v1  ;;  %v7812_v13 = vrot.slane %v7810_v57, 5  ;;  %v7816_v2 = vrot.slane %v7814_v50, 4  ;;  %v7820_v30 = vshll.u32 %v17081_v3, 16  ;;  %v8372_v1 = vld [vmem:[#allocation2 + $0x84] sm:$0xe]  ;;  %v13803_v57 = vld [vmem:[%s19054_s3 + $0x1d0] sm:$0xff]  }
 0x2dc   : > { %13414 = vmatprep.mubr.bf16.mxu0 %v12046_v56  ;;  %v7799_v21 = vsel %vm13974_vm2, %v7794_v17, %v7798_v7  ;;  %v17199_v44 = vsel %vm14326_vm5, %v8486_v63, %v8487_v54  ;;  %v12019_v8 = vrot.slane %v8371_v42, 9  ;;  %13491 = vmatpush3.bf16.msra.mxu0 %v13798_v27  ;;  %v7807_v55 = vor.u32 %v7806_v11, %v7803_v33  ;;  %v17221_v54 = vld [vmem:[#allocation2 + $0x88] sm:$0xf]  ;;  %v13793_v11 = vld [vmem:[%s19054_s3 + $0x1b0] sm:$0xff]  }
 0x2dd   : > { %v17202_v40 = vcombine.low %v7789_v0, %v7799_v21  ;;  %v12050_v28 = vcombine.low %v17181_v34, %v17199_v44  ;;  %v7817_v35 = vor.u32 %v7816_v2, %v7812_v13  ;;  %13492 = vmatprep.subr.bf16.mxu0 %v13800_v9  ;;  %v19246_v51 = vcombine.low %v16961_v20, %v16975_v59 }
 0x2de   : > { %v7822_v56 = vrot.slane %v7820_v30, 5  ;;  %v8491_v3 = vrot.slane %v17183_v4, 5  ;;  %v8494_v27 = vrot.slane %v17190_v58, 5  ;;  %v7825_v38 = vshrl.u32 %v7629_v25, 16 }
 0x2df   : > { %13291 = vmatmul.mubr.bf16.gmra.mxu1 %v19246_v51  ;;  %v7808_v26 = vrot.slane %v7807_v55, 4  ;;  %v7818_v60 = vrot.slane %v7817_v35, 4  ;;  %v7828_v5 = vshll.u32 %v7629_v25, 16  ;;  %v7834_v7 = vshll.u32 %v17100_v16, 16 }
 0x2e0   : > { %13358 = vmatprep.mubr.bf16.mxu1 %v17031_v6  ;;  %v17218_v52 = vsel %vm14326_vm5, %v12019_v8, %v8491_v3  ;;  %v8493_v20 = vrot.slane %v8491_v3, 4  ;;  %v7827_v59 = vrot.slane %v7825_v38, 4  ;;  %v7838_v45 = vshrl.u32 %v17100_v16, 16  ;;  %13493 = vmatpush3.bf16.msra.mxu0 %v13800_v9  ;;  %v8373_v8 = vld [vmem:[#allocation2 + $0x90] sm:$0xe] }
 0x2e1   : > { %v7813_v6 = vsel %vm13974_vm2, %v7808_v26, %v7812_v13  ;;  %v7823_v12 = vsel %vm13974_vm2, %v7818_v60, %v7822_v56  ;;  %v7830_v42 = vrot.slane %v7828_v5, 5  ;;  %v7836_v46 = vrot.slane %v7834_v7, 5  ;;  %13494 = vmatprep.subr.bf16.mxu0 %v13801_v22  ;;  %v7635_v38 = vld [vmem:[#allocation2 + $0x78] sm:$0xf] }
 0x2e2   : > { %v17232_v50 = vcombine.low %v7813_v6, %v7823_v12  ;;  %v17236_v16 = vsel %vm14326_vm5, %v8493_v20, %v8494_v27  ;;  %v7840_v25 = vrot.slane %v7838_v45, 4  ;;  %v7844_v9 = vshll.u32 %v17117_v48, 16  ;;  %v17273_v27 = vld [vmem:[#allocation2 + $0x98] sm:$0x1]  ;;  %v13806_v6 = vld [vmem:[%s19054_s3 + $0x1c0] sm:$0xff]  }
 0x2e3   : > { %13415 = vmatmul.mubr.bf16.gmra.mxu0 %v12047_v43  ;;  %v12051_v17 = vcombine.low %v17218_v52, %v17236_v16  ;;  %v7831_v63 = vor.u32 %v7830_v42, %v7827_v59  ;;  %v12020_v33 = vrot.slane %v8372_v1, 9  ;;  %v8498_v0 = vrot.slane %v17221_v54, 5 }
 0x2e4   : > { %13418 = vmatprep.mubr.bf16.mxu0 %v12048_v62  ;;  %v7841_v48 = vor.u32 %v7840_v25, %v7836_v46  ;;  %v7846_v13 = vrot.slane %v7844_v9, 5  ;;  %v8501_v23 = vrot.slane %v17227_v37, 5  ;;  %v7849_v31 = vshrl.u32 %v7632_v14, 16  ;;  %13495 = vmatpush3.bf16.msra.mxu0 %v13801_v22  ;;  %v17262_v22 = vld [vmem:[#allocation2 + $0x94] sm:$0xf] }
 0x2e5   : > { %v7832_v43 = vrot.slane %v7831_v63, 4  ;;  %v17254_v2 = vsel %vm14326_vm5, %v12020_v33, %v8498_v0  ;;  %v8500_v21 = vrot.slane %v8498_v0, 4  ;;  %v7852_v30 = vshll.u32 %v7632_v14, 16  ;;  %13496 = vmatprep.subr.bf16.mxu0 %v13803_v57  ;;  %v8374_v25 = vld [vmem:[#allocation2 + $0x9c] sm:$0xe]  ;;  %v13796_v63 = vld [vmem:[%s19054_s3 + $0x1a0] sm:$0xff]  }
 0x2e6   : > { %v7842_v15 = vrot.slane %v7841_v48, 4  ;;  %v7851_v62 = vrot.slane %v7849_v31, 4  ;;  %v7858_v55 = vshll.u32 %v17145_v36, 16  ;;  %v7862_v35 = vshrl.u32 %v17145_v36, 16  ;;  %v7638_v9 = vld [vmem:[#allocation2 + $0x84] sm:$0xf] }
 0x2e7   : > { %13359 = vmatmul.mubr.bf16.vlgmr.msra.gmra.mxu1 %v17061_v18  ;;  %v7837_v51 = vsel %vm13974_vm2, %v7832_v43, %v7836_v46  ;;  %v17270_v56 = vsel %vm14326_vm5, %v8500_v21, %v8501_v23  ;;  %v7854_v18 = vrot.slane %v7852_v30, 5  ;;  %v7868_v3 = vshll.u32 %v17155_v24, 16  ;;  %v17304_v0 = vld [vmem:[#allocation2 + $0xa0] sm:$0xf]  ;;  %v17310_v48 = vld [vmem:[#allocation2 + $0xa4] sm:$0x1] }
 0x2e8   : > { %13362 = vmatprep.mubr.bf16.mxu1 %v17090_v19  ;;  %13439 = vmatpush3.bf16.msra.mxu1 %v17037_v49  ;;  %v13794_v19 = vld [vmem:[%s19054_s3 + $0x1a8] sm:$0xff]   ;;  %v7847_v49 = vsel %vm13974_vm2, %v7842_v15, %v7846_v13  ;;  %v12052_v36 = vcombine.low %v17254_v2, %v17270_v56  ;;  %v7860_v1 = vrot.slane %v7858_v55, 5  ;;  %v7864_v26 = vrot.slane %v7862_v35, 4 }
 0x2e9   : > { %13440 = vmatprep.subr.bf16.mxu1 %v13793_v11  ;;  %13497 = vmatpush3.bf16.msra.mxu0 %v13803_v57  ;;  %v17282_v60 = vcombine.low %v7837_v51, %v7847_v49  ;;  %v7855_v24 = vor.u32 %v7854_v18, %v7851_v62  ;;  %v7870_v5 = vrot.slane %v7868_v3, 5  ;;  %v12021_v7 = vrot.slane %v8373_v8, 9 }
 0x2ea   : > { %13498 = vmatprep.subr.bf16.mxu0 %v13804_v41  ;;  %v7865_v14 = vor.u32 %v7864_v26, %v7860_v1  ;;  %v8505_v20 = vrot.slane %v17262_v22, 5  ;;  %v8508_v59 = vrot.slane %v17273_v27, 5  ;;  %v7873_v45 = vshrl.u32 %v7635_v38, 16 }
 0x2eb   : > { %13419 = vmatmul.mubr.bf16.gmra.mxu0 %v12049_v39  ;;  %v7856_v12 = vrot.slane %v7855_v24, 4  ;;  %v7876_v42 = vshll.u32 %v7635_v38, 16  ;;  %v7882_v46 = vshll.u32 %v17183_v4, 16  ;;  %v7886_v57 = vshrl.u32 %v17183_v4, 16  ;;  %v17306_v4 = vpop.f32.mrf.mxu0  ;;  %v7641_v38 = vld [vmem:[#allocation2 + $0x90] sm:$0xf] }
 0x2ec   : > { %13441 = vmatpush3.bf16.msra.mxu1 %v13793_v11  ;;  %13422 = vmatprep.mubr.bf16.mxu0 %v12050_v28  ;;  %v7866_v33 = vrot.slane %v7865_v14, 4  ;;  %v17302_v61 = vsel %vm14326_vm5, %v12021_v7, %v8505_v20  ;;  %v8507_v53 = vrot.slane %v8505_v20, 4  ;;  %v7875_v39 = vrot.slane %v7873_v45, 4  ;;  %v8375_v24 = vld [vmem:[#allocation2 + $0xa8] sm:$0xe] }
 0x2ed   : > { %13442 = vmatprep.subr.bf16.mxu1 %v13794_v19  ;;  %v7861_v34 = vsel %vm13974_vm2, %v7856_v12, %v7860_v1  ;;  %v7878_v44 = vrot.slane %v7876_v42, 5  ;;  %v7884_v28 = vrot.slane %v7882_v46, 5  ;;  %v7888_v11 = vrot.slane %v7886_v57, 4  ;;  %13499 = vmatpush3.bf16.msra.mxu0 %v13804_v41  ;;  %v17348_v45 = vld [vmem:[#allocation2 + $0xb0] sm:$0x1] }
 0x2ee   : > { %v7871_v13 = vsel %vm13974_vm2, %v7866_v33, %v7870_v5  ;;  %v17317_v23 = vsel %vm14326_vm5, %v8507_v53, %v8508_v59  ;;  %v7892_v31 = vshll.u32 %v17190_v58, 16  ;;  %v12022_v43 = vrot.slane %v8374_v25, 9  ;;  %13500 = vmatprep.subr.bf16.mxu0 %v13806_v6  ;;  %v13799_v58 = vld [vmem:[%s19054_s3 + $0x198] sm:$0xff]   ;;  %v17346_v59 = vld [vmem:[#allocation2 + $0xac] sm:$0xf] }
 0x2ef   : > { %13363 = vmatmul.mubr.bf16.gmra.mxu1 %v17119_v29  ;;  %v17321_v21 = vcombine.low %v7861_v34, %v7871_v13  ;;  %v12053_v30 = vcombine.low %v17302_v61, %v17317_v23  ;;  %v7879_v29 = vor.u32 %v7878_v44, %v7875_v39  ;;  %v8512_v8 = vrot.slane %v17304_v0, 5  ;;  %v8376_v39 = vld [vmem:[#allocation2 + $0xb4] sm:$0xe]  ;;  %v7644_v34 = vld [vmem:[#allocation2 + $0x9c] sm:$0xf] }
 0x2f0   : > { %13366 = vmatprep.mubr.bf16.mxu1 %v17170_v10  ;;  %13443 = vmatpush3.bf16.msra.mxu1 %v13794_v19  ;;  %v7889_v41 = vor.u32 %v7888_v11, %v7884_v28  ;;  %v7894_v15 = vrot.slane %v7892_v31, 5  ;;  %v8515_v62 = vrot.slane %v17310_v48, 5  ;;  %v7897_v55 = vshrl.u32 %v7638_v9, 16  ;;  %v17330_v10 = vpop.f32.mrf.mxu0  ;;  %v17373_v13 = vld [vmem:[#allocation2 + $0xb8] sm:$0xf] }
 0x2f1   : > { %13444 = vmatprep.subr.bf16.mxu1 %v13796_v63  ;;  %v7880_v35 = vrot.slane %v7879_v29, 4  ;;  %v17334_v51 = vsel %vm14326_vm5, %v12022_v43, %v8512_v8  ;;  %v8514_v18 = vrot.slane %v8512_v8, 4  ;;  %v7900_v3 = vshll.u32 %v7638_v9, 16  ;;  %13501 = vmatpush3.bf16.msra.mxu0 %v13806_v6  ;;  %v17379_v8 = vld [vmem:[#allocation2 + $0xbc] sm:$0x1] }
 0x2f2   : > { %v7890_v19 = vrot.slane %v7889_v41, 4  ;;  %v7899_v49 = vrot.slane %v7897_v55, 4  ;;  %v7906_v1 = vshll.u32 %v17221_v54, 16  ;;  %v7910_v26 = vshrl.u32 %v17221_v54, 16  ;;  %v17359_v6 = vpop.f32.mrf.mxu0  ;;  %v13805_v41 = vld [vmem:[%s19054_s3 + $0x188] sm:$0xff]  }
 0x2f3   : > { %13423 = vmatmul.mubr.bf16.gmra.mxu0 %v12051_v17  ;;  %v7885_v5 = vsel %vm13974_vm2, %v7880_v35, %v7884_v28  ;;  %v8516_v7 = vsel %vm14326_vm5, %v8514_v18, %v8515_v62  ;;  %v7902_v14 = vrot.slane %v7900_v3, 5  ;;  %v7916_v20 = vshll.u32 %v17227_v37, 16  ;;  %v13802_v37 = vld [vmem:[%s19054_s3 + $0x190] sm:$0xff]  }
 0x2f4   : > { %13445 = vmatpush3.bf16.msra.mxu1 %v13796_v63  ;;  %13426 = vmatprep.mubr.bf16.mxu0 %v12052_v36  ;;  %v7895_v52 = vsel %vm13974_vm2, %v7890_v19, %v7894_v15  ;;  %v12054_v54 = vcombine.low %v17334_v51, %v8516_v7  ;;  %v7908_v16 = vrot.slane %v7906_v1, 5  ;;  %v7912_v17 = vrot.slane %v7910_v26, 4 }
 0x2f5   : > { %13446 = vmatprep.subr.bf16.mxu1 %v13799_v58  ;;  %v17361_v12 = vcombine.low %v7885_v5, %v7895_v52  ;;  %v7903_v42 = vor.u32 %v7902_v14, %v7899_v49  ;;  %v7918_v46 = vrot.slane %v7916_v20, 5  ;;  %v12023_v2 = vrot.slane %v8375_v24, 9  ;;  %v13807_v5 = vld [vmem:[%s19054_s3 + $0x180] sm:$0xff]  }
 0x2f6   : > { %v7913_v56 = vor.u32 %v7912_v17, %v7908_v16  ;;  %v8519_v36 = vrot.slane %v17346_v59, 5  ;;  %v8522_v57 = vrot.slane %v17348_v45, 5  ;;  %v7921_v25 = vshrl.u32 %v7641_v38, 16 }
 0x2f7   : > { %13367 = vmatmul.mubr.bf16.gmra.mxu1 %v17202_v40  ;;  %v7904_v9 = vrot.slane %v7903_v42, 4  ;;  %v7924_v63 = vshll.u32 %v7641_v38, 16  ;;  %v7930_v33 = vshll.u32 %v17262_v22, 16  ;;  %v7934_v53 = vshrl.u32 %v17262_v22, 16 }
 0x2f8   : > { %13370 = vmatprep.mubr.bf16.mxu1 %v17232_v50  ;;  %13447 = vmatpush3.bf16.msra.mxu1 %v13799_v58  ;;  %v7914_v44 = vrot.slane %v7913_v56, 4  ;;  %v17371_v40 = vsel %vm14326_vm5, %v12023_v2, %v8519_v36  ;;  %v8521_v28 = vrot.slane %v8519_v36, 4  ;;  %v7923_v11 = vrot.slane %v7921_v25, 4  ;;  %v17375_v50 = vpop.f32.mrf.mxu0 }
 0x2f9   : > { %13448 = vmatprep.subr.bf16.mxu1 %v13802_v37  ;;  %v7909_v31 = vsel %vm13974_vm2, %v7904_v9, %v7908_v16  ;;  %v7926_v43 = vrot.slane %v7924_v63, 5  ;;  %v7932_v29 = vrot.slane %v7930_v33, 5  ;;  %v7936_v22 = vrot.slane %v7934_v53, 4  ;;  %v17427_v33 = vld [vmem:[%s19054_s3 + $0x238] sm:$0xff]  }
 0x2fa   : > { %v7919_v15 = vsel %vm13974_vm2, %v7914_v44, %v7918_v46  ;;  %v8523_v62 = vsel %vm14326_vm5, %v8521_v28, %v8522_v57  ;;  %v7940_v58 = vshll.u32 %v17273_v27, 16  ;;  %v12024_v55 = vrot.slane %v8376_v39, 9  ;;  %v8377_v27 = vld [vmem:[#allocation2 + $0xc0] sm:$0xe]  ;;  %v17397_v26 = vpop.f32.mrf.mxu0  ;;  %v7647_v46 = vld [vmem:[#allocation2 + $0xa8] sm:$0xf] }
 0x2fb   : > { %13427 = vmatmul.mubr.bf16.gmra.mxu0 %v12053_v30  ;;  %v17392_v35 = vcombine.low %v7909_v31, %v7919_v15  ;;  %v12055_v51 = vcombine.low %v17371_v40, %v8523_v62  ;;  %v7927_v18 = vor.u32 %v7926_v43, %v7923_v11  ;;  %v7937_v3 = vor.u32 %v7936_v22, %v7932_v29 }
 0x2fc   : > { %13430 = vmatprep.mubr.bf16.mxu0 %v12054_v54  ;;  %v7942_v38 = vrot.slane %v7940_v58, 5  ;;  %v8526_v19 = vrot.slane %v17373_v13, 5  ;;  %v8529_v49 = vrot.slane %v17379_v8, 5  ;;  %v7945_v1 = vshrl.u32 %v7644_v34, 16  ;;  %13449 = vmatpush3.bf16.msra.mxu1 %v13802_v37  ;;  %v17407_v54 = vld [vmem:[#allocation2 + $0xc4] sm:$0xf] }
 0x2fd   : > { %v7928_v24 = vrot.slane %v7927_v18, 4  ;;  %v7938_v61 = vrot.slane %v7937_v3, 4  ;;  %v7948_v23 = vshll.u32 %v7644_v34, 16  ;;  %v7954_v30 = vshll.u32 %v17304_v0, 16  ;;  %13450 = vmatprep.subr.bf16.mxu1 %v13805_v41  ;;  %v17441_v18 = vld [vmem:[#allocation2 + $0x1c] sm:$0xf] }
 0x2fe   : > { %v8527_v7 = vsel %vm14326_vm5, %v12024_v55, %v8526_v19  ;;  %v8528_v14 = vrot.slane %v8526_v19, 4  ;;  %v7947_v20 = vrot.slane %v7945_v1, 4  ;;  %v7958_v52 = vshrl.u32 %v17304_v0, 16  ;;  %v7650_v1 = vld [vmem:[#allocation2 + $0xb4] sm:$0xf] }
 0x2ff   : > { %13371 = vmatmul.mubr.bf16.gmra.mxu1 %v17282_v60  ;;  %v7933_v16 = vsel %vm13974_vm2, %v7928_v24, %v7932_v29  ;;  %v7943_v17 = vsel %vm13974_vm2, %v7938_v61, %v7942_v38  ;;  %v7950_v37 = vrot.slane %v7948_v23, 5  ;;  %v7956_v42 = vrot.slane %v7954_v30, 5  ;;  %v17414_v60 = vld [vmem:[#allocation2 + $0xc8] sm:$0x1] }
 0x300   : > { %13374 = vmatprep.mubr.bf16.mxu1 %v17321_v21  ;;  %v17416_v2 = vcombine.low %v7933_v16, %v7943_v17  ;;  %v8530_v0 = vsel %vm14326_vm5, %v8528_v14, %v8529_v49  ;;  %v7960_v56 = vrot.slane %v7958_v52, 4  ;;  %v7964_v36 = vshll.u32 %v17310_v48, 16  ;;  %13451 = vmatpush3.bf16.msra.mxu1 %v13805_v41  ;;  %v17421_v21 = vpop.f32.mrf.mxu0  ;;  %v9247_v41 = vld [vmem:[#allocation2 + $0x18] sm:$0xf]  ;;  %v17447_v49 = vld [vmem:[#allocation2 + $0x20] sm:$0x1] }
 0x301   : > { %v12056_v57 = vcombine.low %v8527_v7, %v8530_v0  ;;  %v7951_v25 = vor.u32 %v7950_v37, %v7947_v20  ;;  %v12025_v9 = vrot.slane %v8377_v27, 9  ;;  %v8533_v63 = vrot.slane %v17407_v54, 5  ;;  %13452 = vmatprep.subr.bf16.mxu1 %v13807_v5  ;;  %v17452_v7 = vpop.f32.mrf.mxu1 }
 0x302   : > { %v7961_v53 = vor.u32 %v7960_v56, %v7956_v42  ;;  %v7966_v39 = vrot.slane %v7964_v36, 5  ;;  %v8536_v34 = vrot.slane %v17414_v60, 5  ;;  %v7969_v44 = vshrl.u32 %v7647_v46, 16  ;;  %v17434_v15 = vpop.f32.mrf.mxu0 }
 0x303   : > { %13431 = vmatmul.mubr.bf16.gmra.mxu0 %v12055_v51  ;;  %v7952_v48 = vrot.slane %v7951_v25, 4  ;;  %v8534_v40 = vsel %vm14326_vm5, %v12025_v9, %v8533_v63  ;;  %v8535_v28 = vrot.slane %v8533_v63, 4  ;;  %v7972_v11 = vshll.u32 %v7647_v46, 16  ;;  %v9250_v25 = vld [vmem:[#allocation2 + $0x24] sm:$0xf] }
 0x304   : > { %13434 = vmatprep.mubr.bf16.mxu0 %v12056_v57  ;;  %v7962_v31 = vrot.slane %v7961_v53, 4  ;;  %v7971_v43 = vrot.slane %v7969_v44, 4  ;;  %v7978_v29 = vshll.u32 %v17346_v59, 16  ;;  %v7982_v22 = vshrl.u32 %v17346_v59, 16  ;;  %13453 = vmatpush3.bf16.msra.mxu1 %v13807_v5  ;;  %v17454_v14 = vpop.f32.mrf.mxu0 }
 0x305   : > { %v7957_v62 = vsel %vm13974_vm2, %v7952_v48, %v7956_v42  ;;  %v8537_v58 = vsel %vm14326_vm5, %v8535_v28, %v8536_v34  ;;  %v7974_v55 = vrot.slane %v7972_v11, 5  ;;  %v7988_v51 = vshll.u32 %v17348_v45, 16  ;;  %13534 = vmatprep.subr.bf16.mxu1 %v17427_v33  ;;  %19247 = vst [vmem:[#allocation12_spill] sm:$0xff] %v17454_v14  ;;  %v17462_v34 = vpop.f32.mrf.mxu1 }
 0x306   : > { %v7967_v59 = vsel %vm13974_vm2, %v7962_v31, %v7966_v39  ;;  %v12057_v3 = vcombine.low %v8534_v40, %v8537_v58  ;;  %v7980_v38 = vrot.slane %v7978_v29, 5  ;;  %v7984_v19 = vrot.slane %v7982_v22, 4  ;;  %v17468_v31 = vld [vmem:[#allocation2 + $0x28] sm:$0xf] }
 0x307   : > { %13375 = vmatmul.mubr.bf16.gmra.mxu1 %v17361_v12  ;;  %v11998_v27 = vcombine.low %v7957_v62, %v7967_v59  ;;  %v7975_v24 = vor.u32 %v7974_v55, %v7971_v43  ;;  %v7990_v45 = vrot.slane %v7988_v51, 5  ;;  %v9296_v61 = vshrl.u32 %v9247_v41, 16  ;;  %v17464_v44 = vpop.f32.mrf.mxu0 }
 0x308   : > { %13378 = vmatprep.mubr.bf16.mxu1 %v17392_v35  ;;  %v7985_v23 = vor.u32 %v7984_v19, %v7980_v38  ;;  %v9299_v30 = vshll.u32 %v9247_v41, 16  ;;  %v9305_v5 = vshll.u32 %v17441_v18, 16  ;;  %v9309_v12 = vshrl.u32 %v17441_v18, 16  ;;  %v17471_v41 = vld [vmem:[#allocation2 + $0x2c] sm:$0x1]  ;;  %v17478_v19 = vpop.f32.mrf.mxu1 }
 0x309   : > { %v7976_v20 = vrot.slane %v7975_v24, 4  ;;  %v9298_v52 = vrot.slane %v9296_v61, 4  ;;  %v9315_v16 = vshll.u32 %v17447_v49, 16  ;;  %v7993_v17 = vshrl.u32 %v7650_v1, 16 }
 0x30a   : > { %v7986_v35 = vrot.slane %v7985_v23, 4  ;;  %v9301_v37 = vrot.slane %v9299_v30, 5  ;;  %v9307_v42 = vrot.slane %v9305_v5, 5  ;;  %v9311_v46 = vrot.slane %v9309_v12, 4 }
 0x30b   : > { %13435 = vmatmul.mubr.bf16.gmra.mxu0 %v12057_v3  ;;  %v7981_v0 = vsel %vm13974_vm2, %v7976_v20, %v7980_v38  ;;  %v9317_v56 = vrot.slane %v9315_v16, 5  ;;  %v7995_v36 = vrot.slane %v7993_v17, 4  ;;  %v7996_v57 = vshll.u32 %v7650_v1, 16  ;;  %v7653_v3 = vld [vmem:[#allocation2 + $0xc0] sm:$0xf]  ;;  %v17480_v1 = vpop.f32.mrf.mxu0 }
 0x30c   : > { %v7991_v9 = vsel %vm13974_vm2, %v7986_v35, %v7990_v45  ;;  %v9302_v63 = vor.u32 %v9301_v37, %v9298_v52  ;;  %v9312_v53 = vor.u32 %v9311_v46, %v9307_v42  ;;  %v8002_v39 = vshll.u32 %v17373_v13, 16 }
 0x30d   : > { %v11999_v48 = vcombine.low %v7981_v0, %v7991_v9  ;;  %v7998_v40 = vrot.slane %v7996_v57, 5  ;;  %v8006_v28 = vshrl.u32 %v17373_v13, 16  ;;  %v8012_v11 = vshll.u32 %v17379_v8, 16  ;;  %v9253_v0 = vld [vmem:[#allocation2 + $0x30] sm:$0xf] }
 0x30e   : > { %v9303_v43 = vrot.slane %v9302_v63, 4  ;;  %v9313_v29 = vrot.slane %v9312_v53, 4  ;;  %v8004_v22 = vrot.slane %v8002_v39, 5  ;;  %v9320_v62 = vshrl.u32 %v9250_v25, 16  ;;  %v17494_v53 = vld [vmem:[#allocation2 + $0x34] sm:$0xf] }
 0x30f   : > { %13379 = vmatmul.mubr.bf16.gmra.mxu1 %v17416_v2  ;;  %v7999_v58 = vor.u32 %v7998_v40, %v7995_v36  ;;  %v8008_v55 = vrot.slane %v8006_v28, 4  ;;  %v8014_v51 = vrot.slane %v8012_v11, 5  ;;  %v9323_v59 = vshll.u32 %v9250_v25, 16  ;;  %v17489_v36 = vpop.f32.mrf.mxu0 }
 0x310   : > { %13382 = vmatprep.mubr.bf16.mxu1 %v11998_v27  ;;  %v9308_v13 = vsel %vm13974_vm2, %v9303_v43, %v9307_v42  ;;  %v9318_v8 = vsel %vm13974_vm2, %v9313_v29, %v9317_v56  ;;  %v9322_v38 = vrot.slane %v9320_v62, 4  ;;  %v9329_v2 = vshll.u32 %v17468_v31, 16  ;;  %v17487_v56 = vpop.f32.mrf.mxu1  ;;  %v17499_v62 = vld [vmem:[#allocation2 + $0x38] sm:$0x1] }
 0x311   : > { %v12122_v24 = vcombine.low %v9308_v13, %v9318_v8  ;;  %v8000_v27 = vrot.slane %v7999_v58, 4  ;;  %v8009_v45 = vor.u32 %v8008_v55, %v8004_v22  ;;  %v9325_v61 = vrot.slane %v9323_v59, 5 }
 0x312   : > { %v9331_v23 = vrot.slane %v9329_v2, 5  ;;  %v9333_v30 = vshrl.u32 %v17468_v31, 16  ;;  %v9339_v5 = vshll.u32 %v17471_v41, 16  ;;  %v8017_v12 = vshrl.u32 %v7653_v3, 16  ;;  %v9256_v2 = vld [vmem:[#allocation2 + $0x3c] sm:$0xf] }
 0x313   : > { %13502 = vmatprep.mubr.bf16.mxu0 %v12122_v24  ;;  %v8005_v20 = vsel %vm13974_vm2, %v8000_v27, %v8004_v22  ;;  %v8010_v52 = vrot.slane %v8009_v45, 4  ;;  %v9326_v16 = vor.u32 %v9325_v61, %v9322_v38  ;;  %v8020_v17 = vshll.u32 %v7653_v3, 16  ;;  %v17504_v3 = vpop.f32.mrf.mxu0 }
 0x314   : > { %v9335_v35 = vrot.slane %v9333_v30, 4  ;;  %v9341_v37 = vrot.slane %v9339_v5, 5  ;;  %v8019_v42 = vrot.slane %v8017_v12, 4  ;;  %v8026_v46 = vshll.u32 %v17407_v54, 16 }
 0x315   : > { %v8015_v57 = vsel %vm13974_vm2, %v8010_v52, %v8014_v51  ;;  %v9327_v25 = vrot.slane %v9326_v16, 4  ;;  %v8022_v9 = vrot.slane %v8020_v17, 5  ;;  %v8030_v63 = vshrl.u32 %v17407_v54, 16  ;;  %v17514_v17 = vld [vmem:[#allocation2 + $0x44] sm:$0x1] }
 0x316   : > { %v12000_v39 = vcombine.low %v8005_v20, %v8015_v57  ;;  %v9336_v40 = vor.u32 %v9335_v35, %v9331_v23  ;;  %v8028_v28 = vrot.slane %v8026_v46, 5  ;;  %v8036_v11 = vshll.u32 %v17414_v60, 16 }
 0x317   : > { %13383 = vmatmul.mubr.bf16.gmra.mxu1 %v11999_v48  ;;  %v9332_v43 = vsel %vm13974_vm2, %v9327_v25, %v9331_v23  ;;  %v8023_v29 = vor.u32 %v8022_v9, %v8019_v42  ;;  %v8032_v22 = vrot.slane %v8030_v63, 4  ;;  %v9344_v58 = vshrl.u32 %v9253_v0, 16  ;;  %v17502_v48 = vpop.f32.mrf.mxu1  ;;  %v17510_v23 = vld [vmem:[#allocation2 + $0x40] sm:$0xf]  ;;  %v9259_v63 = vld [vmem:[#allocation2 + $0x48] sm:$0xf] }
 0x318   : > { %13386 = vmatprep.mubr.bf16.mxu1 %v12000_v39  ;;  %v9337_v55 = vrot.slane %v9336_v40, 4  ;;  %v8038_v51 = vrot.slane %v8036_v11, 5  ;;  %v9347_v54 = vshll.u32 %v9253_v0, 16  ;;  %v9353_v59 = vshll.u32 %v17494_v53, 16 }
 0x319   : > { %v8024_v13 = vrot.slane %v8023_v29, 4  ;;  %v8033_v60 = vor.u32 %v8032_v22, %v8028_v28  ;;  %v9346_v8 = vrot.slane %v9344_v58, 4  ;;  %v9357_v38 = vshrl.u32 %v17494_v53, 16  ;;  %v17516_v46 = vpop.f32.mrf.mxu1 }
 0x31a   : > { %v9342_v24 = vsel %vm13974_vm2, %v9337_v55, %v9341_v37  ;;  %v9349_v27 = vrot.slane %v9347_v54, 5  ;;  %v9355_v45 = vrot.slane %v9353_v59, 5  ;;  %v9363_v61 = vshll.u32 %v17499_v62, 16  ;;  %v17525_v54 = vld [vmem:[#allocation2 + $0x4c] sm:$0xf] }
 0x31b   : > { %v12123_v30 = vcombine.low %v9332_v43, %v9342_v24  ;;  %v8029_v5 = vsel %vm13974_vm2, %v8024_v13, %v8028_v28  ;;  %v8034_v12 = vrot.slane %v8033_v60, 4  ;;  %v9359_v20 = vrot.slane %v9357_v38, 4  ;;  %v17518_v37 = vpop.f32.mrf.mxu0  ;;  %v13808_v28 = vld [vmem:[#allocation2 + $0x18] sm:$0xff]   ;;  %v17533_v60 = vld [vmem:[#allocation2 + $0x50] sm:$0x1]  ;;  %v17535_v38 = vpop.f32.mrf.mxu1 }
 0x31c   : > { %v9350_v52 = vor.u32 %v9349_v27, %v9346_v8  ;;  %v9365_v16 = vrot.slane %v9363_v61, 5  ;;  %v9368_v35 = vshrl.u32 %v9256_v2, 16  ;;  %v9371_v42 = vshll.u32 %v9256_v2, 16 }
 0x31d   : > { %13503 = vmatmul.mubr.bf16.vlgmr.msra.gmra.mxu0 %v12123_v30  ;;  %v8039_v0 = vsel %vm13974_vm2, %v8034_v12, %v8038_v51  ;;  %v9360_v57 = vor.u32 %v9359_v20, %v9355_v45  ;;  %v9377_v25 = vshll.u32 %v17510_v23, 16  ;;  %v9381_v9 = vshrl.u32 %v17510_v23, 16  ;;  %v17537_v2 = vpop.f32.mrf.mxu0 }
 0x31e   : > { %v12001_v39 = vcombine.low %v8029_v5, %v8039_v0  ;;  %v9351_v40 = vrot.slane %v9350_v52, 4  ;;  %v9370_v11 = vrot.slane %v9368_v35, 4  ;;  %v9373_v43 = vrot.slane %v9371_v42, 5  ;;  %v9262_v42 = vld [vmem:[#allocation2 + $0x54] sm:$0xf] }
 0x31f   : > { %v9361_v29 = vrot.slane %v9360_v57, 4  ;;  %v9379_v22 = vrot.slane %v9377_v25, 5  ;;  %v9383_v58 = vrot.slane %v9381_v9, 4  ;;  %v9387_v55 = vshll.u32 %v17514_v17, 16  ;;  %v17552_v25 = vld [vmem:[#allocation2 + $0x58] sm:$0xf]  ;;  %v17554_v9 = vpop.f32.mrf.mxu1 }
 0x320   : > { %13387 = vmatmul.mubr.bf16.gmra.mxu1 %v12001_v39  ;;  %v9356_v51 = vsel %vm13974_vm2, %v9351_v40, %v9355_v45  ;;  %v9374_v59 = vor.u32 %v9373_v43, %v9370_v11  ;;  %v17531_v13 = vadd.f32 %v17306_v4, %v17452_v7  ;;  %v9392_v8 = vshrl.u32 %v9259_v63, 16  ;;  %19248 = vst [vmem:[#allocation10_spill] sm:$0xff] %v17554_v9  ;;  %v13809_v43 = vld [vmem:[#allocation2 + $0x24] sm:$0xff]  }
 0x321   : > { %v9366_v24 = vsel %vm13974_vm2, %v9361_v29, %v9365_v16  ;;  %13454 = vmatprep.mubr.bf16.mxu1 %v13808_v28  ;;  %v9384_v27 = vor.u32 %v9383_v58, %v9379_v22  ;;  %v9389_v61 = vrot.slane %v9387_v55, 5  ;;  %v9395_v30 = vshll.u32 %v9259_v63, 16  ;;  %v17556_v63 = vpop.f32.mrf.mxu0  ;;  %v13813_v58 = vld [vmem:[%s19054_s3 + $0x230] sm:$0xff]  }
 0x322   : > { %v12124_v45 = vcombine.low %v9356_v51, %v9366_v24  ;;  %v9375_v5 = vrot.slane %v9374_v59, 4  ;;  %v9394_v12 = vrot.slane %v9392_v8, 4  ;;  %v9401_v4 = vshll.u32 %v17525_v54, 16  ;;  %v13811_v59 = vld [vmem:[#allocation2 + $0x30] sm:$0xff]   ;;  %v9265_v24 = vld [vmem:[#allocation2 + $0x60] sm:$0xf] }
 0x323   : > { %v9385_v7 = vrot.slane %v9384_v27, 4  ;;  %v9397_v20 = vrot.slane %v9395_v30, 5  ;;  %v9405_v52 = vshrl.u32 %v17525_v54, 16  ;;  %v9411_v35 = vshll.u32 %v17533_v60, 16 }
 0x324   : > { %13506 = vmatprep.mubr.bf16.mxu0 %v12124_v45  ;;  %v9403_v0 = vrot.slane %v9401_v4, 5  ;;  %v17546_v16 = vadd.f32 %v17330_v10, %v17462_v34  ;;  %v17550_v57 = vadd.f32 %v17359_v6, %v17478_v19  ;;  %v9380_v39 = vsel %vm13974_vm2, %v9375_v5, %v9379_v22  ;;  %v17562_v10 = vld [vmem:[#allocation2 + $0x5c] sm:$0x1]  ;;  %v17574_v5 = vld [vmem:[#allocation2 + $0x64] sm:$0xf]  ;;  %v17578_v4 = vpop.f32.mrf.mxu0 }
 0x325   : > { %v9390_v40 = vsel %vm13974_vm2, %v9385_v7, %v9389_v61  ;;  %v9398_v28 = vor.u32 %v9397_v20, %v9394_v12  ;;  %v9407_v11 = vrot.slane %v9405_v52, 4  ;;  %v9413_v6 = vrot.slane %v9411_v35, 5 }
 0x326   : > { %v12125_v34 = vcombine.low %v9380_v39, %v9390_v40  ;;  %v9416_v19 = vshrl.u32 %v9262_v42, 16  ;;  %v9419_v29 = vshll.u32 %v9262_v42, 16  ;;  %v9425_v22 = vshll.u32 %v17552_v25, 16  ;;  %v17583_v40 = vld [vmem:[#allocation2 + $0x68] sm:$0x1] }
 0x327   : > { %v9399_v55 = vrot.slane %v9398_v28, 4  ;;  %v9408_v51 = vor.u32 %v9407_v11, %v9403_v0  ;;  %v9429_v8 = vshrl.u32 %v17552_v25, 16  ;;  %v9435_v30 = vshll.u32 %v17562_v10, 16  ;;  %v17576_v12 = vpop.f32.mrf.mxu1 }
 0x328   : > { %13507 = vmatmul.mubr.bf16.gmra.mxu0 %v12125_v34  ;;  %13455 = vmatmul.mubr.bf16.vlgmr.msra.gmra.mxu1 %v13809_v43  ;;  %v9418_v27 = vrot.slane %v9416_v19, 4  ;;  %v9421_v61 = vrot.slane %v9419_v29, 5  ;;  %v17572_v45 = vadd.f32 %v17397_v26, %v17502_v48  ;;  %v9427_v52 = vrot.slane %v9425_v22, 5  ;;  %v13812_v29 = vld [vmem:[#allocation2 + $0x3c] sm:$0xff]  }
 0x329   : > { %v9404_v7 = vsel %vm13974_vm2, %v9399_v55, %v9403_v0  ;;  %v9409_v20 = vrot.slane %v9408_v51, 4  ;;  %13458 = vmatprep.mubr.bf16.mxu1 %v13811_v59  ;;  %13535 = vmatpush3.bf16.msra.mxu1 %v17427_v33  ;;  %v9431_v35 = vrot.slane %v9429_v8, 4  ;;  %v9437_v39 = vrot.slane %v9435_v30, 5  ;;  %v13816_v33 = vld [vmem:[%s19054_s3 + $0x228] sm:$0xff]   ;;  %v17592_v59 = vpop.f32.mrf.mxu1 }
 0x32a   : > { %19249 = vst [vmem:[#allocation19_spill] sm:$0xff] %v17572_v45  ;;  %v9422_v42 = vor.u32 %v9421_v61, %v9418_v27  ;;  %v9440_v26 = vshrl.u32 %v9265_v24, 16  ;;  %v9443_v48 = vshll.u32 %v9265_v24, 16  ;;  %13536 = vmatprep.subr.bf16.mxu1 %v13813_v58  ;;  %v9449_v34 = vshll.u32 %v17574_v5, 16  ;;  %v9268_v61 = vld [vmem:[#allocation2 + $0x6c] sm:$0xf] }
 0x32b   : > { %v9414_v28 = vsel %vm13974_vm2, %v9409_v20, %v9413_v6  ;;  %v9432_v11 = vor.u32 %v9431_v35, %v9427_v52  ;;  %v9453_v0 = vshrl.u32 %v17574_v5, 16  ;;  %v9459_v27 = vshll.u32 %v17583_v40, 16  ;;  %v17605_v35 = vld [vmem:[#allocation2 + $0x70] sm:$0xf] }
 0x32c   : > { %v12126_v43 = vcombine.low %v9404_v7, %v9414_v28  ;;  %v9423_v19 = vrot.slane %v9422_v42, 4  ;;  %v9442_v55 = vrot.slane %v9440_v26, 4  ;;  %v9445_v51 = vrot.slane %v9443_v48, 5  ;;  %v17594_v22 = vpop.f32.mrf.mxu0  ;;  %v17607_v42 = vld [vmem:[#allocation2 + $0x74] sm:$0x1]  ;;  %v13819_v26 = vld [vmem:[%s19054_s3 + $0x220] sm:$0xff]  }
 0x32d   : > { %v9433_v8 = vrot.slane %v9432_v11, 4  ;;  %v9451_v6 = vrot.slane %v9449_v34, 5  ;;  %v9455_v24 = vrot.slane %v9453_v0, 4  ;;  %13537 = vmatpush3.bf16.msra.mxu1 %v13813_v58  ;;  %v17599_v7 = vadd.f32 %v17421_v21, %v17516_v46 }
 0x32e   : > { %13510 = vmatprep.mubr.bf16.mxu0 %v12126_v43  ;;  %v9446_v30 = vor.u32 %v9445_v51, %v9442_v55  ;;  %v17603_v20 = vadd.f32 %v17434_v15, %v17535_v38  ;;  %v17612_v58 = vpop.f32.mrf.mxu0  ;;  %v9428_v48 = vsel %vm13974_vm2, %v9423_v19, %v9427_v52  ;;  %v9461_v28 = vrot.slane %v9459_v27, 5  ;;  %v13814_v15 = vld [vmem:[#allocation2 + $0x48] sm:$0xff]   ;;  %13538 = vmatprep.subr.bf16.mxu1 %v13816_v33  ;;  %v9271_v43 = vld [vmem:[#allocation2 + $0x78] sm:$0xf]  ;;  %v13177_v55 = vpop.f32.mrf.mxu1 }
 0x32f   : > { %19250 = vst [vmem:[#allocation17_spill] sm:$0xff] %v17599_v7  ;;  %v9438_v21 = vsel %vm13974_vm2, %v9433_v8, %v9437_v39  ;;  %v9456_v46 = vor.u32 %v9455_v24, %v9451_v6  ;;  %v9464_v34 = vshrl.u32 %v9268_v61, 16  ;;  %v9467_v0 = vshll.u32 %v9268_v61, 16  ;;  %v17621_v39 = vld [vmem:[#allocation2 + $0x7c] sm:$0xf]  ;;  %v13817_v7 = vld [vmem:[#allocation2 + $0x60] sm:$0xff]  }
 0x330   : > { %19251 = vst [vmem:[#allocation28_spill] sm:$0xff] %v17603_v20  ;;  %v12127_v38 = vcombine.low %v9428_v48, %v9438_v21  ;;  %13459 = vmatmul.mubr.bf16.gmra.mxu1 %v13812_v29  ;;  %v9447_v11 = vrot.slane %v9446_v30, 4  ;;  %v9473_v20 = vshll.u32 %v17605_v35, 16  ;;  %v9477_v52 = vshrl.u32 %v17605_v35, 16  ;;  %v17629_v61 = vld [vmem:[#allocation2 + $0x80] sm:$0x1]  ;;  %v17631_v30 = vpop.f32.mrf.mxu0 }
 0x331   : > { %v9457_v51 = vrot.slane %v9456_v46, 4  ;;  %13462 = vmatprep.mubr.bf16.mxu1 %v13814_v15  ;;  %v9483_v19 = vshll.u32 %v17607_v42, 16  ;;  %13539 = vmatpush3.bf16.msra.mxu1 %v13816_v33  ;;  %v9466_v8 = vrot.slane %v9464_v34, 4  ;;  %v9469_v24 = vrot.slane %v9467_v0, 5  ;;  %v13822_v48 = vld [vmem:[%s19054_s3 + $0x218] sm:$0xff]  }
 0x332   : > { %13511 = vmatmul.mubr.bf16.gmra.mxu0 %v12127_v38  ;;  %v9452_v29 = vsel %vm13974_vm2, %v9447_v11, %v9451_v6  ;;  %v17627_v27 = vadd.f32 %v17464_v44, %v17576_v12  ;;  %13540 = vmatprep.subr.bf16.mxu1 %v13819_v26  ;;  %v9475_v21 = vrot.slane %v9473_v20, 5  ;;  %v9479_v6 = vrot.slane %v9477_v52, 4  ;;  %v6343_v12 = vpop.f32.mrf.mxu1  ;;  %v13815_v0 = vld [vmem:[#allocation2 + $0x54] sm:$0xff]  }
 0x333   : > { %v9462_v33 = vsel %vm13974_vm2, %v9457_v51, %v9461_v28  ;;  %v9485_v46 = vrot.slane %v9483_v19, 5  ;;  %v9470_v38 = vor.u32 %v9469_v24, %v9466_v8  ;;  %v9488_v11 = vshrl.u32 %v9271_v43, 16  ;;  %v17645_v19 = vpop.f32.mrf.mxu0 }
 0x334   : > { %19252 = vst [vmem:[#allocation23_spill] sm:$0xff] %v17627_v27  ;;  %v12128_v15 = vcombine.low %v9452_v29, %v9462_v33  ;;  %v9491_v44 = vshll.u32 %v9271_v43, 16  ;;  %v9480_v34 = vor.u32 %v9479_v6, %v9475_v21  ;;  %v9497_v27 = vshll.u32 %v17621_v39, 16  ;;  %v9274_v43 = vld [vmem:[#allocation2 + $0x84] sm:$0xf]  ;;  %v13825_v29 = vld [vmem:[%s19054_s3 + $0x210] sm:$0xff]  }
 0x335   : > { %v9501_v14 = vshrl.u32 %v17621_v39, 16  ;;  %v9507_v9 = vshll.u32 %v17629_v61, 16  ;;  %13541 = vmatpush3.bf16.msra.mxu1 %v13819_v26  ;;  %v9471_v28 = vrot.slane %v9470_v38, 4  ;;  %v9490_v20 = vrot.slane %v9488_v11, 4  ;;  %v17650_v6 = vld [vmem:[#allocation2 + $0x88] sm:$0xf] }
 0x336   : > { %13514 = vmatprep.mubr.bf16.mxu0 %v12128_v15  ;;  %v9493_v51 = vrot.slane %v9491_v44, 5  ;;  %v17643_v52 = vadd.f32 %v17480_v1, %v17592_v59  ;;  %13542 = vmatprep.subr.bf16.mxu1 %v13822_v48  ;;  %v9481_v8 = vrot.slane %v9480_v34, 4  ;;  %v9499_v24 = vrot.slane %v9497_v27, 5  ;;  %v17660_v11 = vld [vmem:[#allocation2 + $0x8c] sm:$0x1] }
 0x337   : > { %v9503_v33 = vrot.slane %v9501_v14, 4  ;;  %v9509_v26 = vrot.slane %v9507_v9, 5  ;;  %v9476_v15 = vsel %vm13974_vm2, %v9471_v28, %v9475_v21  ;;  %v17655_v59 = vadd.f32 %v17489_v36, %v13177_v55  ;;  %19256 = vst [vmem:[#allocation5_spill] sm:$0xff] %v17660_v11  ;;  %v9277_v55 = vld [vmem:[#allocation2 + $0x90] sm:$0xf]  ;;  %v19292_v47 = vld [vmem:[#allocation28_spill] sm:$0xff] }
 0x338   : > { %19253 = vst [vmem:[#allocation30_spill] sm:$0xff] %v17643_v52  ;;  %13463 = vmatmul.mubr.bf16.gmra.mxu1 %v13815_v0  ;;  %v9494_v1 = vor.u32 %v9493_v51, %v9490_v20  ;;  %v17658_v38 = vadd.f32 %v17504_v3, %v6343_v12  ;;  %v13180_v44 = vpop.f32.mrf.mxu1  ;;  %v9486_v14 = vsel %vm13974_vm2, %v9481_v8, %v9485_v46  ;;  %v9512_v27 = vshrl.u32 %v9274_v43, 16  ;;  %v13828_v46 = vld [vmem:[%s19054_s3 + $0x208] sm:$0xff]  }
 0x339   : > { %19254 = vst [vmem:[#allocation29_spill] sm:$0xff] %v17655_v59  ;;  %v9504_v9 = vor.u32 %v9503_v33, %v9499_v24  ;;  %13466 = vmatprep.mubr.bf16.mxu1 %v13817_v7  ;;  %v9515_v34 = vshll.u32 %v9274_v43, 16  ;;  %13543 = vmatpush3.bf16.msra.mxu1 %v13822_v48  ;;  %v12129_v21 = vcombine.low %v9476_v15, %v9486_v14  ;;  %v9521_v28 = vshll.u32 %v17650_v6, 16  ;;  %v17666_v12 = vpop.f32.mrf.mxu0  ;;  %v17672_v43 = vld [vmem:[#allocation2 + $0x94] sm:$0xf] }
 0x33a   : > { %19255 = vst [vmem:[#allocation31_spill] sm:$0xff] %v17658_v38  ;;  %v9495_v0 = vrot.slane %v9494_v1, 4  ;;  %v9525_v36 = vshrl.u32 %v17650_v6, 16  ;;  %v6356_v3 = vpop.f32.mrf.mxu1  ;;  %13544 = vmatprep.subr.bf16.mxu1 %v13825_v29  ;;  %v9514_v7 = vrot.slane %v9512_v27, 4  ;;  %v9531_v48 = vshll.u32 %v17660_v11, 16  ;;  %19257 = vst [vmem:[#allocation8_spill] sm:$0xff] %v17672_v43 }
 0x33b   : > { %v9505_v20 = vrot.slane %v9504_v9, 4  ;;  %v9517_v51 = vrot.slane %v9515_v34, 5  ;;  %13515 = vmatmul.mubr.bf16.gmra.mxu0 %v12129_v21  ;;  %v9523_v33 = vrot.slane %v9521_v28, 5  ;;  %v17677_v1 = vadd.f32 %v17518_v37, %v13180_v44  ;;  %v17679_v14 = vld [vmem:[#allocation2 + $0x98] sm:$0x1]  ;;  %v17681_v59 = vpop.f32.mrf.mxu0 }
 0x33c   : > { %v9500_v8 = vsel %vm13974_vm2, %v9495_v0, %v9499_v24  ;;  %v9527_v15 = vrot.slane %v9525_v36, 4  ;;  %19259 = vst [vmem:[#allocation13_spill] sm:$0xff] %v17679_v14  ;;  %v13181_v38 = vpop.f32.mrf.mxu1  ;;  %v9533_v34 = vrot.slane %v9531_v48, 5  ;;  %v9536_v52 = vshrl.u32 %v9277_v55, 16  ;;  %v13818_v24 = vld [vmem:[#allocation2 + $0x6c] sm:$0xff]   ;;  %v13820_v37 = vld [vmem:[#allocation2 + $0x78] sm:$0xff]  }
 0x33d   : > { %19258 = vst [vmem:[#allocation7_spill] sm:$0xff] %v17677_v1  ;;  %v9510_v9 = vsel %vm13974_vm2, %v9505_v20, %v9509_v26  ;;  %v9518_v27 = vor.u32 %v9517_v51, %v9514_v7  ;;  %13545 = vmatpush3.bf16.msra.mxu1 %v13825_v29  ;;  %v9539_v0 = vshll.u32 %v9277_v55, 16  ;;  %v9545_v28 = vshll.u32 %v17672_v43, 16  ;;  %v17686_v44 = vpop.f32.mrf.mxu0  ;;  %v13831_v36 = vld [vmem:[%s19054_s3 + $0x200] sm:$0xff]   ;;  %v9280_v51 = vld [vmem:[#allocation2 + $0x9c] sm:$0xf] }
 0x33e   : > { %v12130_v21 = vcombine.low %v9500_v8, %v9510_v9  ;;  %v9528_v11 = vor.u32 %v9527_v15, %v9523_v33  ;;  %13546 = vmatprep.subr.bf16.mxu1 %v13828_v46  ;;  %v9538_v26 = vrot.slane %v9536_v52, 4  ;;  %v9549_v20 = vshrl.u32 %v17672_v43, 16  ;;  %v6359_v7 = vpop.f32.mrf.mxu1  ;;  %v17696_v9 = vld [vmem:[#allocation2 + $0xa0] sm:$0xf] }
 0x33f   : > { %v9519_v1 = vrot.slane %v9518_v27, 4  ;;  %v9555_v29 = vshll.u32 %v17679_v14, 16  ;;  %v9541_v48 = vrot.slane %v9539_v0, 5  ;;  %v9547_v8 = vrot.slane %v9545_v28, 5  ;;  %19261 = vst [vmem:[#allocation16_spill] sm:$0xff] %v17696_v9  ;;  %v17698_v45 = vpop.f32.mrf.mxu0 }
 0x340   : > { %13518 = vmatprep.mubr.bf16.mxu0 %v12130_v21  ;;  %v9529_v55 = vrot.slane %v9528_v11, 4  ;;  %13467 = vmatmul.mubr.bf16.gmra.mxu1 %v13818_v24  ;;  %v17694_v15 = vadd.f32 %v17537_v2, %v6356_v3  ;;  %v9551_v27 = vrot.slane %v9549_v20, 4  ;;  %v17703_v14 = vadd.f32 %v17556_v63, %v13181_v38  ;;  %v17705_v11 = vld [vmem:[#allocation2 + $0xa4] sm:$0x1] }
 0x341   : > { %v9524_v52 = vsel %vm13974_vm2, %v9519_v1, %v9523_v33  ;;  %v9557_v43 = vrot.slane %v9555_v29, 5  ;;  %13470 = vmatprep.mubr.bf16.mxu1 %v13820_v37  ;;  %19263 = vst [vmem:[#allocation6_spill] sm:$0xff] %v17705_v11  ;;  %13547 = vmatpush3.bf16.msra.mxu1 %v13828_v46  ;;  %v9542_v3 = vor.u32 %v9541_v48, %v9538_v26  ;;  %v9560_v24 = vshrl.u32 %v9280_v51, 16  ;;  %v9283_v37 = vld [vmem:[#allocation2 + $0xa8] sm:$0xf] }
 0x342   : > { %19260 = vst [vmem:[#allocation11_spill] sm:$0xff] %v17694_v15  ;;  %19262 = vst [vmem:[#allocation20_spill] sm:$0xff] %v17703_v14  ;;  %v9534_v2 = vsel %vm13974_vm2, %v9529_v55, %v9533_v34  ;;  %v17710_v21 = vadd.f32 %v17578_v4, %v6359_v7  ;;  %13548 = vmatprep.subr.bf16.mxu1 %v13831_v36  ;;  %v9552_v33 = vor.u32 %v9551_v27, %v9547_v8  ;;  %v17717_v29 = vld [vmem:[#allocation2 + $0xac] sm:$0xf] }
 0x343   : > { %v12131_v0 = vcombine.low %v9524_v52, %v9534_v2  ;;  %v9563_v1 = vshll.u32 %v9280_v51, 16  ;;  %v9569_v28 = vshll.u32 %v17696_v9, 16  ;;  %v17713_v63 = vpop.f32.mrf.mxu0  ;;  %v9543_v38 = vrot.slane %v9542_v3, 4  ;;  %v13821_v3 = vld [vmem:[#allocation2 + $0x84] sm:$0xff]  }
 0x344   : > { %19264 = vst [vmem:[#allocation18_spill] sm:$0xff] %v17710_v21  ;;  %v9562_v20 = vrot.slane %v9560_v24, 4  ;;  %v9573_v46 = vshrl.u32 %v17696_v9, 16  ;;  %v9579_v34 = vshll.u32 %v17705_v11, 16  ;;  %v13184_v26 = vpop.f32.mrf.mxu1  ;;  %v9553_v4 = vrot.slane %v9552_v33, 4 }
 0x345   : > { %13519 = vmatmul.mubr.bf16.gmra.mxu0 %v12131_v0  ;;  %v9565_v7 = vrot.slane %v9563_v1, 5  ;;  %v9571_v55 = vrot.slane %v9569_v28, 5  ;;  %v17720_v51 = vadd.f32 %v17594_v22, %v13184_v26  ;;  %v17722_v48 = vpop.f32.mrf.mxu0  ;;  %13549 = vmatpush3.bf16.msra.mxu1 %v13831_v36  ;;  %v9548_v52 = vsel %vm13974_vm2, %v9543_v38, %v9547_v8  ;;  %v17726_v24 = vld [vmem:[#allocation2 + $0xb0] sm:$0x1] }
 0x346   : > { %v9575_v27 = vrot.slane %v9573_v46, 4  ;;  %v9581_v2 = vrot.slane %v9579_v34, 5  ;;  %19266 = vst [vmem:[#allocation15_spill] sm:$0xff] %v17726_v24  ;;  %v9584_v21 = vshrl.u32 %v9283_v37, 16  ;;  %v6372_v14 = vpop.f32.mrf.mxu1  ;;  %v9558_v0 = vsel %vm13974_vm2, %v9553_v4, %v9557_v43  ;;  %v13823_v28 = vld [vmem:[#allocation2 + $0x90] sm:$0xff]  }
 0x347   : > { %19265 = vst [vmem:[#allocation22_spill] sm:$0xff] %v17720_v51  ;;  %v9566_v33 = vor.u32 %v9565_v7, %v9562_v20  ;;  %v9587_v1 = vshll.u32 %v9283_v37, 16  ;;  %v9593_v22 = vshll.u32 %v17717_v29, 16  ;;  %v17731_v26 = vpop.f32.mrf.mxu0  ;;  %v12132_v36 = vcombine.low %v9548_v52, %v9558_v0  ;;  %v9286_v43 = vld [vmem:[#allocation2 + $0xb4] sm:$0xf] }
 0x348   : > { %v9576_v51 = vor.u32 %v9575_v27, %v9571_v55  ;;  %13471 = vmatmul.mubr.bf16.gmra.mxu1 %v13821_v3  ;;  %v9586_v8 = vrot.slane %v9584_v21, 4  ;;  %v9597_v38 = vshrl.u32 %v17717_v29, 16  ;;  %v13185_v46 = vpop.f32.mrf.mxu1  ;;  %v9603_v9 = vshll.u32 %v17726_v24, 16  ;;  %v17743_v27 = vld [vmem:[#allocation2 + $0xb8] sm:$0xf] }
 0x349   : > { %v9567_v34 = vrot.slane %v9566_v33, 4  ;;  %v9589_v15 = vrot.slane %v9587_v1, 5  ;;  %v9595_v11 = vrot.slane %v9593_v22, 5  ;;  %13474 = vmatprep.mubr.bf16.mxu1 %v13823_v28  ;;  %v17735_v37 = vpop.f32.mrf.mxu0  ;;  %13522 = vmatprep.mubr.bf16.mxu0 %v12132_v36  ;;  %v17738_v7 = vadd.f32 %v17612_v58, %v6372_v14  ;;  %19269 = vst [vmem:[#allocation14_spill] sm:$0xff] %v17743_v27  ;;  %v17750_v22 = vld [vmem:[#allocation2 + $0xbc] sm:$0x1] }
 0x34a   : > { %v9577_v20 = vrot.slane %v9576_v51, 4  ;;  %v9599_v4 = vrot.slane %v9597_v38, 4  ;;  %v17741_v21 = vadd.f32 %v17631_v30, %v13185_v46  ;;  %v6375_v52 = vpop.f32.mrf.mxu1  ;;  %v9605_v33 = vrot.slane %v9603_v9, 5  ;;  %19271 = vst [vmem:[#allocation27_spill] sm:$0xff] %v17750_v22  ;;  %v13824_v9 = vld [vmem:[#allocation2 + $0x9c] sm:$0xff]  }
 0x34b   : > { %19267 = vst [vmem:[#allocation21_spill] sm:$0xff] %v17738_v7  ;;  %v9572_v3 = vsel %vm13974_vm2, %v9567_v34, %v9571_v55  ;;  %v9590_v0 = vor.u32 %v9589_v15, %v9586_v8  ;;  %v17748_v1 = vadd.f32 %v17645_v19, %v6375_v52  ;;  %v17752_v51 = vpop.f32.mrf.mxu0  ;;  %v9608_v14 = vshrl.u32 %v9286_v43, 16  ;;  %v9289_v55 = vld [vmem:[#allocation2 + $0xc0] sm:$0xf] }
 0x34c   : > { %19268 = vst [vmem:[#allocation9_spill] sm:$0xff] %v17741_v21  ;;  %v9582_v58 = vsel %vm13974_vm2, %v9577_v20, %v9581_v2  ;;  %v9600_v30 = vor.u32 %v9599_v4, %v9595_v11  ;;  %v9611_v28 = vshll.u32 %v9286_v43, 16  ;;  %v9617_v46 = vshll.u32 %v17743_v27, 16  ;;  %v17761_v2 = vld [vmem:[#allocation2 + $0xc4] sm:$0xf] }
 0x34d   : > { %19270 = vst [vmem:[#allocation25_spill] sm:$0xff] %v17748_v1  ;;  %v12133_v36 = vcombine.low %v9572_v3, %v9582_v58  ;;  %v9591_v38 = vrot.slane %v9590_v0, 4  ;;  %v9621_v15 = vshrl.u32 %v17743_v27, 16  ;;  %v17758_v19 = vpop.f32.mrf.mxu0  ;;  %v9610_v34 = vrot.slane %v9608_v14, 4  ;;  %v17768_v0 = vld [vmem:[#allocation2 + $0xc8] sm:$0x1] }
 0x34e   : > { %v9601_v8 = vrot.slane %v9600_v30, 4  ;;  %v9613_v52 = vrot.slane %v9611_v28, 5  ;;  %v9627_v1 = vshll.u32 %v17750_v22, 16  ;;  %v13188_v21 = vpop.f32.mrf.mxu1  ;;  %v9619_v20 = vrot.slane %v9617_v46, 5  ;;  %19273 = vst [vmem:[#allocation26_spill] sm:$0xff] %v17768_v0  ;;  %v13826_v58 = vld [vmem:[#allocation2 + $0xa8] sm:$0xff]  }
 0x34f   : > { %13523 = vmatmul.mubr.bf16.gmra.mxu0 %v12133_v36  ;;  %v9596_v43 = vsel %vm13974_vm2, %v9591_v38, %v9595_v11  ;;  %v9623_v4 = vrot.slane %v9621_v15, 4  ;;  %v17766_v3 = vadd.f32 %v17666_v12, %v13188_v21  ;;  %v17770_v30 = vpop.f32.mrf.mxu0  ;;  %v9632_v36 = vshrl.u32 %v9289_v55, 16 }
 0x350   : > { %v9606_v14 = vsel %vm13974_vm2, %v9601_v8, %v9605_v33  ;;  %v9614_v28 = vor.u32 %v9613_v52, %v9610_v34  ;;  %v9629_v7 = vrot.slane %v9627_v1, 5  ;;  %13475 = vmatmul.mubr.bf16.gmra.mxu1 %v13824_v9  ;;  %v6388_v22 = vpop.f32.mrf.mxu1  ;;  %v9635_v38 = vshll.u32 %v9289_v55, 16  ;;  %v10001_v52 = vld [vmem:[#allocation2 + $0x18] sm:$0xe] }
 0x351   : > { %19272 = vst [vmem:[#allocation24_spill] sm:$0xff] %v17766_v3  ;;  %v12134_v24 = vcombine.low %v9596_v43, %v9606_v14  ;;  %v9624_v11 = vor.u32 %v9623_v4, %v9619_v20  ;;  %v9641_v46 = vshll.u32 %v17761_v2, 16  ;;  %13478 = vmatprep.mubr.bf16.mxu1 %v13826_v58  ;;  %v17775_v12 = vpop.f32.mrf.mxu0  ;;  %v9634_v15 = vrot.slane %v9632_v36, 4 }
 0x352   : > { %v9615_v21 = vrot.slane %v9614_v28, 4  ;;  %v9645_v3 = vshrl.u32 %v17761_v2, 16  ;;  %v9651_v27 = vshll.u32 %v17768_v0, 16  ;;  %v13189_v33 = vpop.f32.mrf.mxu1  ;;  %v9637_v9 = vrot.slane %v9635_v38, 5  ;;  %v9292_v28 = vld [vmem:[#allocation2 + $0xcc] sm:$0xf] }
 0x353   : > { %13526 = vmatprep.mubr.bf16.mxu0 %v12134_v24  ;;  %v9625_v1 = vrot.slane %v9624_v11, 4  ;;  %v9643_v8 = vrot.slane %v9641_v46, 5  ;;  %v17780_v34 = vadd.f32 %v17681_v59, %v6388_v22  ;;  %v17782_v55 = vpop.f32.mrf.mxu0  ;;  %v17787_v58 = vadd.f32 %v17686_v44, %v13189_v33  ;;  %v17796_v38 = vld [vmem:[#allocation2 + $0xd0] sm:$0xf] }
 0x354   : > { %v9620_v43 = vsel %vm13974_vm2, %v9615_v21, %v9619_v20  ;;  %v9647_v4 = vrot.slane %v9645_v3, 4  ;;  %v6391_v14 = vpop.f32.mrf.mxu1  ;;  %v9638_v36 = vor.u32 %v9637_v9, %v9634_v15  ;;  %v9653_v11 = vrot.slane %v9651_v27, 5  ;;  %v13827_v21 = vld [vmem:[#allocation2 + $0xb4] sm:$0xff]  }
 0x355   : > { %19274 = vst [vmem:[#allocation32_spill] sm:$0xff] %v17787_v58  ;;  %v9630_v24 = vsel %vm13974_vm2, %v9625_v1, %v9629_v7  ;;  %v17792_v59 = vadd.f32 %v17698_v45, %v6391_v14  ;;  %v17794_v22 = vpop.f32.mrf.mxu0  ;;  %v12146_v44 = vrot.slane %v10001_v52, 9  ;;  %v10067_v33 = vrot.slane %v17441_v18, 5  ;;  %v13829_v7 = vld [vmem:[#allocation2 + $0xc0] sm:$0xff]   ;;  %v17811_v14 = vld [vmem:[#allocation2 + $0xd4] sm:$0x1] }
 0x356   : > { %v12135_v46 = vcombine.low %v9620_v43, %v9630_v24  ;;  %v9648_v20 = vor.u32 %v9647_v4, %v9643_v8  ;;  %v13192_v3 = vpop.f32.mrf.mxu1  ;;  %v9639_v58 = vrot.slane %v9638_v36, 4  ;;  %v9656_v27 = vshrl.u32 %v9292_v28, 16  ;;  %19277 = vst [vmem:[#allocation35_spill] sm:$0xff] %v17811_v14 }
 0x357   : > { %v17800_v0 = vadd.f32 %v17713_v63, %v13192_v3  ;;  %v9659_v15 = vshll.u32 %v9292_v28, 16  ;;  %v17802_v45 = vpop.f32.mrf.mxu0  ;;  %v10069_v43 = vrot.slane %v10067_v33, 4  ;;  %v10070_v4 = vrot.slane %v17447_v49, 5 }
 0x358   : > { %13527 = vmatmul.mubr.bf16.gmra.mxu0 %v12135_v46  ;;  %v9649_v1 = vrot.slane %v9648_v20, 4  ;;  %13479 = vmatmul.mubr.bf16.gmra.mxu1 %v13827_v21  ;;  %v6404_v9 = vpop.f32.mrf.mxu1  ;;  %v9665_v52 = vshll.u32 %v17796_v38, 16  ;;  %v9644_v18 = vsel %vm13974_vm2, %v9639_v58, %v9643_v8  ;;  %v9658_v28 = vrot.slane %v9656_v27, 4  ;;  %v10002_v58 = vld [vmem:[#allocation2 + $0x24] sm:$0xe] }
 0x359   : > { %19275 = vst [vmem:[#allocation34_spill] sm:$0xff] %v17800_v0  ;;  %13482 = vmatprep.mubr.bf16.mxu1 %v13829_v7  ;;  %v17809_v63 = vadd.f32 %v17722_v48, %v6404_v9  ;;  %v9661_v24 = vrot.slane %v9659_v15, 5  ;;  %v17813_v36 = vpop.f32.mrf.mxu0  ;;  %v10071_v49 = vsel %vm14326_vm5, %v10069_v43, %v10070_v4  ;;  %v9669_v8 = vshrl.u32 %v17796_v38, 16 }
 0x35a   : > { %v9654_v46 = vsel %vm13974_vm2, %v9649_v1, %v9653_v11  ;;  %v13193_v20 = vpop.f32.mrf.mxu1  ;;  %v9667_v3 = vrot.slane %v9665_v52, 5  ;;  %v17822_v48 = vadd.f32 %v17375_v50, %v17487_v56  ;;  %v13830_v1 = vld [vmem:[#allocation2 + $0xcc] sm:$0xff]   ;;  %v10068_v9 = vsel %vm14326_vm5, %v12146_v44, %v10067_v33  ;;  %v10004_v33 = vld [vmem:[#allocation2 + $0x3c] sm:$0xe] }
 0x35b   : > { %19276 = vst [vmem:[#allocation33_spill] sm:$0xff] %v17809_v63  ;;  %v12136_v21 = vcombine.low %v9644_v18, %v9654_v46  ;;  %v17825_v7 = vadd.f32 %v17731_v26, %v13193_v20  ;;  %v9662_v27 = vor.u32 %v9661_v24, %v9658_v28  ;;  %v17827_v15 = vpop.f32.mrf.mxu0  ;;  %v9671_v43 = vrot.slane %v9669_v8, 4  ;;  %v10003_v63 = vld [vmem:[#allocation2 + $0x30] sm:$0xe] }
 0x35c   : > { %v6407_v11 = vpop.f32.mrf.mxu1  ;;  %v9675_v4 = vshll.u32 %v17811_v14, 16  ;;  %v10074_v52 = vrot.slane %v17468_v31, 5  ;;  %v12178_v56 = vcombine.low %v10068_v9, %v10071_v49  ;;  %v12147_v18 = vrot.slane %v10002_v58, 9  ;;  %v19297_v14 = vld [vmem:[#allocation27_spill] sm:$0xff] }
 0x35d   : > { %19278 = vst [vmem:[#allocation36_spill] sm:$0xff] %v17825_v7  ;;  %13530 = vmatprep.mubr.bf16.mxu0 %v12136_v21  ;;  %v17834_v50 = vadd.f32 %v17735_v37, %v6407_v11  ;;  %v9663_v26 = vrot.slane %v9662_v27, 4  ;;  %v17836_v28 = vpop.f32.mrf.mxu0  ;;  %v9672_v46 = vor.u32 %v9671_v43, %v9667_v3  ;;  %v10077_v44 = vrot.slane %v17471_v41, 5 }
 0x35e   : > { %v13196_v24 = vpop.f32.mrf.mxu1  ;;  %v9677_v20 = vrot.slane %v9675_v4, 5  ;;  %v10076_v7 = vrot.slane %v10074_v52, 4  ;;  %v10075_v31 = vsel %vm14326_vm5, %v12147_v18, %v10074_v52  ;;  %v12148_v37 = vrot.slane %v10003_v63, 9  ;;  %v10005_v4 = vld [vmem:[#allocation2 + $0x48] sm:$0xe] }
 0x35f   : > { %19279 = vst [vmem:[#allocation38_spill] sm:$0xff] %v17834_v50  ;;  %v17840_v8 = vadd.f32 %v17752_v51, %v13196_v24  ;;  %v10081_v49 = vrot.slane %v17494_v53, 5  ;;  %v17845_v21 = vpop.f32.mrf.mxu0  ;;  %v9668_v27 = vsel %vm13974_vm2, %v9663_v26, %v9667_v3  ;;  %v9673_v11 = vrot.slane %v9672_v46, 4  ;;  %v10006_v46 = vld [vmem:[#allocation2 + $0x54] sm:$0xe] }
 0x360   : > { %13483 = vmatmul.mubr.bf16.gmra.mxu1 %v13830_v1  ;;  %v6420_v58 = vpop.f32.mrf.mxu1  ;;  %v10078_v41 = vsel %vm14326_vm5, %v10076_v7, %v10077_v44  ;;  %v10088_v51 = vrot.slane %v17510_v23, 5  ;;  %v10084_v53 = vrot.slane %v17499_v62, 5  ;;  %v12149_v1 = vrot.slane %v10004_v33, 9 }
 0x361   : > { %19280 = vst [vmem:[#allocation37_spill] sm:$0xff] %v17840_v8  ;;  %13550 = vmatprep.mubr.bf16.mxu1 %v12178_v56  ;;  %v17853_v9 = vadd.f32 %v17758_v19, %v6420_v58  ;;  %v10083_v63 = vrot.slane %v10081_v49, 4  ;;  %v17856_v43 = vpop.f32.mrf.mxu0  ;;  %v9678_v3 = vsel %vm13974_vm2, %v9673_v11, %v9677_v20  ;;  %v12179_v26 = vcombine.low %v10075_v31, %v10078_v41  ;;  %v10007_v11 = vld [vmem:[#allocation2 + $0x60] sm:$0xe] }
 0x362   : > { %v13197_v52 = vpop.f32.mrf.mxu1  ;;  %v10090_v18 = vrot.slane %v10088_v51, 4  ;;  %v10091_v7 = vrot.slane %v17514_v17, 5  ;;  %v12137_v23 = vcombine.low %v9668_v27, %v9678_v3  ;;  %v10082_v19 = vsel %vm14326_vm5, %v12148_v37, %v10081_v49 }
 0x363   : > { %19281 = vst [vmem:[#allocation39_spill] sm:$0xff] %v17853_v9  ;;  %v17862_v56 = vadd.f32 %v17770_v30, %v13197_v52  ;;  %v10085_v62 = vsel %vm14326_vm5, %v10083_v63, %v10084_v53  ;;  %v17868_v24 = vpop.f32.mrf.mxu0  ;;  %v17872_v20 = vsel %vm14326_vm5, %v12149_v1, %v10088_v51  ;;  %v12150_v30 = vrot.slane %v10005_v4, 9  ;;  %v10008_v1 = vld [vmem:[#allocation2 + $0x6c] sm:$0xe] }
 0x364   : > { %v6423_v44 = vpop.f32.mrf.mxu1  ;;  %v17876_v17 = vsel %vm14326_vm5, %v10090_v18, %v10091_v7  ;;  %v10095_v33 = vrot.slane %v17525_v54, 5  ;;  %13531 = vmatmul.mubr.bf16.gmra.mxu0 %v12137_v23  ;;  %v12180_v37 = vcombine.low %v10082_v19, %v10085_v62  ;;  %v10098_v58 = vrot.slane %v17533_v60, 5 }
 0x365   : > { %19282 = vst [vmem:[#allocation40_spill] sm:$0xff] %v17862_v56  ;;  %v17880_v31 = vadd.f32 %v17775_v12, %v6423_v44  ;;  %v17882_v49 = vpop.f32.mrf.mxu0  ;;  %v10102_v27 = vrot.slane %v17552_v25, 5  ;;  %v12181_v51 = vcombine.low %v17872_v20, %v17876_v17  ;;  %v12151_v53 = vrot.slane %v10006_v46, 9  ;;  %v10009_v46 = vld [vmem:[#allocation2 + $0x78] sm:$0xe]  ;;  %v19293_v56 = vld [vmem:[#allocation6_spill] sm:$0xff] }
 0x366   : > { %v13264_v41 = vpop.f32.mrf.mxu1  ;;  %v10096_v63 = vsel %vm14326_vm5, %v12150_v30, %v10095_v33  ;;  %v10097_v54 = vrot.slane %v10095_v33, 4  ;;  %v10105_v60 = vrot.slane %v17562_v10, 5  ;;  %v10109_v25 = vrot.slane %v17574_v5, 5 }
 0x367   : > { %19283 = vst [vmem:[#allocation41_spill] sm:$0xff] %v17880_v31  ;;  %v17891_v12 = vadd.f32 %v13264_v41, %v17531_v13  ;;  %v17893_v4 = vpop.f32.mrf.mxu0  ;;  %v10104_v3 = vrot.slane %v10102_v27, 4  ;;  %v17901_v7 = vsel %vm14326_vm5, %v12151_v53, %v10102_v27  ;;  %v12152_v23 = vrot.slane %v10007_v11, 9  ;;  %v10010_v27 = vld [vmem:[#allocation2 + $0x84] sm:$0xe] }
 0x368   : > { %13551 = vmatmul.mubr.bf16.vlgmr.msra.gmra.mxu1 %v12179_v26  ;;  %v7063_v52 = vpop.f32.mrf.mxu1  ;;  %v10099_v18 = vsel %vm14326_vm5, %v10097_v54, %v10098_v58  ;;  %v10116_v13 = vrot.slane %v17605_v35, 5  ;;  %v10112_v5 = vrot.slane %v17583_v40, 5  ;;  %v12153_v26 = vrot.slane %v10008_v1, 9 }
 0x369   : > { %13554 = vmatprep.mubr.bf16.mxu1 %v12180_v37  ;;  %v17905_v19 = vadd.f32 %v7063_v52, %v17546_v16  ;;  %v17907_v62 = vpop.f32.mrf.mxu0  ;;  %v17911_v10 = vsel %vm14326_vm5, %v10104_v3, %v10105_v60  ;;  %v12182_v20 = vcombine.low %v10096_v63, %v10099_v18  ;;  %v10111_v35 = vrot.slane %v10109_v25, 4  ;;  %v10011_v60 = vld [vmem:[#allocation2 + $0x90] sm:$0xe] }
 0x36a   : > { %v13265_v44 = vpop.f32.mrf.mxu1  ;;  %v10118_v30 = vrot.slane %v10116_v13, 4  ;;  %v17923_v37 = vsel %vm14326_vm5, %v12152_v23, %v10109_v25  ;;  %v10119_v40 = vrot.slane %v17607_v42, 5  ;;  %v10123_v58 = vrot.slane %v17621_v39, 5  ;;  %v19284_v23 = vld [vmem:[#allocation19_spill] sm:$0xff] }
 0x36b   : > { %v17917_v16 = vadd.f32 %v13265_v44, %v17550_v57  ;;  %v17919_v33 = vpop.f32.mrf.mxu0  ;;  %v17929_v41 = vsel %vm14326_vm5, %v10111_v35, %v10112_v5  ;;  %v17933_v57 = vsel %vm14326_vm5, %v12153_v26, %v10116_v13  ;;  %v12154_v63 = vrot.slane %v10009_v46, 9  ;;  %v19285_v46 = vld [vmem:[#allocation5_spill] sm:$0xff] }
 0x36c   : > { %v7066_v11 = vpop.f32.mrf.mxu1  ;;  %v10130_v54 = vrot.slane %v17650_v6, 5  ;;  %v17945_v39 = vsel %vm14326_vm5, %v10118_v30, %v10119_v40  ;;  %v10126_v3 = vrot.slane %v17629_v61, 5  ;;  %v10125_v6 = vrot.slane %v10123_v58, 4  ;;  %v19286_v61 = vld [vmem:[#allocation8_spill] sm:$0xff]  ;;  %v10012_v30 = vld [vmem:[#allocation2 + $0x9c] sm:$0xe] }
 0x36d   : > { %v17937_v53 = vadd.f32 %v7066_v11, %v17822_v48  ;;  %v17939_v1 = vpop.f32.mrf.mxu0  ;;  %v12155_v18 = vrot.slane %v10010_v27, 9  ;;  %v17957_v26 = vsel %vm14326_vm5, %v12154_v63, %v10123_v58  ;;  %v10133_v44 = vrot.slane %v19285_v46, 5  ;;  %v19288_v58 = vld [vmem:[#allocation17_spill] sm:$0xff] }
 0x36e   : > { %v13268_v25 = vpop.f32.mrf.mxu1  ;;  %v10132_v48 = vrot.slane %v10130_v54, 4  ;;  %v10137_v35 = vrot.slane %v19286_v61, 5  ;;  %v17963_v27 = vsel %vm14326_vm5, %v10125_v6, %v10126_v3  ;;  %v19289_v3 = vld [vmem:[#allocation13_spill] sm:$0xff] }
 0x36f   : > { %v17951_v13 = vadd.f32 %v13268_v25, %v19284_v23  ;;  %v17953_v5 = vpop.f32.mrf.mxu0  ;;  %v17967_v11 = vsel %vm14326_vm5, %v12155_v18, %v10130_v54  ;;  %v12156_v25 = vrot.slane %v10011_v60, 9  ;;  %v19287_v23 = vld [vmem:[#allocation16_spill] sm:$0xff]  ;;  %v10140_v6 = vrot.slane %v19289_v3, 5 }
 0x370   : > { %13555 = vmatmul.mubr.bf16.gmra.mxu1 %v12181_v51  ;;  %v7079_v40 = vpop.f32.mrf.mxu1  ;;  %v10144_v52 = vrot.slane %v19287_v23, 5  ;;  %v17977_v61 = vsel %vm14326_vm5, %v10132_v48, %v10133_v44  ;;  %v10139_v60 = vrot.slane %v10137_v35, 4  ;;  %v12157_v18 = vrot.slane %v10012_v30, 9  ;;  %v10013_v23 = vld [vmem:[#allocation2 + $0xa8] sm:$0xe] }
 0x371   : > { %13558 = vmatprep.mubr.bf16.mxu1 %v12182_v20  ;;  %v7194_v63 = vadd.f32 %v7079_v40, %v19288_v58  ;;  %v17971_v46 = vpop.f32.mrf.mxu0  ;;  %v19290_v40 = vld [vmem:[#allocation10_spill] sm:$0xff]  ;;  %v19291_v58 = vld [vmem:[#allocation12_spill] sm:$0xff]  ;;  %v10147_v48 = vrot.slane %v19293_v56, 5  ;;  %v10151_v44 = vrot.slane %v17717_v29, 5  ;;  %v17991_v9 = vsel %vm14326_vm5, %v12156_v25, %v10137_v35 }
 0x372   : > { %v13269_v42 = vpop.f32.mrf.mxu1  ;;  %v10146_v20 = vrot.slane %v10144_v52, 4  ;;  %v6633_v17 = vadd.f32 %v19291_v58, %v19290_v40  ;;  %v17995_v30 = vsel %vm14326_vm5, %v10139_v60, %v10140_v6  ;;  %v17999_v40 = vsel %vm14326_vm5, %v12157_v18, %v10144_v52  ;;  %v19295_v18 = vld [vmem:[#allocation15_spill] sm:$0xff] }
 0x373   : > { %v7197_v31 = vadd.f32 %v13269_v42, %v19292_v47  ;;  %v17985_v51 = vpop.f32.mrf.mxu0  ;;  %v10014_v47 = vld [vmem:[#allocation2 + $0xb4] sm:$0xe]  ;;  %v12158_v25 = vrot.slane %v10013_v23, 9  ;;  %v10153_v52 = vrot.slane %v10151_v44, 4  ;;  %v10154_v8 = vrot.slane %v19295_v18, 5 }
 0x374   : > { %v7082_v3 = vpop.f32.mrf.mxu1  ;;  %v19294_v42 = vld [vmem:[#allocation14_spill] sm:$0xff]  ;;  %v18008_v35 = vsel %vm14326_vm5, %v10146_v20, %v10147_v48  ;;  %v12159_v0 = vrot.slane %v10014_v47, 9  ;;  %v10161_v29 = vrot.slane %v19297_v14, 5  ;;  %v19298_v20 = vcombine.low %v17901_v7, %v17911_v10 }
 0x375   : > { %v10158_v58 = vrot.slane %v19294_v42, 5  ;;  %v7195_v54 = vadd.f32 %v7082_v3, %v6633_v17  ;;  %v18002_v56 = vpop.f32.mrf.mxu0  ;;  %v12189_v60 = vcombine.low %v17999_v40, %v18008_v35  ;;  %v19296_v42 = vld [vmem:[#allocation23_spill] sm:$0xff]  ;;  %v18022_v48 = vsel %vm14326_vm5, %v12158_v25, %v10151_v44  ;;  %v19300_v47 = vld [vmem:[#allocation30_spill] sm:$0xff]  ;;  %v19317_v35 = vld [vmem:[#allocation32_spill] sm:$0xff] }
 0x376   : > { %v13272_v6 = vpop.f32.mrf.mxu1  ;;  %v18026_v18 = vsel %vm14326_vm5, %v10153_v52, %v10154_v8 }
 0x377   : > { %v10160_v50 = vrot.slane %v10158_v58, 4  ;;  %v7200_v17 = vadd.f32 %v13272_v6, %v19296_v42  ;;  %v18014_v3 = vpop.f32.mrf.mxu0  ;;  %v19299_v6 = vcombine.low %v17923_v37, %v17929_v41  ;;  %v12190_v7 = vcombine.low %v18022_v48, %v18026_v18  ;;  %v19301_v37 = vld [vmem:[#allocation29_spill] sm:$0xff] }
 0x378   : > { %13559 = vmatmul.mubr.bf16.gmra.mxu1 %v19298_v20  ;;  %v7095_v23 = vpop.f32.mrf.mxu1  ;;  %v18036_v10 = vsel %vm14326_vm5, %v12159_v0, %v10158_v58  ;;  %v18049_v20 = vadd.f32 %v17782_v55, %v17891_v12  ;;  %v18053_v0 = vadd.f32 %v17794_v22, %v17905_v19  ;;  %v18072_v19 = vadd.f32 %v17845_v21, %v7197_v31  ;;  %v19306_v31 = vld [vmem:[#allocation11_spill] sm:$0xff] }
 0x379   : > { %13562 = vmatprep.mubr.bf16.mxu1 %v19299_v6  ;;  %v7198_v42 = vadd.f32 %v7095_v23, %v19300_v47  ;;  %v7516_v14 = vpop.f32.mrf.mxu0  ;;  %v18040_v44 = vsel %vm14326_vm5, %v10160_v50, %v10161_v29  ;;  %v18057_v50 = vadd.f32 %v17802_v45, %v17917_v16  ;;  %v18061_v29 = vadd.f32 %v17813_v36, %v17937_v53  ;;  %v19302_v6 = vld [vmem:[#allocation31_spill] sm:$0xff] }
 0x37a   : > { %v13273_v8 = vpop.f32.mrf.mxu1  ;;  %v12191_v25 = vcombine.low %v18036_v10, %v18040_v44  ;;  %v18065_v23 = vadd.f32 %v17827_v15, %v17951_v13  ;;  %v18069_v47 = vadd.f32 %v17836_v28, %v7194_v63  ;;  %v18075_v45 = vadd.f32 %v17856_v43, %v7195_v54  ;;  %v19303_v16 = vld [vmem:[#allocation7_spill] sm:$0xff] }
 0x37b   : > { %v7201_v41 = vadd.f32 %v13273_v8, %v19301_v37  ;;  %v18045_v52 = vpop.f32.mrf.mxu0  ;;  %v18078_v36 = vadd.f32 %v17868_v24, %v7200_v17  ;;  %v18084_v13 = vadd.f32 %v17882_v49, %v7198_v42  ;;  %v19304_v21 = vcombine.low %v17933_v57, %v17945_v39  ;;  %v19307_v42 = vld [vmem:[#allocation20_spill] sm:$0xff]  ;;  %v19308_v39 = vld [vmem:[#allocation18_spill] sm:$0xff] }
 0x37c   : > { %v7098_v58 = vpop.f32.mrf.mxu1  ;;  %v19305_v24 = vcombine.low %v17957_v26, %v17963_v27 }
 0x37d   : > { %v7199_v55 = vadd.f32 %v7098_v58, %v19302_v6  ;;  %v7529_v12 = vpop.f32.mrf.mxu0  ;;  %v18087_v28 = vadd.f32 %v17893_v4, %v7201_v41  ;;  %v19309_v6 = vld [vmem:[#allocation22_spill] sm:$0xff] }
 0x37e   : > { %v13276_v22 = vpop.f32.mrf.mxu1 }
 0x37f   : > { %v7204_v53 = vadd.f32 %v13276_v22, %v19303_v16  ;;  %v18081_v15 = vpop.f32.mrf.mxu0  ;;  %v18090_v63 = vadd.f32 %v17907_v62, %v7199_v55 }
 0x380   : > { %13563 = vmatmul.mubr.bf16.gmra.mxu1 %v19304_v21  ;;  %v7111_v43 = vpop.f32.mrf.mxu1  ;;  %v19312_v21 = vld [vmem:[#allocation21_spill] sm:$0xff] }
 0x381   : > { %13566 = vmatprep.mubr.bf16.mxu1 %v19305_v24  ;;  %v7202_v54 = vadd.f32 %v7111_v43, %v19306_v31  ;;  %v7532_v17 = vpop.f32.mrf.mxu0  ;;  %v18100_v49 = vadd.f32 %v17919_v33, %v7204_v53  ;;  %v19311_v53 = vcombine.low %v17991_v9, %v17995_v30  ;;  %v19314_v9 = vld [vmem:[#allocation25_spill] sm:$0xff] }
 0x382   : > { %v13277_v4 = vpop.f32.mrf.mxu1 }
 0x383   : > { %v7205_v8 = vadd.f32 %v13277_v4, %v19307_v42  ;;  %v18103_v62 = vpop.f32.mrf.mxu0  ;;  %v18106_v37 = vadd.f32 %v17939_v1, %v7202_v54  ;;  %v19310_v1 = vcombine.low %v17967_v11, %v17977_v61  ;;  %v19313_v54 = vld [vmem:[#allocation9_spill] sm:$0xff]  ;;  %v10165_v42 = vrot.slane %v17761_v2, 5 }
 0x384   : > { %v7114_v57 = vpop.f32.mrf.mxu1 }
 0x385   : > { %v7203_v41 = vadd.f32 %v7114_v57, %v19308_v39  ;;  %v18109_v58 = vpop.f32.mrf.mxu0  ;;  %v18112_v26 = vadd.f32 %v17953_v5, %v7205_v8  ;;  %v19315_v39 = vld [vmem:[#allocation24_spill] sm:$0xff]  ;;  %v10167_v2 = vrot.slane %v10165_v42, 4 }
 0x386   : > { %v13280_v27 = vpop.f32.mrf.mxu1 }
 0x387   : > { %v7208_v33 = vadd.f32 %v13280_v27, %v19309_v6  ;;  %v18115_v55 = vpop.f32.mrf.mxu0  ;;  %v18118_v22 = vadd.f32 %v17971_v46, %v7203_v41 }
 0x388   : > { %13567 = vmatmul.mubr.bf16.gmra.mxu1 %v19310_v1  ;;  %v7127_v16 = vpop.f32.mrf.mxu1 }
 0x389   : > { %13570 = vmatprep.mubr.bf16.mxu1 %v19311_v53  ;;  %v7206_v5 = vadd.f32 %v7127_v16, %v19312_v21  ;;  %v18127_v43 = vpop.f32.mrf.mxu0  ;;  %v18130_v24 = vadd.f32 %v17985_v51, %v7208_v33  ;;  %v10015_v33 = vld [vmem:[#allocation2 + $0xc0] sm:$0xe]  ;;  %v10016_v16 = vld [vmem:[#allocation2 + $0xcc] sm:$0xe]  ;;  %v10172_v53 = vrot.slane %v17796_v38, 5 }
 0x38a   : > { %v13281_v31 = vpop.f32.mrf.mxu1  ;;  %v12160_v18 = vrot.slane %v10015_v33, 9  ;;  %v19320_v33 = vld [vmem:[#allocation33_spill] sm:$0xff] }
 0x38b   : > { %v7209_v46 = vadd.f32 %v13281_v31, %v19313_v54  ;;  %v18133_v4 = vpop.f32.mrf.mxu0  ;;  %v18136_v11 = vadd.f32 %v18002_v56, %v7206_v5  ;;  %v19316_v5 = vld [vmem:[#allocation26_spill] sm:$0xff] }
 0x38c   : > { %v7130_v61 = vpop.f32.mrf.mxu1  ;;  %v10168_v40 = vrot.slane %v19316_v5, 5 }
 0x38d   : > { %v7207_v30 = vadd.f32 %v7130_v61, %v19314_v9  ;;  %v18140_v8 = vpop.f32.mrf.mxu0  ;;  %v18143_v57 = vadd.f32 %v18014_v3, %v7209_v46  ;;  %v10174_v46 = vrot.slane %v10172_v53, 4 }
 0x38e   : > { %v13284_v51 = vpop.f32.mrf.mxu1 }
 0x38f   : > { %v7212_v41 = vadd.f32 %v13284_v51, %v19315_v39  ;;  %v18146_v27 = vpop.f32.mrf.mxu0  ;;  %v18148_v6 = vadd.f32 %v7516_v14, %v7207_v30  ;;  %v19319_v39 = vld [vmem:[#allocation34_spill] sm:$0xff] }
 0x390   : > { %13571 = vmatmul.mubr.bf16.gmra.mxu1 %v12189_v60  ;;  %v7143_v56 = vpop.f32.mrf.mxu1 }
 0x391   : > { %13574 = vmatprep.mubr.bf16.mxu1 %v12190_v7  ;;  %v7210_v3 = vadd.f32 %v7143_v56, %v17780_v34  ;;  %v7564_v1 = vpop.f32.mrf.mxu0  ;;  %v18159_v14 = vadd.f32 %v18045_v52, %v7212_v41  ;;  %v10169_v34 = vsel %vm14326_vm5, %v10167_v2, %v10168_v40  ;;  %v12161_v7 = vrot.slane %v10016_v16, 9  ;;  %v19318_v52 = vld [vmem:[#allocation35_spill] sm:$0xff]  ;;  %v19321_v40 = vld [vmem:[#allocation36_spill] sm:$0xff] }
 0x392   : > { %v13285_v21 = vpop.f32.mrf.mxu1  ;;  %v10175_v61 = vrot.slane %v19318_v52, 5  ;;  %v19324_v52 = vld [vmem:[#allocation39_spill] sm:$0xff] }
 0x393   : > { %v7213_v60 = vadd.f32 %v13285_v21, %v19317_v35  ;;  %v18163_v31 = vpop.f32.mrf.mxu0  ;;  %v18165_v54 = vadd.f32 %v7529_v12, %v7210_v3  ;;  %v10166_v12 = vsel %vm14326_vm5, %v12160_v18, %v10165_v42  ;;  %v10173_v16 = vsel %vm14326_vm5, %v12161_v7, %v10172_v53 }
 0x394   : > { %v7146_v48 = vpop.f32.mrf.mxu1  ;;  %v12192_v56 = vcombine.low %v10166_v12, %v10169_v34  ;;  %v10176_v42 = vsel %vm14326_vm5, %v10174_v46, %v10175_v61 }
 0x395   : > { %v7211_v38 = vadd.f32 %v7146_v48, %v17792_v59  ;;  %v18171_v9 = vpop.f32.mrf.mxu0  ;;  %v18174_v30 = vadd.f32 %v18081_v15, %v7213_v60  ;;  %v12193_v60 = vcombine.low %v10173_v16, %v10176_v42  ;;  %v19322_v48 = vld [vmem:[#allocation38_spill] sm:$0xff] }
 0x397   : > { %v13288_v51 = vpop.f32.mrf.mxu1  ;;  %v18179_v3 = vpop.f32.mrf.mxu0  ;;  %v18181_v2 = vadd.f32 %v7532_v17, %v7211_v38 }
 0x398   : > { %v7216_v41 = vadd.f32 %v13288_v51, %v19319_v39  ;;  %13575 = vmatmul.mubr.bf16.gmra.mxu1 %v12191_v25 }
 0x399   : > { %v7159_v59 = vpop.f32.mrf.mxu1  ;;  %13578 = vmatprep.mubr.bf16.mxu1 %v12192_v56  ;;  %v18191_v21 = vpop.f32.mrf.mxu0 }
 0x39a   : > { %v7214_v15 = vadd.f32 %v7159_v59, %v19320_v33  ;;  %v18194_v5 = vadd.f32 %v18103_v62, %v7216_v41  ;;  %v19323_v62 = vld [vmem:[#allocation37_spill] sm:$0xff] }
 0x39b   : > { %v13289_v17 = vpop.f32.mrf.mxu1  ;;  %v18197_v10 = vpop.f32.mrf.mxu0 }
 0x39c   : > { %v7217_v35 = vadd.f32 %v13289_v17, %v19321_v40  ;;  %v18200_v44 = vadd.f32 %v18109_v58, %v7214_v15 }
 0x39d   : > { %v7162_v25 = vpop.f32.mrf.mxu1  ;;  %v18203_v18 = vpop.f32.mrf.mxu0 }
 0x39e   : > { %v7215_v53 = vadd.f32 %v7162_v25, %v19322_v48  ;;  %v18206_v32 = vadd.f32 %v18115_v55, %v7217_v35  ;;  %v19325_v55 = vld [vmem:[#allocation40_spill] sm:$0xff] }
 0x39f   : > { %v13292_v34 = vpop.f32.mrf.mxu1  ;;  %v18209_v38 = vpop.f32.mrf.mxu0 }
 0x3a0   : > { %v7220_v7 = vadd.f32 %v13292_v34, %v19323_v62  ;;  %v18212_v46 = vadd.f32 %v18127_v43, %v7215_v53  ;;  %13579 = vmatmul.mubr.bf16.gmra.mxu1 %v12193_v60  ;;  %v19326_v43 = vld [vmem:[#allocation41_spill] sm:$0xff] }
 0x3a1   : > { %v7175_v58 = vpop.f32.mrf.mxu1  ;;  %v18215_v51 = vpop.f32.mrf.mxu0 }
 0x3a2   : > { %v7218_v61 = vadd.f32 %v7175_v58, %v19324_v52  ;;  %v18218_v12 = vadd.f32 %v18133_v4, %v7220_v7 }
 0x3a3   : > { %v13293_v39 = vpop.f32.mrf.mxu1  ;;  %v18221_v56 = vpop.f32.mrf.mxu0 }
 0x3a4   : > { %v7221_v41 = vadd.f32 %v13293_v39, %v19325_v55  ;;  %v18224_v59 = vadd.f32 %v18140_v8, %v7218_v61 }
 0x3a5   : > { %v7178_v33 = vpop.f32.mrf.mxu1  ;;  %v18227_v16 = vpop.f32.mrf.mxu0 }
 0x3a6   : > { %v7219_v15 = vadd.f32 %v7178_v33, %v19326_v43  ;;  %v18230_v42 = vadd.f32 %v18146_v27, %v7221_v41 }
 0x3a7   : > { %v13360_v17 = vpop.f32.mrf.mxu1  ;;  %v18235_v40 = vpop.f32.mrf.mxu0 }
 0x3a8   : > { %v18233_v4 = vadd.f32 %v13360_v17, %v18049_v20  ;;  %v18237_v35 = vadd.f32 %v7564_v1, %v7219_v15 }
 0x3a9   : > { %v8203_v25 = vpop.f32.mrf.mxu1  ;;  %v18242_v60 = vpop.f32.mrf.mxu0 }
 0x3aa   : > { %v18240_v8 = vadd.f32 %v8203_v25, %v18053_v0 }
 0x3ab   : > { %v13361_v48 = vpop.f32.mrf.mxu1  ;;  %v18247_v27 = vpop.f32.mrf.mxu0 }
 0x3ac   : > { %v18245_v53 = vadd.f32 %v13361_v48, %v18057_v50 }
 0x3ad   : > { %v8206_v34 = vpop.f32.mrf.mxu1  ;;  %v18252_v62 = vpop.f32.mrf.mxu0 }
 0x3ae   : > { %v18250_v20 = vadd.f32 %v8206_v34, %v18061_v29 }
 0x3af   : > { %v13364_v1 = vpop.f32.mrf.mxu1  ;;  %v18257_v0 = vpop.f32.mrf.mxu0 }
 0x3b0   : > { %v18255_v7 = vadd.f32 %v13364_v1, %v18065_v23 }
 0x3b1   : > { %v8219_v58 = vpop.f32.mrf.mxu1  ;;  %v18262_v50 = vpop.f32.mrf.mxu0 }
 0x3b2   : > { %v18260_v52 = vadd.f32 %v8219_v58, %v18069_v47 }
 0x3b3   : > { %v13365_v61 = vpop.f32.mrf.mxu1  ;;  %v18267_v29 = vpop.f32.mrf.mxu0 }
 0x3b4   : > { %v18265_v39 = vadd.f32 %v13365_v61, %v18072_v19 }
 0x3b5   : > { %v8222_v55 = vpop.f32.mrf.mxu1  ;;  %v18272_v23 = vpop.f32.mrf.mxu0 }
 0x3b6   : > { %v18270_v41 = vadd.f32 %v8222_v55, %v18075_v45 }
 0x3b7   : > { %v13368_v33 = vpop.f32.mrf.mxu1  ;;  %v18277_v47 = vpop.f32.mrf.mxu0 }
 0x3b8   : > { %v18275_v43 = vadd.f32 %v13368_v33, %v18078_v36 }
 0x3b9   : > { %v8235_v15 = vpop.f32.mrf.mxu1  ;;  %v18282_v19 = vpop.f32.mrf.mxu0 }
 0x3ba   : > { %v18280_v17 = vadd.f32 %v8235_v15, %v18084_v13  ;;  %19327 = vst [vmem:[#allocation43_spill] sm:$0xff] %v18282_v19 }
 0x3bb   : > { %v13369_v25 = vpop.f32.mrf.mxu1  ;;  %v18287_v45 = vpop.f32.mrf.mxu0 }
 0x3bc   : > { %v18285_v48 = vadd.f32 %v13369_v25, %v18087_v28  ;;  %19328 = vst [vmem:[#allocation42_spill] sm:$0xff] %v18287_v45 }
 0x3bd   : > { %v8238_v34 = vpop.f32.mrf.mxu1  ;;  %v18292_v36 = vpop.f32.mrf.mxu0 }
 0x3be   : > { %v18290_v1 = vadd.f32 %v8238_v34, %v18090_v63  ;;  %19329 = vst [vmem:[#allocation45_spill] sm:$0xff] %v18292_v36 }
 0x3bf   : > { %v13372_v58 = vpop.f32.mrf.mxu1  ;;  %v18297_v13 = vpop.f32.mrf.mxu0 }
 0x3c0   : > { %v18295_v61 = vadd.f32 %v13372_v58, %v18100_v49  ;;  %19330 = vst [vmem:[#allocation47_spill] sm:$0xff] %v18297_v13 }
 0x3c1   : > { %v8251_v55 = vpop.f32.mrf.mxu1  ;;  %v18305_v25 = vpop.f32.mrf.mxu0 }
 0x3c2   : > { %v18300_v33 = vadd.f32 %v8251_v55, %v18106_v37  ;;  %19331 = vst [vmem:[#allocation56_spill] sm:$0xff] %v18305_v25 }
 0x3c3   : > { %v13373_v28 = vpop.f32.mrf.mxu1  ;;  %v18313_v58 = vpop.f32.mrf.mxu0 }
 0x3c4   : > { %v18303_v15 = vadd.f32 %v13373_v28, %v18112_v26  ;;  %19332 = vst [vmem:[#allocation44_spill] sm:$0xff] %v18313_v58 }
 0x3c5   : > { %v8254_v63 = vpop.f32.mrf.mxu1  ;;  %v18321_v28 = vpop.f32.mrf.mxu0 }
 0x3c6   : > { %v18308_v34 = vadd.f32 %v8254_v63, %v18118_v22  ;;  %19333 = vst [vmem:[#allocation49_spill] sm:$0xff] %v18321_v28 }
 0x3c7   : > { %v13376_v36 = vpop.f32.mrf.mxu1 }
 0x3c8   : > { %v18311_v49 = vadd.f32 %v13376_v36, %v18130_v24  ;;  %v18329_v36 = vpop.f32.mrf.mxu0 }
 0x3c9   : > { %v8267_v13 = vpop.f32.mrf.mxu1  ;;  %19336 = vst [vmem:[#allocation48_spill] sm:$0xff] %v18329_v36 }
 0x3ca   : > { %v18316_v37 = vadd.f32 %v8267_v13, %v18136_v11 }
 0x3cb   : > { %v13377_v55 = vpop.f32.mrf.mxu1 }
 0x3cc   : > { %v18319_v26 = vadd.f32 %v13377_v55, %v18143_v57  ;;  %v18337_v55 = vpop.f32.mrf.mxu0 }
 0x3cd   : > { %v8270_v25 = vpop.f32.mrf.mxu1  ;;  %19339 = vst [vmem:[#allocation50_spill] sm:$0xff] %v18337_v55 }
 0x3ce   : > { %v18324_v22 = vadd.f32 %v8270_v25, %v18148_v6 }
 0x3cf   : > { %v13380_v63 = vpop.f32.mrf.mxu1 }
 0x3d0   : > { %19334 = vst [vmem:[#allocation46_spill] sm:$0xff] %v18324_v22  ;;  %v18327_v24 = vadd.f32 %v13380_v63, %v18159_v14  ;;  %v18342_v63 = vpop.f32.mrf.mxu0 }
 0x3d1   : > { %v8283_v58 = vpop.f32.mrf.mxu1  ;;  %19341 = vst [vmem:[#allocation52_spill] sm:$0xff] %v18342_v63 }
 0x3d2   : > { %19335 = vst [vmem:[#allocation51_spill] sm:$0xff] %v18327_v24  ;;  %v18332_v11 = vadd.f32 %v8283_v58, %v18165_v54 }
 0x3d3   : > { %v13381_v13 = vpop.f32.mrf.mxu1 }
 0x3d4   : > { %19337 = vst [vmem:[#allocation53_spill] sm:$0xff] %v18332_v11  ;;  %v18335_v57 = vadd.f32 %v13381_v13, %v18174_v30  ;;  %v18350_v13 = vpop.f32.mrf.mxu0 }
 0x3d5   : > { %v8286_v6 = vpop.f32.mrf.mxu1  ;;  %19344 = vst [vmem:[#allocation4_spill] sm:$0xff] %v18350_v13 }
 0x3d6   : > { %19338 = vst [vmem:[#allocation55_spill] sm:$0xff] %v18335_v57  ;;  %v18340_v25 = vadd.f32 %v8286_v6, %v18181_v2  ;;  %v12205_v6 = vld [vmem:[%s13933_s20 + $0x18] sm:$0xf]  ;;  %v18359_v63 = vpop.f32.mrf.mxu0 }
 0x3d7   : > { %v13384_v14 = vpop.f32.mrf.mxu1  ;;  %19347 = vst [vmem:[#allocation8_spill] sm:$0xff] %v18359_v63  ;;  %v10575_v13 = vshll.u32 %v12205_v6, 16 }
 0x3d8   : > { %19340 = vst [vmem:[#allocation58_spill] sm:$0xff] %v18340_v25  ;;  %v18345_v36 = vadd.f32 %v13384_v14, %v18194_v5  ;;  %v12206_v5 = vld [vmem:[%s13933_s20 + $0x1c] sm:$0xf] }
 0x3d9   : > { %v8299_v54 = vpop.f32.mrf.mxu1  ;;  %v10581_v25 = vshll.u32 %v12206_v5, 16 }
 0x3da   : > { %19342 = vst [vmem:[#allocation54_spill] sm:$0xff] %v18345_v36  ;;  %v18348_v58 = vadd.f32 %v8299_v54, %v18200_v44  ;;  %v12202_v36 = vld [vmem:[%s13933_s20 + $0xc] sm:$0xf]  ;;  %v10572_v54 = vshrl.u32 %v12205_v6, 16  ;;  %v10577_v6 = vrot.slane %v10575_v13, 5 }
 0x3db   : > { %v13385_v30 = vpop.f32.mrf.mxu1  ;;  %v10551_v63 = vshll.u32 %v12202_v36, 16 }
 0x3dc   : > { %19343 = vst [vmem:[#allocation57_spill] sm:$0xff] %v18348_v58  ;;  %v18353_v55 = vadd.f32 %v13385_v30, %v18206_v32  ;;  %v18366_v32 = vpop.f32.mrf.mxu0 }
 0x3dd   : > { %v8302_v28 = vpop.f32.mrf.mxu1  ;;  %19349 = vst [vmem:[#allocation17_spill] sm:$0xff] %v18366_v32 }
 0x3de   : > { %19345 = vst [vmem:[#allocation19_spill] sm:$0xff] %v18353_v55  ;;  %v18356_v2 = vadd.f32 %v8302_v28, %v18212_v46  ;;  %v10585_v46 = vshrl.u32 %v12206_v5, 16  ;;  %v12203_v28 = vld [vmem:[%s13933_s20 + $0x10] sm:$0xf] }
 0x3df   : > { %v10557_v32 = vshll.u32 %v12203_v28, 16  ;;  %v10561_v11 = vshrl.u32 %v12203_v28, 16 }
 0x3e0   : > { %19346 = vst [vmem:[#allocation5_spill] sm:$0xff] %v18356_v2  ;;  %v13388_v14 = vpop.f32.mrf.mxu1  ;;  %v10548_v2 = vshrl.u32 %v12202_v36, 16  ;;  %v10553_v36 = vrot.slane %v10551_v63, 5  ;;  %v10587_v45 = vrot.slane %v10585_v46, 4  ;;  %v12204_v46 = vld [vmem:[%s13933_s20 + $0x14] sm:$0x1] }
 0x3e1   : > { %v18364_v44 = vadd.f32 %v13388_v14, %v18218_v12  ;;  %v10574_v12 = vrot.slane %v10572_v54, 4 }
 0x3e2   : > { %v8315_v58 = vpop.f32.mrf.mxu1  ;;  %v10550_v5 = vrot.slane %v10548_v2, 4 }
 0x3e3   : > { %19348 = vst [vmem:[#allocation16_spill] sm:$0xff] %v18364_v44  ;;  %v18369_v30 = vadd.f32 %v8315_v58, %v18224_v59  ;;  %v18375_v44 = vrot.slane %v10581_v25, 5  ;;  %v18377_v59 = vpop.f32.mrf.mxu0  ;;  %v10578_v25 = vor.u32 %v10577_v6, %v10574_v12  ;;  %v18402_v12 = vadd.f32 %v18171_v9, %v18240_v8  ;;  %v12209_v6 = vld [vmem:[%s13933_s20 + $0x28] sm:$0xf] }
 0x3e4   : > { %v13389_v55 = vpop.f32.mrf.mxu1  ;;  %19352 = vst [vmem:[#allocation12_spill] sm:$0xff] %v18377_v59  ;;  %v10554_v59 = vor.u32 %v10553_v36, %v10550_v5 }
 0x3e5   : > { %19350 = vst [vmem:[#allocation13_spill] sm:$0xff] %v18369_v30  ;;  %v18373_v57 = vadd.f32 %v13389_v55, %v18230_v42  ;;  %v12207_v30 = vld [vmem:[%s13933_s20 + $0x20] sm:$0x1]  ;;  %v12211_v55 = vld [vmem:[%s13933_s20 + $0x30] sm:$0xf]  ;;  %v18389_v28 = vpop.f32.mrf.mxu0  ;;  %v10588_v2 = vor.u32 %v10587_v45, %v18375_v44  ;;  %19359 = vst [vmem:[#allocation30_spill] sm:$0xff] %v18402_v12 }
 0x3e6   : > { %v8318_v14 = vpop.f32.mrf.mxu1  ;;  %v10591_v13 = vshll.u32 %v12207_v30, 16  ;;  %19356 = vst [vmem:[#allocation15_spill] sm:$0xff] %v18389_v28  ;;  %v10623_v24 = vshll.u32 %v12211_v55, 16  ;;  %v18398_v30 = vadd.f32 %v18163_v31, %v18233_v4  ;;  %v10579_v45 = vrot.slane %v10578_v25, 4 }
 0x3e7   : > { %19351 = vst [vmem:[#allocation10_spill] sm:$0xff] %v18373_v57  ;;  %v18380_v58 = vadd.f32 %v8318_v14, %v18237_v35  ;;  %v12208_v57 = vld [vmem:[%s13933_s20 + $0x24] sm:$0xf]  ;;  %v10559_v35 = vrot.slane %v10557_v32, 5  ;;  %v10563_v14 = vrot.slane %v10561_v11, 4  ;;  %v18407_v5 = vpop.f32.mrf.mxu0  ;;  %v10555_v36 = vrot.slane %v10554_v59, 4 }
 0x3e8   : > { %v18383_v42 = vpop.f32.mrf.mxu1  ;;  %v10596_v19 = vshrl.u32 %v12208_v57, 16  ;;  %v10599_v22 = vshll.u32 %v12208_v57, 16  ;;  %19358 = vst [vmem:[#allocation27_spill] sm:$0xff] %v18398_v30  ;;  %v10593_v11 = vrot.slane %v10591_v13, 5  ;;  %v10625_v31 = vrot.slane %v10623_v24, 5 }
 0x3e9   : > { %19353 = vst [vmem:[#allocation28_spill] sm:$0xff] %v18380_v58  ;;  %19354 = vst [vmem:[#allocation6_spill] sm:$0xff] %v18383_v42  ;;  %v10620_v58 = vshrl.u32 %v12211_v55, 16  ;;  %v12212_v42 = vld [vmem:[%s13933_s20 + $0x34] sm:$0xf]  ;;  %v10589_v55 = vrot.slane %v10588_v2, 4  ;;  %v10564_v28 = vor.u32 %v10563_v14, %v10559_v35  ;;  %v18413_v25 = vadd.f32 %v18179_v3, %v18245_v53 }
 0x3ea   : > { %v18386_v54 = vpop.f32.mrf.mxu1  ;;  %v10629_v4 = vshll.u32 %v12212_v42, 16  ;;  %v10633_v30 = vshrl.u32 %v12212_v42, 16  ;;  %v10598_v9 = vrot.slane %v10596_v19, 4  ;;  %v10601_v8 = vrot.slane %v10599_v22, 5  ;;  %v18429_v22 = vpop.f32.mrf.mxu0  ;;  %v12213_v14 = vld [vmem:[%s13933_s20 + $0x38] sm:$0x1] }
 0x3eb   : > { %19355 = vst [vmem:[#allocation14_spill] sm:$0xff] %v18386_v54  ;;  %v10622_v54 = vrot.slane %v10620_v58, 4  ;;  %v10605_v12 = vshll.u32 %v12209_v6, 16  ;;  %v18417_v59 = vadd.f32 %v18191_v21, %v18250_v20  ;;  %v18421_v13 = vadd.f32 %v18197_v10, %v18255_v7  ;;  %v12217_v7 = vld [vmem:[%s13933_s20 + $0x48] sm:$0xf] }
 0x3ec   : > { %v18392_v63 = vpop.f32.mrf.mxu1  ;;  %v18425_v24 = vadd.f32 %v18203_v18, %v18260_v52  ;;  %v18433_v3 = vadd.f32 %v18209_v38, %v18265_v39  ;;  %v10584_v53 = vsel %vm13974_vm2, %v10579_v45, %v18375_v44  ;;  %v10594_v10 = vsel %vm13974_vm2, %v10589_v55, %v10593_v11 }
 0x3ed   : > { %19357 = vst [vmem:[#allocation23_spill] sm:$0xff] %v18392_v63  ;;  %v10567_v63 = vshll.u32 %v12204_v46, 16  ;;  %v10560_v52 = vsel %vm13974_vm2, %v10555_v36, %v10559_v35  ;;  %v10565_v58 = vrot.slane %v10564_v28, 4  ;;  %v10626_v42 = vor.u32 %v10625_v31, %v10622_v54  ;;  %v12210_v28 = vld [vmem:[%s13933_s20 + $0x2c] sm:$0x1] }
 0x3ee   : > { %v18404_v32 = vpop.f32.mrf.mxu1  ;;  %v10631_v2 = vrot.slane %v10629_v4, 5  ;;  %v10602_v38 = vor.u32 %v10601_v8, %v10598_v9  ;;  %v18445_v39 = vrot.slane %v10605_v12, 5  ;;  %v10635_v44 = vrot.slane %v10633_v30, 4  ;;  %v12218_v4 = vld [vmem:[%s13933_s20 + $0x4c] sm:$0xf] }
 0x3ef   : > { %19360 = vst [vmem:[#allocation29_spill] sm:$0xff] %v18404_v32  ;;  %v10609_v32 = vshrl.u32 %v12209_v6, 16  ;;  %v10569_v20 = vrot.slane %v10567_v63, 5  ;;  %v18450_v45 = vadd.f32 %v18215_v51, %v18270_v41  ;;  %v18454_v11 = vunpack.c.l.bf16 %v10584_v53  ;;  %v18457_v6 = vpop.f32.mrf.mxu0  ;;  %v12215_v9 = vld [vmem:[%s13933_s20 + $0x40] sm:$0xf] }
 0x3f0   : > { %v18409_v57 = vpop.f32.mrf.mxu1  ;;  %v10668_v54 = vshrl.u32 %v12217_v7, 16  ;;  %v10671_v35 = vshll.u32 %v12217_v7, 16  ;;  %v18461_v12 = vadd.f32 %v18221_v56, %v18275_v43  ;;  %v18465_v30 = vadd.f32 %v18227_v16, %v18280_v17 }
 0x3f1   : > { %v10611_v46 = vrot.slane %v10609_v32, 4  ;;  %v18467_v51 = vunpack.c.l.bf16 %v10560_v52  ;;  %v18469_v41 = vunpack.c.l.bf16 %v10594_v10  ;;  %v12214_v32 = vld [vmem:[%s13933_s20 + $0x3c] sm:$0xf]  ;;  %v18476_v55 = vadd.f32 %v18235_v40, %v18285_v48  ;;  %v18485_v48 = vpop.f32.mrf.mxu0 }
 0x3f2   : > { %v18427_v19 = vpop.f32.mrf.mxu1  ;;  %v10570_v31 = vsel %vm13974_vm2, %v10565_v58, %v10569_v20  ;;  %v10627_v56 = vrot.slane %v10626_v42, 4  ;;  %v10639_v43 = vshll.u32 %v12213_v14, 16  ;;  %v10603_v16 = vrot.slane %v10602_v38, 4 }
 0x3f3   : > { %19362 = vst [vmem:[#allocation31_spill] sm:$0xff] %v18469_v41  ;;  %19363 = vst [vmem:[#allocation7_spill] sm:$0xff] %v18476_v55  ;;  %v10636_v17 = vor.u32 %v10635_v44, %v10631_v2  ;;  %v10612_v8 = vor.u32 %v10611_v46, %v18445_v39  ;;  %v10615_v53 = vshll.u32 %v12210_v28, 16  ;;  %v10670_v7 = vrot.slane %v10668_v54, 4 }
 0x3f4   : > { %v18441_v18 = vpop.f32.mrf.mxu1  ;;  %v10673_v52 = vrot.slane %v10671_v35, 5  ;;  %v10644_v41 = vshrl.u32 %v12214_v32, 16  ;;  %v10647_v40 = vshll.u32 %v12214_v32, 16  ;;  %v10677_v55 = vshll.u32 %v12218_v4, 16 }
 0x3f5   : > { %v10681_v20 = vshrl.u32 %v12218_v4, 16  ;;  %v10653_v58 = vshll.u32 %v12215_v9, 16  ;;  %v10657_v42 = vshrl.u32 %v12215_v9, 16  ;;  %v18491_v38 = vadd.f32 %v18242_v60, %v18290_v1  ;;  %v12223_v9 = vld [vmem:[%s13933_s20 + $0x60] sm:$0xf] }
 0x3f6   : > { %v18452_v63 = vpop.f32.mrf.mxu1  ;;  %v18495_v44 = vadd.f32 %v18247_v27, %v18295_v61  ;;  %v18497_v46 = vunpack.c.l.bf16 %v10570_v31  ;;  %v10632_v28 = vsel %vm13974_vm2, %v10627_v56, %v10631_v2  ;;  %v10637_v54 = vrot.slane %v10636_v17, 4  ;;  %v18507_v31 = vpop.f32.mrf.mxu0  ;;  %v12219_v56 = vld [vmem:[%s13933_s20 + $0x50] sm:$0x1] }
 0x3f7   : > { %v10641_v35 = vrot.slane %v10639_v43, 5  ;;  %v10613_v32 = vrot.slane %v10612_v8, 4  ;;  %v10617_v4 = vrot.slane %v10615_v53, 5  ;;  %v10608_v60 = vsel %vm13974_vm2, %v10603_v16, %v18445_v39  ;;  %v12216_v39 = vld [vmem:[%s13933_s20 + $0x44] sm:$0x1] }
 0x3f8   : > { %v18472_v36 = vpop.f32.mrf.mxu1  ;;  %19365 = vst [vmem:[#allocation20_spill] sm:$0xff] %v18495_v44  ;;  %v10674_v27 = vor.u32 %v10673_v52, %v10670_v7  ;;  %v10646_v1 = vrot.slane %v10644_v41, 4  ;;  %v10649_v61 = vrot.slane %v10647_v40, 5  ;;  %v10679_v44 = vrot.slane %v10677_v55, 5  ;;  %v12224_v41 = vld [vmem:[%s13933_s20 + $0x64] sm:$0xf] }
 0x3f9   : > { %v18509_v2 = vrot.slane %v10653_v58, 5  ;;  %v10683_v43 = vrot.slane %v10681_v20, 4  ;;  %v10659_v17 = vrot.slane %v10657_v42, 4  ;;  %v18516_v53 = vadd.f32 %v18252_v62, %v18300_v33 }
 0x3fa   : > { %v18483_v10 = vpop.f32.mrf.mxu1  ;;  %v10716_v16 = vshrl.u32 %v12223_v9, 16  ;;  %v10719_v7 = vshll.u32 %v12223_v9, 16  ;;  %v18524_v55 = vadd.f32 %v18257_v0, %v18303_v15  ;;  %v18528_v52 = vadd.f32 %v18262_v50, %v18308_v34  ;;  %v12220_v0 = vld [vmem:[%s13933_s20 + $0x54] sm:$0xf]  ;;  %v18539_v15 = vpop.f32.mrf.mxu0 }
 0x3fb   : > { %19368 = vst [vmem:[#allocation21_spill] sm:$0xff] %v18516_v53  ;;  %v18530_v40 = vunpack.c.l.bf16 %v10608_v60  ;;  %v10642_v62 = vsel %vm13974_vm2, %v10637_v54, %v10641_v35  ;;  %v10618_v20 = vsel %vm13974_vm2, %v10613_v32, %v10617_v4  ;;  %v10675_v58 = vrot.slane %v10674_v27, 4  ;;  %v19414_v53 = vld [vmem:[#allocation48_spill] sm:$0xff] }
 0x3fc   : > { %v18487_v14 = vpop.f32.mrf.mxu1  ;;  %19369 = vst [vmem:[#allocation9_spill] sm:$0xff] %v18524_v55  ;;  %19370 = vst [vmem:[#allocation25_spill] sm:$0xff] %v18528_v52  ;;  %v10650_v42 = vor.u32 %v10649_v61, %v10646_v1  ;;  %v10684_v9 = vor.u32 %v10683_v43, %v10679_v44  ;;  %v10660_v50 = vor.u32 %v10659_v17, %v18509_v2  ;;  %v10663_v34 = vshll.u32 %v12216_v39, 16  ;;  %v12221_v1 = vld [vmem:[%s13933_s20 + $0x58] sm:$0xf] }
 0x3fd   : > { %19364 = vst [vmem:[#allocation11_spill] sm:$0xff] %v18487_v14  ;;  %v10725_v60 = vshll.u32 %v12224_v41, 16  ;;  %v18544_v54 = vunpack.c.l.bf16 %v10642_v62  ;;  %v10718_v35 = vrot.slane %v10716_v16, 4  ;;  %v10721_v55 = vrot.slane %v10719_v7, 5  ;;  %v12229_v7 = vld [vmem:[%s13933_s20 + $0x78] sm:$0xf] }
 0x3fe   : > { %v18502_v14 = vpop.f32.mrf.mxu1  ;;  %v10729_v32 = vshrl.u32 %v12224_v41, 16  ;;  %v18548_v4 = vadd.f32 %v18267_v29, %v18311_v49  ;;  %v18550_v27 = vunpack.c.l.bf16 %v10618_v20  ;;  %v10692_v61 = vshrl.u32 %v12220_v0, 16  ;;  %v18562_v29 = vpop.f32.mrf.mxu0 }
 0x3ff   : > { %19366 = vst [vmem:[#allocation18_spill] sm:$0xff] %v18502_v14  ;;  %v18518_v14 = vunpack.c.l.bf16 %v10632_v28  ;;  %v10687_v28 = vshll.u32 %v12219_v56, 16  ;;  %19373 = vst [vmem:[#allocation32_spill] sm:$0xff] %v18544_v54  ;;  %v10695_v56 = vshll.u32 %v12220_v0, 16  ;;  %v18557_v17 = vadd.f32 %v18272_v23, %v18316_v37  ;;  %v19418_v54 = vld [vmem:[#allocation5_spill] sm:$0xff] }
 0x400   : > { %v18512_v8 = vpop.f32.mrf.mxu1  ;;  %19374 = vst [vmem:[#allocation35_spill] sm:$0xff] %v18548_v4  ;;  %19375 = vst [vmem:[#allocation34_spill] sm:$0xff] %v18550_v27  ;;  %v10680_v39 = vsel %vm13974_vm2, %v10675_v58, %v10679_v44  ;;  %v10651_v41 = vrot.slane %v10650_v42, 4  ;;  %v10685_v49 = vrot.slane %v10684_v9, 4  ;;  %v10661_v62 = vrot.slane %v10660_v50, 4  ;;  %v19381_v50 = vld [vmem:[#allocation46_spill] sm:$0xff] }
 0x401   : > { %19367 = vst [vmem:[#allocation22_spill] sm:$0xff] %v18512_v8  ;;  %19377 = vst [vmem:[#allocation36_spill] sm:$0xff] %v18557_v17  ;;  %v10689_v16 = vrot.slane %v10687_v28, 5  ;;  %v10665_v20 = vrot.slane %v10663_v34, 5  ;;  %v18564_v4 = vrot.slane %v10725_v60, 5  ;;  %v10705_v23 = vshrl.u32 %v12221_v1, 16 }
 0x402   : > { %v18534_v33 = vpop.f32.mrf.mxu1  ;;  %v10731_v37 = vrot.slane %v10729_v32, 4  ;;  %v10694_v17 = vrot.slane %v10692_v61, 4  ;;  %v10697_v44 = vrot.slane %v10695_v56, 5  ;;  %v12225_v58 = vld [vmem:[%s13933_s20 + $0x68] sm:$0x1]  ;;  %v10764_v42 = vshrl.u32 %v12229_v7, 16  ;;  %v18585_v61 = vpop.f32.mrf.mxu0 }
 0x403   : > { %19371 = vst [vmem:[#allocation24_spill] sm:$0xff] %v18534_v33  ;;  %v10767_v28 = vshll.u32 %v12229_v7, 16  ;;  %v18573_v9 = vadd.f32 %v18277_v47, %v18319_v26  ;;  %v19382_v34 = vld [vmem:[#allocation43_spill] sm:$0xff]  ;;  %v19388_v56 = vld [vmem:[#allocation53_spill] sm:$0xff]  ;;  %v10656_v47 = vsel %vm13974_vm2, %v10651_v41, %v18509_v2  ;;  %v10690_v26 = vsel %vm13974_vm2, %v10685_v49, %v10689_v16 }
 0x404   : > { %v18542_v52 = vpop.f32.mrf.mxu1  ;;  %v18577_v60 = vadd.f32 %v19382_v34, %v19381_v50  ;;  %v19389_v7 = vld [vmem:[#allocation45_spill] sm:$0xff]  ;;  %v10666_v50 = vsel %vm13974_vm2, %v10661_v62, %v10665_v20  ;;  %v12230_v34 = vld [vmem:[%s13933_s20 + $0x7c] sm:$0xf]  ;;  %v10707_v2 = vrot.slane %v10705_v23, 4  ;;  %v10766_v41 = vrot.slane %v10764_v42, 4 }
 0x405   : > { %19372 = vst [vmem:[#allocation26_spill] sm:$0xff] %v18542_v52  ;;  %v10701_v52 = vshll.u32 %v12221_v1, 16  ;;  %19380 = vst [vmem:[#allocation39_spill] sm:$0xff] %v18573_v9  ;;  %v18583_v1 = vunpack.c.l.bf16 %v10680_v39  ;;  %v10769_v9 = vrot.slane %v10767_v28, 5  ;;  %v18608_v49 = vunpack.c.l.bf16 %v10656_v47  ;;  %v19400_v28 = vld [vmem:[#allocation58_spill] sm:$0xff]  ;;  %v19401_v47 = vld [vmem:[#allocation56_spill] sm:$0xff] }
 0x406   : > { %v18553_v43 = vpop.f32.mrf.mxu1  ;;  %19383 = vst [vmem:[#allocation40_spill] sm:$0xff] %v18577_v60  ;;  %v12222_v60 = vld [vmem:[%s13933_s20 + $0x5c] sm:$0x1]  ;;  %v10773_v62 = vshll.u32 %v12230_v34, 16  ;;  %v10777_v23 = vshrl.u32 %v12230_v34, 16 }
 0x407   : > { %19376 = vst [vmem:[#allocation33_spill] sm:$0xff] %v18553_v43  ;;  %v10722_v43 = vor.u32 %v10721_v55, %v10718_v35  ;;  %v19384_v55 = vld [vmem:[#allocation51_spill] sm:$0xff]  ;;  %v19385_v35 = vld [vmem:[#allocation42_spill] sm:$0xff]  ;;  %19387 = vst [vmem:[#allocation3_spill] sm:$0xff] %v18583_v1 }
 0x408   : > { %v18566_v0 = vpop.f32.mrf.mxu1  ;;  %v18581_v32 = vadd.f32 %v19385_v35, %v19384_v55  ;;  %v12226_v55 = vld [vmem:[%s13933_s20 + $0x6c] sm:$0xf]  ;;  %19393 = vst [vmem:[#allocation42_spill] sm:$0xff] %v18608_v49 }
 0x409   : > { %19378 = vst [vmem:[#allocation38_spill] sm:$0xff] %v18566_v0  ;;  %v10723_v35 = vrot.slane %v10722_v43, 4  ;;  %v10740_v20 = vshrl.u32 %v12226_v55, 16  ;;  %v18610_v43 = vpop.f32.mrf.mxu0  ;;  %v19395_v0 = vld [vmem:[#allocation47_spill] sm:$0xff] }
 0x40a   : > { %v18569_v33 = vpop.f32.mrf.mxu1  ;;  %19386 = vst [vmem:[#allocation41_spill] sm:$0xff] %v18581_v32  ;;  %v18602_v32 = vrot.slane %v10701_v52, 5  ;;  %v19394_v52 = vld [vmem:[#allocation55_spill] sm:$0xff] }
 0x40b   : > { %19379 = vst [vmem:[#allocation37_spill] sm:$0xff] %v18569_v33  ;;  %v18589_v33 = vadd.f32 %v19389_v7, %v19388_v56  ;;  %v10732_v56 = vor.u32 %v10731_v37, %v18564_v4  ;;  %v10735_v7 = vshll.u32 %v12225_v58, 16  ;;  %v18614_v37 = vadd.f32 %v19395_v0, %v19394_v52  ;;  %v12235_v52 = vld [vmem:[%s13933_s20 + $0x90] sm:$0xf] }
 0x40c   : > { %v18600_v39 = vpop.f32.mrf.mxu1  ;;  %v18616_v58 = vunpack.c.l.bf16 %v10690_v26  ;;  %v10711_v0 = vshll.u32 %v12222_v60, 16  ;;  %v10708_v34 = vor.u32 %v10707_v2, %v18602_v32  ;;  %v12231_v60 = vld [vmem:[%s13933_s20 + $0x80] sm:$0x1]  ;;  %v19406_v2 = vld [vmem:[#allocation54_spill] sm:$0xff] }
 0x40d   : > { %19390 = vst [vmem:[#allocation46_spill] sm:$0xff] %v18589_v33  ;;  %19391 = vst [vmem:[#allocation43_spill] sm:$0xff] %v18600_v39  ;;  %v10698_v33 = vor.u32 %v10697_v44, %v10694_v17  ;;  %v10743_v39 = vshll.u32 %v12226_v55, 16  ;;  %v18618_v17 = vunpack.c.l.bf16 %v10666_v50  ;;  %v12227_v44 = vld [vmem:[%s13933_s20 + $0x70] sm:$0xf]  ;;  %v10728_v55 = vsel %vm13974_vm2, %v10723_v35, %v18564_v4 }
 0x40e   : > { %v18606_v16 = vpop.f32.mrf.mxu1  ;;  %19396 = vst [vmem:[#allocation53_spill] sm:$0xff] %v18614_v37  ;;  %19397 = vst [vmem:[#allocation45_spill] sm:$0xff] %v18616_v58  ;;  %v10737_v49 = vrot.slane %v10735_v7, 5  ;;  %v10733_v50 = vrot.slane %v10732_v56, 4  ;;  %v10770_v37 = vor.u32 %v10769_v9, %v10766_v41  ;;  %v18638_v58 = vpop.f32.mrf.mxu0  ;;  %v10753_v4 = vshrl.u32 %v12227_v44, 16  ;;  %v19407_v9 = vld [vmem:[#allocation44_spill] sm:$0xff] }
 0x40f   : > { %19392 = vst [vmem:[#allocation51_spill] sm:$0xff] %v18606_v16  ;;  %19398 = vst [vmem:[#allocation55_spill] sm:$0xff] %v18618_v17  ;;  %v18625_v16 = vadd.f32 %v19401_v47, %v19400_v28  ;;  %v18631_v26 = vrot.slane %v10698_v33, 4  ;;  %v10742_v28 = vrot.slane %v10740_v20, 4  ;;  %v10745_v47 = vrot.slane %v10743_v39, 5 }
 0x410   : > { %v18621_v42 = vpop.f32.mrf.mxu1  ;;  %19404 = vst [vmem:[#allocation59_spill] sm:$0xff] %v18638_v58  ;;  %v10779_v35 = vrot.slane %v10777_v23, 4  ;;  %v10812_v33 = vshrl.u32 %v12235_v52, 16  ;;  %v10815_v7 = vshll.u32 %v12235_v52, 16  ;;  %v18645_v41 = vadd.f32 %v19407_v9, %v19406_v2  ;;  %v19413_v58 = vld [vmem:[#allocation19_spill] sm:$0xff] }
 0x411   : > { %19399 = vst [vmem:[#allocation47_spill] sm:$0xff] %v18621_v42  ;;  %19402 = vst [vmem:[#allocation58_spill] sm:$0xff] %v18625_v16  ;;  %v18636_v42 = vrot.slane %v10773_v62, 5  ;;  %v10749_v16 = vshll.u32 %v12227_v44, 16  ;;  %v19409_v62 = vld [vmem:[#allocation57_spill] sm:$0xff]  ;;  %v18651_v39 = vunpack.c.l.bf16 %v10728_v55  ;;  %v10713_v1 = vrot.slane %v10711_v0, 5 }
 0x412   : > { %v18634_v17 = vpop.f32.mrf.mxu1  ;;  %19408 = vst [vmem:[#allocation54_spill] sm:$0xff] %v18645_v41  ;;  %v18655_v44 = vadd.f32 %v19414_v53, %v19413_v58  ;;  %v10738_v23 = vsel %vm13974_vm2, %v10733_v50, %v10737_v49  ;;  %v10709_v52 = vrot.slane %v10708_v34, 4  ;;  %v12236_v2 = vld [vmem:[%s13933_s20 + $0x94] sm:$0xf]  ;;  %v12232_v9 = vld [vmem:[%s13933_s20 + $0x84] sm:$0xf]  ;;  %v10746_v55 = vor.u32 %v10745_v47, %v10742_v28  ;;  %v18667_v58 = vpop.f32.mrf.mxu0 }
 0x413   : > { %19403 = vst [vmem:[#allocation56_spill] sm:$0xff] %v18634_v17  ;;  %v19410_v17 = vld [vmem:[#allocation49_spill] sm:$0xff]  ;;  %19412 = vst [vmem:[#allocation57_spill] sm:$0xff] %v18651_v39  ;;  %v10751_v0 = vrot.slane %v10749_v16, 5  ;;  %v10783_v53 = vshll.u32 %v12231_v60, 16  ;;  %v10755_v49 = vrot.slane %v10753_v4, 4  ;;  %v18678_v16 = vunpack.c.l.bf16 %v10738_v23 }
 0x414   : > { %v18641_v56 = vpop.f32.mrf.mxu1  ;;  %v18649_v20 = vadd.f32 %v19410_v17, %v19409_v62  ;;  %19415 = vst [vmem:[#allocation49_spill] sm:$0xff] %v18655_v44  ;;  %v10704_v17 = vsel %vm13974_vm2, %v18631_v26, %v18602_v32  ;;  %v10780_v62 = vor.u32 %v10779_v35, %v18636_v42  ;;  %v10814_v50 = vrot.slane %v10812_v33, 4  ;;  %v19419_v32 = vld [vmem:[#allocation50_spill] sm:$0xff] }
 0x415   : > { %19405 = vst [vmem:[#allocation60_spill] sm:$0xff] %v18641_v56  ;;  %v10771_v56 = vrot.slane %v10770_v37, 4  ;;  %v10817_v34 = vrot.slane %v10815_v7, 5  ;;  %v12233_v37 = vld [vmem:[%s13933_s20 + $0x88] sm:$0xf]  ;;  %v10825_v39 = vshrl.u32 %v12236_v2, 16  ;;  %v18676_v26 = vadd.f32 %v19419_v32, %v19418_v54 }
 0x416   : > { %19411 = vst [vmem:[#allocation44_spill] sm:$0xff] %v18649_v20  ;;  %v18661_v41 = vpop.f32.mrf.mxu1  ;;  %v12228_v20 = vld [vmem:[%s13933_s20 + $0x74] sm:$0x1]  ;;  %v10788_v27 = vshrl.u32 %v12232_v9, 16  ;;  %v10791_v8 = vshll.u32 %v12232_v9, 16  ;;  %19421 = vst [vmem:[#allocation50_spill] sm:$0xff] %v18678_v16  ;;  %v10714_v28 = vsel %vm13974_vm2, %v10709_v52, %v10713_v1  ;;  %v10756_v9 = vor.u32 %v10755_v49, %v10751_v0 }
 0x417   : > { %19416 = vst [vmem:[#allocation19_spill] sm:$0xff] %v18661_v41  ;;  %v10821_v41 = vshll.u32 %v12236_v2, 16  ;;  %19420 = vst [vmem:[#allocation5_spill] sm:$0xff] %v18676_v26  ;;  %v10776_v47 = vsel %vm13974_vm2, %v10771_v56, %v18636_v42  ;;  %v10747_v60 = vrot.slane %v10746_v55, 4  ;;  %v10785_v35 = vrot.slane %v10783_v53, 5  ;;  %v18687_v2 = vpop.f32.mrf.mxu0  ;;  %v19424_v42 = vld [vmem:[#allocation16_spill] sm:$0xff] }
 0x418   : > { %v18671_v44 = vpop.f32.mrf.mxu1  ;;  %v10797_v33 = vshll.u32 %v12233_v37, 16  ;;  %v10801_v7 = vshrl.u32 %v12233_v37, 16  ;;  %v10781_v54 = vrot.slane %v10780_v62, 4  ;;  %v10759_v23 = vshll.u32 %v12228_v20, 16  ;;  %v19425_v56 = vld [vmem:[#allocation52_spill] sm:$0xff]  ;;  %v19427_v53 = vld [vmem:[#allocation13_spill] sm:$0xff] }
 0x419   : > { %19417 = vst [vmem:[#allocation48_spill] sm:$0xff] %v18671_v44  ;;  %v10818_v32 = vor.u32 %v10817_v34, %v10814_v50  ;;  %v10823_v1 = vrot.slane %v10821_v41, 5  ;;  %v10790_v52 = vrot.slane %v10788_v27, 4  ;;  %v10793_v44 = vrot.slane %v10791_v8, 5  ;;  %v12237_v49 = vld [vmem:[%s13933_s20 + $0x98] sm:$0x1]  ;;  %v18712_v34 = vpop.f32.mrf.mxu0 }
 0x41a   : > { %v18685_v4 = vpop.f32.mrf.mxu1  ;;  %v10827_v16 = vrot.slane %v10825_v39, 4  ;;  %v18693_v55 = vadd.f32 %v19425_v56, %v19424_v42  ;;  %v18699_v62 = vunpack.c.l.bf16 %v10704_v17  ;;  %v18701_v20 = vunpack.c.l.bf16 %v10714_v28  ;;  %19434 = vst [vmem:[#allocation65_spill] sm:$0xff] %v18712_v34  ;;  %v19435_v42 = vld [vmem:[#allocation10_spill] sm:$0xff] }
 0x41b   : > { %19422 = vst [vmem:[#allocation61_spill] sm:$0xff] %v18685_v4  ;;  %v19428_v4 = vld [vmem:[#allocation4_spill] sm:$0xff]  ;;  %v18706_v27 = vunpack.c.l.bf16 %v10776_v47  ;;  %v10752_v8 = vsel %vm13974_vm2, %v10747_v60, %v10751_v0  ;;  %v18710_v41 = vrot.slane %v10797_v33, 5  ;;  %v10803_v39 = vrot.slane %v10801_v7, 4  ;;  %v12241_v47 = vld [vmem:[%s13933_s20 + $0xa8] sm:$0xf] }
 0x41c   : > { %v18689_v26 = vpop.f32.mrf.mxu1  ;;  %19426 = vst [vmem:[#allocation16_spill] sm:$0xff] %v18693_v55  ;;  %v18697_v37 = vadd.f32 %v19428_v4, %v19427_v53  ;;  %19430 = vst [vmem:[#allocation13_spill] sm:$0xff] %v18699_v62  ;;  %v19436_v4 = vld [vmem:[#allocation8_spill] sm:$0xff]  ;;  %v10786_v17 = vsel %vm13974_vm2, %v10781_v54, %v10785_v35  ;;  %v10757_v28 = vrot.slane %v10756_v9, 4  ;;  %v10761_v53 = vrot.slane %v10759_v23, 5  ;;  %v19438_v7 = vld [vmem:[#allocation27_spill] sm:$0xff] }
 0x41d   : > { %19423 = vst [vmem:[#allocation62_spill] sm:$0xff] %v18689_v26  ;;  %19431 = vst [vmem:[#allocation4_spill] sm:$0xff] %v18701_v20  ;;  %v18716_v56 = vadd.f32 %v19436_v4, %v19435_v42  ;;  %v10794_v0 = vor.u32 %v10793_v44, %v10790_v52  ;;  %v10828_v60 = vor.u32 %v10827_v16, %v10823_v1  ;;  %v10831_v33 = vshll.u32 %v12237_v49, 16  ;;  %v19439_v26 = vld [vmem:[#allocation6_spill] sm:$0xff]  ;;  %v19442_v4 = vld [vmem:[#allocation28_spill] sm:$0xff] }
 0x41e   : > { %19429 = vst [vmem:[#allocation52_spill] sm:$0xff] %v18697_v37  ;;  %v18704_v50 = vpop.f32.mrf.mxu1  ;;  %19433 = vst [vmem:[#allocation64_spill] sm:$0xff] %v18706_v27  ;;  %v12234_v37 = vld [vmem:[%s13933_s20 + $0x8c] sm:$0x1]  ;;  %v9217_v27 = vadd.f32 %v19439_v26, %v19438_v7  ;;  %v19440_v20 = vld [vmem:[#allocation30_spill] sm:$0xff]  ;;  %v18732_v35 = vunpack.c.l.bf16 %v10752_v8  ;;  %v10804_v9 = vor.u32 %v10803_v39, %v18710_v41  ;;  %v10860_v44 = vshrl.u32 %v12241_v47, 16 }
 0x41f   : > { %19432 = vst [vmem:[#allocation63_spill] sm:$0xff] %v18704_v50  ;;  %19437 = vst [vmem:[#allocation10_spill] sm:$0xff] %v18716_v56  ;;  %v10819_v50 = vrot.slane %v10818_v32, 4  ;;  %v19441_v62 = vld [vmem:[#allocation14_spill] sm:$0xff]  ;;  %v19443_v56 = vld [vmem:[#allocation17_spill] sm:$0xff]  ;;  %v10807_v23 = vshll.u32 %v12234_v37, 16  ;;  %v10762_v8 = vsel %vm13974_vm2, %v10757_v28, %v10761_v53 }
 0x420   : > { %v18722_v55 = vpop.f32.mrf.mxu1  ;;  %v9215_v42 = vadd.f32 %v19441_v62, %v19440_v20  ;;  %v18730_v34 = vadd.f32 %v19443_v56, %v19442_v4  ;;  %v10863_v16 = vshll.u32 %v12241_v47, 16  ;;  %v19445_v32 = vld [vmem:[#allocation23_spill] sm:$0xff]  ;;  %v19446_v26 = vld [vmem:[#allocation29_spill] sm:$0xff]  ;;  %v18741_v62 = vpop.f32.mrf.mxu0  ;;  %v18743_v20 = vunpack.c.l.bf16 %v10786_v17  ;;  %v19448_v17 = vld [vmem:[#allocation12_spill] sm:$0xff] }
 0x421   : > { %v9218_v52 = vadd.f32 %v19445_v32, %v18413_v25  ;;  %v9216_v49 = vadd.f32 %v19446_v26, %v18417_v59  ;;  %v10824_v37 = vsel %vm13974_vm2, %v10819_v50, %v10823_v1  ;;  %v10795_v39 = vrot.slane %v10794_v0, 4  ;;  %v19449_v32 = vld [vmem:[#allocation15_spill] sm:$0xff] }
 0x422   : > { %19444 = vst [vmem:[#allocation8_spill] sm:$0xff] %v18730_v34  ;;  %v18734_v54 = vpop.f32.mrf.mxu1  ;;  %v10829_v47 = vrot.slane %v10828_v60, 4  ;;  %v10833_v7 = vrot.slane %v10831_v33, 5  ;;  %v9221_v25 = vadd.f32 %v18409_v57, %v18421_v13  ;;  %v9219_v59 = vadd.f32 %v18427_v19, %v18425_v24  ;;  %v18760_v0 = vpop.f32.mrf.mxu0  ;;  %v12238_v19 = vld [vmem:[%s13933_s20 + $0x9c] sm:$0xf] }
 0x423   : > { %v9971_v4 = vadd.f32 %v19448_v17, %v9217_v27  ;;  %v9969_v26 = vadd.f32 %v19449_v32, %v9215_v42  ;;  %v10805_v53 = vrot.slane %v10804_v9, 4  ;;  %v10809_v34 = vrot.slane %v10807_v23, 5  ;;  %v18776_v9 = vld [vmem:[%s19055_s4] ss:$0 sm:$0xff] }
 0x424   : > { %v18747_v56 = vpop.f32.mrf.mxu1  ;;  %v10862_v1 = vrot.slane %v10860_v44, 4  ;;  %v10865_v50 = vrot.slane %v10863_v16, 5  ;;  %v9972_v60 = vadd.f32 %v18407_v5, %v9218_v52  ;;  %v9970_v57 = vadd.f32 %v18429_v22, %v9216_v49 }
 0x425   : > { %19447 = vst [vmem:[#allocation27_spill] sm:$0xff] %v18747_v56  ;;  %v12242_v56 = vld [vmem:[%s13933_s20 + $0xac] sm:$0xf]  ;;  %v18764_v13 = vunpack.c.l.bf16 %v10762_v8  ;;  %v18766_v24 = vunpack.c.l.bf16 %v10824_v37  ;;  %v9222_v27 = vadd.f32 %v18441_v18, %v18433_v3  ;;  %v9220_v33 = vadd.f32 %v18452_v63, %v18450_v45  ;;  %v18787_v8 = vpop.f32.mrf.mxu0 }
 0x426   : > { %v18757_v28 = vpop.f32.mrf.mxu1  ;;  %v10800_v5 = vsel %vm13974_vm2, %v10795_v39, %v18710_v41  ;;  %v10834_v22 = vsel %vm13974_vm2, %v10829_v47, %v10833_v7  ;;  %v9975_v3 = vadd.f32 %v18457_v6, %v9221_v25  ;;  %v9973_v18 = vadd.f32 %v18485_v48, %v9219_v59 }
 0x427   : > { %v10869_v44 = vshll.u32 %v12242_v56, 16  ;;  %v10810_v63 = vsel %vm13974_vm2, %v10805_v53, %v10809_v34  ;;  %v10866_v16 = vor.u32 %v10865_v50, %v10862_v1  ;;  %v10836_v52 = vshrl.u32 %v12238_v19, 16  ;;  %v18809_v53 = vpop.f32.mrf.mxu0 }
 0x428   : > { %v13552_v42 = vpop.f32.mrf.mxu1  ;;  %v10839_v49 = vshll.u32 %v12238_v19, 16  ;;  %v18791_v39 = vunpack.c.l.bf16 %v10800_v5  ;;  %v18793_v6 = vunpack.c.l.bf16 %v10834_v22  ;;  %v9225_v48 = vadd.f32 %v18472_v36, %v18461_v12  ;;  %v12243_v19 = vld [vmem:[%s13933_s20 + $0xb0] sm:$0x1] }
 0x429   : > { %v10469_v23 = vadd.f32 %v13552_v42, %v9971_v4  ;;  %v9976_v34 = vadd.f32 %v18507_v31, %v9222_v27  ;;  %v9974_v7 = vadd.f32 %v18539_v15, %v9220_v33  ;;  %v10873_v25 = vshrl.u32 %v12242_v56, 16 }
 0x42a   : > { %v10340_v45 = vpop.f32.mrf.mxu1  ;;  %v18801_v32 = vunpack.c.l.bf16 %v10810_v63  ;;  %v10867_v36 = vrot.slane %v10866_v16, 4  ;;  %v10871_v31 = vrot.slane %v10869_v44, 5  ;;  %v10838_v15 = vrot.slane %v10836_v52, 4  ;;  %v19450_v44 = vld [vmem:[#allocation31_spill] sm:$0xff] }
 0x42b   : > { %v10972_v41 = vadd.f32 %v18776_v9, %v10469_v23  ;;  %v10467_v37 = vadd.f32 %v10340_v45, %v9969_v26  ;;  %v12239_v26 = vld [vmem:[%s13933_s20 + $0xa0] sm:$0xf]  ;;  %v10841_v56 = vrot.slane %v10839_v49, 5  ;;  %v9223_v27 = vadd.f32 %v18483_v10, %v18465_v30  ;;  %v18822_v49 = vpop.f32.mrf.mxu0 }
 0x42c   : > { %v13553_v47 = vpop.f32.mrf.mxu1  ;;  %v9979_v42 = vadd.f32 %v18562_v29, %v9225_v48  ;;  %v10845_v5 = vshll.u32 %v12239_v26, 16  ;;  %v10875_v22 = vrot.slane %v10873_v25, 4  ;;  %v10849_v30 = vshrl.u32 %v12239_v26, 16 }
 0x42d   : > { %v11036_v59 = vadd.f32 %v18454_v11, %v10972_v41  ;;  %v10970_v17 = vadd.f32 %v18776_v9, %v10467_v37  ;;  %v10470_v4 = vadd.f32 %v13553_v47, %v9972_v60  ;;  %v10842_v52 = vor.u32 %v10841_v56, %v10838_v15  ;;  %v19451_v47 = vld [vmem:[#allocation7_spill] sm:$0xff]  ;;  %v12240_v56 = vld [vmem:[%s13933_s20 + $0xa4] sm:$0x1] }
 0x42e   : > { %v10343_v12 = vpop.f32.mrf.mxu1  ;;  %v10879_v10 = vshll.u32 %v12243_v19, 16  ;;  %v10876_v26 = vor.u32 %v10875_v22, %v10871_v31 }
 0x42f   : > { %v11068_v11 = vmax.f32 %v11036_v59, 0.0  ;;  %v11034_v1 = vadd.f32 %v18467_v51, %v10970_v17  ;;  %v10973_v50 = vadd.f32 %v18776_v9, %v10470_v4  ;;  %v10468_v60 = vadd.f32 %v10343_v12, %v9970_v57 }
 0x430   : > { %v13556_v33 = vpop.f32.mrf.mxu1  ;;  %v10872_v57 = vsel %vm13974_vm2, %v10867_v36, %v10871_v31  ;;  %v9977_v17 = vadd.f32 %v18585_v61, %v9223_v27  ;;  %v18830_v4 = vrot.slane %v10845_v5, 5  ;;  %v18838_v61 = vpop.f32.mrf.mxu0 }
 0x431   : > { %11100 = vst [vmem:[%s18807_s10 + $0x10] sm:$0xff] %v11068_v11  ;;  %v11066_v23 = vmax.f32 %v11034_v1, 0.0  ;;  %v11037_v45 = vadd.f32 %v19450_v44, %v10973_v50  ;;  %v10971_v63 = vadd.f32 %v18776_v9, %v10468_v60  ;;  %v10473_v51 = vadd.f32 %v13556_v33, %v9975_v3  ;;  %v19452_v3 = vld [vmem:[#allocation11_spill] sm:$0xff]  ;;  %v12247_v33 = vld [vmem:[%s13933_s20 + $0xc0] sm:$0xf] }
 0x432   : > { %v10356_v16 = vpop.f32.mrf.mxu1  ;;  %v9226_v25 = vadd.f32 %v19452_v3, %v19451_v47  ;;  %v18836_v11 = vunpack.c.l.bf16 %v10872_v57  ;;  %v10843_v1 = vrot.slane %v10842_v52, 4  ;;  %v10881_v50 = vrot.slane %v10879_v10, 5  ;;  %v19455_v52 = vld [vmem:[#allocation20_spill] sm:$0xff] }
 0x433   : > { %11098 = vst [vmem:[%s18807_s10] sm:$0xff] %v11066_v23  ;;  %v11069_v29 = vmax.f32 %v11037_v45, 0.0  ;;  %v11035_v41 = vadd.f32 %v18497_v46, %v10971_v63  ;;  %v10976_v37 = vadd.f32 %v18776_v9, %v10473_v51  ;;  %v10471_v48 = vadd.f32 %v10356_v16, %v9973_v18  ;;  %v19454_v51 = vld [vmem:[#allocation32_spill] sm:$0xff] }
 0x434   : > { %v13557_v59 = vpop.f32.mrf.mxu1  ;;  %v10851_v60 = vrot.slane %v10849_v30, 4  ;;  %v9980_v23 = vadd.f32 %v18610_v43, %v9226_v25  ;;  %v10877_v44 = vrot.slane %v10876_v26, 4  ;;  %v10855_v45 = vshll.u32 %v12240_v56, 16  ;;  %v19456_v30 = vld [vmem:[#allocation22_spill] sm:$0xff]  ;;  %v19458_v25 = vld [vmem:[#allocation21_spill] sm:$0xff] }
 0x435   : > { %11101 = vst [vmem:[%s18807_s10 + $0x18] sm:$0xff] %v11069_v29  ;;  %v11067_v12 = vmax.f32 %v11035_v41, 0.0  ;;  %v11040_v36 = vadd.f32 %v18518_v14, %v10976_v37  ;;  %v10974_v46 = vadd.f32 %v18776_v9, %v10471_v48  ;;  %v10474_v15 = vadd.f32 %v13557_v59, %v9976_v34  ;;  %v19453_v34 = vld [vmem:[#allocation18_spill] sm:$0xff]  ;;  %v18856_v41 = vpop.f32.mrf.mxu0  ;;  %v19459_v59 = vld [vmem:[#allocation24_spill] sm:$0xff] }
 0x436   : > { %v10359_v18 = vpop.f32.mrf.mxu1  ;;  %v9224_v5 = vadd.f32 %v19453_v34, %v18491_v38  ;;  %v10848_v38 = vsel %vm13974_vm2, %v10843_v1, %v18830_v4  ;;  %v10852_v43 = vor.u32 %v10851_v60, %v18830_v4  ;;  %v10908_v29 = vshrl.u32 %v12247_v33, 16  ;;  %v19457_v48 = vld [vmem:[#allocation34_spill] sm:$0xff] }
 0x437   : > { %11099 = vst [vmem:[%s18807_s10 + $0x8] sm:$0xff] %v11067_v12  ;;  %v11072_v31 = vmax.f32 %v11040_v36, 0.0  ;;  %v11038_v19 = vadd.f32 %v18530_v40, %v10974_v46  ;;  %v10977_v27 = vadd.f32 %v18776_v9, %v10474_v15  ;;  %v10472_v14 = vadd.f32 %v10359_v18, %v9974_v7  ;;  %v19460_v36 = vld [vmem:[#allocation59_spill] sm:$0xff] }
 0x438   : > { %v13560_v22 = vpop.f32.mrf.mxu1  ;;  %v9229_v7 = vadd.f32 %v19456_v30, %v19455_v52  ;;  %v9227_v26 = vadd.f32 %v19459_v59, %v19458_v25  ;;  %v9978_v46 = vadd.f32 %v19460_v36, %v9224_v5  ;;  %v10882_v4 = vsel %vm13974_vm2, %v10877_v44, %v10881_v50  ;;  %v19461_v18 = vld [vmem:[#allocation3_spill] sm:$0xff]  ;;  %v18876_v50 = vpop.f32.mrf.mxu0 }
 0x439   : > { %11104 = vst [vmem:[%s18807_s10 + $0x30] sm:$0xff] %v11072_v31  ;;  %v11070_v63 = vmax.f32 %v11038_v19, 0.0  ;;  %v11041_v16 = vadd.f32 %v19454_v51, %v10977_v27  ;;  %v10975_v57 = vadd.f32 %v18776_v9, %v10472_v14  ;;  %v10477_v40 = vadd.f32 %v13560_v22, %v9979_v42  ;;  %v19463_v19 = vld [vmem:[#allocation26_spill] sm:$0xff] }
 0x43a   : > { %v10372_v10 = vpop.f32.mrf.mxu1  ;;  %v18866_v15 = vrot.slane %v10855_v45, 5  ;;  %v9983_v34 = vadd.f32 %v18667_v58, %v9229_v7  ;;  %v18874_v5 = vunpack.c.l.bf16 %v10848_v38  ;;  %v10911_v22 = vshll.u32 %v12247_v33, 16  ;;  %v19464_v45 = vld [vmem:[#allocation42_spill] sm:$0xff] }
 0x43b   : > { %11102 = vst [vmem:[%s18807_s10 + $0x20] sm:$0xff] %v11070_v63  ;;  %v11073_v37 = vmax.f32 %v11041_v16, 0.0  ;;  %v11039_v47 = vadd.f32 %v19457_v48, %v10975_v57  ;;  %v10980_v42 = vadd.f32 %v18776_v9, %v10477_v40  ;;  %v10475_v3 = vadd.f32 %v10372_v10, %v9977_v17  ;;  %v19462_v17 = vld [vmem:[#allocation9_spill] sm:$0xff] }
 0x43c   : > { %v13561_v12 = vpop.f32.mrf.mxu1  ;;  %v9230_v27 = vadd.f32 %v19463_v19, %v19462_v17  ;;  %v19465_v16 = vld [vmem:[#allocation25_spill] sm:$0xff]  ;;  %v9981_v58 = vadd.f32 %v18687_v2, %v9227_v26  ;;  %v18884_v30 = vunpack.c.l.bf16 %v10882_v4  ;;  %v10853_v33 = vrot.slane %v10852_v43, 4  ;;  %v19471_v4 = vld [vmem:[#allocation55_spill] sm:$0xff] }
 0x43d   : > { %11105 = vst [vmem:[%s18807_s10 + $0x38] sm:$0xff] %v11073_v37  ;;  %v11071_v56 = vmax.f32 %v11039_v47, 0.0  ;;  %v11044_v1 = vadd.f32 %v19461_v18, %v10980_v42  ;;  %v10978_v60 = vadd.f32 %v18776_v9, %v10475_v3  ;;  %v10478_v31 = vadd.f32 %v13561_v12, %v9980_v23  ;;  %v19466_v57 = vld [vmem:[#allocation33_spill] sm:$0xff]  ;;  %v18890_v47 = vld [vmem:[%s13933_s20 + $0xc4] sm:$0xf]  ;;  %v19468_v42 = vld [vmem:[#allocation35_spill] sm:$0xff] }
 0x43e   : > { %v10375_v14 = vpop.f32.mrf.mxu1  ;;  %v9228_v40 = vadd.f32 %v19466_v57, %v19465_v16  ;;  %v19467_v10 = vld [vmem:[#allocation45_spill] sm:$0xff]  ;;  %v19469_v3 = vld [vmem:[#allocation38_spill] sm:$0xff]  ;;  %v10910_v2 = vrot.slane %v10908_v29, 4  ;;  %v10913_v26 = vrot.slane %v10911_v22, 5  ;;  %v10917_v29 = vshll.u32 %v18890_v47, 16  ;;  %v19476_v16 = vld [vmem:[#allocation43_spill] sm:$0xff] }
 0x43f   : > { %11103 = vst [vmem:[%s18807_s10 + $0x28] sm:$0xff] %v11071_v56  ;;  %v11076_v44 = vmax.f32 %v11044_v1, 0.0  ;;  %v11042_v63 = vadd.f32 %v19464_v45, %v10978_v60  ;;  %v10981_v51 = vadd.f32 %v18776_v9, %v10478_v31  ;;  %v10476_v23 = vadd.f32 %v10375_v14, %v9978_v46  ;;  %v19470_v12 = vld [vmem:[#allocation65_spill] sm:$0xff]  ;;  %v18895_v46 = vpop.f32.mrf.mxu0  ;;  %v19472_v60 = vld [vmem:[#allocation36_spill] sm:$0xff] }
 0x440   : > { %v13564_v52 = vpop.f32.mrf.mxu1  ;;  %v9233_v25 = vadd.f32 %v19469_v3, %v19468_v42  ;;  %v9984_v36 = vadd.f32 %v19470_v12, %v9230_v27  ;;  %v19473_v31 = vld [vmem:[#allocation37_spill] sm:$0xff]  ;;  %v9982_v14 = vadd.f32 %v18741_v62, %v9228_v40  ;;  %v10921_v27 = vshrl.u32 %v18890_v47, 16  ;;  %v19478_v3 = vld [vmem:[#allocation40_spill] sm:$0xff] }
 0x441   : > { %11108 = vst [vmem:[%s18807_s10 + $0x50] sm:$0xff] %v11076_v44  ;;  %v11074_v7 = vmax.f32 %v11042_v63, 0.0  ;;  %v11045_v38 = vadd.f32 %v19467_v10, %v10981_v51  ;;  %v10979_v37 = vadd.f32 %v18776_v9, %v10476_v23  ;;  %v10481_v48 = vadd.f32 %v13564_v52, %v9983_v34  ;;  %v19474_v22 = vld [vmem:[#allocation57_spill] sm:$0xff]  ;;  %v12244_v51 = vld [vmem:[%s13933_s20 + $0xb4] sm:$0xf]  ;;  %v19475_v23 = vld [vmem:[#allocation39_spill] sm:$0xff] }
 0x442   : > { %v10388_v59 = vpop.f32.mrf.mxu1  ;;  %v9231_v17 = vadd.f32 %v19473_v31, %v19472_v60  ;;  %v9234_v57 = vadd.f32 %v19476_v16, %v19475_v23  ;;  %v10858_v62 = vsel %vm13974_vm2, %v10853_v33, %v18866_v15  ;;  %v10914_v40 = vor.u32 %v10913_v26, %v10910_v2  ;;  %v19480_v33 = vld [vmem:[#allocation50_spill] sm:$0xff]  ;;  %v19485_v23 = vld [vmem:[#allocation56_spill] sm:$0xff] }
 0x443   : > { %11106 = vst [vmem:[%s18807_s10 + $0x40] sm:$0xff] %v11074_v7  ;;  %v11077_v43 = vmax.f32 %v11045_v38, 0.0  ;;  %v11043_v56 = vadd.f32 %v19471_v4, %v10979_v37  ;;  %v10984_v18 = vadd.f32 %v18776_v9, %v10481_v48  ;;  %v10479_v1 = vadd.f32 %v10388_v59, %v9981_v58  ;;  %v18915_v7 = vpop.f32.mrf.mxu0  ;;  %v19477_v38 = vld [vmem:[#allocation13_spill] sm:$0xff]  ;;  %v19479_v59 = vld [vmem:[#allocation51_spill] sm:$0xff] }
 0x444   : > { %v13565_v19 = vpop.f32.mrf.mxu1  ;;  %v9987_v58 = vadd.f32 %v18760_v0, %v9233_v25  ;;  %v9232_v12 = vadd.f32 %v19479_v59, %v19478_v3  ;;  %v9985_v0 = vadd.f32 %v18787_v8, %v9231_v17  ;;  %v10884_v25 = vshrl.u32 %v12244_v51, 16 }
 0x445   : > { %11109 = vst [vmem:[%s18807_s10 + $0x58] sm:$0xff] %v11077_v43  ;;  %v11075_v34 = vmax.f32 %v11043_v56, 0.0  ;;  %v11048_v44 = vadd.f32 %v19474_v22, %v10984_v18  ;;  %v10982_v45 = vadd.f32 %v18776_v9, %v10479_v1  ;;  %v10482_v63 = vadd.f32 %v13565_v19, %v9984_v36  ;;  %v19481_v56 = vld [vmem:[#allocation41_spill] sm:$0xff]  ;;  %v19482_v18 = vld [vmem:[#allocation47_spill] sm:$0xff]  ;;  %v18933_v17 = vpop.f32.mrf.mxu0 }
 0x446   : > { %v10391_v52 = vpop.f32.mrf.mxu1  ;;  %v10887_v43 = vshll.u32 %v12244_v51, 16  ;;  %v9237_v1 = vadd.f32 %v19482_v18, %v19481_v56  ;;  %v9988_v31 = vadd.f32 %v18809_v53, %v9234_v57  ;;  %v18929_v19 = vunpack.c.l.bf16 %v10858_v62  ;;  %v19484_v51 = vld [vmem:[#allocation46_spill] sm:$0xff]  ;;  %v19486_v62 = vld [vmem:[#allocation64_spill] sm:$0xff] }
 0x447   : > { %11107 = vst [vmem:[%s18807_s10 + $0x48] sm:$0xff] %v11075_v34  ;;  %v11080_v10 = vmax.f32 %v11048_v44, 0.0  ;;  %v11046_v37 = vadd.f32 %v19477_v38, %v10982_v45  ;;  %v10985_v48 = vadd.f32 %v18776_v9, %v10482_v63  ;;  %v10480_v42 = vadd.f32 %v10391_v52, %v9982_v14  ;;  %v19483_v34 = vld [vmem:[#allocation4_spill] sm:$0xff]  ;;  %v12245_v63 = vld [vmem:[%s13933_s20 + $0xb8] sm:$0xf] }
 0x448   : > { %v13568_v36 = vpop.f32.mrf.mxu1  ;;  %v18931_v8 = vrot.slane %v10917_v29, 5  ;;  %v9235_v16 = vadd.f32 %v19485_v23, %v19484_v51  ;;  %v9986_v53 = vadd.f32 %v18822_v49, %v9232_v12  ;;  %v18942_v57 = vrot.slane %v10914_v40, 4  ;;  %v18952_v40 = vpop.f32.mrf.mxu0 }
 0x449   : > { %11112 = vst [vmem:[%s18807_s10 + $0x70] sm:$0xff] %v11080_v10  ;;  %v11078_v15 = vmax.f32 %v11046_v37, 0.0  ;;  %v11049_v2 = vadd.f32 %v19480_v33, %v10985_v48  ;;  %v10983_v26 = vadd.f32 %v18776_v9, %v10480_v42  ;;  %v10485_v4 = vadd.f32 %v13568_v36, %v9987_v58  ;;  %v19487_v48 = vld [vmem:[#allocation53_spill] sm:$0xff]  ;;  %v19488_v42 = vld [vmem:[#allocation60_spill] sm:$0xff] }
 0x44a   : > { %v10404_v60 = vpop.f32.mrf.mxu1  ;;  %v18944_v29 = vrot.slane %v10884_v25, 4  ;;  %v9238_v3 = vadd.f32 %v19488_v42, %v19487_v48  ;;  %v9991_v36 = vadd.f32 %v18838_v61, %v9237_v1  ;;  %v10893_v49 = vshll.u32 %v12245_v63, 16 }
 0x44b   : > { %11110 = vst [vmem:[%s18807_s10 + $0x60] sm:$0xff] %v11078_v15  ;;  %v11081_v14 = vmax.f32 %v11049_v2, 0.0  ;;  %v11047_v22 = vadd.f32 %v19483_v34, %v10983_v26  ;;  %v10988_v44 = vadd.f32 %v18776_v9, %v10485_v4  ;;  %v10483_v45 = vadd.f32 %v10404_v60, %v9985_v0  ;;  %v19489_v2 = vld [vmem:[#allocation58_spill] sm:$0xff]  ;;  %v19490_v26 = vld [vmem:[#allocation19_spill] sm:$0xff] }
 0x44c   : > { %v13569_v52 = vpop.f32.mrf.mxu1  ;;  %v10889_v0 = vrot.slane %v10887_v43, 5  ;;  %v9236_v4 = vadd.f32 %v19490_v26, %v19489_v2  ;;  %v9989_v18 = vadd.f32 %v18856_v41, %v9235_v16  ;;  %v10897_v61 = vshrl.u32 %v12245_v63, 16  ;;  %v19491_v34 = vld [vmem:[#allocation54_spill] sm:$0xff]  ;;  %v9941_v63 = vpop.f32.mrf.mxu0  ;;  %v12246_v2 = vld [vmem:[%s13933_s20 + $0xbc] sm:$0x1]  ;;  %v19497_v26 = vld [vmem:[#allocation5_spill] sm:$0xff] }
 0x44d   : > { %11113 = vst [vmem:[%s18807_s10 + $0x78] sm:$0xff] %v11081_v14  ;;  %v11079_v58 = vmax.f32 %v11047_v22, 0.0  ;;  %v11052_v10 = vadd.f32 %v19486_v62, %v10988_v44  ;;  %v10986_v38 = vadd.f32 %v18776_v9, %v10483_v45  ;;  %v10486_v37 = vadd.f32 %v13569_v52, %v9988_v31  ;;  %v12249_v14 = vld [vmem:[%s13933_s20 + $0xc8] sm:$0x1]  ;;  %v19492_v22 = vld [vmem:[#allocation48_spill] sm:$0xff] }
 0x44e   : > { %v10407_v59 = vpop.f32.mrf.mxu1  ;;  %v18962_v43 = vrot.slane %v10921_v27, 4  ;;  %v9241_v44 = vadd.f32 %v19492_v22, %v19491_v34  ;;  %v9992_v41 = vadd.f32 %v18876_v50, %v9238_v3  ;;  %v10920_v47 = vsel %vm13974_vm2, %v18942_v57, %v18931_v8  ;;  %v19493_v52 = vld [vmem:[#allocation44_spill] sm:$0xff]  ;;  %v19495_v3 = vld [vmem:[#allocation49_spill] sm:$0xff] }
 0x44f   : > { %11111 = vst [vmem:[%s18807_s10 + $0x68] sm:$0xff] %v11079_v58  ;;  %v11084_v12 = vmax.f32 %v11052_v10, 0.0  ;;  %v11050_v25 = vadd.f32 %v18732_v35, %v10986_v38  ;;  %v10989_v15 = vadd.f32 %v18776_v9, %v10486_v37  ;;  %v10484_v33 = vadd.f32 %v10407_v59, %v9986_v53  ;;  %v19494_v53 = vld [vmem:[#allocation61_spill] sm:$0xff]  ;;  %v13532_v37 = vpop.f32.mrf.mxu0  ;;  %v19496_v59 = vld [vmem:[#allocation62_spill] sm:$0xff] }
 0x450   : > { %v13572_v56 = vpop.f32.mrf.mxu1  ;;  %v10890_v27 = vor.u32 %v10889_v0, %v18944_v29  ;;  %v9239_v58 = vadd.f32 %v19494_v53, %v19493_v52  ;;  %v9990_v62 = vadd.f32 %v18895_v46, %v9236_v4  ;;  %v18982_v10 = vrot.slane %v10893_v49, 5  ;;  %v19498_v4 = vld [vmem:[#allocation63_spill] sm:$0xff] }
 0x451   : > { %11116 = vst [vmem:[%s18807_s10 + $0x90] sm:$0xff] %v11084_v12  ;;  %v11082_v1 = vmax.f32 %v11050_v25, 0.0  ;;  %v11053_v60 = vadd.f32 %v18743_v20, %v10989_v15  ;;  %v10987_v35 = vadd.f32 %v18776_v9, %v10484_v33  ;;  %v10489_v31 = vadd.f32 %v13572_v56, %v9991_v36 }
 0x452   : > { %v10420_v45 = vpop.f32.mrf.mxu1  ;;  %v10927_v38 = vshll.u32 %v12249_v14, 16  ;;  %v9242_v36 = vadd.f32 %v19496_v59, %v19495_v3  ;;  %v9995_v12 = vadd.f32 %v18915_v7, %v9241_v44  ;;  %v10924_v46 = vor.u32 %v18962_v43, %v18931_v8  ;;  %v19499_v14 = vld [vmem:[#allocation16_spill] sm:$0xff] }
 0x453   : > { %11114 = vst [vmem:[%s18807_s10 + $0x80] sm:$0xff] %v11082_v1  ;;  %v11085_v20 = vmax.f32 %v11053_v60, 0.0  ;;  %v11051_v51 = vadd.f32 %v18764_v13, %v10987_v35  ;;  %v10992_v23 = vadd.f32 %v18776_v9, %v10489_v31  ;;  %v10487_v16 = vadd.f32 %v10420_v45, %v9989_v18  ;;  %v9954_v35 = vpop.f32.mrf.mxu0 }
 0x454   : > { %v13573_v50 = vpop.f32.mrf.mxu1  ;;  %v10899_v49 = vrot.slane %v10897_v61, 4  ;;  %v9240_v56 = vadd.f32 %v19498_v4, %v19497_v26  ;;  %v9993_v1 = vadd.f32 %v18933_v17, %v9239_v58  ;;  %v10891_v7 = vrot.slane %v10890_v27, 4 }
 0x455   : > { %11117 = vst [vmem:[%s18807_s10 + $0x98] sm:$0xff] %v11085_v20  ;;  %v11083_v29 = vmax.f32 %v11051_v51, 0.0  ;;  %v11056_v48 = vadd.f32 %v18766_v24, %v10992_v23  ;;  %v10990_v13 = vadd.f32 %v18776_v9, %v10487_v16  ;;  %v10490_v42 = vadd.f32 %v13573_v50, %v9992_v41  ;;  %v19500_v51 = vld [vmem:[#allocation52_spill] sm:$0xff]  ;;  %v13533_v53 = vpop.f32.mrf.mxu0 }
 0x456   : > { %v10423_v0 = vpop.f32.mrf.mxu1  ;;  %v10929_v60 = vrot.slane %v10927_v38, 5  ;;  %v9245_v34 = vadd.f32 %v18722_v55, %v19499_v14  ;;  %v9996_v44 = vadd.f32 %v18952_v40, %v9242_v36  ;;  %v10900_v45 = vor.u32 %v10899_v49, %v18982_v10 }
 0x457   : > { %11115 = vst [vmem:[%s18807_s10 + $0x88] sm:$0xff] %v11083_v29  ;;  %v11088_v25 = vmax.f32 %v11056_v48, 0.0  ;;  %v11054_v15 = vadd.f32 %v18791_v39, %v10990_v13  ;;  %v10993_v24 = vadd.f32 %v18776_v9, %v10490_v42  ;;  %v10488_v33 = vadd.f32 %v10423_v0, %v9990_v62  ;;  %v19501_v29 = vld [vmem:[#allocation10_spill] sm:$0xff]  ;;  %v19502_v48 = vld [vmem:[#allocation27_spill] sm:$0xff]  ;;  %v19503_v0 = vld [vmem:[#allocation8_spill] sm:$0xff] }
 0x458   : > { %v13576_v18 = vpop.f32.mrf.mxu1  ;;  %v10903_v17 = vshll.u32 %v12246_v2, 16  ;;  %v9243_v23 = vadd.f32 %v18734_v54, %v19500_v51  ;;  %v9994_v55 = vadd.f32 %v9941_v63, %v9240_v56  ;;  %v10896_v40 = vsel %vm13974_vm2, %v10891_v7, %v18982_v10 }
 0x459   : > { %11120 = vst [vmem:[%s18807_s10 + $0xb0] sm:$0xff] %v11088_v25  ;;  %v11086_v61 = vmax.f32 %v11054_v15, 0.0  ;;  %v11057_v43 = vadd.f32 %v18793_v6, %v10993_v24  ;;  %v10991_v39 = vadd.f32 %v18776_v9, %v10488_v33  ;;  %v10493_v31 = vadd.f32 %v13576_v18, %v9995_v12  ;;  %v9957_v25 = vpop.f32.mrf.mxu0 }
 0x45a   : > { %v10436_v22 = vpop.f32.mrf.mxu1  ;;  %v10925_v52 = vrot.slane %v10924_v46, 4  ;;  %v9999_v38 = vadd.f32 %v13532_v37, %v9245_v34  ;;  %v9246_v54 = vadd.f32 %v19502_v48, %v19501_v29  ;;  %v10901_v63 = vrot.slane %v10900_v45, 4 }
 0x45b   : > { %11118 = vst [vmem:[%s18807_s10 + $0xa0] sm:$0xff] %v11086_v61  ;;  %v11089_v41 = vmax.f32 %v11057_v43, 0.0  ;;  %v11055_v27 = vadd.f32 %v18801_v32, %v10991_v39  ;;  %v10996_v20 = vadd.f32 %v18776_v9, %v10493_v31  ;;  %v10491_v6 = vadd.f32 %v10436_v22, %v9993_v1 }
 0x45c   : > { %v13577_v16 = vpop.f32.mrf.mxu1  ;;  %v10905_v42 = vrot.slane %v10903_v17, 5  ;;  %v9244_v12 = vadd.f32 %v18757_v28, %v19503_v0  ;;  %v11032_v46 = vunpack.c.l.bf16 %v10920_v47  ;;  %v10930_v49 = vsel %vm13974_vm2, %v10925_v52, %v10929_v60 }
 0x45d   : > { %11121 = vst [vmem:[%s18807_s10 + $0xb8] sm:$0xff] %v11089_v41  ;;  %v11087_v58 = vmax.f32 %v11055_v27, 0.0  ;;  %v11060_v50 = vadd.f32 %v18836_v11, %v10996_v20  ;;  %v10994_v32 = vadd.f32 %v18776_v9, %v10491_v6  ;;  %v10494_v62 = vadd.f32 %v13577_v16, %v9996_v44 }
 0x45e   : > { %v10439_v13 = vpop.f32.mrf.mxu1  ;;  %v9997_v11 = vadd.f32 %v9954_v35, %v9243_v23  ;;  %v10000_v28 = vadd.f32 %v13533_v53, %v9246_v54  ;;  %v11030_v26 = vunpack.c.l.bf16 %v10896_v40  ;;  %v10906_v4 = vsel %vm13974_vm2, %v10901_v63, %v10905_v42 }
 0x45f   : > { %11119 = vst [vmem:[%s18807_s10 + $0xa8] sm:$0xff] %v11087_v58  ;;  %v11092_v3 = vmax.f32 %v11060_v50, 0.0  ;;  %v11058_v10 = vadd.f32 %v18874_v5, %v10994_v32  ;;  %v10997_v59 = vadd.f32 %v18776_v9, %v10494_v62  ;;  %v10492_v36 = vadd.f32 %v10439_v13, %v9994_v55 }
 0x460   : > { %v13580_v37 = vpop.f32.mrf.mxu1  ;;  %v9998_v18 = vadd.f32 %v9957_v25, %v9244_v12  ;;  %v11033_v1 = vunpack.c.l.bf16 %v10930_v49  ;;  %v11031_v43 = vunpack.c.l.bf16 %v10906_v4 }
 0x461   : > { %11124 = vst [vmem:[%s18807_s10 + $0xd0] sm:$0xff] %v11092_v3  ;;  %v11090_v5 = vmax.f32 %v11058_v10, 0.0  ;;  %v11061_v15 = vadd.f32 %v18884_v30, %v10997_v59  ;;  %v10995_v24 = vadd.f32 %v18776_v9, %v10492_v36  ;;  %v10497_v33 = vadd.f32 %v13580_v37, %v9999_v38 }
 0x462   : > { %v10452_v2 = vpop.f32.mrf.mxu1 }
 0x463   : > { %11122 = vst [vmem:[%s18807_s10 + $0xc0] sm:$0xff] %v11090_v5  ;;  %v11093_v8 = vmax.f32 %v11061_v15, 0.0  ;;  %v11059_v57 = vadd.f32 %v18929_v19, %v10995_v24  ;;  %v11000_v47 = vadd.f32 %v18776_v9, %v10497_v33  ;;  %v10495_v56 = vadd.f32 %v10452_v2, %v9997_v11 }
 0x464   : > { %v13581_v30 = vpop.f32.mrf.mxu1 }
 0x465   : > { %11125 = vst [vmem:[%s18807_s10 + $0xd8] sm:$0xff] %v11093_v8  ;;  %v11091_v7 = vmax.f32 %v11059_v57, 0.0  ;;  %v11064_v60 = vadd.f32 %v11032_v46, %v11000_v47  ;;  %v10998_v35 = vadd.f32 %v18776_v9, %v10495_v56  ;;  %v10498_v21 = vadd.f32 %v13581_v30, %v10000_v28 }
 0x466   : > { %v10455_v61 = vpop.f32.mrf.mxu1 }
 0x467   : > { %11123 = vst [vmem:[%s18807_s10 + $0xc8] sm:$0xff] %v11091_v7  ;;  %v11096_v19 = vmax.f32 %v11064_v60, 0.0  ;;  %v11062_v39 = vadd.f32 %v11030_v26, %v10998_v35  ;;  %v11001_v31 = vadd.f32 %v18776_v9, %v10498_v21  ;;  %v10496_v14 = vadd.f32 %v10455_v61, %v9998_v18 }
 0x469   : > { %11128 = vst [vmem:[%s18807_s10 + $0xf0] sm:$0xff] %v11096_v19  ;;  %v11094_v34 = vmax.f32 %v11062_v39, 0.0  ;;  %v11065_v22 = vadd.f32 %v11033_v1, %v11001_v31  ;;  %v10999_v44 = vadd.f32 %v18776_v9, %v10496_v14 }
 0x46b   : > { %11126 = vst [vmem:[%s18807_s10 + $0xe0] sm:$0xff] %v11094_v34  ;;  %v11097_v45 = vmax.f32 %v11065_v22, 0.0  ;;  %v11063_v17 = vadd.f32 %v11031_v43, %v10999_v44 }
 0x46d   : > { %11129 = vst [vmem:[%s18807_s10 + $0xf8] sm:$0xff] %v11097_v45  ;;  %v11095_v41 = vmax.f32 %v11063_v17, 0.0 }
 0x46f   : > { %11127 = vst [vmem:[%s18807_s10 + $0xe8] sm:$0xff] %v11095_v41 }
 0x470 PF: > { %s15_s18 = sadd.s32 1, %s13856_s18  }
 0x471   : > { %p12_p4 = scmp.ge.s32.totalorder %s15_s18, 4  }
 0x473   :  { %14 = sbr.rel (!%p12_p4) target bundleno = 1 (0x1), region = 90 }

</bundles_post_ra>
